<compile_context>
chip_gen: v6e
topology: v6e:2x2x1
jax: 0.10.0
libtpu: 0.0.40
codegen_flags: <defaults>
</compile_context>

<pallas_src>
import functools

import numpy as np
import jax
import jax.numpy as jnp
from jax.experimental import pallas as pl
from jax.experimental.pallas import tpu as pltpu


# ----------------------------------------------------------------------------
# Model configuration (UNet.__init__: bilinear=True, fd=8, score_sigmoid=True).
# ----------------------------------------------------------------------------
FD = 8                   # first_feature_dimension (forced to 8 in __init__)
IN_CH = 80               # real_input_channels
H = W = 16               # spatial size of the test input
N_BATCH = 2

BN_EPS = 1e-5
BN_SCALE = float(1.0 / np.sqrt(1.0 + BN_EPS))   # gamma=1, beta=0, mean=0, var=1

OUT_LANES = 4096         # [head 128 | f1 128 | f2 256 | f3 512 | f4 1024 | f5 2048]


# ----------------------------------------------------------------------------
# Host-side matrix builders (everything becomes a matmul operand acting on the
# lane-dense activation layout  A[row, w*C + c],  rows = image-major * height).
# ----------------------------------------------------------------------------
def interp_matrix(out_size, in_size, align_corners):
    """PyTorch-semantics 1-D bilinear interpolation matrix (out_size, in_size)."""
    A = np.zeros((out_size, in_size), np.float32)
    for o in range(out_size):
        if align_corners:
            src = 0.0 if out_size == 1 else o * (in_size - 1) / (out_size - 1)
        else:
            src = (o + 0.5) * in_size / out_size - 0.5
            src = min(max(src, 0.0), float(in_size - 1))
        lo = min(max(int(np.floor(src)), 0), in_size - 1)
        hi = min(lo + 1, in_size - 1)
        f = src - lo
        A[o, lo] += 1.0 - f
        A[o, hi] += f
    return A


def banded_conv3x3(w9, Wsp):
    """w9: (3,3,Cin,Cout) -> (3, Wsp*Cin, Wsp*Cout) banded matrices implementing
    the horizontal taps + channel contraction of a padded 3x3 conv (one per ky)."""
    cin, cout = w9.shape[2], w9.shape[3]
    B = np.zeros((3, Wsp * cin, Wsp * cout), np.float32)
    for ky in range(3):
        for wo in range(Wsp):
            for kx in range(3):
                wi = wo + (kx - 1)
                if 0 <= wi < Wsp:
                    B[ky, wi * cin:(wi + 1) * cin, wo * cout:(wo + 1) * cout] = w9[ky, kx]
    return B


def resize_col_mat(Win, C, Wout, align_corners):
    """(Win*C, Wout*C) separable horizontal bilinear-resize matrix (channels kept)."""
    A = interp_matrix(Wout, Win, align_corners)
    M = np.zeros((Win * C, Wout * C), np.float32)
    idx = np.arange(C)
    for wo in range(Wout):
        for wi in range(Win):
            a = A[wo, wi]
            if a != 0.0:
                M[wi * C + idx, wo * C + idx] = a
    return M


def pool_row_stack(Hsp, n_img):
    """(n*Hsp, n*Hsp) matrix selecting [even rows ; odd rows] (per image)."""
    Ho = Hsp // 2
    RS0 = np.zeros((Ho, Hsp), np.float32)
    RS1 = np.zeros((Ho, Hsp), np.float32)
    for ho in range(Ho):
        RS0[ho, 2 * ho] = 1.0
        RS1[ho, 2 * ho + 1] = 1.0
    eye = np.eye(n_img, dtype=np.float32)
    return np.concatenate([np.kron(eye, RS0), np.kron(eye, RS1)], axis=0)


def pool_col_merged(Wsp, C):
    """(Wsp*C, Wsp*C): left half selects even-w channel blocks, right half odd-w."""
    Wo = Wsp // 2
    M = np.zeros((Wsp * C, Wsp * C), np.float32)
    idx = np.arange(C)
    for wo in range(Wo):
        M[(2 * wo) * C + idx, wo * C + idx] = 1.0
        M[(2 * wo + 1) * C + idx, Wo * C + wo * C + idx] = 1.0
    return M


def kron_rows(n_img, A):
    return np.kron(np.eye(n_img, dtype=np.float32), A)


# ----------------------------------------------------------------------------
# Parameter packing: two bf16 slabs (128- and 256-lane wide) + one f32 bias
# table; kernel slices them with free static offsets.
# ----------------------------------------------------------------------------
ROW_ALIGN = 16  # keep every block 16-row aligned (bf16 sublane packing)


class SlabPacker:
    def __init__(self, width):
        self.width = width
        self._chunks = []
        self._rows = 0
        self.index = {}          # name -> (row_offset, rows_per_tap, ncols)

    def add(self, name, arr):
        a = np.asarray(arr, np.float32)
        if a.ndim == 2:
            a = a[None]
        ntaps, k, c = a.shape
        assert c <= self.width and name not in self.index
        if ntaps > 1:
            assert k % ROW_ALIGN == 0
        self.index[name] = (self._rows, k, c)
        self._chunks.append((self._rows, a.reshape(ntaps * k, c)))
        used = ntaps * k
        self._rows += int(-(-used // ROW_ALIGN) * ROW_ALIGN)

    def finalize(self, dtype):
        M = np.zeros((max(self._rows, ROW_ALIGN), self.width), np.float32)
        for off, flat in self._chunks:
            M[off:off + flat.shape[0], :flat.shape[1]] = flat
        return jnp.asarray(M, dtype=dtype)


class BiasPacker:
    def __init__(self, width):
        self.width = width
        self._rows = []
        self.index = {}          # name -> (row, width)

    def add(self, name, vec):
        v = np.asarray(vec, np.float32).reshape(-1)
        assert v.size <= self.width and name not in self.index
        self.index[name] = (len(self._rows), int(v.size))
        row = np.zeros((self.width,), np.float32)
        row[:v.size] = v
        self._rows.append(row)

    def finalize(self):
        M = np.stack(self._rows, axis=0)
        pad = (-M.shape[0]) % 8
        if pad:
            M = np.concatenate([M, np.zeros((pad, self.width), np.float32)], 0)
        return jnp.asarray(M, dtype=jnp.float32)


def build_params(n_img, seed=0):
    """Synthetic (deterministic) conv weights, BatchNorm folded (eval mode),
    re-expressed as packed matmul operands for the fused kernel."""
    rng = np.random.default_rng(seed)
    s = BN_SCALE

    def conv3(cin, cout):
        w = (rng.standard_normal((3, 3, cin, cout)) / np.sqrt(9.0 * cin)).astype(np.float32)
        b = (0.01 * rng.standard_normal((cout,))).astype(np.float32)
        return w, b

    def conv1(cin, cout):
        w = (rng.standard_normal((cin, cout)) / np.sqrt(cin)).astype(np.float32)
        b = (0.01 * rng.standard_normal((cout,))).astype(np.float32)
        return w, b

    w128 = SlabPacker(128)
    w256 = SlabPacker(256)
    biasp = BiasPacker(256)

    # ---- encoder DoubleConvs ------------------------------------------------
    enc = [("inc1", IN_CH, FD, 16), ("inc2", FD, FD, 16),
           ("d1c1", FD, 2 * FD, 8), ("d1c2", 2 * FD, 2 * FD, 8),
           ("d2c1", 2 * FD, 4 * FD, 4), ("d2c2", 4 * FD, 4 * FD, 4),
           ("d3c1", 4 * FD, 8 * FD, 2), ("d3c2", 8 * FD, 8 * FD, 2),
           ("d4c1", 8 * FD, 16 * FD, 1), ("d4c2", 16 * FD, 16 * FD, 1)]
    for name, cin, cout, Wsp in enc:
        wgt, b = conv3(cin, cout)
        B = banded_conv3x3(wgt * s, Wsp)
        w128.add(name, B[1] if Wsp == 1 else B)          # 1x1 level: centre tap only
        biasp.add(name, np.tile(b * s, Wsp))

    # ---- maxpool selection matrices -----------------------------------------
    for name, Hsp, Wsp, C in (("p1", 16, 16, FD), ("p2", 8, 8, 2 * FD),
                              ("p3", 4, 4, 4 * FD), ("p4", 2, 2, 8 * FD)):
        w128.add(name + "R", pool_row_stack(Hsp, n_img))
        w128.add(name + "C", pool_col_merged(Wsp, C))

    # ---- decoder: pts / score merged branch-major, UC folded into Bu --------
    for k, Cs, Cu, Wi, Wo in ((1, 8 * FD, 16 * FD, 1, 2), (2, 4 * FD, 8 * FD, 2, 4),
                              (3, 2 * FD, 4 * FD, 4, 8), (4, FD, 2 * FD, 8, 16)):
        Co = Cs
        raw = []
        for _ in range(2):                               # pts branch, then score branch
            w1, b1 = conv3(Cs + Cu, Co)                  # cat([skip, up]) ordering
            w2, b2 = conv3(Co, Co)
            raw.append((w1, b1, w2, b2))
        (w1p, b1p, w2p, b2p), (w1s, b1s, w2s, b2s) = raw

        UC = resize_col_mat(Wi, Cu, Wo, True)            # horizontal part of x2 upsample
        w256.add("u%dc1Bs" % k,
                 np.concatenate([banded_conv3x3(w1p[:, :, :Cs, :] * s, Wo),
                                 banded_conv3x3(w1s[:, :, :Cs, :] * s, Wo)], axis=-1))
        Bup = np.einsum("ij,tjk->tik", UC, banded_conv3x3(w1p[:, :, Cs:, :] * s, Wo))
        Buq = np.einsum("ij,tjk->tik", UC, banded_conv3x3(w1s[:, :, Cs:, :] * s, Wo))
        if k == 1:                                       # both branches read the same x5
            w256.add("u1c1Bu", np.concatenate([Bup, Buq], axis=-1))
        else:
            w128.add("u%dc1Bp" % k, Bup)
            w128.add("u%dc1Bq" % k, Buq)
        biasp.add("u%dc1" % k, np.concatenate([np.tile(b1p * s, Wo), np.tile(b1s * s, Wo)]))

        w128.add("u%dc2Bp" % k, banded_conv3x3(w2p * s, Wo))
        w128.add("u%dc2Bq" % k, banded_conv3x3(w2s * s, Wo))
        biasp.add("u%dc2" % k, np.concatenate([np.tile(b2p * s, Wo), np.tile(b2s * s, Wo)]))

        w128.add("up%dR" % k, kron_rows(n_img, interp_matrix(Wo, Wi, True)))

    # ---- merged 1x1 output heads (no BN); lanes [0:16]=pts, [16:32]=score ----
    wop, bop = conv1(FD, 1)
    wos, bos = conv1(FD, 1)
    Whead = np.zeros((2 * W * FD, 128), np.float32)
    bhead = np.zeros((128,), np.float32)
    for wpos in range(W):
        Whead[wpos * FD:(wpos + 1) * FD, wpos] = wop[:, 0]
        Whead[W * FD + wpos * FD:W * FD + (wpos + 1) * FD, W + wpos] = wos[:, 0]
    bhead[:W] = bop[0]
    bhead[W:2 * W] = bos[0]
    w128.add("head", Whead)
    biasp.add("head", bhead)

    # ---- descriptor resizes to 16x16 (F.interpolate, align_corners=False) ----
    for k, Hk in ((2, 8), (3, 4), (4, 2), (5, 1)):
        w128.add("d%dR" % k, kron_rows(n_img, interp_matrix(H, Hk, False)))
    w256.add("d2C", resize_col_mat(8, 2 * FD, W, False))
    dc3 = resize_col_mat(4, 4 * FD, W, False)            # (128, 512)
    dc4 = resize_col_mat(2, 8 * FD, W, False)            # (128, 1024)
    # desc5 (1x1 -> 16x16) is pure replication, done with lane copies in-kernel.

    meta = {}
    for name, (off, k, c) in w128.index.items():
        meta[name] = (0, off, k, c)
    for name, (off, k, c) in w256.index.items():
        meta[name] = (1, off, k, c)

    arrays = {
        "w128": w128.finalize(jnp.bfloat16),
        "w256": w256.finalize(jnp.bfloat16),
        "dc3": jnp.asarray(dc3, jnp.bfloat16),
        "dc4": jnp.asarray(dc4, jnp.bfloat16),
        "bias": biasp.finalize(),
    }
    return meta, dict(biasp.index), arrays


# ----------------------------------------------------------------------------
# The single fused Pallas kernel.
# ----------------------------------------------------------------------------
def _unet_kernel(meta, bias_meta, n_img, x_ref, w128_ref, w256_ref,
                 dc3_ref, dc4_ref, bias_ref, out_ref):
    f32, bf16 = jnp.float32, jnp.bfloat16
    slabs = (w128_ref, w256_ref)

    def wslice(name, tap=0):                 # static slab slice -> weight operand
        slab, off, k, c = meta[name]
        start = off + tap * k
        return slabs[slab][start:start + k, :c]

    def bias(name):
        row, c = bias_meta[name]
        return bias_ref[row:row + 1, :c]

    def mm(a, b):                            # bf16 MXU matmul, f32 accumulation
        return jnp.dot(a.astype(bf16), b.astype(bf16), preferred_element_type=f32)

    def vtaps(p0, p1, p2, Hsp):
        # out[h] = p1[h] + p0[h-1] + p2[h+1]; zero padding at per-image borders.
        # Vertical taps are sublane shifts + masks (off the MXU).
        z = jnp.zeros_like(p1[:1])
        top = jnp.concatenate([z, p0[:-1]], axis=0)
        bot = jnp.concatenate([p2[1:], z], axis=0)
        if n_img > 1:
            rows = jax.lax.broadcasted_iota(jnp.int32, p1.shape, 0)
            top = jnp.where((rows % Hsp) != 0, top, 0.0)
            bot = jnp.where((rows % Hsp) != (Hsp - 1), bot, 0.0)
        return p1 + top + bot

    def conv(a, name, Hsp):
        b = bias(name)
        if Hsp == 1:
            acc = mm(a, wslice(name, 0)) + b
        else:
            acc = vtaps(mm(a, wslice(name, 0)), mm(a, wslice(name, 1)),
                        mm(a, wslice(name, 2)), Hsp) + b
        return jnp.maximum(acc, 0.0).astype(bf16)

    def pool(a, rname, cname):
        sel = mm(wslice(rname), a)                       # [even rows ; odd rows]
        hh = sel.shape[0] // 2
        r = jnp.maximum(sel[:hh, :], sel[hh:, :])
        res = mm(r, wslice(cname))                       # [even cols | odd cols]
        wd = res.shape[1] // 2
        return jnp.maximum(res[:, :wd], res[:, wd:]).astype(bf16)

    x = x_ref[...]

    # ------------------------------- encoder --------------------------------
    x1 = conv(conv(x, "inc1", 16), "inc2", 16)                       # (16n, 128)
    x2 = conv(conv(pool(x1, "p1R", "p1C"), "d1c1", 8), "d1c2", 8)    # (8n, 128)
    x3 = conv(conv(pool(x2, "p2R", "p2C"), "d2c1", 4), "d2c2", 4)    # (4n, 128)
    x4 = conv(conv(pool(x3, "p3R", "p3C"), "d3c1", 2), "d3c2", 2)    # (2n, 128)
    x5 = conv(conv(pool(x4, "p4R", "p4C"), "d4c1", 1), "d4c2", 1)    # (n, 128)

    # ---------- merged pts/score decoder, branch-major [pts | score] --------
    def up_stage(y, skip, k, Hsp):
        if k == 1 and n_img == 1:
            t = jnp.broadcast_to(y.astype(f32), (2, y.shape[1]))     # 1 row -> 2 rows
        else:
            t = mm(wslice("up%dR" % k), y)                           # vertical x2 upsample
        if k == 1:
            parts = [mm(skip, wslice("u1c1Bs", j)) + mm(t, wslice("u1c1Bu", j))
                     for j in range(3)]
        else:
            tup, tuq = t[:, :128], t[:, 128:]
            parts = [mm(skip, wslice("u%dc1Bs" % k, j))
                     + jnp.concatenate([mm(tup, wslice("u%dc1Bp" % k, j)),
                                        mm(tuq, wslice("u%dc1Bq" % k, j))], axis=1)
                     for j in range(3)]
        y1 = jnp.maximum(vtaps(parts[0], parts[1], parts[2], Hsp)
                         + bias("u%dc1" % k), 0.0).astype(bf16)
        yp, yq = y1[:, :128], y1[:, 128:]
        p2 = [jnp.concatenate([mm(yp, wslice("u%dc2Bp" % k, j)),
                               mm(yq, wslice("u%dc2Bq" % k, j))], axis=1)
              for j in range(3)]
        return jnp.maximum(vtaps(p2[0], p2[1], p2[2], Hsp)
                           + bias("u%dc2" % k), 0.0).astype(bf16)

    y = up_stage(x5, x4, 1, 2)
    y = up_stage(y, x3, 2, 4)
    y = up_stage(y, x2, 3, 8)
    y = up_stage(y, x1, 4, 16)                                       # (16n, 256)

    # --------- merged 1x1 heads -> lane-dense 128-wide output slot ----------
    head = mm(y, wslice("head")) + bias("head")
    cols = jax.lax.broadcasted_iota(jnp.int32, head.shape, 1)
    head = jnp.where((cols >= W) & (cols < 2 * W), jax.nn.sigmoid(head), head)

    # -------------------- descriptor resizes to 16x16 -----------------------
    f2 = mm(mm(wslice("d2R"), x2), wslice("d2C"))
    f3 = mm(mm(wslice("d3R"), x3), dc3_ref[...])
    f4 = mm(mm(wslice("d4R"), x4), dc4_ref[...])
    if n_img == 1:
        t5 = jnp.broadcast_to(x5.astype(f32), (H, x5.shape[1]))
    else:
        t5 = mm(wslice("d5R"), x5)
    f5 = jnp.concatenate([t5] * W, axis=1).astype(f32)   # 1x1 -> 16x16 is replication

    # ---------------- lane-dense output slab (all 128-aligned) --------------
    out_ref[:, 0:128] = head
    out_ref[:, 128:256] = x1.astype(f32)                 # f1: identity resize
    out_ref[:, 256:512] = f2
    out_ref[:, 512:1024] = f3
    out_ref[:, 1024:2048] = f4
    out_ref[:, 2048:4096] = f5


# ----------------------------------------------------------------------------
# Wrapper: layout plumbing around the single pallas_call.
# ----------------------------------------------------------------------------
def make_forward(meta, bias_meta, n_img):
    kernel = functools.partial(_unet_kernel, meta, bias_meta, n_img)
    rows = n_img * H

    def forward(x_nchw, w128, w256, dc3, dc4, biasm):
        n = x_nchw.shape[0]
        steps = n // n_img
        x2d = (jnp.transpose(x_nchw, (0, 2, 3, 1))
               .reshape(n * H, W * IN_CH).astype(jnp.bfloat16))

        weight_bytes = sum(int(a.size) * a.dtype.itemsize
                           for a in (w128, w256, dc3, dc4, biasm))
        n_welem = sum(int(a.size) for a in (w128, w256, dc3, dc4))
        cost = pl.CostEstimate(
            flops=int(2 * rows * n_welem * steps),
            transcendentals=int(steps * rows * 128),
            bytes_accessed=int(weight_bytes + x2d.size * 2 + n * H * OUT_LANES * 4))

        slab = pl.pallas_call(
            kernel,
            out_shape=jax.ShapeDtypeStruct((n * H, OUT_LANES), jnp.float32),
            grid=(steps,),
            in_specs=[
                pl.BlockSpec((rows, W * IN_CH), lambda i: (i, 0)),
                pl.BlockSpec(w128.shape, lambda i: (0, 0)),
                pl.BlockSpec(w256.shape, lambda i: (0, 0)),
                pl.BlockSpec(dc3.shape, lambda i: (0, 0)),
                pl.BlockSpec(dc4.shape, lambda i: (0, 0)),
                pl.BlockSpec(biasm.shape, lambda i: (0, 0)),
            ],
            out_specs=pl.BlockSpec((rows, OUT_LANES), lambda i: (i, 0)),
            compiler_params=pltpu.CompilerParams(
                dimension_semantics=("parallel",) if steps > 1 else ("arbitrary",),
                vmem_limit_bytes=32 * 1024 * 1024),
            cost_estimate=cost,
        )(x2d, w128, w256, dc3, dc4, biasm)

        slab = slab.reshape(n, H, OUT_LANES)
        head = slab[:, :, :128]
        detector_scores = head[:, :, 0:W][:, None, :, :]
        weight_scores = head[:, :, W:2 * W][:, None, :, :]
        feats = [
            slab[:, :, 128:256].reshape(n, H, W, FD),
            slab[:, :, 256:512].reshape(n, H, W, 2 * FD),
            slab[:, :, 512:1024].reshape(n, H, W, 4 * FD),
            slab[:, :, 1024:2048].reshape(n, H, W, 8 * FD),
            slab[:, :, 2048:4096].reshape(n, H, W, 16 * FD),
        ]
        descriptors = jnp.transpose(jnp.concatenate(feats, axis=-1), (0, 3, 1, 2))
        return detector_scores, weight_scores, descriptors

    return forward


# ----------------------------------------------------------------------------
if __name__ == "__main__":
    # Single-TC chips (v5e/v6e): fold the batch into rows, grid=(1,).
    # Two-TC chips (v7x/v5p/v4): one image per grid step, parallel grid.
    kind = jax.devices()[0].device_kind.lower()
    multi_tc = any(t in kind for t in ("v7", "7x", "v5p", "v4"))
    imgs_per_step = 1 if multi_tc else N_BATCH

    meta, bias_meta, P = build_params(imgs_per_step, seed=0)
    forward = jax.jit(make_forward(meta, bias_meta, imgs_per_step))

    # NCHW input like the PyTorch module: (batch=2, channels=80, 16, 16).
    x = jax.random.normal(jax.random.PRNGKey(0), (N_BATCH, IN_CH, H, W), jnp.float32)

    detector_scores, weight_scores, descriptors = forward(
        x, P["w128"], P["w256"], P["dc3"], P["dc4"], P["bias"])
    jax.block_until_ready((detector_scores, weight_scores, descriptors))

    assert detector_scores.shape == (N_BATCH, 1, H, W)
    assert weight_scores.shape == (N_BATCH, 1, H, W)
    assert descriptors.shape == (N_BATCH, FD * (1 + 2 + 4 + 8 + 16), H, W)
    assert bool(jnp.all(weight_scores >= 0.0)) and bool(jnp.all(weight_scores <= 1.0))
    assert bool(jnp.all(jnp.isfinite(detector_scores)))
    assert bool(jnp.all(jnp.isfinite(descriptors)))

    print("KERNEL_OK")
</pallas_src>

<mosaic_0001>
module attributes {stable_mosaic.version = 11 : i64} {
  func.func @_unet_kernel(%arg0: i32, %arg1: memref<32x1280xbf16, #tpu.memory_space<vmem>>, %arg2: memref<12576x128xbf16, #tpu.memory_space<vmem>>, %arg3: memref<2048x256xbf16, #tpu.memory_space<vmem>>, %arg4: memref<128x512xbf16, #tpu.memory_space<vmem>>, %arg5: memref<128x1024xbf16, #tpu.memory_space<vmem>>, %arg6: memref<24x256xf32, #tpu.memory_space<vmem>>, %arg7: memref<32x4096xf32, #tpu.memory_space<vmem>>) attributes {dimension_semantics = [#tpu.dimension_semantics<arbitrary>], iteration_bounds = array<i64: 1>, scalar_prefetch = 0 : i64, scratch_operands = 0 : i64, tpu.core_type = #tpu.core_type<tc>, window_params = [{transform_indices = @transform_0, window_bounds = array<i64: 32, 1280>}, {pipeline_mode = #tpu.pipeline_mode<synchronous>, transform_indices = @transform_1, window_bounds = array<i64: 12576, 128>}, {pipeline_mode = #tpu.pipeline_mode<synchronous>, transform_indices = @transform_2, window_bounds = array<i64: 2048, 256>}, {pipeline_mode = #tpu.pipeline_mode<synchronous>, transform_indices = @transform_3, window_bounds = array<i64: 128, 512>}, {pipeline_mode = #tpu.pipeline_mode<synchronous>, transform_indices = @transform_4, window_bounds = array<i64: 128, 1024>}, {pipeline_mode = #tpu.pipeline_mode<synchronous>, transform_indices = @transform_5, window_bounds = array<i64: 24, 256>}, {transform_indices = @transform_6, window_bounds = array<i64: 32, 4096>}]} {
    %c0 = arith.constant 0 : index
    %c0_0 = arith.constant 0 : index
    %0 = vector.load %arg1[%c0, %c0_0] : memref<32x1280xbf16, #tpu.memory_space<vmem>>, vector<32x1280xbf16>
    %c0_1 = arith.constant 0 : index
    %c0_2 = arith.constant 0 : index
    %1 = vector.load %arg6[%c0_1, %c0_2] : memref<24x256xf32, #tpu.memory_space<vmem>>, vector<1x128xf32>
    %c0_3 = arith.constant 0 : index
    %c0_4 = arith.constant 0 : index
    %2 = vector.load %arg2[%c0_3, %c0_4] : memref<12576x128xbf16, #tpu.memory_space<vmem>>, vector<1280x128xbf16>
    %cst = arith.constant dense<0.000000e+00> : vector<32x128xf32>
    %3 = tpu.matmul %0, %2, %cst {dimension_numbers = #tpu.dot_dimension_numbers<[1], [0], [0], [1], [0, 0, 1, 1], [], []>} : vector<32x1280xbf16>, vector<1280x128xbf16>, vector<32x128xf32> -> vector<32x128xf32>
    %c1280 = arith.constant 1280 : index
    %c0_5 = arith.constant 0 : index
    %4 = vector.load %arg2[%c1280, %c0_5] : memref<12576x128xbf16, #tpu.memory_space<vmem>>, vector<1280x128xbf16>
    %cst_6 = arith.constant dense<0.000000e+00> : vector<32x128xf32>
    %5 = tpu.matmul %0, %4, %cst_6 {dimension_numbers = #tpu.dot_dimension_numbers<[1], [0], [0], [1], [0, 0, 1, 1], [], []>} : vector<32x1280xbf16>, vector<1280x128xbf16>, vector<32x128xf32> -> vector<32x128xf32>
    %c2560 = arith.constant 2560 : index
    %c0_7 = arith.constant 0 : index
    %6 = vector.load %arg2[%c2560, %c0_7] : memref<12576x128xbf16, #tpu.memory_space<vmem>>, vector<1280x128xbf16>
    %cst_8 = arith.constant dense<0.000000e+00> : vector<32x128xf32>
    %7 = tpu.matmul %0, %6, %cst_8 {dimension_numbers = #tpu.dot_dimension_numbers<[1], [0], [0], [1], [0, 0, 1, 1], [], []>} : vector<32x1280xbf16>, vector<1280x128xbf16>, vector<32x128xf32> -> vector<32x128xf32>
    %cst_9 = arith.constant 0.000000e+00 : f32
    %8 = vector.broadcast %cst_9 : f32 to vector<1x128xf32>
    %9 = vector.extract_strided_slice %3 {offsets = [0, 0], sizes = [31, 128], strides = [1, 1]} : vector<32x128xf32> to vector<31x128xf32>
    %10 = tpu.concatenate %8, %9 in 0 : vector<1x128xf32>, vector<31x128xf32> -> vector<32x128xf32>
    %11 = vector.extract_strided_slice %7 {offsets = [1, 0], sizes = [31, 128], strides = [1, 1]} : vector<32x128xf32> to vector<31x128xf32>
    %12 = tpu.concatenate %11, %8 in 0 : vector<31x128xf32>, vector<1x128xf32> -> vector<32x128xf32>
    %13 = tpu.iota {dimensions = array<i32: 0>} : vector<32x128xi32>
    %c16_i32 = arith.constant 16 : i32
    %c0_i32 = arith.constant 0 : i32
    %14 = arith.cmpi eq, %c16_i32, %c0_i32 : i32
    %c1_i32 = arith.constant 1 : i32
    %15 = arith.select %14, %c1_i32, %c16_i32 : i32
    %16 = vector.broadcast %15 : i32 to vector<32x128xi32>
    %17 = arith.remsi %13, %16 : vector<32x128xi32>
    %c0_i32_10 = arith.constant 0 : i32
    %18 = vector.broadcast %c0_i32_10 : i32 to vector<32x128xi32>
    %19 = arith.cmpi ne, %17, %18 : vector<32x128xi32>
    %c0_i32_11 = arith.constant 0 : i32
    %20 = vector.broadcast %c0_i32_11 : i32 to vector<32x128xi32>
    %21 = arith.cmpi slt, %17, %20 : vector<32x128xi32>
    %c0_i32_12 = arith.constant 0 : i32
    %22 = arith.cmpi slt, %15, %c0_i32_12 : i32
    %23 = vector.broadcast %22 : i1 to vector<32x128xi1>
    %24 = vector.broadcast %23 : vector<32x128xi1> to vector<32x128xi1>
    %25 = arith.xori %21, %24 : vector<32x128xi1>
    %26 = arith.andi %25, %19 : vector<32x128xi1>
    %27 = vector.broadcast %15 : i32 to vector<32x128xi32>
    %28 = arith.addi %17, %27 : vector<32x128xi32>
    %29 = arith.select %26, %28, %17 : vector<32x128xi1>, vector<32x128xi32>
    %c0_i32_13 = arith.constant 0 : i32
    %30 = vector.broadcast %c0_i32_13 : i32 to vector<32x128xi32>
    %31 = arith.cmpi ne, %29, %30 : vector<32x128xi32>
    %cst_14 = arith.constant 0.000000e+00 : f32
    %32 = vector.broadcast %cst_14 : f32 to vector<32x128xf32>
    %33 = arith.select %31, %10, %32 : vector<32x128xi1>, vector<32x128xf32>
    %c16_i32_15 = arith.constant 16 : i32
    %c0_i32_16 = arith.constant 0 : i32
    %34 = arith.cmpi eq, %c16_i32_15, %c0_i32_16 : i32
    %c1_i32_17 = arith.constant 1 : i32
    %35 = arith.select %34, %c1_i32_17, %c16_i32_15 : i32
    %36 = vector.broadcast %35 : i32 to vector<32x128xi32>
    %37 = arith.remsi %13, %36 : vector<32x128xi32>
    %c0_i32_18 = arith.constant 0 : i32
    %38 = vector.broadcast %c0_i32_18 : i32 to vector<32x128xi32>
    %39 = arith.cmpi ne, %37, %38 : vector<32x128xi32>
    %c0_i32_19 = arith.constant 0 : i32
    %40 = vector.broadcast %c0_i32_19 : i32 to vector<32x128xi32>
    %41 = arith.cmpi slt, %37, %40 : vector<32x128xi32>
    %c0_i32_20 = arith.constant 0 : i32
    %42 = arith.cmpi slt, %35, %c0_i32_20 : i32
    %43 = vector.broadcast %42 : i1 to vector<32x128xi1>
    %44 = vector.broadcast %43 : vector<32x128xi1> to vector<32x128xi1>
    %45 = arith.xori %41, %44 : vector<32x128xi1>
    %46 = arith.andi %45, %39 : vector<32x128xi1>
    %47 = vector.broadcast %35 : i32 to vector<32x128xi32>
    %48 = arith.addi %37, %47 : vector<32x128xi32>
    %49 = arith.select %46, %48, %37 : vector<32x128xi1>, vector<32x128xi32>
    %c15_i32 = arith.constant 15 : i32
    %50 = vector.broadcast %c15_i32 : i32 to vector<32x128xi32>
    %51 = arith.cmpi ne, %49, %50 : vector<32x128xi32>
    %cst_21 = arith.constant 0.000000e+00 : f32
    %52 = vector.broadcast %cst_21 : f32 to vector<32x128xf32>
    %53 = arith.select %51, %12, %52 : vector<32x128xi1>, vector<32x128xf32>
    %54 = arith.addf %5, %33 : vector<32x128xf32>
    %55 = arith.addf %54, %53 : vector<32x128xf32>
    %56 = vector.broadcast %1 : vector<1x128xf32> to vector<32x128xf32>
    %57 = arith.addf %55, %56 : vector<32x128xf32>
    %cst_22 = arith.constant 0.000000e+00 : f32
    %58 = vector.broadcast %cst_22 : f32 to vector<32x128xf32>
    %59 = arith.maximumf %57, %58 : vector<32x128xf32>
    %60 = arith.truncf %59 : vector<32x128xf32> to vector<32x128xbf16>
    %c1 = arith.constant 1 : index
    %c0_23 = arith.constant 0 : index
    %61 = vector.load %arg6[%c1, %c0_23] : memref<24x256xf32, #tpu.memory_space<vmem>>, vector<1x128xf32>
    %c3840 = arith.constant 3840 : index
    %c0_24 = arith.constant 0 : index
    %62 = vector.load %arg2[%c3840, %c0_24] : memref<12576x128xbf16, #tpu.memory_space<vmem>>, vector<128x128xbf16>
    %cst_25 = arith.constant dense<0.000000e+00> : vector<32x128xf32>
    %63 = tpu.matmul %60, %62, %cst_25 {dimension_numbers = #tpu.dot_dimension_numbers<[1], [0], [0], [1], [0, 0, 1, 1], [], []>} : vector<32x128xbf16>, vector<128x128xbf16>, vector<32x128xf32> -> vector<32x128xf32>
    %c3968 = arith.constant 3968 : index
    %c0_26 = arith.constant 0 : index
    %64 = vector.load %arg2[%c3968, %c0_26] : memref<12576x128xbf16, #tpu.memory_space<vmem>>, vector<128x128xbf16>
    %cst_27 = arith.constant dense<0.000000e+00> : vector<32x128xf32>
    %65 = tpu.matmul %60, %64, %cst_27 {dimension_numbers = #tpu.dot_dimension_numbers<[1], [0], [0], [1], [0, 0, 1, 1], [], []>} : vector<32x128xbf16>, vector<128x128xbf16>, vector<32x128xf32> -> vector<32x128xf32>
    %c4096 = arith.constant 4096 : index
    %c0_28 = arith.constant 0 : index
    %66 = vector.load %arg2[%c4096, %c0_28] : memref<12576x128xbf16, #tpu.memory_space<vmem>>, vector<128x128xbf16>
    %cst_29 = arith.constant dense<0.000000e+00> : vector<32x128xf32>
    %67 = tpu.matmul %60, %66, %cst_29 {dimension_numbers = #tpu.dot_dimension_numbers<[1], [0], [0], [1], [0, 0, 1, 1], [], []>} : vector<32x128xbf16>, vector<128x128xbf16>, vector<32x128xf32> -> vector<32x128xf32>
    %cst_30 = arith.constant 0.000000e+00 : f32
    %68 = vector.broadcast %cst_30 : f32 to vector<1x128xf32>
    %69 = vector.extract_strided_slice %63 {offsets = [0, 0], sizes = [31, 128], strides = [1, 1]} : vector<32x128xf32> to vector<31x128xf32>
    %70 = tpu.concatenate %68, %69 in 0 : vector<1x128xf32>, vector<31x128xf32> -> vector<32x128xf32>
    %71 = vector.extract_strided_slice %67 {offsets = [1, 0], sizes = [31, 128], strides = [1, 1]} : vector<32x128xf32> to vector<31x128xf32>
    %72 = tpu.concatenate %71, %68 in 0 : vector<31x128xf32>, vector<1x128xf32> -> vector<32x128xf32>
    %73 = tpu.iota {dimensions = array<i32: 0>} : vector<32x128xi32>
    %c16_i32_31 = arith.constant 16 : i32
    %c0_i32_32 = arith.constant 0 : i32
    %74 = arith.cmpi eq, %c16_i32_31, %c0_i32_32 : i32
    %c1_i32_33 = arith.constant 1 : i32
    %75 = arith.select %74, %c1_i32_33, %c16_i32_31 : i32
    %76 = vector.broadcast %75 : i32 to vector<32x128xi32>
    %77 = arith.remsi %73, %76 : vector<32x128xi32>
    %c0_i32_34 = arith.constant 0 : i32
    %78 = vector.broadcast %c0_i32_34 : i32 to vector<32x128xi32>
    %79 = arith.cmpi ne, %77, %78 : vector<32x128xi32>
    %c0_i32_35 = arith.constant 0 : i32
    %80 = vector.broadcast %c0_i32_35 : i32 to vector<32x128xi32>
    %81 = arith.cmpi slt, %77, %80 : vector<32x128xi32>
    %c0_i32_36 = arith.constant 0 : i32
    %82 = arith.cmpi slt, %75, %c0_i32_36 : i32
    %83 = vector.broadcast %82 : i1 to vector<32x128xi1>
    %84 = vector.broadcast %83 : vector<32x128xi1> to vector<32x128xi1>
    %85 = arith.xori %81, %84 : vector<32x128xi1>
    %86 = arith.andi %85, %79 : vector<32x128xi1>
    %87 = vector.broadcast %75 : i32 to vector<32x128xi32>
    %88 = arith.addi %77, %87 : vector<32x128xi32>
    %89 = arith.select %86, %88, %77 : vector<32x128xi1>, vector<32x128xi32>
    %c0_i32_37 = arith.constant 0 : i32
    %90 = vector.broadcast %c0_i32_37 : i32 to vector<32x128xi32>
    %91 = arith.cmpi ne, %89, %90 : vector<32x128xi32>
    %cst_38 = arith.constant 0.000000e+00 : f32
    %92 = vector.broadcast %cst_38 : f32 to vector<32x128xf32>
    %93 = arith.select %91, %70, %92 : vector<32x128xi1>, vector<32x128xf32>
    %c16_i32_39 = arith.constant 16 : i32
    %c0_i32_40 = arith.constant 0 : i32
    %94 = arith.cmpi eq, %c16_i32_39, %c0_i32_40 : i32
    %c1_i32_41 = arith.constant 1 : i32
    %95 = arith.select %94, %c1_i32_41, %c16_i32_39 : i32
    %96 = vector.broadcast %95 : i32 to vector<32x128xi32>
    %97 = arith.remsi %73, %96 : vector<32x128xi32>
    %c0_i32_42 = arith.constant 0 : i32
    %98 = vector.broadcast %c0_i32_42 : i32 to vector<32x128xi32>
    %99 = arith.cmpi ne, %97, %98 : vector<32x128xi32>
    %c0_i32_43 = arith.constant 0 : i32
    %100 = vector.broadcast %c0_i32_43 : i32 to vector<32x128xi32>
    %101 = arith.cmpi slt, %97, %100 : vector<32x128xi32>
    %c0_i32_44 = arith.constant 0 : i32
    %102 = arith.cmpi slt, %95, %c0_i32_44 : i32
    %103 = vector.broadcast %102 : i1 to vector<32x128xi1>
    %104 = vector.broadcast %103 : vector<32x128xi1> to vector<32x128xi1>
    %105 = arith.xori %101, %104 : vector<32x128xi1>
    %106 = arith.andi %105, %99 : vector<32x128xi1>
    %107 = vector.broadcast %95 : i32 to vector<32x128xi32>
    %108 = arith.addi %97, %107 : vector<32x128xi32>
    %109 = arith.select %106, %108, %97 : vector<32x128xi1>, vector<32x128xi32>
    %c15_i32_45 = arith.constant 15 : i32
    %110 = vector.broadcast %c15_i32_45 : i32 to vector<32x128xi32>
    %111 = arith.cmpi ne, %109, %110 : vector<32x128xi32>
    %cst_46 = arith.constant 0.000000e+00 : f32
    %112 = vector.broadcast %cst_46 : f32 to vector<32x128xf32>
    %113 = arith.select %111, %72, %112 : vector<32x128xi1>, vector<32x128xf32>
    %114 = arith.addf %65, %93 : vector<32x128xf32>
    %115 = arith.addf %114, %113 : vector<32x128xf32>
    %116 = vector.broadcast %61 : vector<1x128xf32> to vector<32x128xf32>
    %117 = arith.addf %115, %116 : vector<32x128xf32>
    %cst_47 = arith.constant 0.000000e+00 : f32
    %118 = vector.broadcast %cst_47 : f32 to vector<32x128xf32>
    %119 = arith.maximumf %117, %118 : vector<32x128xf32>
    %120 = arith.truncf %119 : vector<32x128xf32> to vector<32x128xbf16>
    %c6144 = arith.constant 6144 : index
    %c0_48 = arith.constant 0 : index
    %121 = vector.load %arg2[%c6144, %c0_48] : memref<12576x128xbf16, #tpu.memory_space<vmem>>, vector<32x32xbf16>
    %cst_49 = arith.constant dense<0.000000e+00> : vector<32x128xf32>
    %122 = tpu.matmul %121, %120, %cst_49 {dimension_numbers = #tpu.dot_dimension_numbers<[1], [0], [0], [1], [0, 0, 1, 1], [], []>} : vector<32x32xbf16>, vector<32x128xbf16>, vector<32x128xf32> -> vector<32x128xf32>
    %123 = vector.extract_strided_slice %122 {offsets = [0, 0], sizes = [16, 128], strides = [1, 1]} : vector<32x128xf32> to vector<16x128xf32>
    %124 = vector.extract_strided_slice %122 {offsets = [16, 0], sizes = [16, 128], strides = [1, 1]} : vector<32x128xf32> to vector<16x128xf32>
    %125 = arith.maximumf %123, %124 : vector<16x128xf32>
    %c6176 = arith.constant 6176 : index
    %c0_50 = arith.constant 0 : index
    %126 = vector.load %arg2[%c6176, %c0_50] : memref<12576x128xbf16, #tpu.memory_space<vmem>>, vector<128x128xbf16>
    %127 = arith.truncf %125 : vector<16x128xf32> to vector<16x128xbf16>
    %cst_51 = arith.constant dense<0.000000e+00> : vector<16x128xf32>
    %128 = tpu.matmul %127, %126, %cst_51 {dimension_numbers = #tpu.dot_dimension_numbers<[1], [0], [0], [1], [0, 0, 1, 1], [], []>} : vector<16x128xbf16>, vector<128x128xbf16>, vector<16x128xf32> -> vector<16x128xf32>
    %129 = vector.extract_strided_slice %128 {offsets = [0, 0], sizes = [16, 64], strides = [1, 1]} : vector<16x128xf32> to vector<16x64xf32>
    %130 = vector.extract_strided_slice %128 {offsets = [0, 64], sizes = [16, 64], strides = [1, 1]} : vector<16x128xf32> to vector<16x64xf32>
    %131 = arith.maximumf %129, %130 : vector<16x64xf32>
    %132 = arith.truncf %131 : vector<16x64xf32> to vector<16x64xbf16>
    %c2 = arith.constant 2 : index
    %c0_52 = arith.constant 0 : index
    %133 = vector.load %arg6[%c2, %c0_52] : memref<24x256xf32, #tpu.memory_space<vmem>>, vector<1x128xf32>
    %c4224 = arith.constant 4224 : index
    %c0_53 = arith.constant 0 : index
    %134 = vector.load %arg2[%c4224, %c0_53] : memref<12576x128xbf16, #tpu.memory_space<vmem>>, vector<64x128xbf16>
    %cst_54 = arith.constant dense<0.000000e+00> : vector<16x128xf32>
    %135 = tpu.matmul %132, %134, %cst_54 {dimension_numbers = #tpu.dot_dimension_numbers<[1], [0], [0], [1], [0, 0, 1, 1], [], []>} : vector<16x64xbf16>, vector<64x128xbf16>, vector<16x128xf32> -> vector<16x128xf32>
    %c4288 = arith.constant 4288 : index
    %c0_55 = arith.constant 0 : index
    %136 = vector.load %arg2[%c4288, %c0_55] : memref<12576x128xbf16, #tpu.memory_space<vmem>>, vector<64x128xbf16>
    %cst_56 = arith.constant dense<0.000000e+00> : vector<16x128xf32>
    %137 = tpu.matmul %132, %136, %cst_56 {dimension_numbers = #tpu.dot_dimension_numbers<[1], [0], [0], [1], [0, 0, 1, 1], [], []>} : vector<16x64xbf16>, vector<64x128xbf16>, vector<16x128xf32> -> vector<16x128xf32>
    %c4352 = arith.constant 4352 : index
    %c0_57 = arith.constant 0 : index
    %138 = vector.load %arg2[%c4352, %c0_57] : memref<12576x128xbf16, #tpu.memory_space<vmem>>, vector<64x128xbf16>
    %cst_58 = arith.constant dense<0.000000e+00> : vector<16x128xf32>
    %139 = tpu.matmul %132, %138, %cst_58 {dimension_numbers = #tpu.dot_dimension_numbers<[1], [0], [0], [1], [0, 0, 1, 1], [], []>} : vector<16x64xbf16>, vector<64x128xbf16>, vector<16x128xf32> -> vector<16x128xf32>
    %cst_59 = arith.constant 0.000000e+00 : f32
    %140 = vector.broadcast %cst_59 : f32 to vector<1x128xf32>
    %141 = vector.extract_strided_slice %135 {offsets = [0, 0], sizes = [15, 128], strides = [1, 1]} : vector<16x128xf32> to vector<15x128xf32>
    %142 = tpu.concatenate %140, %141 in 0 : vector<1x128xf32>, vector<15x128xf32> -> vector<16x128xf32>
    %143 = vector.extract_strided_slice %139 {offsets = [1, 0], sizes = [15, 128], strides = [1, 1]} : vector<16x128xf32> to vector<15x128xf32>
    %144 = tpu.concatenate %143, %140 in 0 : vector<15x128xf32>, vector<1x128xf32> -> vector<16x128xf32>
    %145 = tpu.iota {dimensions = array<i32: 0>} : vector<16x128xi32>
    %c8_i32 = arith.constant 8 : i32
    %c0_i32_60 = arith.constant 0 : i32
    %146 = arith.cmpi eq, %c8_i32, %c0_i32_60 : i32
    %c1_i32_61 = arith.constant 1 : i32
    %147 = arith.select %146, %c1_i32_61, %c8_i32 : i32
    %148 = vector.broadcast %147 : i32 to vector<16x128xi32>
    %149 = arith.remsi %145, %148 : vector<16x128xi32>
    %c0_i32_62 = arith.constant 0 : i32
    %150 = vector.broadcast %c0_i32_62 : i32 to vector<16x128xi32>
    %151 = arith.cmpi ne, %149, %150 : vector<16x128xi32>
    %c0_i32_63 = arith.constant 0 : i32
    %152 = vector.broadcast %c0_i32_63 : i32 to vector<16x128xi32>
    %153 = arith.cmpi slt, %149, %152 : vector<16x128xi32>
    %c0_i32_64 = arith.constant 0 : i32
    %154 = arith.cmpi slt, %147, %c0_i32_64 : i32
    %155 = vector.broadcast %154 : i1 to vector<16x128xi1>
    %156 = vector.broadcast %155 : vector<16x128xi1> to vector<16x128xi1>
    %157 = arith.xori %153, %156 : vector<16x128xi1>
    %158 = arith.andi %157, %151 : vector<16x128xi1>
    %159 = vector.broadcast %147 : i32 to vector<16x128xi32>
    %160 = arith.addi %149, %159 : vector<16x128xi32>
    %161 = arith.select %158, %160, %149 : vector<16x128xi1>, vector<16x128xi32>
    %c0_i32_65 = arith.constant 0 : i32
    %162 = vector.broadcast %c0_i32_65 : i32 to vector<16x128xi32>
    %163 = arith.cmpi ne, %161, %162 : vector<16x128xi32>
    %cst_66 = arith.constant 0.000000e+00 : f32
    %164 = vector.broadcast %cst_66 : f32 to vector<16x128xf32>
    %165 = arith.select %163, %142, %164 : vector<16x128xi1>, vector<16x128xf32>
    %c8_i32_67 = arith.constant 8 : i32
    %c0_i32_68 = arith.constant 0 : i32
    %166 = arith.cmpi eq, %c8_i32_67, %c0_i32_68 : i32
    %c1_i32_69 = arith.constant 1 : i32
    %167 = arith.select %166, %c1_i32_69, %c8_i32_67 : i32
    %168 = vector.broadcast %167 : i32 to vector<16x128xi32>
    %169 = arith.remsi %145, %168 : vector<16x128xi32>
    %c0_i32_70 = arith.constant 0 : i32
    %170 = vector.broadcast %c0_i32_70 : i32 to vector<16x128xi32>
    %171 = arith.cmpi ne, %169, %170 : vector<16x128xi32>
    %c0_i32_71 = arith.constant 0 : i32
    %172 = vector.broadcast %c0_i32_71 : i32 to vector<16x128xi32>
    %173 = arith.cmpi slt, %169, %172 : vector<16x128xi32>
    %c0_i32_72 = arith.constant 0 : i32
    %174 = arith.cmpi slt, %167, %c0_i32_72 : i32
    %175 = vector.broadcast %174 : i1 to vector<16x128xi1>
    %176 = vector.broadcast %175 : vector<16x128xi1> to vector<16x128xi1>
    %177 = arith.xori %173, %176 : vector<16x128xi1>
    %178 = arith.andi %177, %171 : vector<16x128xi1>
    %179 = vector.broadcast %167 : i32 to vector<16x128xi32>
    %180 = arith.addi %169, %179 : vector<16x128xi32>
    %181 = arith.select %178, %180, %169 : vector<16x128xi1>, vector<16x128xi32>
    %c7_i32 = arith.constant 7 : i32
    %182 = vector.broadcast %c7_i32 : i32 to vector<16x128xi32>
    %183 = arith.cmpi ne, %181, %182 : vector<16x128xi32>
    %cst_73 = arith.constant 0.000000e+00 : f32
    %184 = vector.broadcast %cst_73 : f32 to vector<16x128xf32>
    %185 = arith.select %183, %144, %184 : vector<16x128xi1>, vector<16x128xf32>
    %186 = arith.addf %137, %165 : vector<16x128xf32>
    %187 = arith.addf %186, %185 : vector<16x128xf32>
    %188 = vector.broadcast %133 : vector<1x128xf32> to vector<16x128xf32>
    %189 = arith.addf %187, %188 : vector<16x128xf32>
    %cst_74 = arith.constant 0.000000e+00 : f32
    %190 = vector.broadcast %cst_74 : f32 to vector<16x128xf32>
    %191 = arith.maximumf %189, %190 : vector<16x128xf32>
    %192 = arith.truncf %191 : vector<16x128xf32> to vector<16x128xbf16>
    %c3 = arith.constant 3 : index
    %c0_75 = arith.constant 0 : index
    %193 = vector.load %arg6[%c3, %c0_75] : memref<24x256xf32, #tpu.memory_space<vmem>>, vector<1x128xf32>
    %c4416 = arith.constant 4416 : index
    %c0_76 = arith.constant 0 : index
    %194 = vector.load %arg2[%c4416, %c0_76] : memref<12576x128xbf16, #tpu.memory_space<vmem>>, vector<128x128xbf16>
    %cst_77 = arith.constant dense<0.000000e+00> : vector<16x128xf32>
    %195 = tpu.matmul %192, %194, %cst_77 {dimension_numbers = #tpu.dot_dimension_numbers<[1], [0], [0], [1], [0, 0, 1, 1], [], []>} : vector<16x128xbf16>, vector<128x128xbf16>, vector<16x128xf32> -> vector<16x128xf32>
    %c4544 = arith.constant 4544 : index
    %c0_78 = arith.constant 0 : index
    %196 = vector.load %arg2[%c4544, %c0_78] : memref<12576x128xbf16, #tpu.memory_space<vmem>>, vector<128x128xbf16>
    %cst_79 = arith.constant dense<0.000000e+00> : vector<16x128xf32>
    %197 = tpu.matmul %192, %196, %cst_79 {dimension_numbers = #tpu.dot_dimension_numbers<[1], [0], [0], [1], [0, 0, 1, 1], [], []>} : vector<16x128xbf16>, vector<128x128xbf16>, vector<16x128xf32> -> vector<16x128xf32>
    %c4672 = arith.constant 4672 : index
    %c0_80 = arith.constant 0 : index
    %198 = vector.load %arg2[%c4672, %c0_80] : memref<12576x128xbf16, #tpu.memory_space<vmem>>, vector<128x128xbf16>
    %cst_81 = arith.constant dense<0.000000e+00> : vector<16x128xf32>
    %199 = tpu.matmul %192, %198, %cst_81 {dimension_numbers = #tpu.dot_dimension_numbers<[1], [0], [0], [1], [0, 0, 1, 1], [], []>} : vector<16x128xbf16>, vector<128x128xbf16>, vector<16x128xf32> -> vector<16x128xf32>
    %cst_82 = arith.constant 0.000000e+00 : f32
    %200 = vector.broadcast %cst_82 : f32 to vector<1x128xf32>
    %201 = vector.extract_strided_slice %195 {offsets = [0, 0], sizes = [15, 128], strides = [1, 1]} : vector<16x128xf32> to vector<15x128xf32>
    %202 = tpu.concatenate %200, %201 in 0 : vector<1x128xf32>, vector<15x128xf32> -> vector<16x128xf32>
    %203 = vector.extract_strided_slice %199 {offsets = [1, 0], sizes = [15, 128], strides = [1, 1]} : vector<16x128xf32> to vector<15x128xf32>
    %204 = tpu.concatenate %203, %200 in 0 : vector<15x128xf32>, vector<1x128xf32> -> vector<16x128xf32>
    %205 = tpu.iota {dimensions = array<i32: 0>} : vector<16x128xi32>
    %c8_i32_83 = arith.constant 8 : i32
    %c0_i32_84 = arith.constant 0 : i32
    %206 = arith.cmpi eq, %c8_i32_83, %c0_i32_84 : i32
    %c1_i32_85 = arith.constant 1 : i32
    %207 = arith.select %206, %c1_i32_85, %c8_i32_83 : i32
    %208 = vector.broadcast %207 : i32 to vector<16x128xi32>
    %209 = arith.remsi %205, %208 : vector<16x128xi32>
    %c0_i32_86 = arith.constant 0 : i32
    %210 = vector.broadcast %c0_i32_86 : i32 to vector<16x128xi32>
    %211 = arith.cmpi ne, %209, %210 : vector<16x128xi32>
    %c0_i32_87 = arith.constant 0 : i32
    %212 = vector.broadcast %c0_i32_87 : i32 to vector<16x128xi32>
    %213 = arith.cmpi slt, %209, %212 : vector<16x128xi32>
    %c0_i32_88 = arith.constant 0 : i32
    %214 = arith.cmpi slt, %207, %c0_i32_88 : i32
    %215 = vector.broadcast %214 : i1 to vector<16x128xi1>
    %216 = vector.broadcast %215 : vector<16x128xi1> to vector<16x128xi1>
    %217 = arith.xori %213, %216 : vector<16x128xi1>
    %218 = arith.andi %217, %211 : vector<16x128xi1>
    %219 = vector.broadcast %207 : i32 to vector<16x128xi32>
    %220 = arith.addi %209, %219 : vector<16x128xi32>
    %221 = arith.select %218, %220, %209 : vector<16x128xi1>, vector<16x128xi32>
    %c0_i32_89 = arith.constant 0 : i32
    %222 = vector.broadcast %c0_i32_89 : i32 to vector<16x128xi32>
    %223 = arith.cmpi ne, %221, %222 : vector<16x128xi32>
    %cst_90 = arith.constant 0.000000e+00 : f32
    %224 = vector.broadcast %cst_90 : f32 to vector<16x128xf32>
    %225 = arith.select %223, %202, %224 : vector<16x128xi1>, vector<16x128xf32>
    %c8_i32_91 = arith.constant 8 : i32
    %c0_i32_92 = arith.constant 0 : i32
    %226 = arith.cmpi eq, %c8_i32_91, %c0_i32_92 : i32
    %c1_i32_93 = arith.constant 1 : i32
    %227 = arith.select %226, %c1_i32_93, %c8_i32_91 : i32
    %228 = vector.broadcast %227 : i32 to vector<16x128xi32>
    %229 = arith.remsi %205, %228 : vector<16x128xi32>
    %c0_i32_94 = arith.constant 0 : i32
    %230 = vector.broadcast %c0_i32_94 : i32 to vector<16x128xi32>
    %231 = arith.cmpi ne, %229, %230 : vector<16x128xi32>
    %c0_i32_95 = arith.constant 0 : i32
    %232 = vector.broadcast %c0_i32_95 : i32 to vector<16x128xi32>
    %233 = arith.cmpi slt, %229, %232 : vector<16x128xi32>
    %c0_i32_96 = arith.constant 0 : i32
    %234 = arith.cmpi slt, %227, %c0_i32_96 : i32
    %235 = vector.broadcast %234 : i1 to vector<16x128xi1>
    %236 = vector.broadcast %235 : vector<16x128xi1> to vector<16x128xi1>
    %237 = arith.xori %233, %236 : vector<16x128xi1>
    %238 = arith.andi %237, %231 : vector<16x128xi1>
    %239 = vector.broadcast %227 : i32 to vector<16x128xi32>
    %240 = arith.addi %229, %239 : vector<16x128xi32>
    %241 = arith.select %238, %240, %229 : vector<16x128xi1>, vector<16x128xi32>
    %c7_i32_97 = arith.constant 7 : i32
    %242 = vector.broadcast %c7_i32_97 : i32 to vector<16x128xi32>
    %243 = arith.cmpi ne, %241, %242 : vector<16x128xi32>
    %cst_98 = arith.constant 0.000000e+00 : f32
    %244 = vector.broadcast %cst_98 : f32 to vector<16x128xf32>
    %245 = arith.select %243, %204, %244 : vector<16x128xi1>, vector<16x128xf32>
    %246 = arith.addf %197, %225 : vector<16x128xf32>
    %247 = arith.addf %246, %245 : vector<16x128xf32>
    %248 = vector.broadcast %193 : vector<1x128xf32> to vector<16x128xf32>
    %249 = arith.addf %247, %248 : vector<16x128xf32>
    %cst_99 = arith.constant 0.000000e+00 : f32
    %250 = vector.broadcast %cst_99 : f32 to vector<16x128xf32>
    %251 = arith.maximumf %249, %250 : vector<16x128xf32>
    %252 = arith.truncf %251 : vector<16x128xf32> to vector<16x128xbf16>
    %c6304 = arith.constant 6304 : index
    %c0_100 = arith.constant 0 : index
    %253 = vector.load %arg2[%c6304, %c0_100] : memref<12576x128xbf16, #tpu.memory_space<vmem>>, vector<16x16xbf16>
    %cst_101 = arith.constant dense<0.000000e+00> : vector<16x128xf32>
    %254 = tpu.matmul %253, %252, %cst_101 {dimension_numbers = #tpu.dot_dimension_numbers<[1], [0], [0], [1], [0, 0, 1, 1], [], []>} : vector<16x16xbf16>, vector<16x128xbf16>, vector<16x128xf32> -> vector<16x128xf32>
    %255 = vector.extract_strided_slice %254 {offsets = [0, 0], sizes = [8, 128], strides = [1, 1]} : vector<16x128xf32> to vector<8x128xf32>
    %256 = vector.extract_strided_slice %254 {offsets = [8, 0], sizes = [8, 128], strides = [1, 1]} : vector<16x128xf32> to vector<8x128xf32>
    %257 = arith.maximumf %255, %256 : vector<8x128xf32>
    %c6320 = arith.constant 6320 : index
    %c0_102 = arith.constant 0 : index
    %258 = vector.load %arg2[%c6320, %c0_102] : memref<12576x128xbf16, #tpu.memory_space<vmem>>, vector<128x128xbf16>
    %259 = arith.truncf %257 : vector<8x128xf32> to vector<8x128xbf16>
    %cst_103 = arith.constant dense<0.000000e+00> : vector<8x128xf32>
    %260 = tpu.matmul %259, %258, %cst_103 {dimension_numbers = #tpu.dot_dimension_numbers<[1], [0], [0], [1], [0, 0, 1, 1], [], []>} : vector<8x128xbf16>, vector<128x128xbf16>, vector<8x128xf32> -> vector<8x128xf32>
    %261 = vector.extract_strided_slice %260 {offsets = [0, 0], sizes = [8, 64], strides = [1, 1]} : vector<8x128xf32> to vector<8x64xf32>
    %262 = vector.extract_strided_slice %260 {offsets = [0, 64], sizes = [8, 64], strides = [1, 1]} : vector<8x128xf32> to vector<8x64xf32>
    %263 = arith.maximumf %261, %262 : vector<8x64xf32>
    %264 = arith.truncf %263 : vector<8x64xf32> to vector<8x64xbf16>
    %c4 = arith.constant 4 : index
    %c0_104 = arith.constant 0 : index
    %265 = vector.load %arg6[%c4, %c0_104] : memref<24x256xf32, #tpu.memory_space<vmem>>, vector<1x128xf32>
    %c4800 = arith.constant 4800 : index
    %c0_105 = arith.constant 0 : index
    %266 = vector.load %arg2[%c4800, %c0_105] : memref<12576x128xbf16, #tpu.memory_space<vmem>>, vector<64x128xbf16>
    %cst_106 = arith.constant dense<0.000000e+00> : vector<8x128xf32>
    %267 = tpu.matmul %264, %266, %cst_106 {dimension_numbers = #tpu.dot_dimension_numbers<[1], [0], [0], [1], [0, 0, 1, 1], [], []>} : vector<8x64xbf16>, vector<64x128xbf16>, vector<8x128xf32> -> vector<8x128xf32>
    %c4864 = arith.constant 4864 : index
    %c0_107 = arith.constant 0 : index
    %268 = vector.load %arg2[%c4864, %c0_107] : memref<12576x128xbf16, #tpu.memory_space<vmem>>, vector<64x128xbf16>
    %cst_108 = arith.constant dense<0.000000e+00> : vector<8x128xf32>
    %269 = tpu.matmul %264, %268, %cst_108 {dimension_numbers = #tpu.dot_dimension_numbers<[1], [0], [0], [1], [0, 0, 1, 1], [], []>} : vector<8x64xbf16>, vector<64x128xbf16>, vector<8x128xf32> -> vector<8x128xf32>
    %c4928 = arith.constant 4928 : index
    %c0_109 = arith.constant 0 : index
    %270 = vector.load %arg2[%c4928, %c0_109] : memref<12576x128xbf16, #tpu.memory_space<vmem>>, vector<64x128xbf16>
    %cst_110 = arith.constant dense<0.000000e+00> : vector<8x128xf32>
    %271 = tpu.matmul %264, %270, %cst_110 {dimension_numbers = #tpu.dot_dimension_numbers<[1], [0], [0], [1], [0, 0, 1, 1], [], []>} : vector<8x64xbf16>, vector<64x128xbf16>, vector<8x128xf32> -> vector<8x128xf32>
    %cst_111 = arith.constant 0.000000e+00 : f32
    %272 = vector.broadcast %cst_111 : f32 to vector<1x128xf32>
    %273 = vector.extract_strided_slice %267 {offsets = [0, 0], sizes = [7, 128], strides = [1, 1]} : vector<8x128xf32> to vector<7x128xf32>
    %274 = tpu.concatenate %272, %273 in 0 : vector<1x128xf32>, vector<7x128xf32> -> vector<8x128xf32>
    %275 = vector.extract_strided_slice %271 {offsets = [1, 0], sizes = [7, 128], strides = [1, 1]} : vector<8x128xf32> to vector<7x128xf32>
    %276 = tpu.concatenate %275, %272 in 0 : vector<7x128xf32>, vector<1x128xf32> -> vector<8x128xf32>
    %277 = tpu.iota {dimensions = array<i32: 0>} : vector<8x128xi32>
    %c4_i32 = arith.constant 4 : i32
    %c0_i32_112 = arith.constant 0 : i32
    %278 = arith.cmpi eq, %c4_i32, %c0_i32_112 : i32
    %c1_i32_113 = arith.constant 1 : i32
    %279 = arith.select %278, %c1_i32_113, %c4_i32 : i32
    %280 = vector.broadcast %279 : i32 to vector<8x128xi32>
    %281 = arith.remsi %277, %280 : vector<8x128xi32>
    %c0_i32_114 = arith.constant 0 : i32
    %282 = vector.broadcast %c0_i32_114 : i32 to vector<8x128xi32>
    %283 = arith.cmpi ne, %281, %282 : vector<8x128xi32>
    %c0_i32_115 = arith.constant 0 : i32
    %284 = vector.broadcast %c0_i32_115 : i32 to vector<8x128xi32>
    %285 = arith.cmpi slt, %281, %284 : vector<8x128xi32>
    %c0_i32_116 = arith.constant 0 : i32
    %286 = arith.cmpi slt, %279, %c0_i32_116 : i32
    %287 = vector.broadcast %286 : i1 to vector<8x128xi1>
    %288 = vector.broadcast %287 : vector<8x128xi1> to vector<8x128xi1>
    %289 = arith.xori %285, %288 : vector<8x128xi1>
    %290 = arith.andi %289, %283 : vector<8x128xi1>
    %291 = vector.broadcast %279 : i32 to vector<8x128xi32>
    %292 = arith.addi %281, %291 : vector<8x128xi32>
    %293 = arith.select %290, %292, %281 : vector<8x128xi1>, vector<8x128xi32>
    %c0_i32_117 = arith.constant 0 : i32
    %294 = vector.broadcast %c0_i32_117 : i32 to vector<8x128xi32>
    %295 = arith.cmpi ne, %293, %294 : vector<8x128xi32>
    %cst_118 = arith.constant 0.000000e+00 : f32
    %296 = vector.broadcast %cst_118 : f32 to vector<8x128xf32>
    %297 = arith.select %295, %274, %296 : vector<8x128xi1>, vector<8x128xf32>
    %c4_i32_119 = arith.constant 4 : i32
    %c0_i32_120 = arith.constant 0 : i32
    %298 = arith.cmpi eq, %c4_i32_119, %c0_i32_120 : i32
    %c1_i32_121 = arith.constant 1 : i32
    %299 = arith.select %298, %c1_i32_121, %c4_i32_119 : i32
    %300 = vector.broadcast %299 : i32 to vector<8x128xi32>
    %301 = arith.remsi %277, %300 : vector<8x128xi32>
    %c0_i32_122 = arith.constant 0 : i32
    %302 = vector.broadcast %c0_i32_122 : i32 to vector<8x128xi32>
    %303 = arith.cmpi ne, %301, %302 : vector<8x128xi32>
    %c0_i32_123 = arith.constant 0 : i32
    %304 = vector.broadcast %c0_i32_123 : i32 to vector<8x128xi32>
    %305 = arith.cmpi slt, %301, %304 : vector<8x128xi32>
    %c0_i32_124 = arith.constant 0 : i32
    %306 = arith.cmpi slt, %299, %c0_i32_124 : i32
    %307 = vector.broadcast %306 : i1 to vector<8x128xi1>
    %308 = vector.broadcast %307 : vector<8x128xi1> to vector<8x128xi1>
    %309 = arith.xori %305, %308 : vector<8x128xi1>
    %310 = arith.andi %309, %303 : vector<8x128xi1>
    %311 = vector.broadcast %299 : i32 to vector<8x128xi32>
    %312 = arith.addi %301, %311 : vector<8x128xi32>
    %313 = arith.select %310, %312, %301 : vector<8x128xi1>, vector<8x128xi32>
    %c3_i32 = arith.constant 3 : i32
    %314 = vector.broadcast %c3_i32 : i32 to vector<8x128xi32>
    %315 = arith.cmpi ne, %313, %314 : vector<8x128xi32>
    %cst_125 = arith.constant 0.000000e+00 : f32
    %316 = vector.broadcast %cst_125 : f32 to vector<8x128xf32>
    %317 = arith.select %315, %276, %316 : vector<8x128xi1>, vector<8x128xf32>
    %318 = arith.addf %269, %297 : vector<8x128xf32>
    %319 = arith.addf %318, %317 : vector<8x128xf32>
    %320 = vector.broadcast %265 : vector<1x128xf32> to vector<8x128xf32>
    %321 = arith.addf %319, %320 : vector<8x128xf32>
    %cst_126 = arith.constant 0.000000e+00 : f32
    %322 = vector.broadcast %cst_126 : f32 to vector<8x128xf32>
    %323 = arith.maximumf %321, %322 : vector<8x128xf32>
    %324 = arith.truncf %323 : vector<8x128xf32> to vector<8x128xbf16>
    %c5 = arith.constant 5 : index
    %c0_127 = arith.constant 0 : index
    %325 = vector.load %arg6[%c5, %c0_127] : memref<24x256xf32, #tpu.memory_space<vmem>>, vector<1x128xf32>
    %c4992 = arith.constant 4992 : index
    %c0_128 = arith.constant 0 : index
    %326 = vector.load %arg2[%c4992, %c0_128] : memref<12576x128xbf16, #tpu.memory_space<vmem>>, vector<128x128xbf16>
    %cst_129 = arith.constant dense<0.000000e+00> : vector<8x128xf32>
    %327 = tpu.matmul %324, %326, %cst_129 {dimension_numbers = #tpu.dot_dimension_numbers<[1], [0], [0], [1], [0, 0, 1, 1], [], []>} : vector<8x128xbf16>, vector<128x128xbf16>, vector<8x128xf32> -> vector<8x128xf32>
    %c5120 = arith.constant 5120 : index
    %c0_130 = arith.constant 0 : index
    %328 = vector.load %arg2[%c5120, %c0_130] : memref<12576x128xbf16, #tpu.memory_space<vmem>>, vector<128x128xbf16>
    %cst_131 = arith.constant dense<0.000000e+00> : vector<8x128xf32>
    %329 = tpu.matmul %324, %328, %cst_131 {dimension_numbers = #tpu.dot_dimension_numbers<[1], [0], [0], [1], [0, 0, 1, 1], [], []>} : vector<8x128xbf16>, vector<128x128xbf16>, vector<8x128xf32> -> vector<8x128xf32>
    %c5248 = arith.constant 5248 : index
    %c0_132 = arith.constant 0 : index
    %330 = vector.load %arg2[%c5248, %c0_132] : memref<12576x128xbf16, #tpu.memory_space<vmem>>, vector<128x128xbf16>
    %cst_133 = arith.constant dense<0.000000e+00> : vector<8x128xf32>
    %331 = tpu.matmul %324, %330, %cst_133 {dimension_numbers = #tpu.dot_dimension_numbers<[1], [0], [0], [1], [0, 0, 1, 1], [], []>} : vector<8x128xbf16>, vector<128x128xbf16>, vector<8x128xf32> -> vector<8x128xf32>
    %cst_134 = arith.constant 0.000000e+00 : f32
    %332 = vector.broadcast %cst_134 : f32 to vector<1x128xf32>
    %333 = vector.extract_strided_slice %327 {offsets = [0, 0], sizes = [7, 128], strides = [1, 1]} : vector<8x128xf32> to vector<7x128xf32>
    %334 = tpu.concatenate %332, %333 in 0 : vector<1x128xf32>, vector<7x128xf32> -> vector<8x128xf32>
    %335 = vector.extract_strided_slice %331 {offsets = [1, 0], sizes = [7, 128], strides = [1, 1]} : vector<8x128xf32> to vector<7x128xf32>
    %336 = tpu.concatenate %335, %332 in 0 : vector<7x128xf32>, vector<1x128xf32> -> vector<8x128xf32>
    %337 = tpu.iota {dimensions = array<i32: 0>} : vector<8x128xi32>
    %c4_i32_135 = arith.constant 4 : i32
    %c0_i32_136 = arith.constant 0 : i32
    %338 = arith.cmpi eq, %c4_i32_135, %c0_i32_136 : i32
    %c1_i32_137 = arith.constant 1 : i32
    %339 = arith.select %338, %c1_i32_137, %c4_i32_135 : i32
    %340 = vector.broadcast %339 : i32 to vector<8x128xi32>
    %341 = arith.remsi %337, %340 : vector<8x128xi32>
    %c0_i32_138 = arith.constant 0 : i32
    %342 = vector.broadcast %c0_i32_138 : i32 to vector<8x128xi32>
    %343 = arith.cmpi ne, %341, %342 : vector<8x128xi32>
    %c0_i32_139 = arith.constant 0 : i32
    %344 = vector.broadcast %c0_i32_139 : i32 to vector<8x128xi32>
    %345 = arith.cmpi slt, %341, %344 : vector<8x128xi32>
    %c0_i32_140 = arith.constant 0 : i32
    %346 = arith.cmpi slt, %339, %c0_i32_140 : i32
    %347 = vector.broadcast %346 : i1 to vector<8x128xi1>
    %348 = vector.broadcast %347 : vector<8x128xi1> to vector<8x128xi1>
    %349 = arith.xori %345, %348 : vector<8x128xi1>
    %350 = arith.andi %349, %343 : vector<8x128xi1>
    %351 = vector.broadcast %339 : i32 to vector<8x128xi32>
    %352 = arith.addi %341, %351 : vector<8x128xi32>
    %353 = arith.select %350, %352, %341 : vector<8x128xi1>, vector<8x128xi32>
    %c0_i32_141 = arith.constant 0 : i32
    %354 = vector.broadcast %c0_i32_141 : i32 to vector<8x128xi32>
    %355 = arith.cmpi ne, %353, %354 : vector<8x128xi32>
    %cst_142 = arith.constant 0.000000e+00 : f32
    %356 = vector.broadcast %cst_142 : f32 to vector<8x128xf32>
    %357 = arith.select %355, %334, %356 : vector<8x128xi1>, vector<8x128xf32>
    %c4_i32_143 = arith.constant 4 : i32
    %c0_i32_144 = arith.constant 0 : i32
    %358 = arith.cmpi eq, %c4_i32_143, %c0_i32_144 : i32
    %c1_i32_145 = arith.constant 1 : i32
    %359 = arith.select %358, %c1_i32_145, %c4_i32_143 : i32
    %360 = vector.broadcast %359 : i32 to vector<8x128xi32>
    %361 = arith.remsi %337, %360 : vector<8x128xi32>
    %c0_i32_146 = arith.constant 0 : i32
    %362 = vector.broadcast %c0_i32_146 : i32 to vector<8x128xi32>
    %363 = arith.cmpi ne, %361, %362 : vector<8x128xi32>
    %c0_i32_147 = arith.constant 0 : i32
    %364 = vector.broadcast %c0_i32_147 : i32 to vector<8x128xi32>
    %365 = arith.cmpi slt, %361, %364 : vector<8x128xi32>
    %c0_i32_148 = arith.constant 0 : i32
    %366 = arith.cmpi slt, %359, %c0_i32_148 : i32
    %367 = vector.broadcast %366 : i1 to vector<8x128xi1>
    %368 = vector.broadcast %367 : vector<8x128xi1> to vector<8x128xi1>
    %369 = arith.xori %365, %368 : vector<8x128xi1>
    %370 = arith.andi %369, %363 : vector<8x128xi1>
    %371 = vector.broadcast %359 : i32 to vector<8x128xi32>
    %372 = arith.addi %361, %371 : vector<8x128xi32>
    %373 = arith.select %370, %372, %361 : vector<8x128xi1>, vector<8x128xi32>
    %c3_i32_149 = arith.constant 3 : i32
    %374 = vector.broadcast %c3_i32_149 : i32 to vector<8x128xi32>
    %375 = arith.cmpi ne, %373, %374 : vector<8x128xi32>
    %cst_150 = arith.constant 0.000000e+00 : f32
    %376 = vector.broadcast %cst_150 : f32 to vector<8x128xf32>
    %377 = arith.select %375, %336, %376 : vector<8x128xi1>, vector<8x128xf32>
    %378 = arith.addf %329, %357 : vector<8x128xf32>
    %379 = arith.addf %378, %377 : vector<8x128xf32>
    %380 = vector.broadcast %325 : vector<1x128xf32> to vector<8x128xf32>
    %381 = arith.addf %379, %380 : vector<8x128xf32>
    %cst_151 = arith.constant 0.000000e+00 : f32
    %382 = vector.broadcast %cst_151 : f32 to vector<8x128xf32>
    %383 = arith.maximumf %381, %382 : vector<8x128xf32>
    %384 = arith.truncf %383 : vector<8x128xf32> to vector<8x128xbf16>
    %c6448 = arith.constant 6448 : index
    %c0_152 = arith.constant 0 : index
    %385 = vector.load %arg2[%c6448, %c0_152] : memref<12576x128xbf16, #tpu.memory_space<vmem>>, vector<8x8xbf16>
    %cst_153 = arith.constant dense<0.000000e+00> : vector<8x128xf32>
    %386 = tpu.matmul %385, %384, %cst_153 {dimension_numbers = #tpu.dot_dimension_numbers<[1], [0], [0], [1], [0, 0, 1, 1], [], []>} : vector<8x8xbf16>, vector<8x128xbf16>, vector<8x128xf32> -> vector<8x128xf32>
    %387 = vector.extract_strided_slice %386 {offsets = [0, 0], sizes = [4, 128], strides = [1, 1]} : vector<8x128xf32> to vector<4x128xf32>
    %388 = vector.extract_strided_slice %386 {offsets = [4, 0], sizes = [4, 128], strides = [1, 1]} : vector<8x128xf32> to vector<4x128xf32>
    %389 = arith.maximumf %387, %388 : vector<4x128xf32>
    %c6464 = arith.constant 6464 : index
    %c0_154 = arith.constant 0 : index
    %390 = vector.load %arg2[%c6464, %c0_154] : memref<12576x128xbf16, #tpu.memory_space<vmem>>, vector<128x128xbf16>
    %391 = arith.truncf %389 : vector<4x128xf32> to vector<4x128xbf16>
    %cst_155 = arith.constant dense<0.000000e+00> : vector<4x128xf32>
    %392 = tpu.matmul %391, %390, %cst_155 {dimension_numbers = #tpu.dot_dimension_numbers<[1], [0], [0], [1], [0, 0, 1, 1], [], []>} : vector<4x128xbf16>, vector<128x128xbf16>, vector<4x128xf32> -> vector<4x128xf32>
    %393 = vector.extract_strided_slice %392 {offsets = [0, 0], sizes = [4, 64], strides = [1, 1]} : vector<4x128xf32> to vector<4x64xf32>
    %394 = vector.extract_strided_slice %392 {offsets = [0, 64], sizes = [4, 64], strides = [1, 1]} : vector<4x128xf32> to vector<4x64xf32>
    %395 = arith.maximumf %393, %394 : vector<4x64xf32>
    %396 = arith.truncf %395 : vector<4x64xf32> to vector<4x64xbf16>
    %c6 = arith.constant 6 : index
    %c0_156 = arith.constant 0 : index
    %397 = vector.load %arg6[%c6, %c0_156] : memref<24x256xf32, #tpu.memory_space<vmem>>, vector<1x128xf32>
    %c5376 = arith.constant 5376 : index
    %c0_157 = arith.constant 0 : index
    %398 = vector.load %arg2[%c5376, %c0_157] : memref<12576x128xbf16, #tpu.memory_space<vmem>>, vector<64x128xbf16>
    %cst_158 = arith.constant dense<0.000000e+00> : vector<4x128xf32>
    %399 = tpu.matmul %396, %398, %cst_158 {dimension_numbers = #tpu.dot_dimension_numbers<[1], [0], [0], [1], [0, 0, 1, 1], [], []>} : vector<4x64xbf16>, vector<64x128xbf16>, vector<4x128xf32> -> vector<4x128xf32>
    %c5440 = arith.constant 5440 : index
    %c0_159 = arith.constant 0 : index
    %400 = vector.load %arg2[%c5440, %c0_159] : memref<12576x128xbf16, #tpu.memory_space<vmem>>, vector<64x128xbf16>
    %cst_160 = arith.constant dense<0.000000e+00> : vector<4x128xf32>
    %401 = tpu.matmul %396, %400, %cst_160 {dimension_numbers = #tpu.dot_dimension_numbers<[1], [0], [0], [1], [0, 0, 1, 1], [], []>} : vector<4x64xbf16>, vector<64x128xbf16>, vector<4x128xf32> -> vector<4x128xf32>
    %c5504 = arith.constant 5504 : index
    %c0_161 = arith.constant 0 : index
    %402 = vector.load %arg2[%c5504, %c0_161] : memref<12576x128xbf16, #tpu.memory_space<vmem>>, vector<64x128xbf16>
    %cst_162 = arith.constant dense<0.000000e+00> : vector<4x128xf32>
    %403 = tpu.matmul %396, %402, %cst_162 {dimension_numbers = #tpu.dot_dimension_numbers<[1], [0], [0], [1], [0, 0, 1, 1], [], []>} : vector<4x64xbf16>, vector<64x128xbf16>, vector<4x128xf32> -> vector<4x128xf32>
    %cst_163 = arith.constant 0.000000e+00 : f32
    %404 = vector.broadcast %cst_163 : f32 to vector<1x128xf32>
    %405 = vector.extract_strided_slice %399 {offsets = [0, 0], sizes = [3, 128], strides = [1, 1]} : vector<4x128xf32> to vector<3x128xf32>
    %406 = tpu.concatenate %404, %405 in 0 : vector<1x128xf32>, vector<3x128xf32> -> vector<4x128xf32>
    %407 = vector.extract_strided_slice %403 {offsets = [1, 0], sizes = [3, 128], strides = [1, 1]} : vector<4x128xf32> to vector<3x128xf32>
    %408 = tpu.concatenate %407, %404 in 0 : vector<3x128xf32>, vector<1x128xf32> -> vector<4x128xf32>
    %409 = tpu.iota {dimensions = array<i32: 0>} : vector<4x128xi32>
    %c2_i32 = arith.constant 2 : i32
    %c0_i32_164 = arith.constant 0 : i32
    %410 = arith.cmpi eq, %c2_i32, %c0_i32_164 : i32
    %c1_i32_165 = arith.constant 1 : i32
    %411 = arith.select %410, %c1_i32_165, %c2_i32 : i32
    %412 = vector.broadcast %411 : i32 to vector<4x128xi32>
    %413 = arith.remsi %409, %412 : vector<4x128xi32>
    %c0_i32_166 = arith.constant 0 : i32
    %414 = vector.broadcast %c0_i32_166 : i32 to vector<4x128xi32>
    %415 = arith.cmpi ne, %413, %414 : vector<4x128xi32>
    %c0_i32_167 = arith.constant 0 : i32
    %416 = vector.broadcast %c0_i32_167 : i32 to vector<4x128xi32>
    %417 = arith.cmpi slt, %413, %416 : vector<4x128xi32>
    %c0_i32_168 = arith.constant 0 : i32
    %418 = arith.cmpi slt, %411, %c0_i32_168 : i32
    %419 = vector.broadcast %418 : i1 to vector<4x128xi1>
    %420 = vector.broadcast %419 : vector<4x128xi1> to vector<4x128xi1>
    %421 = arith.xori %417, %420 : vector<4x128xi1>
    %422 = arith.andi %421, %415 : vector<4x128xi1>
    %423 = vector.broadcast %411 : i32 to vector<4x128xi32>
    %424 = arith.addi %413, %423 : vector<4x128xi32>
    %425 = arith.select %422, %424, %413 : vector<4x128xi1>, vector<4x128xi32>
    %c0_i32_169 = arith.constant 0 : i32
    %426 = vector.broadcast %c0_i32_169 : i32 to vector<4x128xi32>
    %427 = arith.cmpi ne, %425, %426 : vector<4x128xi32>
    %cst_170 = arith.constant 0.000000e+00 : f32
    %428 = vector.broadcast %cst_170 : f32 to vector<4x128xf32>
    %429 = arith.select %427, %406, %428 : vector<4x128xi1>, vector<4x128xf32>
    %c2_i32_171 = arith.constant 2 : i32
    %c0_i32_172 = arith.constant 0 : i32
    %430 = arith.cmpi eq, %c2_i32_171, %c0_i32_172 : i32
    %c1_i32_173 = arith.constant 1 : i32
    %431 = arith.select %430, %c1_i32_173, %c2_i32_171 : i32
    %432 = vector.broadcast %431 : i32 to vector<4x128xi32>
    %433 = arith.remsi %409, %432 : vector<4x128xi32>
    %c0_i32_174 = arith.constant 0 : i32
    %434 = vector.broadcast %c0_i32_174 : i32 to vector<4x128xi32>
    %435 = arith.cmpi ne, %433, %434 : vector<4x128xi32>
    %c0_i32_175 = arith.constant 0 : i32
    %436 = vector.broadcast %c0_i32_175 : i32 to vector<4x128xi32>
    %437 = arith.cmpi slt, %433, %436 : vector<4x128xi32>
    %c0_i32_176 = arith.constant 0 : i32
    %438 = arith.cmpi slt, %431, %c0_i32_176 : i32
    %439 = vector.broadcast %438 : i1 to vector<4x128xi1>
    %440 = vector.broadcast %439 : vector<4x128xi1> to vector<4x128xi1>
    %441 = arith.xori %437, %440 : vector<4x128xi1>
    %442 = arith.andi %441, %435 : vector<4x128xi1>
    %443 = vector.broadcast %431 : i32 to vector<4x128xi32>
    %444 = arith.addi %433, %443 : vector<4x128xi32>
    %445 = arith.select %442, %444, %433 : vector<4x128xi1>, vector<4x128xi32>
    %c1_i32_177 = arith.constant 1 : i32
    %446 = vector.broadcast %c1_i32_177 : i32 to vector<4x128xi32>
    %447 = arith.cmpi ne, %445, %446 : vector<4x128xi32>
    %cst_178 = arith.constant 0.000000e+00 : f32
    %448 = vector.broadcast %cst_178 : f32 to vector<4x128xf32>
    %449 = arith.select %447, %408, %448 : vector<4x128xi1>, vector<4x128xf32>
    %450 = arith.addf %401, %429 : vector<4x128xf32>
    %451 = arith.addf %450, %449 : vector<4x128xf32>
    %452 = vector.broadcast %397 : vector<1x128xf32> to vector<4x128xf32>
    %453 = arith.addf %451, %452 : vector<4x128xf32>
    %cst_179 = arith.constant 0.000000e+00 : f32
    %454 = vector.broadcast %cst_179 : f32 to vector<4x128xf32>
    %455 = arith.maximumf %453, %454 : vector<4x128xf32>
    %456 = arith.truncf %455 : vector<4x128xf32> to vector<4x128xbf16>
    %c7 = arith.constant 7 : index
    %c0_180 = arith.constant 0 : index
    %457 = vector.load %arg6[%c7, %c0_180] : memref<24x256xf32, #tpu.memory_space<vmem>>, vector<1x128xf32>
    %c5568 = arith.constant 5568 : index
    %c0_181 = arith.constant 0 : index
    %458 = vector.load %arg2[%c5568, %c0_181] : memref<12576x128xbf16, #tpu.memory_space<vmem>>, vector<128x128xbf16>
    %cst_182 = arith.constant dense<0.000000e+00> : vector<4x128xf32>
    %459 = tpu.matmul %456, %458, %cst_182 {dimension_numbers = #tpu.dot_dimension_numbers<[1], [0], [0], [1], [0, 0, 1, 1], [], []>} : vector<4x128xbf16>, vector<128x128xbf16>, vector<4x128xf32> -> vector<4x128xf32>
    %c5696 = arith.constant 5696 : index
    %c0_183 = arith.constant 0 : index
    %460 = vector.load %arg2[%c5696, %c0_183] : memref<12576x128xbf16, #tpu.memory_space<vmem>>, vector<128x128xbf16>
    %cst_184 = arith.constant dense<0.000000e+00> : vector<4x128xf32>
    %461 = tpu.matmul %456, %460, %cst_184 {dimension_numbers = #tpu.dot_dimension_numbers<[1], [0], [0], [1], [0, 0, 1, 1], [], []>} : vector<4x128xbf16>, vector<128x128xbf16>, vector<4x128xf32> -> vector<4x128xf32>
    %c5824 = arith.constant 5824 : index
    %c0_185 = arith.constant 0 : index
    %462 = vector.load %arg2[%c5824, %c0_185] : memref<12576x128xbf16, #tpu.memory_space<vmem>>, vector<128x128xbf16>
    %cst_186 = arith.constant dense<0.000000e+00> : vector<4x128xf32>
    %463 = tpu.matmul %456, %462, %cst_186 {dimension_numbers = #tpu.dot_dimension_numbers<[1], [0], [0], [1], [0, 0, 1, 1], [], []>} : vector<4x128xbf16>, vector<128x128xbf16>, vector<4x128xf32> -> vector<4x128xf32>
    %cst_187 = arith.constant 0.000000e+00 : f32
    %464 = vector.broadcast %cst_187 : f32 to vector<1x128xf32>
    %465 = vector.extract_strided_slice %459 {offsets = [0, 0], sizes = [3, 128], strides = [1, 1]} : vector<4x128xf32> to vector<3x128xf32>
    %466 = tpu.concatenate %464, %465 in 0 : vector<1x128xf32>, vector<3x128xf32> -> vector<4x128xf32>
    %467 = vector.extract_strided_slice %463 {offsets = [1, 0], sizes = [3, 128], strides = [1, 1]} : vector<4x128xf32> to vector<3x128xf32>
    %468 = tpu.concatenate %467, %464 in 0 : vector<3x128xf32>, vector<1x128xf32> -> vector<4x128xf32>
    %469 = tpu.iota {dimensions = array<i32: 0>} : vector<4x128xi32>
    %c2_i32_188 = arith.constant 2 : i32
    %c0_i32_189 = arith.constant 0 : i32
    %470 = arith.cmpi eq, %c2_i32_188, %c0_i32_189 : i32
    %c1_i32_190 = arith.constant 1 : i32
    %471 = arith.select %470, %c1_i32_190, %c2_i32_188 : i32
    %472 = vector.broadcast %471 : i32 to vector<4x128xi32>
    %473 = arith.remsi %469, %472 : vector<4x128xi32>
    %c0_i32_191 = arith.constant 0 : i32
    %474 = vector.broadcast %c0_i32_191 : i32 to vector<4x128xi32>
    %475 = arith.cmpi ne, %473, %474 : vector<4x128xi32>
    %c0_i32_192 = arith.constant 0 : i32
    %476 = vector.broadcast %c0_i32_192 : i32 to vector<4x128xi32>
    %477 = arith.cmpi slt, %473, %476 : vector<4x128xi32>
    %c0_i32_193 = arith.constant 0 : i32
    %478 = arith.cmpi slt, %471, %c0_i32_193 : i32
    %479 = vector.broadcast %478 : i1 to vector<4x128xi1>
    %480 = vector.broadcast %479 : vector<4x128xi1> to vector<4x128xi1>
    %481 = arith.xori %477, %480 : vector<4x128xi1>
    %482 = arith.andi %481, %475 : vector<4x128xi1>
    %483 = vector.broadcast %471 : i32 to vector<4x128xi32>
    %484 = arith.addi %473, %483 : vector<4x128xi32>
    %485 = arith.select %482, %484, %473 : vector<4x128xi1>, vector<4x128xi32>
    %c0_i32_194 = arith.constant 0 : i32
    %486 = vector.broadcast %c0_i32_194 : i32 to vector<4x128xi32>
    %487 = arith.cmpi ne, %485, %486 : vector<4x128xi32>
    %cst_195 = arith.constant 0.000000e+00 : f32
    %488 = vector.broadcast %cst_195 : f32 to vector<4x128xf32>
    %489 = arith.select %487, %466, %488 : vector<4x128xi1>, vector<4x128xf32>
    %c2_i32_196 = arith.constant 2 : i32
    %c0_i32_197 = arith.constant 0 : i32
    %490 = arith.cmpi eq, %c2_i32_196, %c0_i32_197 : i32
    %c1_i32_198 = arith.constant 1 : i32
    %491 = arith.select %490, %c1_i32_198, %c2_i32_196 : i32
    %492 = vector.broadcast %491 : i32 to vector<4x128xi32>
    %493 = arith.remsi %469, %492 : vector<4x128xi32>
    %c0_i32_199 = arith.constant 0 : i32
    %494 = vector.broadcast %c0_i32_199 : i32 to vector<4x128xi32>
    %495 = arith.cmpi ne, %493, %494 : vector<4x128xi32>
    %c0_i32_200 = arith.constant 0 : i32
    %496 = vector.broadcast %c0_i32_200 : i32 to vector<4x128xi32>
    %497 = arith.cmpi slt, %493, %496 : vector<4x128xi32>
    %c0_i32_201 = arith.constant 0 : i32
    %498 = arith.cmpi slt, %491, %c0_i32_201 : i32
    %499 = vector.broadcast %498 : i1 to vector<4x128xi1>
    %500 = vector.broadcast %499 : vector<4x128xi1> to vector<4x128xi1>
    %501 = arith.xori %497, %500 : vector<4x128xi1>
    %502 = arith.andi %501, %495 : vector<4x128xi1>
    %503 = vector.broadcast %491 : i32 to vector<4x128xi32>
    %504 = arith.addi %493, %503 : vector<4x128xi32>
    %505 = arith.select %502, %504, %493 : vector<4x128xi1>, vector<4x128xi32>
    %c1_i32_202 = arith.constant 1 : i32
    %506 = vector.broadcast %c1_i32_202 : i32 to vector<4x128xi32>
    %507 = arith.cmpi ne, %505, %506 : vector<4x128xi32>
    %cst_203 = arith.constant 0.000000e+00 : f32
    %508 = vector.broadcast %cst_203 : f32 to vector<4x128xf32>
    %509 = arith.select %507, %468, %508 : vector<4x128xi1>, vector<4x128xf32>
    %510 = arith.addf %461, %489 : vector<4x128xf32>
    %511 = arith.addf %510, %509 : vector<4x128xf32>
    %512 = vector.broadcast %457 : vector<1x128xf32> to vector<4x128xf32>
    %513 = arith.addf %511, %512 : vector<4x128xf32>
    %cst_204 = arith.constant 0.000000e+00 : f32
    %514 = vector.broadcast %cst_204 : f32 to vector<4x128xf32>
    %515 = arith.maximumf %513, %514 : vector<4x128xf32>
    %516 = arith.truncf %515 : vector<4x128xf32> to vector<4x128xbf16>
    %c6592 = arith.constant 6592 : index
    %c0_205 = arith.constant 0 : index
    %517 = vector.load %arg2[%c6592, %c0_205] : memref<12576x128xbf16, #tpu.memory_space<vmem>>, vector<4x4xbf16>
    %cst_206 = arith.constant dense<0.000000e+00> : vector<4x128xf32>
    %518 = tpu.matmul %517, %516, %cst_206 {dimension_numbers = #tpu.dot_dimension_numbers<[1], [0], [0], [1], [0, 0, 1, 1], [], []>} : vector<4x4xbf16>, vector<4x128xbf16>, vector<4x128xf32> -> vector<4x128xf32>
    %519 = vector.extract_strided_slice %518 {offsets = [0, 0], sizes = [2, 128], strides = [1, 1]} : vector<4x128xf32> to vector<2x128xf32>
    %520 = vector.extract_strided_slice %518 {offsets = [2, 0], sizes = [2, 128], strides = [1, 1]} : vector<4x128xf32> to vector<2x128xf32>
    %521 = arith.maximumf %519, %520 : vector<2x128xf32>
    %c6608 = arith.constant 6608 : index
    %c0_207 = arith.constant 0 : index
    %522 = vector.load %arg2[%c6608, %c0_207] : memref<12576x128xbf16, #tpu.memory_space<vmem>>, vector<128x128xbf16>
    %523 = arith.truncf %521 : vector<2x128xf32> to vector<2x128xbf16>
    %cst_208 = arith.constant dense<0.000000e+00> : vector<2x128xf32>
    %524 = tpu.matmul %523, %522, %cst_208 {dimension_numbers = #tpu.dot_dimension_numbers<[1], [0], [0], [1], [0, 0, 1, 1], [], []>} : vector<2x128xbf16>, vector<128x128xbf16>, vector<2x128xf32> -> vector<2x128xf32>
    %525 = vector.extract_strided_slice %524 {offsets = [0, 0], sizes = [2, 64], strides = [1, 1]} : vector<2x128xf32> to vector<2x64xf32>
    %526 = vector.extract_strided_slice %524 {offsets = [0, 64], sizes = [2, 64], strides = [1, 1]} : vector<2x128xf32> to vector<2x64xf32>
    %527 = arith.maximumf %525, %526 : vector<2x64xf32>
    %528 = arith.truncf %527 : vector<2x64xf32> to vector<2x64xbf16>
    %c8 = arith.constant 8 : index
    %c0_209 = arith.constant 0 : index
    %529 = vector.load %arg6[%c8, %c0_209] : memref<24x256xf32, #tpu.memory_space<vmem>>, vector<1x128xf32>
    %c5952 = arith.constant 5952 : index
    %c0_210 = arith.constant 0 : index
    %530 = vector.load %arg2[%c5952, %c0_210] : memref<12576x128xbf16, #tpu.memory_space<vmem>>, vector<64x128xbf16>
    %cst_211 = arith.constant dense<0.000000e+00> : vector<2x128xf32>
    %531 = tpu.matmul %528, %530, %cst_211 {dimension_numbers = #tpu.dot_dimension_numbers<[1], [0], [0], [1], [0, 0, 1, 1], [], []>} : vector<2x64xbf16>, vector<64x128xbf16>, vector<2x128xf32> -> vector<2x128xf32>
    %532 = vector.broadcast %529 : vector<1x128xf32> to vector<2x128xf32>
    %533 = arith.addf %531, %532 : vector<2x128xf32>
    %cst_212 = arith.constant 0.000000e+00 : f32
    %534 = vector.broadcast %cst_212 : f32 to vector<2x128xf32>
    %535 = arith.maximumf %533, %534 : vector<2x128xf32>
    %536 = arith.truncf %535 : vector<2x128xf32> to vector<2x128xbf16>
    %c9 = arith.constant 9 : index
    %c0_213 = arith.constant 0 : index
    %537 = vector.load %arg6[%c9, %c0_213] : memref<24x256xf32, #tpu.memory_space<vmem>>, vector<1x128xf32>
    %c6016 = arith.constant 6016 : index
    %c0_214 = arith.constant 0 : index
    %538 = vector.load %arg2[%c6016, %c0_214] : memref<12576x128xbf16, #tpu.memory_space<vmem>>, vector<128x128xbf16>
    %cst_215 = arith.constant dense<0.000000e+00> : vector<2x128xf32>
    %539 = tpu.matmul %536, %538, %cst_215 {dimension_numbers = #tpu.dot_dimension_numbers<[1], [0], [0], [1], [0, 0, 1, 1], [], []>} : vector<2x128xbf16>, vector<128x128xbf16>, vector<2x128xf32> -> vector<2x128xf32>
    %540 = vector.broadcast %537 : vector<1x128xf32> to vector<2x128xf32>
    %541 = arith.addf %539, %540 : vector<2x128xf32>
    %cst_216 = arith.constant 0.000000e+00 : f32
    %542 = vector.broadcast %cst_216 : f32 to vector<2x128xf32>
    %543 = arith.maximumf %541, %542 : vector<2x128xf32>
    %544 = arith.truncf %543 : vector<2x128xf32> to vector<2x128xbf16>
    %c7504 = arith.constant 7504 : index
    %c0_217 = arith.constant 0 : index
    %545 = vector.load %arg2[%c7504, %c0_217] : memref<12576x128xbf16, #tpu.memory_space<vmem>>, vector<4x2xbf16>
    %cst_218 = arith.constant dense<0.000000e+00> : vector<4x128xf32>
    %546 = tpu.matmul %545, %544, %cst_218 {dimension_numbers = #tpu.dot_dimension_numbers<[1], [0], [0], [1], [0, 0, 1, 1], [], []>} : vector<4x2xbf16>, vector<2x128xbf16>, vector<4x128xf32> -> vector<4x128xf32>
    %c0_219 = arith.constant 0 : index
    %c0_220 = arith.constant 0 : index
    %547 = vector.load %arg3[%c0_219, %c0_220] : memref<2048x256xbf16, #tpu.memory_space<vmem>>, vector<128x256xbf16>
    %cst_221 = arith.constant dense<0.000000e+00> : vector<4x256xf32>
    %548 = tpu.matmul %516, %547, %cst_221 {dimension_numbers = #tpu.dot_dimension_numbers<[1], [0], [0], [1], [0, 0, 1, 1], [], []>} : vector<4x128xbf16>, vector<128x256xbf16>, vector<4x256xf32> -> vector<4x256xf32>
    %c384 = arith.constant 384 : index
    %c0_222 = arith.constant 0 : index
    %549 = vector.load %arg3[%c384, %c0_222] : memref<2048x256xbf16, #tpu.memory_space<vmem>>, vector<128x256xbf16>
    %550 = arith.truncf %546 : vector<4x128xf32> to vector<4x128xbf16>
    %cst_223 = arith.constant dense<0.000000e+00> : vector<4x256xf32>
    %551 = tpu.matmul %550, %549, %cst_223 {dimension_numbers = #tpu.dot_dimension_numbers<[1], [0], [0], [1], [0, 0, 1, 1], [], []>} : vector<4x128xbf16>, vector<128x256xbf16>, vector<4x256xf32> -> vector<4x256xf32>
    %552 = arith.addf %548, %551 : vector<4x256xf32>
    %c128 = arith.constant 128 : index
    %c0_224 = arith.constant 0 : index
    %553 = vector.load %arg3[%c128, %c0_224] : memref<2048x256xbf16, #tpu.memory_space<vmem>>, vector<128x256xbf16>
    %cst_225 = arith.constant dense<0.000000e+00> : vector<4x256xf32>
    %554 = tpu.matmul %516, %553, %cst_225 {dimension_numbers = #tpu.dot_dimension_numbers<[1], [0], [0], [1], [0, 0, 1, 1], [], []>} : vector<4x128xbf16>, vector<128x256xbf16>, vector<4x256xf32> -> vector<4x256xf32>
    %c512 = arith.constant 512 : index
    %c0_226 = arith.constant 0 : index
    %555 = vector.load %arg3[%c512, %c0_226] : memref<2048x256xbf16, #tpu.memory_space<vmem>>, vector<128x256xbf16>
    %556 = arith.truncf %546 : vector<4x128xf32> to vector<4x128xbf16>
    %cst_227 = arith.constant dense<0.000000e+00> : vector<4x256xf32>
    %557 = tpu.matmul %556, %555, %cst_227 {dimension_numbers = #tpu.dot_dimension_numbers<[1], [0], [0], [1], [0, 0, 1, 1], [], []>} : vector<4x128xbf16>, vector<128x256xbf16>, vector<4x256xf32> -> vector<4x256xf32>
    %558 = arith.addf %554, %557 : vector<4x256xf32>
    %c256 = arith.constant 256 : index
    %c0_228 = arith.constant 0 : index
    %559 = vector.load %arg3[%c256, %c0_228] : memref<2048x256xbf16, #tpu.memory_space<vmem>>, vector<128x256xbf16>
    %cst_229 = arith.constant dense<0.000000e+00> : vector<4x256xf32>
    %560 = tpu.matmul %516, %559, %cst_229 {dimension_numbers = #tpu.dot_dimension_numbers<[1], [0], [0], [1], [0, 0, 1, 1], [], []>} : vector<4x128xbf16>, vector<128x256xbf16>, vector<4x256xf32> -> vector<4x256xf32>
    %c640 = arith.constant 640 : index
    %c0_230 = arith.constant 0 : index
    %561 = vector.load %arg3[%c640, %c0_230] : memref<2048x256xbf16, #tpu.memory_space<vmem>>, vector<128x256xbf16>
    %562 = arith.truncf %546 : vector<4x128xf32> to vector<4x128xbf16>
    %cst_231 = arith.constant dense<0.000000e+00> : vector<4x256xf32>
    %563 = tpu.matmul %562, %561, %cst_231 {dimension_numbers = #tpu.dot_dimension_numbers<[1], [0], [0], [1], [0, 0, 1, 1], [], []>} : vector<4x128xbf16>, vector<128x256xbf16>, vector<4x256xf32> -> vector<4x256xf32>
    %564 = arith.addf %560, %563 : vector<4x256xf32>
    %cst_232 = arith.constant 0.000000e+00 : f32
    %565 = vector.broadcast %cst_232 : f32 to vector<1x256xf32>
    %566 = vector.extract_strided_slice %552 {offsets = [0, 0], sizes = [3, 256], strides = [1, 1]} : vector<4x256xf32> to vector<3x256xf32>
    %567 = tpu.concatenate %565, %566 in 0 : vector<1x256xf32>, vector<3x256xf32> -> vector<4x256xf32>
    %568 = vector.extract_strided_slice %564 {offsets = [1, 0], sizes = [3, 256], strides = [1, 1]} : vector<4x256xf32> to vector<3x256xf32>
    %569 = tpu.concatenate %568, %565 in 0 : vector<3x256xf32>, vector<1x256xf32> -> vector<4x256xf32>
    %570 = tpu.iota {dimensions = array<i32: 0>} : vector<4x256xi32>
    %c2_i32_233 = arith.constant 2 : i32
    %c0_i32_234 = arith.constant 0 : i32
    %571 = arith.cmpi eq, %c2_i32_233, %c0_i32_234 : i32
    %c1_i32_235 = arith.constant 1 : i32
    %572 = arith.select %571, %c1_i32_235, %c2_i32_233 : i32
    %573 = vector.broadcast %572 : i32 to vector<4x256xi32>
    %574 = arith.remsi %570, %573 : vector<4x256xi32>
    %c0_i32_236 = arith.constant 0 : i32
    %575 = vector.broadcast %c0_i32_236 : i32 to vector<4x256xi32>
    %576 = arith.cmpi ne, %574, %575 : vector<4x256xi32>
    %c0_i32_237 = arith.constant 0 : i32
    %577 = vector.broadcast %c0_i32_237 : i32 to vector<4x256xi32>
    %578 = arith.cmpi slt, %574, %577 : vector<4x256xi32>
    %c0_i32_238 = arith.constant 0 : i32
    %579 = arith.cmpi slt, %572, %c0_i32_238 : i32
    %580 = vector.broadcast %579 : i1 to vector<4x256xi1>
    %581 = vector.broadcast %580 : vector<4x256xi1> to vector<4x256xi1>
    %582 = arith.xori %578, %581 : vector<4x256xi1>
    %583 = arith.andi %582, %576 : vector<4x256xi1>
    %584 = vector.broadcast %572 : i32 to vector<4x256xi32>
    %585 = arith.addi %574, %584 : vector<4x256xi32>
    %586 = arith.select %583, %585, %574 : vector<4x256xi1>, vector<4x256xi32>
    %c0_i32_239 = arith.constant 0 : i32
    %587 = vector.broadcast %c0_i32_239 : i32 to vector<4x256xi32>
    %588 = arith.cmpi ne, %586, %587 : vector<4x256xi32>
    %cst_240 = arith.constant 0.000000e+00 : f32
    %589 = vector.broadcast %cst_240 : f32 to vector<4x256xf32>
    %590 = arith.select %588, %567, %589 : vector<4x256xi1>, vector<4x256xf32>
    %c2_i32_241 = arith.constant 2 : i32
    %c0_i32_242 = arith.constant 0 : i32
    %591 = arith.cmpi eq, %c2_i32_241, %c0_i32_242 : i32
    %c1_i32_243 = arith.constant 1 : i32
    %592 = arith.select %591, %c1_i32_243, %c2_i32_241 : i32
    %593 = vector.broadcast %592 : i32 to vector<4x256xi32>
    %594 = arith.remsi %570, %593 : vector<4x256xi32>
    %c0_i32_244 = arith.constant 0 : i32
    %595 = vector.broadcast %c0_i32_244 : i32 to vector<4x256xi32>
    %596 = arith.cmpi ne, %594, %595 : vector<4x256xi32>
    %c0_i32_245 = arith.constant 0 : i32
    %597 = vector.broadcast %c0_i32_245 : i32 to vector<4x256xi32>
    %598 = arith.cmpi slt, %594, %597 : vector<4x256xi32>
    %c0_i32_246 = arith.constant 0 : i32
    %599 = arith.cmpi slt, %592, %c0_i32_246 : i32
    %600 = vector.broadcast %599 : i1 to vector<4x256xi1>
    %601 = vector.broadcast %600 : vector<4x256xi1> to vector<4x256xi1>
    %602 = arith.xori %598, %601 : vector<4x256xi1>
    %603 = arith.andi %602, %596 : vector<4x256xi1>
    %604 = vector.broadcast %592 : i32 to vector<4x256xi32>
    %605 = arith.addi %594, %604 : vector<4x256xi32>
    %606 = arith.select %603, %605, %594 : vector<4x256xi1>, vector<4x256xi32>
    %c1_i32_247 = arith.constant 1 : i32
    %607 = vector.broadcast %c1_i32_247 : i32 to vector<4x256xi32>
    %608 = arith.cmpi ne, %606, %607 : vector<4x256xi32>
    %cst_248 = arith.constant 0.000000e+00 : f32
    %609 = vector.broadcast %cst_248 : f32 to vector<4x256xf32>
    %610 = arith.select %608, %569, %609 : vector<4x256xi1>, vector<4x256xf32>
    %611 = arith.addf %558, %590 : vector<4x256xf32>
    %612 = arith.addf %611, %610 : vector<4x256xf32>
    %c10 = arith.constant 10 : index
    %c0_249 = arith.constant 0 : index
    %613 = vector.load %arg6[%c10, %c0_249] : memref<24x256xf32, #tpu.memory_space<vmem>>, vector<1x256xf32>
    %614 = vector.broadcast %613 : vector<1x256xf32> to vector<4x256xf32>
    %615 = arith.addf %612, %614 : vector<4x256xf32>
    %cst_250 = arith.constant 0.000000e+00 : f32
    %616 = vector.broadcast %cst_250 : f32 to vector<4x256xf32>
    %617 = arith.maximumf %615, %616 : vector<4x256xf32>
    %618 = arith.truncf %617 : vector<4x256xf32> to vector<4x256xbf16>
    %619 = vector.extract_strided_slice %618 {offsets = [0, 0], sizes = [4, 128], strides = [1, 1]} : vector<4x256xbf16> to vector<4x128xbf16>
    %620 = vector.extract_strided_slice %618 {offsets = [0, 128], sizes = [4, 128], strides = [1, 1]} : vector<4x256xbf16> to vector<4x128xbf16>
    %c6736 = arith.constant 6736 : index
    %c0_251 = arith.constant 0 : index
    %621 = vector.load %arg2[%c6736, %c0_251] : memref<12576x128xbf16, #tpu.memory_space<vmem>>, vector<128x128xbf16>
    %cst_252 = arith.constant dense<0.000000e+00> : vector<4x128xf32>
    %622 = tpu.matmul %619, %621, %cst_252 {dimension_numbers = #tpu.dot_dimension_numbers<[1], [0], [0], [1], [0, 0, 1, 1], [], []>} : vector<4x128xbf16>, vector<128x128xbf16>, vector<4x128xf32> -> vector<4x128xf32>
    %c7120 = arith.constant 7120 : index
    %c0_253 = arith.constant 0 : index
    %623 = vector.load %arg2[%c7120, %c0_253] : memref<12576x128xbf16, #tpu.memory_space<vmem>>, vector<128x128xbf16>
    %cst_254 = arith.constant dense<0.000000e+00> : vector<4x128xf32>
    %624 = tpu.matmul %620, %623, %cst_254 {dimension_numbers = #tpu.dot_dimension_numbers<[1], [0], [0], [1], [0, 0, 1, 1], [], []>} : vector<4x128xbf16>, vector<128x128xbf16>, vector<4x128xf32> -> vector<4x128xf32>
    %625 = tpu.concatenate %622, %624 in 1 : vector<4x128xf32>, vector<4x128xf32> -> vector<4x256xf32>
    %c6864 = arith.constant 6864 : index
    %c0_255 = arith.constant 0 : index
    %626 = vector.load %arg2[%c6864, %c0_255] : memref<12576x128xbf16, #tpu.memory_space<vmem>>, vector<128x128xbf16>
    %cst_256 = arith.constant dense<0.000000e+00> : vector<4x128xf32>
    %627 = tpu.matmul %619, %626, %cst_256 {dimension_numbers = #tpu.dot_dimension_numbers<[1], [0], [0], [1], [0, 0, 1, 1], [], []>} : vector<4x128xbf16>, vector<128x128xbf16>, vector<4x128xf32> -> vector<4x128xf32>
    %c7248 = arith.constant 7248 : index
    %c0_257 = arith.constant 0 : index
    %628 = vector.load %arg2[%c7248, %c0_257] : memref<12576x128xbf16, #tpu.memory_space<vmem>>, vector<128x128xbf16>
    %cst_258 = arith.constant dense<0.000000e+00> : vector<4x128xf32>
    %629 = tpu.matmul %620, %628, %cst_258 {dimension_numbers = #tpu.dot_dimension_numbers<[1], [0], [0], [1], [0, 0, 1, 1], [], []>} : vector<4x128xbf16>, vector<128x128xbf16>, vector<4x128xf32> -> vector<4x128xf32>
    %630 = tpu.concatenate %627, %629 in 1 : vector<4x128xf32>, vector<4x128xf32> -> vector<4x256xf32>
    %c6992 = arith.constant 6992 : index
    %c0_259 = arith.constant 0 : index
    %631 = vector.load %arg2[%c6992, %c0_259] : memref<12576x128xbf16, #tpu.memory_space<vmem>>, vector<128x128xbf16>
    %cst_260 = arith.constant dense<0.000000e+00> : vector<4x128xf32>
    %632 = tpu.matmul %619, %631, %cst_260 {dimension_numbers = #tpu.dot_dimension_numbers<[1], [0], [0], [1], [0, 0, 1, 1], [], []>} : vector<4x128xbf16>, vector<128x128xbf16>, vector<4x128xf32> -> vector<4x128xf32>
    %c7376 = arith.constant 7376 : index
    %c0_261 = arith.constant 0 : index
    %633 = vector.load %arg2[%c7376, %c0_261] : memref<12576x128xbf16, #tpu.memory_space<vmem>>, vector<128x128xbf16>
    %cst_262 = arith.constant dense<0.000000e+00> : vector<4x128xf32>
    %634 = tpu.matmul %620, %633, %cst_262 {dimension_numbers = #tpu.dot_dimension_numbers<[1], [0], [0], [1], [0, 0, 1, 1], [], []>} : vector<4x128xbf16>, vector<128x128xbf16>, vector<4x128xf32> -> vector<4x128xf32>
    %635 = tpu.concatenate %632, %634 in 1 : vector<4x128xf32>, vector<4x128xf32> -> vector<4x256xf32>
    %cst_263 = arith.constant 0.000000e+00 : f32
    %636 = vector.broadcast %cst_263 : f32 to vector<1x256xf32>
    %637 = vector.extract_strided_slice %625 {offsets = [0, 0], sizes = [3, 256], strides = [1, 1]} : vector<4x256xf32> to vector<3x256xf32>
    %638 = tpu.concatenate %636, %637 in 0 : vector<1x256xf32>, vector<3x256xf32> -> vector<4x256xf32>
    %639 = vector.extract_strided_slice %635 {offsets = [1, 0], sizes = [3, 256], strides = [1, 1]} : vector<4x256xf32> to vector<3x256xf32>
    %640 = tpu.concatenate %639, %636 in 0 : vector<3x256xf32>, vector<1x256xf32> -> vector<4x256xf32>
    %641 = tpu.iota {dimensions = array<i32: 0>} : vector<4x256xi32>
    %c2_i32_264 = arith.constant 2 : i32
    %c0_i32_265 = arith.constant 0 : i32
    %642 = arith.cmpi eq, %c2_i32_264, %c0_i32_265 : i32
    %c1_i32_266 = arith.constant 1 : i32
    %643 = arith.select %642, %c1_i32_266, %c2_i32_264 : i32
    %644 = vector.broadcast %643 : i32 to vector<4x256xi32>
    %645 = arith.remsi %641, %644 : vector<4x256xi32>
    %c0_i32_267 = arith.constant 0 : i32
    %646 = vector.broadcast %c0_i32_267 : i32 to vector<4x256xi32>
    %647 = arith.cmpi ne, %645, %646 : vector<4x256xi32>
    %c0_i32_268 = arith.constant 0 : i32
    %648 = vector.broadcast %c0_i32_268 : i32 to vector<4x256xi32>
    %649 = arith.cmpi slt, %645, %648 : vector<4x256xi32>
    %c0_i32_269 = arith.constant 0 : i32
    %650 = arith.cmpi slt, %643, %c0_i32_269 : i32
    %651 = vector.broadcast %650 : i1 to vector<4x256xi1>
    %652 = vector.broadcast %651 : vector<4x256xi1> to vector<4x256xi1>
    %653 = arith.xori %649, %652 : vector<4x256xi1>
    %654 = arith.andi %653, %647 : vector<4x256xi1>
    %655 = vector.broadcast %643 : i32 to vector<4x256xi32>
    %656 = arith.addi %645, %655 : vector<4x256xi32>
    %657 = arith.select %654, %656, %645 : vector<4x256xi1>, vector<4x256xi32>
    %c0_i32_270 = arith.constant 0 : i32
    %658 = vector.broadcast %c0_i32_270 : i32 to vector<4x256xi32>
    %659 = arith.cmpi ne, %657, %658 : vector<4x256xi32>
    %cst_271 = arith.constant 0.000000e+00 : f32
    %660 = vector.broadcast %cst_271 : f32 to vector<4x256xf32>
    %661 = arith.select %659, %638, %660 : vector<4x256xi1>, vector<4x256xf32>
    %c2_i32_272 = arith.constant 2 : i32
    %c0_i32_273 = arith.constant 0 : i32
    %662 = arith.cmpi eq, %c2_i32_272, %c0_i32_273 : i32
    %c1_i32_274 = arith.constant 1 : i32
    %663 = arith.select %662, %c1_i32_274, %c2_i32_272 : i32
    %664 = vector.broadcast %663 : i32 to vector<4x256xi32>
    %665 = arith.remsi %641, %664 : vector<4x256xi32>
    %c0_i32_275 = arith.constant 0 : i32
    %666 = vector.broadcast %c0_i32_275 : i32 to vector<4x256xi32>
    %667 = arith.cmpi ne, %665, %666 : vector<4x256xi32>
    %c0_i32_276 = arith.constant 0 : i32
    %668 = vector.broadcast %c0_i32_276 : i32 to vector<4x256xi32>
    %669 = arith.cmpi slt, %665, %668 : vector<4x256xi32>
    %c0_i32_277 = arith.constant 0 : i32
    %670 = arith.cmpi slt, %663, %c0_i32_277 : i32
    %671 = vector.broadcast %670 : i1 to vector<4x256xi1>
    %672 = vector.broadcast %671 : vector<4x256xi1> to vector<4x256xi1>
    %673 = arith.xori %669, %672 : vector<4x256xi1>
    %674 = arith.andi %673, %667 : vector<4x256xi1>
    %675 = vector.broadcast %663 : i32 to vector<4x256xi32>
    %676 = arith.addi %665, %675 : vector<4x256xi32>
    %677 = arith.select %674, %676, %665 : vector<4x256xi1>, vector<4x256xi32>
    %c1_i32_278 = arith.constant 1 : i32
    %678 = vector.broadcast %c1_i32_278 : i32 to vector<4x256xi32>
    %679 = arith.cmpi ne, %677, %678 : vector<4x256xi32>
    %cst_279 = arith.constant 0.000000e+00 : f32
    %680 = vector.broadcast %cst_279 : f32 to vector<4x256xf32>
    %681 = arith.select %679, %640, %680 : vector<4x256xi1>, vector<4x256xf32>
    %682 = arith.addf %630, %661 : vector<4x256xf32>
    %683 = arith.addf %682, %681 : vector<4x256xf32>
    %c11 = arith.constant 11 : index
    %c0_280 = arith.constant 0 : index
    %684 = vector.load %arg6[%c11, %c0_280] : memref<24x256xf32, #tpu.memory_space<vmem>>, vector<1x256xf32>
    %685 = vector.broadcast %684 : vector<1x256xf32> to vector<4x256xf32>
    %686 = arith.addf %683, %685 : vector<4x256xf32>
    %cst_281 = arith.constant 0.000000e+00 : f32
    %687 = vector.broadcast %cst_281 : f32 to vector<4x256xf32>
    %688 = arith.maximumf %686, %687 : vector<4x256xf32>
    %689 = arith.truncf %688 : vector<4x256xf32> to vector<4x256xbf16>
    %c9056 = arith.constant 9056 : index
    %c0_282 = arith.constant 0 : index
    %690 = vector.load %arg2[%c9056, %c0_282] : memref<12576x128xbf16, #tpu.memory_space<vmem>>, vector<8x4xbf16>
    %cst_283 = arith.constant dense<0.000000e+00> : vector<8x256xf32>
    %691 = tpu.matmul %690, %689, %cst_283 {dimension_numbers = #tpu.dot_dimension_numbers<[1], [0], [0], [1], [0, 0, 1, 1], [], []>} : vector<8x4xbf16>, vector<4x256xbf16>, vector<8x256xf32> -> vector<8x256xf32>
    %692 = vector.extract_strided_slice %691 {offsets = [0, 0], sizes = [8, 128], strides = [1, 1]} : vector<8x256xf32> to vector<8x128xf32>
    %693 = vector.extract_strided_slice %691 {offsets = [0, 128], sizes = [8, 128], strides = [1, 1]} : vector<8x256xf32> to vector<8x128xf32>
    %c768 = arith.constant 768 : index
    %c0_284 = arith.constant 0 : index
    %694 = vector.load %arg3[%c768, %c0_284] : memref<2048x256xbf16, #tpu.memory_space<vmem>>, vector<128x256xbf16>
    %cst_285 = arith.constant dense<0.000000e+00> : vector<8x256xf32>
    %695 = tpu.matmul %384, %694, %cst_285 {dimension_numbers = #tpu.dot_dimension_numbers<[1], [0], [0], [1], [0, 0, 1, 1], [], []>} : vector<8x128xbf16>, vector<128x256xbf16>, vector<8x256xf32> -> vector<8x256xf32>
    %c7520 = arith.constant 7520 : index
    %c0_286 = arith.constant 0 : index
    %696 = vector.load %arg2[%c7520, %c0_286] : memref<12576x128xbf16, #tpu.memory_space<vmem>>, vector<128x128xbf16>
    %697 = arith.truncf %692 : vector<8x128xf32> to vector<8x128xbf16>
    %cst_287 = arith.constant dense<0.000000e+00> : vector<8x128xf32>
    %698 = tpu.matmul %697, %696, %cst_287 {dimension_numbers = #tpu.dot_dimension_numbers<[1], [0], [0], [1], [0, 0, 1, 1], [], []>} : vector<8x128xbf16>, vector<128x128xbf16>, vector<8x128xf32> -> vector<8x128xf32>
    %c7904 = arith.constant 7904 : index
    %c0_288 = arith.constant 0 : index
    %699 = vector.load %arg2[%c7904, %c0_288] : memref<12576x128xbf16, #tpu.memory_space<vmem>>, vector<128x128xbf16>
    %700 = arith.truncf %693 : vector<8x128xf32> to vector<8x128xbf16>
    %cst_289 = arith.constant dense<0.000000e+00> : vector<8x128xf32>
    %701 = tpu.matmul %700, %699, %cst_289 {dimension_numbers = #tpu.dot_dimension_numbers<[1], [0], [0], [1], [0, 0, 1, 1], [], []>} : vector<8x128xbf16>, vector<128x128xbf16>, vector<8x128xf32> -> vector<8x128xf32>
    %702 = tpu.concatenate %698, %701 in 1 : vector<8x128xf32>, vector<8x128xf32> -> vector<8x256xf32>
    %703 = arith.addf %695, %702 : vector<8x256xf32>
    %c896 = arith.constant 896 : index
    %c0_290 = arith.constant 0 : index
    %704 = vector.load %arg3[%c896, %c0_290] : memref<2048x256xbf16, #tpu.memory_space<vmem>>, vector<128x256xbf16>
    %cst_291 = arith.constant dense<0.000000e+00> : vector<8x256xf32>
    %705 = tpu.matmul %384, %704, %cst_291 {dimension_numbers = #tpu.dot_dimension_numbers<[1], [0], [0], [1], [0, 0, 1, 1], [], []>} : vector<8x128xbf16>, vector<128x256xbf16>, vector<8x256xf32> -> vector<8x256xf32>
    %c7648 = arith.constant 7648 : index
    %c0_292 = arith.constant 0 : index
    %706 = vector.load %arg2[%c7648, %c0_292] : memref<12576x128xbf16, #tpu.memory_space<vmem>>, vector<128x128xbf16>
    %707 = arith.truncf %692 : vector<8x128xf32> to vector<8x128xbf16>
    %cst_293 = arith.constant dense<0.000000e+00> : vector<8x128xf32>
    %708 = tpu.matmul %707, %706, %cst_293 {dimension_numbers = #tpu.dot_dimension_numbers<[1], [0], [0], [1], [0, 0, 1, 1], [], []>} : vector<8x128xbf16>, vector<128x128xbf16>, vector<8x128xf32> -> vector<8x128xf32>
    %c8032 = arith.constant 8032 : index
    %c0_294 = arith.constant 0 : index
    %709 = vector.load %arg2[%c8032, %c0_294] : memref<12576x128xbf16, #tpu.memory_space<vmem>>, vector<128x128xbf16>
    %710 = arith.truncf %693 : vector<8x128xf32> to vector<8x128xbf16>
    %cst_295 = arith.constant dense<0.000000e+00> : vector<8x128xf32>
    %711 = tpu.matmul %710, %709, %cst_295 {dimension_numbers = #tpu.dot_dimension_numbers<[1], [0], [0], [1], [0, 0, 1, 1], [], []>} : vector<8x128xbf16>, vector<128x128xbf16>, vector<8x128xf32> -> vector<8x128xf32>
    %712 = tpu.concatenate %708, %711 in 1 : vector<8x128xf32>, vector<8x128xf32> -> vector<8x256xf32>
    %713 = arith.addf %705, %712 : vector<8x256xf32>
    %c1024 = arith.constant 1024 : index
    %c0_296 = arith.constant 0 : index
    %714 = vector.load %arg3[%c1024, %c0_296] : memref<2048x256xbf16, #tpu.memory_space<vmem>>, vector<128x256xbf16>
    %cst_297 = arith.constant dense<0.000000e+00> : vector<8x256xf32>
    %715 = tpu.matmul %384, %714, %cst_297 {dimension_numbers = #tpu.dot_dimension_numbers<[1], [0], [0], [1], [0, 0, 1, 1], [], []>} : vector<8x128xbf16>, vector<128x256xbf16>, vector<8x256xf32> -> vector<8x256xf32>
    %c7776 = arith.constant 7776 : index
    %c0_298 = arith.constant 0 : index
    %716 = vector.load %arg2[%c7776, %c0_298] : memref<12576x128xbf16, #tpu.memory_space<vmem>>, vector<128x128xbf16>
    %717 = arith.truncf %692 : vector<8x128xf32> to vector<8x128xbf16>
    %cst_299 = arith.constant dense<0.000000e+00> : vector<8x128xf32>
    %718 = tpu.matmul %717, %716, %cst_299 {dimension_numbers = #tpu.dot_dimension_numbers<[1], [0], [0], [1], [0, 0, 1, 1], [], []>} : vector<8x128xbf16>, vector<128x128xbf16>, vector<8x128xf32> -> vector<8x128xf32>
    %c8160 = arith.constant 8160 : index
    %c0_300 = arith.constant 0 : index
    %719 = vector.load %arg2[%c8160, %c0_300] : memref<12576x128xbf16, #tpu.memory_space<vmem>>, vector<128x128xbf16>
    %720 = arith.truncf %693 : vector<8x128xf32> to vector<8x128xbf16>
    %cst_301 = arith.constant dense<0.000000e+00> : vector<8x128xf32>
    %721 = tpu.matmul %720, %719, %cst_301 {dimension_numbers = #tpu.dot_dimension_numbers<[1], [0], [0], [1], [0, 0, 1, 1], [], []>} : vector<8x128xbf16>, vector<128x128xbf16>, vector<8x128xf32> -> vector<8x128xf32>
    %722 = tpu.concatenate %718, %721 in 1 : vector<8x128xf32>, vector<8x128xf32> -> vector<8x256xf32>
    %723 = arith.addf %715, %722 : vector<8x256xf32>
    %cst_302 = arith.constant 0.000000e+00 : f32
    %724 = vector.broadcast %cst_302 : f32 to vector<1x256xf32>
    %725 = vector.extract_strided_slice %703 {offsets = [0, 0], sizes = [7, 256], strides = [1, 1]} : vector<8x256xf32> to vector<7x256xf32>
    %726 = tpu.concatenate %724, %725 in 0 : vector<1x256xf32>, vector<7x256xf32> -> vector<8x256xf32>
    %727 = vector.extract_strided_slice %723 {offsets = [1, 0], sizes = [7, 256], strides = [1, 1]} : vector<8x256xf32> to vector<7x256xf32>
    %728 = tpu.concatenate %727, %724 in 0 : vector<7x256xf32>, vector<1x256xf32> -> vector<8x256xf32>
    %729 = tpu.iota {dimensions = array<i32: 0>} : vector<8x256xi32>
    %c4_i32_303 = arith.constant 4 : i32
    %c0_i32_304 = arith.constant 0 : i32
    %730 = arith.cmpi eq, %c4_i32_303, %c0_i32_304 : i32
    %c1_i32_305 = arith.constant 1 : i32
    %731 = arith.select %730, %c1_i32_305, %c4_i32_303 : i32
    %732 = vector.broadcast %731 : i32 to vector<8x256xi32>
    %733 = arith.remsi %729, %732 : vector<8x256xi32>
    %c0_i32_306 = arith.constant 0 : i32
    %734 = vector.broadcast %c0_i32_306 : i32 to vector<8x256xi32>
    %735 = arith.cmpi ne, %733, %734 : vector<8x256xi32>
    %c0_i32_307 = arith.constant 0 : i32
    %736 = vector.broadcast %c0_i32_307 : i32 to vector<8x256xi32>
    %737 = arith.cmpi slt, %733, %736 : vector<8x256xi32>
    %c0_i32_308 = arith.constant 0 : i32
    %738 = arith.cmpi slt, %731, %c0_i32_308 : i32
    %739 = vector.broadcast %738 : i1 to vector<8x256xi1>
    %740 = vector.broadcast %739 : vector<8x256xi1> to vector<8x256xi1>
    %741 = arith.xori %737, %740 : vector<8x256xi1>
    %742 = arith.andi %741, %735 : vector<8x256xi1>
    %743 = vector.broadcast %731 : i32 to vector<8x256xi32>
    %744 = arith.addi %733, %743 : vector<8x256xi32>
    %745 = arith.select %742, %744, %733 : vector<8x256xi1>, vector<8x256xi32>
    %c0_i32_309 = arith.constant 0 : i32
    %746 = vector.broadcast %c0_i32_309 : i32 to vector<8x256xi32>
    %747 = arith.cmpi ne, %745, %746 : vector<8x256xi32>
    %cst_310 = arith.constant 0.000000e+00 : f32
    %748 = vector.broadcast %cst_310 : f32 to vector<8x256xf32>
    %749 = arith.select %747, %726, %748 : vector<8x256xi1>, vector<8x256xf32>
    %c4_i32_311 = arith.constant 4 : i32
    %c0_i32_312 = arith.constant 0 : i32
    %750 = arith.cmpi eq, %c4_i32_311, %c0_i32_312 : i32
    %c1_i32_313 = arith.constant 1 : i32
    %751 = arith.select %750, %c1_i32_313, %c4_i32_311 : i32
    %752 = vector.broadcast %751 : i32 to vector<8x256xi32>
    %753 = arith.remsi %729, %752 : vector<8x256xi32>
    %c0_i32_314 = arith.constant 0 : i32
    %754 = vector.broadcast %c0_i32_314 : i32 to vector<8x256xi32>
    %755 = arith.cmpi ne, %753, %754 : vector<8x256xi32>
    %c0_i32_315 = arith.constant 0 : i32
    %756 = vector.broadcast %c0_i32_315 : i32 to vector<8x256xi32>
    %757 = arith.cmpi slt, %753, %756 : vector<8x256xi32>
    %c0_i32_316 = arith.constant 0 : i32
    %758 = arith.cmpi slt, %751, %c0_i32_316 : i32
    %759 = vector.broadcast %758 : i1 to vector<8x256xi1>
    %760 = vector.broadcast %759 : vector<8x256xi1> to vector<8x256xi1>
    %761 = arith.xori %757, %760 : vector<8x256xi1>
    %762 = arith.andi %761, %755 : vector<8x256xi1>
    %763 = vector.broadcast %751 : i32 to vector<8x256xi32>
    %764 = arith.addi %753, %763 : vector<8x256xi32>
    %765 = arith.select %762, %764, %753 : vector<8x256xi1>, vector<8x256xi32>
    %c3_i32_317 = arith.constant 3 : i32
    %766 = vector.broadcast %c3_i32_317 : i32 to vector<8x256xi32>
    %767 = arith.cmpi ne, %765, %766 : vector<8x256xi32>
    %cst_318 = arith.constant 0.000000e+00 : f32
    %768 = vector.broadcast %cst_318 : f32 to vector<8x256xf32>
    %769 = arith.select %767, %728, %768 : vector<8x256xi1>, vector<8x256xf32>
    %770 = arith.addf %713, %749 : vector<8x256xf32>
    %771 = arith.addf %770, %769 : vector<8x256xf32>
    %c12 = arith.constant 12 : index
    %c0_319 = arith.constant 0 : index
    %772 = vector.load %arg6[%c12, %c0_319] : memref<24x256xf32, #tpu.memory_space<vmem>>, vector<1x256xf32>
    %773 = vector.broadcast %772 : vector<1x256xf32> to vector<8x256xf32>
    %774 = arith.addf %771, %773 : vector<8x256xf32>
    %cst_320 = arith.constant 0.000000e+00 : f32
    %775 = vector.broadcast %cst_320 : f32 to vector<8x256xf32>
    %776 = arith.maximumf %774, %775 : vector<8x256xf32>
    %777 = arith.truncf %776 : vector<8x256xf32> to vector<8x256xbf16>
    %778 = vector.extract_strided_slice %777 {offsets = [0, 0], sizes = [8, 128], strides = [1, 1]} : vector<8x256xbf16> to vector<8x128xbf16>
    %779 = vector.extract_strided_slice %777 {offsets = [0, 128], sizes = [8, 128], strides = [1, 1]} : vector<8x256xbf16> to vector<8x128xbf16>
    %c8288 = arith.constant 8288 : index
    %c0_321 = arith.constant 0 : index
    %780 = vector.load %arg2[%c8288, %c0_321] : memref<12576x128xbf16, #tpu.memory_space<vmem>>, vector<128x128xbf16>
    %cst_322 = arith.constant dense<0.000000e+00> : vector<8x128xf32>
    %781 = tpu.matmul %778, %780, %cst_322 {dimension_numbers = #tpu.dot_dimension_numbers<[1], [0], [0], [1], [0, 0, 1, 1], [], []>} : vector<8x128xbf16>, vector<128x128xbf16>, vector<8x128xf32> -> vector<8x128xf32>
    %c8672 = arith.constant 8672 : index
    %c0_323 = arith.constant 0 : index
    %782 = vector.load %arg2[%c8672, %c0_323] : memref<12576x128xbf16, #tpu.memory_space<vmem>>, vector<128x128xbf16>
    %cst_324 = arith.constant dense<0.000000e+00> : vector<8x128xf32>
    %783 = tpu.matmul %779, %782, %cst_324 {dimension_numbers = #tpu.dot_dimension_numbers<[1], [0], [0], [1], [0, 0, 1, 1], [], []>} : vector<8x128xbf16>, vector<128x128xbf16>, vector<8x128xf32> -> vector<8x128xf32>
    %784 = tpu.concatenate %781, %783 in 1 : vector<8x128xf32>, vector<8x128xf32> -> vector<8x256xf32>
    %c8416 = arith.constant 8416 : index
    %c0_325 = arith.constant 0 : index
    %785 = vector.load %arg2[%c8416, %c0_325] : memref<12576x128xbf16, #tpu.memory_space<vmem>>, vector<128x128xbf16>
    %cst_326 = arith.constant dense<0.000000e+00> : vector<8x128xf32>
    %786 = tpu.matmul %778, %785, %cst_326 {dimension_numbers = #tpu.dot_dimension_numbers<[1], [0], [0], [1], [0, 0, 1, 1], [], []>} : vector<8x128xbf16>, vector<128x128xbf16>, vector<8x128xf32> -> vector<8x128xf32>
    %c8800 = arith.constant 8800 : index
    %c0_327 = arith.constant 0 : index
    %787 = vector.load %arg2[%c8800, %c0_327] : memref<12576x128xbf16, #tpu.memory_space<vmem>>, vector<128x128xbf16>
    %cst_328 = arith.constant dense<0.000000e+00> : vector<8x128xf32>
    %788 = tpu.matmul %779, %787, %cst_328 {dimension_numbers = #tpu.dot_dimension_numbers<[1], [0], [0], [1], [0, 0, 1, 1], [], []>} : vector<8x128xbf16>, vector<128x128xbf16>, vector<8x128xf32> -> vector<8x128xf32>
    %789 = tpu.concatenate %786, %788 in 1 : vector<8x128xf32>, vector<8x128xf32> -> vector<8x256xf32>
    %c8544 = arith.constant 8544 : index
    %c0_329 = arith.constant 0 : index
    %790 = vector.load %arg2[%c8544, %c0_329] : memref<12576x128xbf16, #tpu.memory_space<vmem>>, vector<128x128xbf16>
    %cst_330 = arith.constant dense<0.000000e+00> : vector<8x128xf32>
    %791 = tpu.matmul %778, %790, %cst_330 {dimension_numbers = #tpu.dot_dimension_numbers<[1], [0], [0], [1], [0, 0, 1, 1], [], []>} : vector<8x128xbf16>, vector<128x128xbf16>, vector<8x128xf32> -> vector<8x128xf32>
    %c8928 = arith.constant 8928 : index
    %c0_331 = arith.constant 0 : index
    %792 = vector.load %arg2[%c8928, %c0_331] : memref<12576x128xbf16, #tpu.memory_space<vmem>>, vector<128x128xbf16>
    %cst_332 = arith.constant dense<0.000000e+00> : vector<8x128xf32>
    %793 = tpu.matmul %779, %792, %cst_332 {dimension_numbers = #tpu.dot_dimension_numbers<[1], [0], [0], [1], [0, 0, 1, 1], [], []>} : vector<8x128xbf16>, vector<128x128xbf16>, vector<8x128xf32> -> vector<8x128xf32>
    %794 = tpu.concatenate %791, %793 in 1 : vector<8x128xf32>, vector<8x128xf32> -> vector<8x256xf32>
    %cst_333 = arith.constant 0.000000e+00 : f32
    %795 = vector.broadcast %cst_333 : f32 to vector<1x256xf32>
    %796 = vector.extract_strided_slice %784 {offsets = [0, 0], sizes = [7, 256], strides = [1, 1]} : vector<8x256xf32> to vector<7x256xf32>
    %797 = tpu.concatenate %795, %796 in 0 : vector<1x256xf32>, vector<7x256xf32> -> vector<8x256xf32>
    %798 = vector.extract_strided_slice %794 {offsets = [1, 0], sizes = [7, 256], strides = [1, 1]} : vector<8x256xf32> to vector<7x256xf32>
    %799 = tpu.concatenate %798, %795 in 0 : vector<7x256xf32>, vector<1x256xf32> -> vector<8x256xf32>
    %800 = tpu.iota {dimensions = array<i32: 0>} : vector<8x256xi32>
    %c4_i32_334 = arith.constant 4 : i32
    %c0_i32_335 = arith.constant 0 : i32
    %801 = arith.cmpi eq, %c4_i32_334, %c0_i32_335 : i32
    %c1_i32_336 = arith.constant 1 : i32
    %802 = arith.select %801, %c1_i32_336, %c4_i32_334 : i32
    %803 = vector.broadcast %802 : i32 to vector<8x256xi32>
    %804 = arith.remsi %800, %803 : vector<8x256xi32>
    %c0_i32_337 = arith.constant 0 : i32
    %805 = vector.broadcast %c0_i32_337 : i32 to vector<8x256xi32>
    %806 = arith.cmpi ne, %804, %805 : vector<8x256xi32>
    %c0_i32_338 = arith.constant 0 : i32
    %807 = vector.broadcast %c0_i32_338 : i32 to vector<8x256xi32>
    %808 = arith.cmpi slt, %804, %807 : vector<8x256xi32>
    %c0_i32_339 = arith.constant 0 : i32
    %809 = arith.cmpi slt, %802, %c0_i32_339 : i32
    %810 = vector.broadcast %809 : i1 to vector<8x256xi1>
    %811 = vector.broadcast %810 : vector<8x256xi1> to vector<8x256xi1>
    %812 = arith.xori %808, %811 : vector<8x256xi1>
    %813 = arith.andi %812, %806 : vector<8x256xi1>
    %814 = vector.broadcast %802 : i32 to vector<8x256xi32>
    %815 = arith.addi %804, %814 : vector<8x256xi32>
    %816 = arith.select %813, %815, %804 : vector<8x256xi1>, vector<8x256xi32>
    %c0_i32_340 = arith.constant 0 : i32
    %817 = vector.broadcast %c0_i32_340 : i32 to vector<8x256xi32>
    %818 = arith.cmpi ne, %816, %817 : vector<8x256xi32>
    %cst_341 = arith.constant 0.000000e+00 : f32
    %819 = vector.broadcast %cst_341 : f32 to vector<8x256xf32>
    %820 = arith.select %818, %797, %819 : vector<8x256xi1>, vector<8x256xf32>
    %c4_i32_342 = arith.constant 4 : i32
    %c0_i32_343 = arith.constant 0 : i32
    %821 = arith.cmpi eq, %c4_i32_342, %c0_i32_343 : i32
    %c1_i32_344 = arith.constant 1 : i32
    %822 = arith.select %821, %c1_i32_344, %c4_i32_342 : i32
    %823 = vector.broadcast %822 : i32 to vector<8x256xi32>
    %824 = arith.remsi %800, %823 : vector<8x256xi32>
    %c0_i32_345 = arith.constant 0 : i32
    %825 = vector.broadcast %c0_i32_345 : i32 to vector<8x256xi32>
    %826 = arith.cmpi ne, %824, %825 : vector<8x256xi32>
    %c0_i32_346 = arith.constant 0 : i32
    %827 = vector.broadcast %c0_i32_346 : i32 to vector<8x256xi32>
    %828 = arith.cmpi slt, %824, %827 : vector<8x256xi32>
    %c0_i32_347 = arith.constant 0 : i32
    %829 = arith.cmpi slt, %822, %c0_i32_347 : i32
    %830 = vector.broadcast %829 : i1 to vector<8x256xi1>
    %831 = vector.broadcast %830 : vector<8x256xi1> to vector<8x256xi1>
    %832 = arith.xori %828, %831 : vector<8x256xi1>
    %833 = arith.andi %832, %826 : vector<8x256xi1>
    %834 = vector.broadcast %822 : i32 to vector<8x256xi32>
    %835 = arith.addi %824, %834 : vector<8x256xi32>
    %836 = arith.select %833, %835, %824 : vector<8x256xi1>, vector<8x256xi32>
    %c3_i32_348 = arith.constant 3 : i32
    %837 = vector.broadcast %c3_i32_348 : i32 to vector<8x256xi32>
    %838 = arith.cmpi ne, %836, %837 : vector<8x256xi32>
    %cst_349 = arith.constant 0.000000e+00 : f32
    %839 = vector.broadcast %cst_349 : f32 to vector<8x256xf32>
    %840 = arith.select %838, %799, %839 : vector<8x256xi1>, vector<8x256xf32>
    %841 = arith.addf %789, %820 : vector<8x256xf32>
    %842 = arith.addf %841, %840 : vector<8x256xf32>
    %c13 = arith.constant 13 : index
    %c0_350 = arith.constant 0 : index
    %843 = vector.load %arg6[%c13, %c0_350] : memref<24x256xf32, #tpu.memory_space<vmem>>, vector<1x256xf32>
    %844 = vector.broadcast %843 : vector<1x256xf32> to vector<8x256xf32>
    %845 = arith.addf %842, %844 : vector<8x256xf32>
    %cst_351 = arith.constant 0.000000e+00 : f32
    %846 = vector.broadcast %cst_351 : f32 to vector<8x256xf32>
    %847 = arith.maximumf %845, %846 : vector<8x256xf32>
    %848 = arith.truncf %847 : vector<8x256xf32> to vector<8x256xbf16>
    %c10608 = arith.constant 10608 : index
    %c0_352 = arith.constant 0 : index
    %849 = vector.load %arg2[%c10608, %c0_352] : memref<12576x128xbf16, #tpu.memory_space<vmem>>, vector<16x8xbf16>
    %cst_353 = arith.constant dense<0.000000e+00> : vector<16x256xf32>
    %850 = tpu.matmul %849, %848, %cst_353 {dimension_numbers = #tpu.dot_dimension_numbers<[1], [0], [0], [1], [0, 0, 1, 1], [], []>} : vector<16x8xbf16>, vector<8x256xbf16>, vector<16x256xf32> -> vector<16x256xf32>
    %851 = vector.extract_strided_slice %850 {offsets = [0, 0], sizes = [16, 128], strides = [1, 1]} : vector<16x256xf32> to vector<16x128xf32>
    %852 = vector.extract_strided_slice %850 {offsets = [0, 128], sizes = [16, 128], strides = [1, 1]} : vector<16x256xf32> to vector<16x128xf32>
    %c1152 = arith.constant 1152 : index
    %c0_354 = arith.constant 0 : index
    %853 = vector.load %arg3[%c1152, %c0_354] : memref<2048x256xbf16, #tpu.memory_space<vmem>>, vector<128x256xbf16>
    %cst_355 = arith.constant dense<0.000000e+00> : vector<16x256xf32>
    %854 = tpu.matmul %252, %853, %cst_355 {dimension_numbers = #tpu.dot_dimension_numbers<[1], [0], [0], [1], [0, 0, 1, 1], [], []>} : vector<16x128xbf16>, vector<128x256xbf16>, vector<16x256xf32> -> vector<16x256xf32>
    %c9072 = arith.constant 9072 : index
    %c0_356 = arith.constant 0 : index
    %855 = vector.load %arg2[%c9072, %c0_356] : memref<12576x128xbf16, #tpu.memory_space<vmem>>, vector<128x128xbf16>
    %856 = arith.truncf %851 : vector<16x128xf32> to vector<16x128xbf16>
    %cst_357 = arith.constant dense<0.000000e+00> : vector<16x128xf32>
    %857 = tpu.matmul %856, %855, %cst_357 {dimension_numbers = #tpu.dot_dimension_numbers<[1], [0], [0], [1], [0, 0, 1, 1], [], []>} : vector<16x128xbf16>, vector<128x128xbf16>, vector<16x128xf32> -> vector<16x128xf32>
    %c9456 = arith.constant 9456 : index
    %c0_358 = arith.constant 0 : index
    %858 = vector.load %arg2[%c9456, %c0_358] : memref<12576x128xbf16, #tpu.memory_space<vmem>>, vector<128x128xbf16>
    %859 = arith.truncf %852 : vector<16x128xf32> to vector<16x128xbf16>
    %cst_359 = arith.constant dense<0.000000e+00> : vector<16x128xf32>
    %860 = tpu.matmul %859, %858, %cst_359 {dimension_numbers = #tpu.dot_dimension_numbers<[1], [0], [0], [1], [0, 0, 1, 1], [], []>} : vector<16x128xbf16>, vector<128x128xbf16>, vector<16x128xf32> -> vector<16x128xf32>
    %861 = tpu.concatenate %857, %860 in 1 : vector<16x128xf32>, vector<16x128xf32> -> vector<16x256xf32>
    %862 = arith.addf %854, %861 : vector<16x256xf32>
    %c1280_360 = arith.constant 1280 : index
    %c0_361 = arith.constant 0 : index
    %863 = vector.load %arg3[%c1280_360, %c0_361] : memref<2048x256xbf16, #tpu.memory_space<vmem>>, vector<128x256xbf16>
    %cst_362 = arith.constant dense<0.000000e+00> : vector<16x256xf32>
    %864 = tpu.matmul %252, %863, %cst_362 {dimension_numbers = #tpu.dot_dimension_numbers<[1], [0], [0], [1], [0, 0, 1, 1], [], []>} : vector<16x128xbf16>, vector<128x256xbf16>, vector<16x256xf32> -> vector<16x256xf32>
    %c9200 = arith.constant 9200 : index
    %c0_363 = arith.constant 0 : index
    %865 = vector.load %arg2[%c9200, %c0_363] : memref<12576x128xbf16, #tpu.memory_space<vmem>>, vector<128x128xbf16>
    %866 = arith.truncf %851 : vector<16x128xf32> to vector<16x128xbf16>
    %cst_364 = arith.constant dense<0.000000e+00> : vector<16x128xf32>
    %867 = tpu.matmul %866, %865, %cst_364 {dimension_numbers = #tpu.dot_dimension_numbers<[1], [0], [0], [1], [0, 0, 1, 1], [], []>} : vector<16x128xbf16>, vector<128x128xbf16>, vector<16x128xf32> -> vector<16x128xf32>
    %c9584 = arith.constant 9584 : index
    %c0_365 = arith.constant 0 : index
    %868 = vector.load %arg2[%c9584, %c0_365] : memref<12576x128xbf16, #tpu.memory_space<vmem>>, vector<128x128xbf16>
    %869 = arith.truncf %852 : vector<16x128xf32> to vector<16x128xbf16>
    %cst_366 = arith.constant dense<0.000000e+00> : vector<16x128xf32>
    %870 = tpu.matmul %869, %868, %cst_366 {dimension_numbers = #tpu.dot_dimension_numbers<[1], [0], [0], [1], [0, 0, 1, 1], [], []>} : vector<16x128xbf16>, vector<128x128xbf16>, vector<16x128xf32> -> vector<16x128xf32>
    %871 = tpu.concatenate %867, %870 in 1 : vector<16x128xf32>, vector<16x128xf32> -> vector<16x256xf32>
    %872 = arith.addf %864, %871 : vector<16x256xf32>
    %c1408 = arith.constant 1408 : index
    %c0_367 = arith.constant 0 : index
    %873 = vector.load %arg3[%c1408, %c0_367] : memref<2048x256xbf16, #tpu.memory_space<vmem>>, vector<128x256xbf16>
    %cst_368 = arith.constant dense<0.000000e+00> : vector<16x256xf32>
    %874 = tpu.matmul %252, %873, %cst_368 {dimension_numbers = #tpu.dot_dimension_numbers<[1], [0], [0], [1], [0, 0, 1, 1], [], []>} : vector<16x128xbf16>, vector<128x256xbf16>, vector<16x256xf32> -> vector<16x256xf32>
    %c9328 = arith.constant 9328 : index
    %c0_369 = arith.constant 0 : index
    %875 = vector.load %arg2[%c9328, %c0_369] : memref<12576x128xbf16, #tpu.memory_space<vmem>>, vector<128x128xbf16>
    %876 = arith.truncf %851 : vector<16x128xf32> to vector<16x128xbf16>
    %cst_370 = arith.constant dense<0.000000e+00> : vector<16x128xf32>
    %877 = tpu.matmul %876, %875, %cst_370 {dimension_numbers = #tpu.dot_dimension_numbers<[1], [0], [0], [1], [0, 0, 1, 1], [], []>} : vector<16x128xbf16>, vector<128x128xbf16>, vector<16x128xf32> -> vector<16x128xf32>
    %c9712 = arith.constant 9712 : index
    %c0_371 = arith.constant 0 : index
    %878 = vector.load %arg2[%c9712, %c0_371] : memref<12576x128xbf16, #tpu.memory_space<vmem>>, vector<128x128xbf16>
    %879 = arith.truncf %852 : vector<16x128xf32> to vector<16x128xbf16>
    %cst_372 = arith.constant dense<0.000000e+00> : vector<16x128xf32>
    %880 = tpu.matmul %879, %878, %cst_372 {dimension_numbers = #tpu.dot_dimension_numbers<[1], [0], [0], [1], [0, 0, 1, 1], [], []>} : vector<16x128xbf16>, vector<128x128xbf16>, vector<16x128xf32> -> vector<16x128xf32>
    %881 = tpu.concatenate %877, %880 in 1 : vector<16x128xf32>, vector<16x128xf32> -> vector<16x256xf32>
    %882 = arith.addf %874, %881 : vector<16x256xf32>
    %cst_373 = arith.constant 0.000000e+00 : f32
    %883 = vector.broadcast %cst_373 : f32 to vector<1x256xf32>
    %884 = vector.extract_strided_slice %862 {offsets = [0, 0], sizes = [15, 256], strides = [1, 1]} : vector<16x256xf32> to vector<15x256xf32>
    %885 = tpu.concatenate %883, %884 in 0 : vector<1x256xf32>, vector<15x256xf32> -> vector<16x256xf32>
    %886 = vector.extract_strided_slice %882 {offsets = [1, 0], sizes = [15, 256], strides = [1, 1]} : vector<16x256xf32> to vector<15x256xf32>
    %887 = tpu.concatenate %886, %883 in 0 : vector<15x256xf32>, vector<1x256xf32> -> vector<16x256xf32>
    %888 = tpu.iota {dimensions = array<i32: 0>} : vector<16x256xi32>
    %c8_i32_374 = arith.constant 8 : i32
    %c0_i32_375 = arith.constant 0 : i32
    %889 = arith.cmpi eq, %c8_i32_374, %c0_i32_375 : i32
    %c1_i32_376 = arith.constant 1 : i32
    %890 = arith.select %889, %c1_i32_376, %c8_i32_374 : i32
    %891 = vector.broadcast %890 : i32 to vector<16x256xi32>
    %892 = arith.remsi %888, %891 : vector<16x256xi32>
    %c0_i32_377 = arith.constant 0 : i32
    %893 = vector.broadcast %c0_i32_377 : i32 to vector<16x256xi32>
    %894 = arith.cmpi ne, %892, %893 : vector<16x256xi32>
    %c0_i32_378 = arith.constant 0 : i32
    %895 = vector.broadcast %c0_i32_378 : i32 to vector<16x256xi32>
    %896 = arith.cmpi slt, %892, %895 : vector<16x256xi32>
    %c0_i32_379 = arith.constant 0 : i32
    %897 = arith.cmpi slt, %890, %c0_i32_379 : i32
    %898 = vector.broadcast %897 : i1 to vector<16x256xi1>
    %899 = vector.broadcast %898 : vector<16x256xi1> to vector<16x256xi1>
    %900 = arith.xori %896, %899 : vector<16x256xi1>
    %901 = arith.andi %900, %894 : vector<16x256xi1>
    %902 = vector.broadcast %890 : i32 to vector<16x256xi32>
    %903 = arith.addi %892, %902 : vector<16x256xi32>
    %904 = arith.select %901, %903, %892 : vector<16x256xi1>, vector<16x256xi32>
    %c0_i32_380 = arith.constant 0 : i32
    %905 = vector.broadcast %c0_i32_380 : i32 to vector<16x256xi32>
    %906 = arith.cmpi ne, %904, %905 : vector<16x256xi32>
    %cst_381 = arith.constant 0.000000e+00 : f32
    %907 = vector.broadcast %cst_381 : f32 to vector<16x256xf32>
    %908 = arith.select %906, %885, %907 : vector<16x256xi1>, vector<16x256xf32>
    %c8_i32_382 = arith.constant 8 : i32
    %c0_i32_383 = arith.constant 0 : i32
    %909 = arith.cmpi eq, %c8_i32_382, %c0_i32_383 : i32
    %c1_i32_384 = arith.constant 1 : i32
    %910 = arith.select %909, %c1_i32_384, %c8_i32_382 : i32
    %911 = vector.broadcast %910 : i32 to vector<16x256xi32>
    %912 = arith.remsi %888, %911 : vector<16x256xi32>
    %c0_i32_385 = arith.constant 0 : i32
    %913 = vector.broadcast %c0_i32_385 : i32 to vector<16x256xi32>
    %914 = arith.cmpi ne, %912, %913 : vector<16x256xi32>
    %c0_i32_386 = arith.constant 0 : i32
    %915 = vector.broadcast %c0_i32_386 : i32 to vector<16x256xi32>
    %916 = arith.cmpi slt, %912, %915 : vector<16x256xi32>
    %c0_i32_387 = arith.constant 0 : i32
    %917 = arith.cmpi slt, %910, %c0_i32_387 : i32
    %918 = vector.broadcast %917 : i1 to vector<16x256xi1>
    %919 = vector.broadcast %918 : vector<16x256xi1> to vector<16x256xi1>
    %920 = arith.xori %916, %919 : vector<16x256xi1>
    %921 = arith.andi %920, %914 : vector<16x256xi1>
    %922 = vector.broadcast %910 : i32 to vector<16x256xi32>
    %923 = arith.addi %912, %922 : vector<16x256xi32>
    %924 = arith.select %921, %923, %912 : vector<16x256xi1>, vector<16x256xi32>
    %c7_i32_388 = arith.constant 7 : i32
    %925 = vector.broadcast %c7_i32_388 : i32 to vector<16x256xi32>
    %926 = arith.cmpi ne, %924, %925 : vector<16x256xi32>
    %cst_389 = arith.constant 0.000000e+00 : f32
    %927 = vector.broadcast %cst_389 : f32 to vector<16x256xf32>
    %928 = arith.select %926, %887, %927 : vector<16x256xi1>, vector<16x256xf32>
    %929 = arith.addf %872, %908 : vector<16x256xf32>
    %930 = arith.addf %929, %928 : vector<16x256xf32>
    %c14 = arith.constant 14 : index
    %c0_390 = arith.constant 0 : index
    %931 = vector.load %arg6[%c14, %c0_390] : memref<24x256xf32, #tpu.memory_space<vmem>>, vector<1x256xf32>
    %932 = vector.broadcast %931 : vector<1x256xf32> to vector<16x256xf32>
    %933 = arith.addf %930, %932 : vector<16x256xf32>
    %cst_391 = arith.constant 0.000000e+00 : f32
    %934 = vector.broadcast %cst_391 : f32 to vector<16x256xf32>
    %935 = arith.maximumf %933, %934 : vector<16x256xf32>
    %936 = arith.truncf %935 : vector<16x256xf32> to vector<16x256xbf16>
    %937 = vector.extract_strided_slice %936 {offsets = [0, 0], sizes = [16, 128], strides = [1, 1]} : vector<16x256xbf16> to vector<16x128xbf16>
    %938 = vector.extract_strided_slice %936 {offsets = [0, 128], sizes = [16, 128], strides = [1, 1]} : vector<16x256xbf16> to vector<16x128xbf16>
    %c9840 = arith.constant 9840 : index
    %c0_392 = arith.constant 0 : index
    %939 = vector.load %arg2[%c9840, %c0_392] : memref<12576x128xbf16, #tpu.memory_space<vmem>>, vector<128x128xbf16>
    %cst_393 = arith.constant dense<0.000000e+00> : vector<16x128xf32>
    %940 = tpu.matmul %937, %939, %cst_393 {dimension_numbers = #tpu.dot_dimension_numbers<[1], [0], [0], [1], [0, 0, 1, 1], [], []>} : vector<16x128xbf16>, vector<128x128xbf16>, vector<16x128xf32> -> vector<16x128xf32>
    %c10224 = arith.constant 10224 : index
    %c0_394 = arith.constant 0 : index
    %941 = vector.load %arg2[%c10224, %c0_394] : memref<12576x128xbf16, #tpu.memory_space<vmem>>, vector<128x128xbf16>
    %cst_395 = arith.constant dense<0.000000e+00> : vector<16x128xf32>
    %942 = tpu.matmul %938, %941, %cst_395 {dimension_numbers = #tpu.dot_dimension_numbers<[1], [0], [0], [1], [0, 0, 1, 1], [], []>} : vector<16x128xbf16>, vector<128x128xbf16>, vector<16x128xf32> -> vector<16x128xf32>
    %943 = tpu.concatenate %940, %942 in 1 : vector<16x128xf32>, vector<16x128xf32> -> vector<16x256xf32>
    %c9968 = arith.constant 9968 : index
    %c0_396 = arith.constant 0 : index
    %944 = vector.load %arg2[%c9968, %c0_396] : memref<12576x128xbf16, #tpu.memory_space<vmem>>, vector<128x128xbf16>
    %cst_397 = arith.constant dense<0.000000e+00> : vector<16x128xf32>
    %945 = tpu.matmul %937, %944, %cst_397 {dimension_numbers = #tpu.dot_dimension_numbers<[1], [0], [0], [1], [0, 0, 1, 1], [], []>} : vector<16x128xbf16>, vector<128x128xbf16>, vector<16x128xf32> -> vector<16x128xf32>
    %c10352 = arith.constant 10352 : index
    %c0_398 = arith.constant 0 : index
    %946 = vector.load %arg2[%c10352, %c0_398] : memref<12576x128xbf16, #tpu.memory_space<vmem>>, vector<128x128xbf16>
    %cst_399 = arith.constant dense<0.000000e+00> : vector<16x128xf32>
    %947 = tpu.matmul %938, %946, %cst_399 {dimension_numbers = #tpu.dot_dimension_numbers<[1], [0], [0], [1], [0, 0, 1, 1], [], []>} : vector<16x128xbf16>, vector<128x128xbf16>, vector<16x128xf32> -> vector<16x128xf32>
    %948 = tpu.concatenate %945, %947 in 1 : vector<16x128xf32>, vector<16x128xf32> -> vector<16x256xf32>
    %c10096 = arith.constant 10096 : index
    %c0_400 = arith.constant 0 : index
    %949 = vector.load %arg2[%c10096, %c0_400] : memref<12576x128xbf16, #tpu.memory_space<vmem>>, vector<128x128xbf16>
    %cst_401 = arith.constant dense<0.000000e+00> : vector<16x128xf32>
    %950 = tpu.matmul %937, %949, %cst_401 {dimension_numbers = #tpu.dot_dimension_numbers<[1], [0], [0], [1], [0, 0, 1, 1], [], []>} : vector<16x128xbf16>, vector<128x128xbf16>, vector<16x128xf32> -> vector<16x128xf32>
    %c10480 = arith.constant 10480 : index
    %c0_402 = arith.constant 0 : index
    %951 = vector.load %arg2[%c10480, %c0_402] : memref<12576x128xbf16, #tpu.memory_space<vmem>>, vector<128x128xbf16>
    %cst_403 = arith.constant dense<0.000000e+00> : vector<16x128xf32>
    %952 = tpu.matmul %938, %951, %cst_403 {dimension_numbers = #tpu.dot_dimension_numbers<[1], [0], [0], [1], [0, 0, 1, 1], [], []>} : vector<16x128xbf16>, vector<128x128xbf16>, vector<16x128xf32> -> vector<16x128xf32>
    %953 = tpu.concatenate %950, %952 in 1 : vector<16x128xf32>, vector<16x128xf32> -> vector<16x256xf32>
    %cst_404 = arith.constant 0.000000e+00 : f32
    %954 = vector.broadcast %cst_404 : f32 to vector<1x256xf32>
    %955 = vector.extract_strided_slice %943 {offsets = [0, 0], sizes = [15, 256], strides = [1, 1]} : vector<16x256xf32> to vector<15x256xf32>
    %956 = tpu.concatenate %954, %955 in 0 : vector<1x256xf32>, vector<15x256xf32> -> vector<16x256xf32>
    %957 = vector.extract_strided_slice %953 {offsets = [1, 0], sizes = [15, 256], strides = [1, 1]} : vector<16x256xf32> to vector<15x256xf32>
    %958 = tpu.concatenate %957, %954 in 0 : vector<15x256xf32>, vector<1x256xf32> -> vector<16x256xf32>
    %959 = tpu.iota {dimensions = array<i32: 0>} : vector<16x256xi32>
    %c8_i32_405 = arith.constant 8 : i32
    %c0_i32_406 = arith.constant 0 : i32
    %960 = arith.cmpi eq, %c8_i32_405, %c0_i32_406 : i32
    %c1_i32_407 = arith.constant 1 : i32
    %961 = arith.select %960, %c1_i32_407, %c8_i32_405 : i32
    %962 = vector.broadcast %961 : i32 to vector<16x256xi32>
    %963 = arith.remsi %959, %962 : vector<16x256xi32>
    %c0_i32_408 = arith.constant 0 : i32
    %964 = vector.broadcast %c0_i32_408 : i32 to vector<16x256xi32>
    %965 = arith.cmpi ne, %963, %964 : vector<16x256xi32>
    %c0_i32_409 = arith.constant 0 : i32
    %966 = vector.broadcast %c0_i32_409 : i32 to vector<16x256xi32>
    %967 = arith.cmpi slt, %963, %966 : vector<16x256xi32>
    %c0_i32_410 = arith.constant 0 : i32
    %968 = arith.cmpi slt, %961, %c0_i32_410 : i32
    %969 = vector.broadcast %968 : i1 to vector<16x256xi1>
    %970 = vector.broadcast %969 : vector<16x256xi1> to vector<16x256xi1>
    %971 = arith.xori %967, %970 : vector<16x256xi1>
    %972 = arith.andi %971, %965 : vector<16x256xi1>
    %973 = vector.broadcast %961 : i32 to vector<16x256xi32>
    %974 = arith.addi %963, %973 : vector<16x256xi32>
    %975 = arith.select %972, %974, %963 : vector<16x256xi1>, vector<16x256xi32>
    %c0_i32_411 = arith.constant 0 : i32
    %976 = vector.broadcast %c0_i32_411 : i32 to vector<16x256xi32>
    %977 = arith.cmpi ne, %975, %976 : vector<16x256xi32>
    %cst_412 = arith.constant 0.000000e+00 : f32
    %978 = vector.broadcast %cst_412 : f32 to vector<16x256xf32>
    %979 = arith.select %977, %956, %978 : vector<16x256xi1>, vector<16x256xf32>
    %c8_i32_413 = arith.constant 8 : i32
    %c0_i32_414 = arith.constant 0 : i32
    %980 = arith.cmpi eq, %c8_i32_413, %c0_i32_414 : i32
    %c1_i32_415 = arith.constant 1 : i32
    %981 = arith.select %980, %c1_i32_415, %c8_i32_413 : i32
    %982 = vector.broadcast %981 : i32 to vector<16x256xi32>
    %983 = arith.remsi %959, %982 : vector<16x256xi32>
    %c0_i32_416 = arith.constant 0 : i32
    %984 = vector.broadcast %c0_i32_416 : i32 to vector<16x256xi32>
    %985 = arith.cmpi ne, %983, %984 : vector<16x256xi32>
    %c0_i32_417 = arith.constant 0 : i32
    %986 = vector.broadcast %c0_i32_417 : i32 to vector<16x256xi32>
    %987 = arith.cmpi slt, %983, %986 : vector<16x256xi32>
    %c0_i32_418 = arith.constant 0 : i32
    %988 = arith.cmpi slt, %981, %c0_i32_418 : i32
    %989 = vector.broadcast %988 : i1 to vector<16x256xi1>
    %990 = vector.broadcast %989 : vector<16x256xi1> to vector<16x256xi1>
    %991 = arith.xori %987, %990 : vector<16x256xi1>
    %992 = arith.andi %991, %985 : vector<16x256xi1>
    %993 = vector.broadcast %981 : i32 to vector<16x256xi32>
    %994 = arith.addi %983, %993 : vector<16x256xi32>
    %995 = arith.select %992, %994, %983 : vector<16x256xi1>, vector<16x256xi32>
    %c7_i32_419 = arith.constant 7 : i32
    %996 = vector.broadcast %c7_i32_419 : i32 to vector<16x256xi32>
    %997 = arith.cmpi ne, %995, %996 : vector<16x256xi32>
    %cst_420 = arith.constant 0.000000e+00 : f32
    %998 = vector.broadcast %cst_420 : f32 to vector<16x256xf32>
    %999 = arith.select %997, %958, %998 : vector<16x256xi1>, vector<16x256xf32>
    %1000 = arith.addf %948, %979 : vector<16x256xf32>
    %1001 = arith.addf %1000, %999 : vector<16x256xf32>
    %c15 = arith.constant 15 : index
    %c0_421 = arith.constant 0 : index
    %1002 = vector.load %arg6[%c15, %c0_421] : memref<24x256xf32, #tpu.memory_space<vmem>>, vector<1x256xf32>
    %1003 = vector.broadcast %1002 : vector<1x256xf32> to vector<16x256xf32>
    %1004 = arith.addf %1001, %1003 : vector<16x256xf32>
    %cst_422 = arith.constant 0.000000e+00 : f32
    %1005 = vector.broadcast %cst_422 : f32 to vector<16x256xf32>
    %1006 = arith.maximumf %1004, %1005 : vector<16x256xf32>
    %1007 = arith.truncf %1006 : vector<16x256xf32> to vector<16x256xbf16>
    %c12160 = arith.constant 12160 : index
    %c0_423 = arith.constant 0 : index
    %1008 = vector.load %arg2[%c12160, %c0_423] : memref<12576x128xbf16, #tpu.memory_space<vmem>>, vector<32x16xbf16>
    %cst_424 = arith.constant dense<0.000000e+00> : vector<32x256xf32>
    %1009 = tpu.matmul %1008, %1007, %cst_424 {dimension_numbers = #tpu.dot_dimension_numbers<[1], [0], [0], [1], [0, 0, 1, 1], [], []>} : vector<32x16xbf16>, vector<16x256xbf16>, vector<32x256xf32> -> vector<32x256xf32>
    %1010 = vector.extract_strided_slice %1009 {offsets = [0, 0], sizes = [32, 128], strides = [1, 1]} : vector<32x256xf32> to vector<32x128xf32>
    %1011 = vector.extract_strided_slice %1009 {offsets = [0, 128], sizes = [32, 128], strides = [1, 1]} : vector<32x256xf32> to vector<32x128xf32>
    %c1536 = arith.constant 1536 : index
    %c0_425 = arith.constant 0 : index
    %1012 = vector.load %arg3[%c1536, %c0_425] : memref<2048x256xbf16, #tpu.memory_space<vmem>>, vector<128x256xbf16>
    %cst_426 = arith.constant dense<0.000000e+00> : vector<32x256xf32>
    %1013 = tpu.matmul %120, %1012, %cst_426 {dimension_numbers = #tpu.dot_dimension_numbers<[1], [0], [0], [1], [0, 0, 1, 1], [], []>} : vector<32x128xbf16>, vector<128x256xbf16>, vector<32x256xf32> -> vector<32x256xf32>
    %c10624 = arith.constant 10624 : index
    %c0_427 = arith.constant 0 : index
    %1014 = vector.load %arg2[%c10624, %c0_427] : memref<12576x128xbf16, #tpu.memory_space<vmem>>, vector<128x128xbf16>
    %1015 = arith.truncf %1010 : vector<32x128xf32> to vector<32x128xbf16>
    %cst_428 = arith.constant dense<0.000000e+00> : vector<32x128xf32>
    %1016 = tpu.matmul %1015, %1014, %cst_428 {dimension_numbers = #tpu.dot_dimension_numbers<[1], [0], [0], [1], [0, 0, 1, 1], [], []>} : vector<32x128xbf16>, vector<128x128xbf16>, vector<32x128xf32> -> vector<32x128xf32>
    %c11008 = arith.constant 11008 : index
    %c0_429 = arith.constant 0 : index
    %1017 = vector.load %arg2[%c11008, %c0_429] : memref<12576x128xbf16, #tpu.memory_space<vmem>>, vector<128x128xbf16>
    %1018 = arith.truncf %1011 : vector<32x128xf32> to vector<32x128xbf16>
    %cst_430 = arith.constant dense<0.000000e+00> : vector<32x128xf32>
    %1019 = tpu.matmul %1018, %1017, %cst_430 {dimension_numbers = #tpu.dot_dimension_numbers<[1], [0], [0], [1], [0, 0, 1, 1], [], []>} : vector<32x128xbf16>, vector<128x128xbf16>, vector<32x128xf32> -> vector<32x128xf32>
    %1020 = tpu.concatenate %1016, %1019 in 1 : vector<32x128xf32>, vector<32x128xf32> -> vector<32x256xf32>
    %1021 = arith.addf %1013, %1020 : vector<32x256xf32>
    %c1664 = arith.constant 1664 : index
    %c0_431 = arith.constant 0 : index
    %1022 = vector.load %arg3[%c1664, %c0_431] : memref<2048x256xbf16, #tpu.memory_space<vmem>>, vector<128x256xbf16>
    %cst_432 = arith.constant dense<0.000000e+00> : vector<32x256xf32>
    %1023 = tpu.matmul %120, %1022, %cst_432 {dimension_numbers = #tpu.dot_dimension_numbers<[1], [0], [0], [1], [0, 0, 1, 1], [], []>} : vector<32x128xbf16>, vector<128x256xbf16>, vector<32x256xf32> -> vector<32x256xf32>
    %c10752 = arith.constant 10752 : index
    %c0_433 = arith.constant 0 : index
    %1024 = vector.load %arg2[%c10752, %c0_433] : memref<12576x128xbf16, #tpu.memory_space<vmem>>, vector<128x128xbf16>
    %1025 = arith.truncf %1010 : vector<32x128xf32> to vector<32x128xbf16>
    %cst_434 = arith.constant dense<0.000000e+00> : vector<32x128xf32>
    %1026 = tpu.matmul %1025, %1024, %cst_434 {dimension_numbers = #tpu.dot_dimension_numbers<[1], [0], [0], [1], [0, 0, 1, 1], [], []>} : vector<32x128xbf16>, vector<128x128xbf16>, vector<32x128xf32> -> vector<32x128xf32>
    %c11136 = arith.constant 11136 : index
    %c0_435 = arith.constant 0 : index
    %1027 = vector.load %arg2[%c11136, %c0_435] : memref<12576x128xbf16, #tpu.memory_space<vmem>>, vector<128x128xbf16>
    %1028 = arith.truncf %1011 : vector<32x128xf32> to vector<32x128xbf16>
    %cst_436 = arith.constant dense<0.000000e+00> : vector<32x128xf32>
    %1029 = tpu.matmul %1028, %1027, %cst_436 {dimension_numbers = #tpu.dot_dimension_numbers<[1], [0], [0], [1], [0, 0, 1, 1], [], []>} : vector<32x128xbf16>, vector<128x128xbf16>, vector<32x128xf32> -> vector<32x128xf32>
    %1030 = tpu.concatenate %1026, %1029 in 1 : vector<32x128xf32>, vector<32x128xf32> -> vector<32x256xf32>
    %1031 = arith.addf %1023, %1030 : vector<32x256xf32>
    %c1792 = arith.constant 1792 : index
    %c0_437 = arith.constant 0 : index
    %1032 = vector.load %arg3[%c1792, %c0_437] : memref<2048x256xbf16, #tpu.memory_space<vmem>>, vector<128x256xbf16>
    %cst_438 = arith.constant dense<0.000000e+00> : vector<32x256xf32>
    %1033 = tpu.matmul %120, %1032, %cst_438 {dimension_numbers = #tpu.dot_dimension_numbers<[1], [0], [0], [1], [0, 0, 1, 1], [], []>} : vector<32x128xbf16>, vector<128x256xbf16>, vector<32x256xf32> -> vector<32x256xf32>
    %c10880 = arith.constant 10880 : index
    %c0_439 = arith.constant 0 : index
    %1034 = vector.load %arg2[%c10880, %c0_439] : memref<12576x128xbf16, #tpu.memory_space<vmem>>, vector<128x128xbf16>
    %1035 = arith.truncf %1010 : vector<32x128xf32> to vector<32x128xbf16>
    %cst_440 = arith.constant dense<0.000000e+00> : vector<32x128xf32>
    %1036 = tpu.matmul %1035, %1034, %cst_440 {dimension_numbers = #tpu.dot_dimension_numbers<[1], [0], [0], [1], [0, 0, 1, 1], [], []>} : vector<32x128xbf16>, vector<128x128xbf16>, vector<32x128xf32> -> vector<32x128xf32>
    %c11264 = arith.constant 11264 : index
    %c0_441 = arith.constant 0 : index
    %1037 = vector.load %arg2[%c11264, %c0_441] : memref<12576x128xbf16, #tpu.memory_space<vmem>>, vector<128x128xbf16>
    %1038 = arith.truncf %1011 : vector<32x128xf32> to vector<32x128xbf16>
    %cst_442 = arith.constant dense<0.000000e+00> : vector<32x128xf32>
    %1039 = tpu.matmul %1038, %1037, %cst_442 {dimension_numbers = #tpu.dot_dimension_numbers<[1], [0], [0], [1], [0, 0, 1, 1], [], []>} : vector<32x128xbf16>, vector<128x128xbf16>, vector<32x128xf32> -> vector<32x128xf32>
    %1040 = tpu.concatenate %1036, %1039 in 1 : vector<32x128xf32>, vector<32x128xf32> -> vector<32x256xf32>
    %1041 = arith.addf %1033, %1040 : vector<32x256xf32>
    %cst_443 = arith.constant 0.000000e+00 : f32
    %1042 = vector.broadcast %cst_443 : f32 to vector<1x256xf32>
    %1043 = vector.extract_strided_slice %1021 {offsets = [0, 0], sizes = [31, 256], strides = [1, 1]} : vector<32x256xf32> to vector<31x256xf32>
    %1044 = tpu.concatenate %1042, %1043 in 0 : vector<1x256xf32>, vector<31x256xf32> -> vector<32x256xf32>
    %1045 = vector.extract_strided_slice %1041 {offsets = [1, 0], sizes = [31, 256], strides = [1, 1]} : vector<32x256xf32> to vector<31x256xf32>
    %1046 = tpu.concatenate %1045, %1042 in 0 : vector<31x256xf32>, vector<1x256xf32> -> vector<32x256xf32>
    %1047 = tpu.iota {dimensions = array<i32: 0>} : vector<32x256xi32>
    %c16_i32_444 = arith.constant 16 : i32
    %c0_i32_445 = arith.constant 0 : i32
    %1048 = arith.cmpi eq, %c16_i32_444, %c0_i32_445 : i32
    %c1_i32_446 = arith.constant 1 : i32
    %1049 = arith.select %1048, %c1_i32_446, %c16_i32_444 : i32
    %1050 = vector.broadcast %1049 : i32 to vector<32x256xi32>
    %1051 = arith.remsi %1047, %1050 : vector<32x256xi32>
    %c0_i32_447 = arith.constant 0 : i32
    %1052 = vector.broadcast %c0_i32_447 : i32 to vector<32x256xi32>
    %1053 = arith.cmpi ne, %1051, %1052 : vector<32x256xi32>
    %c0_i32_448 = arith.constant 0 : i32
    %1054 = vector.broadcast %c0_i32_448 : i32 to vector<32x256xi32>
    %1055 = arith.cmpi slt, %1051, %1054 : vector<32x256xi32>
    %c0_i32_449 = arith.constant 0 : i32
    %1056 = arith.cmpi slt, %1049, %c0_i32_449 : i32
    %1057 = vector.broadcast %1056 : i1 to vector<32x256xi1>
    %1058 = vector.broadcast %1057 : vector<32x256xi1> to vector<32x256xi1>
    %1059 = arith.xori %1055, %1058 : vector<32x256xi1>
    %1060 = arith.andi %1059, %1053 : vector<32x256xi1>
    %1061 = vector.broadcast %1049 : i32 to vector<32x256xi32>
    %1062 = arith.addi %1051, %1061 : vector<32x256xi32>
    %1063 = arith.select %1060, %1062, %1051 : vector<32x256xi1>, vector<32x256xi32>
    %c0_i32_450 = arith.constant 0 : i32
    %1064 = vector.broadcast %c0_i32_450 : i32 to vector<32x256xi32>
    %1065 = arith.cmpi ne, %1063, %1064 : vector<32x256xi32>
    %cst_451 = arith.constant 0.000000e+00 : f32
    %1066 = vector.broadcast %cst_451 : f32 to vector<32x256xf32>
    %1067 = arith.select %1065, %1044, %1066 : vector<32x256xi1>, vector<32x256xf32>
    %c16_i32_452 = arith.constant 16 : i32
    %c0_i32_453 = arith.constant 0 : i32
    %1068 = arith.cmpi eq, %c16_i32_452, %c0_i32_453 : i32
    %c1_i32_454 = arith.constant 1 : i32
    %1069 = arith.select %1068, %c1_i32_454, %c16_i32_452 : i32
    %1070 = vector.broadcast %1069 : i32 to vector<32x256xi32>
    %1071 = arith.remsi %1047, %1070 : vector<32x256xi32>
    %c0_i32_455 = arith.constant 0 : i32
    %1072 = vector.broadcast %c0_i32_455 : i32 to vector<32x256xi32>
    %1073 = arith.cmpi ne, %1071, %1072 : vector<32x256xi32>
    %c0_i32_456 = arith.constant 0 : i32
    %1074 = vector.broadcast %c0_i32_456 : i32 to vector<32x256xi32>
    %1075 = arith.cmpi slt, %1071, %1074 : vector<32x256xi32>
    %c0_i32_457 = arith.constant 0 : i32
    %1076 = arith.cmpi slt, %1069, %c0_i32_457 : i32
    %1077 = vector.broadcast %1076 : i1 to vector<32x256xi1>
    %1078 = vector.broadcast %1077 : vector<32x256xi1> to vector<32x256xi1>
    %1079 = arith.xori %1075, %1078 : vector<32x256xi1>
    %1080 = arith.andi %1079, %1073 : vector<32x256xi1>
    %1081 = vector.broadcast %1069 : i32 to vector<32x256xi32>
    %1082 = arith.addi %1071, %1081 : vector<32x256xi32>
    %1083 = arith.select %1080, %1082, %1071 : vector<32x256xi1>, vector<32x256xi32>
    %c15_i32_458 = arith.constant 15 : i32
    %1084 = vector.broadcast %c15_i32_458 : i32 to vector<32x256xi32>
    %1085 = arith.cmpi ne, %1083, %1084 : vector<32x256xi32>
    %cst_459 = arith.constant 0.000000e+00 : f32
    %1086 = vector.broadcast %cst_459 : f32 to vector<32x256xf32>
    %1087 = arith.select %1085, %1046, %1086 : vector<32x256xi1>, vector<32x256xf32>
    %1088 = arith.addf %1031, %1067 : vector<32x256xf32>
    %1089 = arith.addf %1088, %1087 : vector<32x256xf32>
    %c16 = arith.constant 16 : index
    %c0_460 = arith.constant 0 : index
    %1090 = vector.load %arg6[%c16, %c0_460] : memref<24x256xf32, #tpu.memory_space<vmem>>, vector<1x256xf32>
    %1091 = vector.broadcast %1090 : vector<1x256xf32> to vector<32x256xf32>
    %1092 = arith.addf %1089, %1091 : vector<32x256xf32>
    %cst_461 = arith.constant 0.000000e+00 : f32
    %1093 = vector.broadcast %cst_461 : f32 to vector<32x256xf32>
    %1094 = arith.maximumf %1092, %1093 : vector<32x256xf32>
    %1095 = arith.truncf %1094 : vector<32x256xf32> to vector<32x256xbf16>
    %1096 = vector.extract_strided_slice %1095 {offsets = [0, 0], sizes = [32, 128], strides = [1, 1]} : vector<32x256xbf16> to vector<32x128xbf16>
    %1097 = vector.extract_strided_slice %1095 {offsets = [0, 128], sizes = [32, 128], strides = [1, 1]} : vector<32x256xbf16> to vector<32x128xbf16>
    %c11392 = arith.constant 11392 : index
    %c0_462 = arith.constant 0 : index
    %1098 = vector.load %arg2[%c11392, %c0_462] : memref<12576x128xbf16, #tpu.memory_space<vmem>>, vector<128x128xbf16>
    %cst_463 = arith.constant dense<0.000000e+00> : vector<32x128xf32>
    %1099 = tpu.matmul %1096, %1098, %cst_463 {dimension_numbers = #tpu.dot_dimension_numbers<[1], [0], [0], [1], [0, 0, 1, 1], [], []>} : vector<32x128xbf16>, vector<128x128xbf16>, vector<32x128xf32> -> vector<32x128xf32>
    %c11776 = arith.constant 11776 : index
    %c0_464 = arith.constant 0 : index
    %1100 = vector.load %arg2[%c11776, %c0_464] : memref<12576x128xbf16, #tpu.memory_space<vmem>>, vector<128x128xbf16>
    %cst_465 = arith.constant dense<0.000000e+00> : vector<32x128xf32>
    %1101 = tpu.matmul %1097, %1100, %cst_465 {dimension_numbers = #tpu.dot_dimension_numbers<[1], [0], [0], [1], [0, 0, 1, 1], [], []>} : vector<32x128xbf16>, vector<128x128xbf16>, vector<32x128xf32> -> vector<32x128xf32>
    %1102 = tpu.concatenate %1099, %1101 in 1 : vector<32x128xf32>, vector<32x128xf32> -> vector<32x256xf32>
    %c11520 = arith.constant 11520 : index
    %c0_466 = arith.constant 0 : index
    %1103 = vector.load %arg2[%c11520, %c0_466] : memref<12576x128xbf16, #tpu.memory_space<vmem>>, vector<128x128xbf16>
    %cst_467 = arith.constant dense<0.000000e+00> : vector<32x128xf32>
    %1104 = tpu.matmul %1096, %1103, %cst_467 {dimension_numbers = #tpu.dot_dimension_numbers<[1], [0], [0], [1], [0, 0, 1, 1], [], []>} : vector<32x128xbf16>, vector<128x128xbf16>, vector<32x128xf32> -> vector<32x128xf32>
    %c11904 = arith.constant 11904 : index
    %c0_468 = arith.constant 0 : index
    %1105 = vector.load %arg2[%c11904, %c0_468] : memref<12576x128xbf16, #tpu.memory_space<vmem>>, vector<128x128xbf16>
    %cst_469 = arith.constant dense<0.000000e+00> : vector<32x128xf32>
    %1106 = tpu.matmul %1097, %1105, %cst_469 {dimension_numbers = #tpu.dot_dimension_numbers<[1], [0], [0], [1], [0, 0, 1, 1], [], []>} : vector<32x128xbf16>, vector<128x128xbf16>, vector<32x128xf32> -> vector<32x128xf32>
    %1107 = tpu.concatenate %1104, %1106 in 1 : vector<32x128xf32>, vector<32x128xf32> -> vector<32x256xf32>
    %c11648 = arith.constant 11648 : index
    %c0_470 = arith.constant 0 : index
    %1108 = vector.load %arg2[%c11648, %c0_470] : memref<12576x128xbf16, #tpu.memory_space<vmem>>, vector<128x128xbf16>
    %cst_471 = arith.constant dense<0.000000e+00> : vector<32x128xf32>
    %1109 = tpu.matmul %1096, %1108, %cst_471 {dimension_numbers = #tpu.dot_dimension_numbers<[1], [0], [0], [1], [0, 0, 1, 1], [], []>} : vector<32x128xbf16>, vector<128x128xbf16>, vector<32x128xf32> -> vector<32x128xf32>
    %c12032 = arith.constant 12032 : index
    %c0_472 = arith.constant 0 : index
    %1110 = vector.load %arg2[%c12032, %c0_472] : memref<12576x128xbf16, #tpu.memory_space<vmem>>, vector<128x128xbf16>
    %cst_473 = arith.constant dense<0.000000e+00> : vector<32x128xf32>
    %1111 = tpu.matmul %1097, %1110, %cst_473 {dimension_numbers = #tpu.dot_dimension_numbers<[1], [0], [0], [1], [0, 0, 1, 1], [], []>} : vector<32x128xbf16>, vector<128x128xbf16>, vector<32x128xf32> -> vector<32x128xf32>
    %1112 = tpu.concatenate %1109, %1111 in 1 : vector<32x128xf32>, vector<32x128xf32> -> vector<32x256xf32>
    %cst_474 = arith.constant 0.000000e+00 : f32
    %1113 = vector.broadcast %cst_474 : f32 to vector<1x256xf32>
    %1114 = vector.extract_strided_slice %1102 {offsets = [0, 0], sizes = [31, 256], strides = [1, 1]} : vector<32x256xf32> to vector<31x256xf32>
    %1115 = tpu.concatenate %1113, %1114 in 0 : vector<1x256xf32>, vector<31x256xf32> -> vector<32x256xf32>
    %1116 = vector.extract_strided_slice %1112 {offsets = [1, 0], sizes = [31, 256], strides = [1, 1]} : vector<32x256xf32> to vector<31x256xf32>
    %1117 = tpu.concatenate %1116, %1113 in 0 : vector<31x256xf32>, vector<1x256xf32> -> vector<32x256xf32>
    %1118 = tpu.iota {dimensions = array<i32: 0>} : vector<32x256xi32>
    %c16_i32_475 = arith.constant 16 : i32
    %c0_i32_476 = arith.constant 0 : i32
    %1119 = arith.cmpi eq, %c16_i32_475, %c0_i32_476 : i32
    %c1_i32_477 = arith.constant 1 : i32
    %1120 = arith.select %1119, %c1_i32_477, %c16_i32_475 : i32
    %1121 = vector.broadcast %1120 : i32 to vector<32x256xi32>
    %1122 = arith.remsi %1118, %1121 : vector<32x256xi32>
    %c0_i32_478 = arith.constant 0 : i32
    %1123 = vector.broadcast %c0_i32_478 : i32 to vector<32x256xi32>
    %1124 = arith.cmpi ne, %1122, %1123 : vector<32x256xi32>
    %c0_i32_479 = arith.constant 0 : i32
    %1125 = vector.broadcast %c0_i32_479 : i32 to vector<32x256xi32>
    %1126 = arith.cmpi slt, %1122, %1125 : vector<32x256xi32>
    %c0_i32_480 = arith.constant 0 : i32
    %1127 = arith.cmpi slt, %1120, %c0_i32_480 : i32
    %1128 = vector.broadcast %1127 : i1 to vector<32x256xi1>
    %1129 = vector.broadcast %1128 : vector<32x256xi1> to vector<32x256xi1>
    %1130 = arith.xori %1126, %1129 : vector<32x256xi1>
    %1131 = arith.andi %1130, %1124 : vector<32x256xi1>
    %1132 = vector.broadcast %1120 : i32 to vector<32x256xi32>
    %1133 = arith.addi %1122, %1132 : vector<32x256xi32>
    %1134 = arith.select %1131, %1133, %1122 : vector<32x256xi1>, vector<32x256xi32>
    %c0_i32_481 = arith.constant 0 : i32
    %1135 = vector.broadcast %c0_i32_481 : i32 to vector<32x256xi32>
    %1136 = arith.cmpi ne, %1134, %1135 : vector<32x256xi32>
    %cst_482 = arith.constant 0.000000e+00 : f32
    %1137 = vector.broadcast %cst_482 : f32 to vector<32x256xf32>
    %1138 = arith.select %1136, %1115, %1137 : vector<32x256xi1>, vector<32x256xf32>
    %c16_i32_483 = arith.constant 16 : i32
    %c0_i32_484 = arith.constant 0 : i32
    %1139 = arith.cmpi eq, %c16_i32_483, %c0_i32_484 : i32
    %c1_i32_485 = arith.constant 1 : i32
    %1140 = arith.select %1139, %c1_i32_485, %c16_i32_483 : i32
    %1141 = vector.broadcast %1140 : i32 to vector<32x256xi32>
    %1142 = arith.remsi %1118, %1141 : vector<32x256xi32>
    %c0_i32_486 = arith.constant 0 : i32
    %1143 = vector.broadcast %c0_i32_486 : i32 to vector<32x256xi32>
    %1144 = arith.cmpi ne, %1142, %1143 : vector<32x256xi32>
    %c0_i32_487 = arith.constant 0 : i32
    %1145 = vector.broadcast %c0_i32_487 : i32 to vector<32x256xi32>
    %1146 = arith.cmpi slt, %1142, %1145 : vector<32x256xi32>
    %c0_i32_488 = arith.constant 0 : i32
    %1147 = arith.cmpi slt, %1140, %c0_i32_488 : i32
    %1148 = vector.broadcast %1147 : i1 to vector<32x256xi1>
    %1149 = vector.broadcast %1148 : vector<32x256xi1> to vector<32x256xi1>
    %1150 = arith.xori %1146, %1149 : vector<32x256xi1>
    %1151 = arith.andi %1150, %1144 : vector<32x256xi1>
    %1152 = vector.broadcast %1140 : i32 to vector<32x256xi32>
    %1153 = arith.addi %1142, %1152 : vector<32x256xi32>
    %1154 = arith.select %1151, %1153, %1142 : vector<32x256xi1>, vector<32x256xi32>
    %c15_i32_489 = arith.constant 15 : i32
    %1155 = vector.broadcast %c15_i32_489 : i32 to vector<32x256xi32>
    %1156 = arith.cmpi ne, %1154, %1155 : vector<32x256xi32>
    %cst_490 = arith.constant 0.000000e+00 : f32
    %1157 = vector.broadcast %cst_490 : f32 to vector<32x256xf32>
    %1158 = arith.select %1156, %1117, %1157 : vector<32x256xi1>, vector<32x256xf32>
    %1159 = arith.addf %1107, %1138 : vector<32x256xf32>
    %1160 = arith.addf %1159, %1158 : vector<32x256xf32>
    %c17 = arith.constant 17 : index
    %c0_491 = arith.constant 0 : index
    %1161 = vector.load %arg6[%c17, %c0_491] : memref<24x256xf32, #tpu.memory_space<vmem>>, vector<1x256xf32>
    %1162 = vector.broadcast %1161 : vector<1x256xf32> to vector<32x256xf32>
    %1163 = arith.addf %1160, %1162 : vector<32x256xf32>
    %cst_492 = arith.constant 0.000000e+00 : f32
    %1164 = vector.broadcast %cst_492 : f32 to vector<32x256xf32>
    %1165 = arith.maximumf %1163, %1164 : vector<32x256xf32>
    %1166 = arith.truncf %1165 : vector<32x256xf32> to vector<32x256xbf16>
    %c12192 = arith.constant 12192 : index
    %c0_493 = arith.constant 0 : index
    %1167 = vector.load %arg2[%c12192, %c0_493] : memref<12576x128xbf16, #tpu.memory_space<vmem>>, vector<256x128xbf16>
    %cst_494 = arith.constant dense<0.000000e+00> : vector<32x128xf32>
    %1168 = tpu.matmul %1166, %1167, %cst_494 {dimension_numbers = #tpu.dot_dimension_numbers<[1], [0], [0], [1], [0, 0, 1, 1], [], []>} : vector<32x256xbf16>, vector<256x128xbf16>, vector<32x128xf32> -> vector<32x128xf32>
    %c18 = arith.constant 18 : index
    %c0_495 = arith.constant 0 : index
    %1169 = vector.load %arg6[%c18, %c0_495] : memref<24x256xf32, #tpu.memory_space<vmem>>, vector<1x128xf32>
    %1170 = vector.broadcast %1169 : vector<1x128xf32> to vector<32x128xf32>
    %1171 = arith.addf %1168, %1170 : vector<32x128xf32>
    %1172 = tpu.iota {dimensions = array<i32: 1>} : vector<32x128xi32>
    %c16_i32_496 = arith.constant 16 : i32
    %1173 = vector.broadcast %c16_i32_496 : i32 to vector<32x128xi32>
    %1174 = arith.cmpi sge, %1172, %1173 : vector<32x128xi32>
    %c32_i32 = arith.constant 32 : i32
    %1175 = vector.broadcast %c32_i32 : i32 to vector<32x128xi32>
    %1176 = arith.cmpi slt, %1172, %1175 : vector<32x128xi32>
    %1177 = arith.andi %1174, %1176 : vector<32x128xi1>
    %1178 = arith.negf %1171 : vector<32x128xf32>
    %1179 = math.exp %1178 : vector<32x128xf32>
    %cst_497 = arith.constant 1.000000e+00 : f32
    %1180 = vector.broadcast %cst_497 : f32 to vector<32x128xf32>
    %1181 = arith.addf %1180, %1179 : vector<32x128xf32>
    %1182 = arith.divf %1180, %1181 : vector<32x128xf32>
    %1183 = arith.select %1177, %1182, %1171 : vector<32x128xi1>, vector<32x128xf32>
    %c12448 = arith.constant 12448 : index
    %c0_498 = arith.constant 0 : index
    %1184 = vector.load %arg2[%c12448, %c0_498] : memref<12576x128xbf16, #tpu.memory_space<vmem>>, vector<32x16xbf16>
    %cst_499 = arith.constant dense<0.000000e+00> : vector<32x128xf32>
    %1185 = tpu.matmul %1184, %252, %cst_499 {dimension_numbers = #tpu.dot_dimension_numbers<[1], [0], [0], [1], [0, 0, 1, 1], [], []>} : vector<32x16xbf16>, vector<16x128xbf16>, vector<32x128xf32> -> vector<32x128xf32>
    %c1920 = arith.constant 1920 : index
    %c0_500 = arith.constant 0 : index
    %1186 = vector.load %arg3[%c1920, %c0_500] : memref<2048x256xbf16, #tpu.memory_space<vmem>>, vector<128x256xbf16>
    %1187 = arith.truncf %1185 : vector<32x128xf32> to vector<32x128xbf16>
    %cst_501 = arith.constant dense<0.000000e+00> : vector<32x256xf32>
    %1188 = tpu.matmul %1187, %1186, %cst_501 {dimension_numbers = #tpu.dot_dimension_numbers<[1], [0], [0], [1], [0, 0, 1, 1], [], []>} : vector<32x128xbf16>, vector<128x256xbf16>, vector<32x256xf32> -> vector<32x256xf32>
    %c12480 = arith.constant 12480 : index
    %c0_502 = arith.constant 0 : index
    %1189 = vector.load %arg2[%c12480, %c0_502] : memref<12576x128xbf16, #tpu.memory_space<vmem>>, vector<32x8xbf16>
    %cst_503 = arith.constant dense<0.000000e+00> : vector<32x128xf32>
    %1190 = tpu.matmul %1189, %384, %cst_503 {dimension_numbers = #tpu.dot_dimension_numbers<[1], [0], [0], [1], [0, 0, 1, 1], [], []>} : vector<32x8xbf16>, vector<8x128xbf16>, vector<32x128xf32> -> vector<32x128xf32>
    %c0_504 = arith.constant 0 : index
    %c0_505 = arith.constant 0 : index
    %1191 = vector.load %arg4[%c0_504, %c0_505] : memref<128x512xbf16, #tpu.memory_space<vmem>>, vector<128x512xbf16>
    %1192 = arith.truncf %1190 : vector<32x128xf32> to vector<32x128xbf16>
    %cst_506 = arith.constant dense<0.000000e+00> : vector<32x512xf32>
    %1193 = tpu.matmul %1192, %1191, %cst_506 {dimension_numbers = #tpu.dot_dimension_numbers<[1], [0], [0], [1], [0, 0, 1, 1], [], []>} : vector<32x128xbf16>, vector<128x512xbf16>, vector<32x512xf32> -> vector<32x512xf32>
    %c12512 = arith.constant 12512 : index
    %c0_507 = arith.constant 0 : index
    %1194 = vector.load %arg2[%c12512, %c0_507] : memref<12576x128xbf16, #tpu.memory_space<vmem>>, vector<32x4xbf16>
    %cst_508 = arith.constant dense<0.000000e+00> : vector<32x128xf32>
    %1195 = tpu.matmul %1194, %516, %cst_508 {dimension_numbers = #tpu.dot_dimension_numbers<[1], [0], [0], [1], [0, 0, 1, 1], [], []>} : vector<32x4xbf16>, vector<4x128xbf16>, vector<32x128xf32> -> vector<32x128xf32>
    %c0_509 = arith.constant 0 : index
    %c0_510 = arith.constant 0 : index
    %1196 = vector.load %arg5[%c0_509, %c0_510] : memref<128x1024xbf16, #tpu.memory_space<vmem>>, vector<128x1024xbf16>
    %1197 = arith.truncf %1195 : vector<32x128xf32> to vector<32x128xbf16>
    %cst_511 = arith.constant dense<0.000000e+00> : vector<32x1024xf32>
    %1198 = tpu.matmul %1197, %1196, %cst_511 {dimension_numbers = #tpu.dot_dimension_numbers<[1], [0], [0], [1], [0, 0, 1, 1], [], []>} : vector<32x128xbf16>, vector<128x1024xbf16>, vector<32x1024xf32> -> vector<32x1024xf32>
    %c12544 = arith.constant 12544 : index
    %c0_512 = arith.constant 0 : index
    %1199 = vector.load %arg2[%c12544, %c0_512] : memref<12576x128xbf16, #tpu.memory_space<vmem>>, vector<32x2xbf16>
    %cst_513 = arith.constant dense<0.000000e+00> : vector<32x128xf32>
    %1200 = tpu.matmul %1199, %544, %cst_513 {dimension_numbers = #tpu.dot_dimension_numbers<[1], [0], [0], [1], [0, 0, 1, 1], [], []>} : vector<32x2xbf16>, vector<2x128xbf16>, vector<32x128xf32> -> vector<32x128xf32>
    %1201 = tpu.concatenate %1200, %1200, %1200, %1200, %1200, %1200, %1200, %1200, %1200, %1200, %1200, %1200, %1200, %1200, %1200, %1200 in 1 : vector<32x128xf32>, vector<32x128xf32>, vector<32x128xf32>, vector<32x128xf32>, vector<32x128xf32>, vector<32x128xf32>, vector<32x128xf32>, vector<32x128xf32>, vector<32x128xf32>, vector<32x128xf32>, vector<32x128xf32>, vector<32x128xf32>, vector<32x128xf32>, vector<32x128xf32>, vector<32x128xf32>, vector<32x128xf32> -> vector<32x2048xf32>
    %c0_514 = arith.constant 0 : index
    %c0_515 = arith.constant 0 : index
    %1202 = vector.load %arg7[%c0_514, %c0_515] : memref<32x4096xf32, #tpu.memory_space<vmem>>, vector<32x128xf32>
    tpu.vector_store %arg7[%c0_514, %c0_515], %1183 {strides = array<i32>} : memref<32x4096xf32, #tpu.memory_space<vmem>>, vector<32x128xf32>,
    %1203 = arith.extf %120 : vector<32x128xbf16> to vector<32x128xf32>
    %c0_516 = arith.constant 0 : index
    %c128_517 = arith.constant 128 : index
    %1204 = vector.load %arg7[%c0_516, %c128_517] : memref<32x4096xf32, #tpu.memory_space<vmem>>, vector<32x128xf32>
    tpu.vector_store %arg7[%c0_516, %c128_517], %1203 {strides = array<i32>} : memref<32x4096xf32, #tpu.memory_space<vmem>>, vector<32x128xf32>,
    %c0_518 = arith.constant 0 : index
    %c256_519 = arith.constant 256 : index
    %1205 = vector.load %arg7[%c0_518, %c256_519] : memref<32x4096xf32, #tpu.memory_space<vmem>>, vector<32x256xf32>
    tpu.vector_store %arg7[%c0_518, %c256_519], %1188 {strides = array<i32>} : memref<32x4096xf32, #tpu.memory_space<vmem>>, vector<32x256xf32>,
    %c0_520 = arith.constant 0 : index
    %c512_521 = arith.constant 512 : index
    %1206 = vector.load %arg7[%c0_520, %c512_521] : memref<32x4096xf32, #tpu.memory_space<vmem>>, vector<32x512xf32>
    tpu.vector_store %arg7[%c0_520, %c512_521], %1193 {strides = array<i32>} : memref<32x4096xf32, #tpu.memory_space<vmem>>, vector<32x512xf32>,
    %c0_522 = arith.constant 0 : index
    %c1024_523 = arith.constant 1024 : index
    %1207 = vector.load %arg7[%c0_522, %c1024_523] : memref<32x4096xf32, #tpu.memory_space<vmem>>, vector<32x1024xf32>
    tpu.vector_store %arg7[%c0_522, %c1024_523], %1198 {strides = array<i32>} : memref<32x4096xf32, #tpu.memory_space<vmem>>, vector<32x1024xf32>,
    %c0_524 = arith.constant 0 : index
    %c2048 = arith.constant 2048 : index
    %1208 = vector.load %arg7[%c0_524, %c2048] : memref<32x4096xf32, #tpu.memory_space<vmem>>, vector<32x2048xf32>
    tpu.vector_store %arg7[%c0_524, %c2048], %1201 {strides = array<i32>} : memref<32x4096xf32, #tpu.memory_space<vmem>>, vector<32x2048xf32>,
    return
  }
  func.func @transform_0(%arg0: i32) -> (i32, i32) {
    %c0_i32 = arith.constant 0 : i32
    %c0_i32_0 = arith.constant 0 : i32
    return %arg0, %c0_i32 : i32, i32
  }
  func.func @transform_1(%arg0: i32) -> (i32, i32) {
    %c0_i32 = arith.constant 0 : i32
    %c0_i32_0 = arith.constant 0 : i32
    %c0_i32_1 = arith.constant 0 : i32
    return %c0_i32, %c0_i32_0 : i32, i32
  }
  func.func @transform_2(%arg0: i32) -> (i32, i32) {
    %c0_i32 = arith.constant 0 : i32
    %c0_i32_0 = arith.constant 0 : i32
    %c0_i32_1 = arith.constant 0 : i32
    return %c0_i32, %c0_i32_0 : i32, i32
  }
  func.func @transform_3(%arg0: i32) -> (i32, i32) {
    %c0_i32 = arith.constant 0 : i32
    %c0_i32_0 = arith.constant 0 : i32
    %c0_i32_1 = arith.constant 0 : i32
    return %c0_i32, %c0_i32_0 : i32, i32
  }
  func.func @transform_4(%arg0: i32) -> (i32, i32) {
    %c0_i32 = arith.constant 0 : i32
    %c0_i32_0 = arith.constant 0 : i32
    %c0_i32_1 = arith.constant 0 : i32
    return %c0_i32, %c0_i32_0 : i32, i32
  }
  func.func @transform_5(%arg0: i32) -> (i32, i32) {
    %c0_i32 = arith.constant 0 : i32
    %c0_i32_0 = arith.constant 0 : i32
    %c0_i32_1 = arith.constant 0 : i32
    return %c0_i32, %c0_i32_0 : i32, i32
  }
  func.func @transform_6(%arg0: i32) -> (i32, i32) {
    %c0_i32 = arith.constant 0 : i32
    %c0_i32_0 = arith.constant 0 : i32
    return %arg0, %c0_i32 : i32, i32
  }
}

</mosaic_0001>

<bundles_post_ra>
// kernel: forward.1
= control target key start
LH: loop header
LB: loop body
LE: loop exit
PB: predicated region body
PF: predicated region fallthrough
CT: control target
= control target key end

     0   :  { %11 = vsyncpa [#allocation3], 0  ;;  %s22102_s0 = inlined_call_operand.vmem [shape: bf16[32,1280], index: 0, kind: input, shape index: {}]   ;;  %s22103_s1 = inlined_call_operand.hbm [shape: bf16[12576,128], index: 1, kind: input, shape index: {}]   ;;  %s22104_s2 = inlined_call_operand.hbm [shape: bf16[2048,256], index: 2, kind: input, shape index: {}]   ;;  %s22105_s3 = inlined_call_operand.hbm [shape: bf16[128,512], index: 3, kind: input, shape index: {}]   ;;  %s22106_s4 = inlined_call_operand.hbm [shape: bf16[128,1024], index: 4, kind: input, shape index: {}]   ;;  %s22107_s5 = inlined_call_operand.hbm [shape: f32[24,256], index: 5, kind: input, shape index: {}]   ;;  %s22108_s6 = inlined_call_operand.vmem [shape: f32[32,4096], index: 6, kind: output, shape index: {}]  }
   0x1   :  { %12 = vsyncpa [#allocation5], 0 }
   0x2   :  { %13 = vsyncpa [#allocation8], 0  ;;  %s20113_s21 = smov [#allocation4]  }
   0x3   :  { %s33_s22 = sshll.u32 %s20113_s21, 4  ;;  %s34_s22 = int_to_ptr.vmem [resolvable:$true] %s33_s22 }
   0x4   :  { %s20015_s23 = scalar_lea.vmem %s34_s22, 32768  ;;  %p20020_p1 = scmp.lt.s32.totalorder %s34_s22, %s34_s22 }
   0x5   :  { %p20016_p0 = scmp.ne.s32.totalorder %s34_s22, %s20015_s23  ;;  %p20021_p2 = scmp.lt.s32.totalorder %s20015_s23, %s20015_s23 }
   0x7   :  { %p20022_p3 = por %p20021_p2, %p20020_p1 }
   0x9   :  { %p20023_p4 = pnand %p20022_p3, %p20016_p0 }
   0xb   :  { %20026 = shalt.err (!%p20023_p4)
}
   0xc   :  { %s20114_s24 = smov 128   ;;  %s20115_s25 = smov 8  }
   0xd   :  { %39 = dma.hbm_to_vmem [thread:$0]  %s22104_s2, 32768, %s34_s22, [#allocation5], %s20114_s24, %s20114_s24, %s20115_s25  }
   0xe   :  { %s20116_s28 = smov [#allocation7]  }
   0xf   :  { %s57_s29 = sshll.u32 %s20116_s28, 4  ;;  %s58_s29 = int_to_ptr.vmem [resolvable:$true] %s57_s29 }
  0x10   :  { %s20035_s30 = scalar_lea.vmem %s58_s29, 8192  ;;  %p20040_p6 = scmp.lt.s32.totalorder %s58_s29, %s58_s29 }
  0x11   :  { %p20036_p5 = scmp.ne.s32.totalorder %s58_s29, %s20035_s30  ;;  %p20041_p7 = scmp.lt.s32.totalorder %s20035_s30, %s20035_s30 }
  0x13   :  { %p20042_p8 = por %p20041_p7, %p20040_p6 }
  0x15   :  { %p20043_p9 = pnand %p20042_p8, %p20036_p5 }
  0x17   :  { %20046 = shalt.err (!%p20043_p9)
}
  0x18   :  { %s20117_s7 = smov 512   ;;  %s20118_s8 = smov 32  }
  0x19   :  { %63 = dma.hbm_to_vmem [thread:$0]  %s22106_s4, 8192, %s58_s29, [#allocation8], %s20117_s7, %s20117_s7, %s20118_s8  }
  0x1a   :  { %s20119_s11 = smov [#allocation2]  }
  0x1b   :  { %s21_s12 = sshll.u32 %s20119_s11, 4  ;;  %s22_s12 = int_to_ptr.vmem [resolvable:$true] %s21_s12 }
  0x1c   :  { %s20055_s2 = scalar_lea.vmem %s22_s12, 100608  ;;  %p20060_p11 = scmp.lt.s32.totalorder %s22_s12, %s22_s12 }
  0x1d   :  { %p20056_p10 = scmp.ne.s32.totalorder %s22_s12, %s20055_s2  ;;  %p20061_p12 = scmp.lt.s32.totalorder %s20055_s2, %s20055_s2 }
  0x1f   :  { %p20062_p13 = por %p20061_p12, %p20060_p11 }
  0x21   :  { %p20063_p0 = pnand %p20062_p13, %p20056_p10 }
  0x23   :  { %20066 = shalt.err (!%p20063_p0)
}
  0x24   :  { %s20120_s13 = smov 64   ;;  %s20121_s14 = smov 4  }
  0x25   :  { %27 = dma.hbm_to_vmem [thread:$0]  %s22103_s1, 100608, %s22_s12, [#allocation3], %s20120_s13, %s20120_s13, %s20121_s14  }
  0x26   :  { %s20122_s17 = smov [#allocation6]  }
  0x27   :  { %s45_s4 = sshll.u32 %s20122_s17, 4  ;;  %s46_s4 = int_to_ptr.vmem [resolvable:$true] %s45_s4 }
  0x28   :  { %s20075_s18 = scalar_lea.vmem %s46_s4, 4096  ;;  %p20080_p2 = scmp.lt.s32.totalorder %s46_s4, %s46_s4 }
  0x29   :  { %p20076_p1 = scmp.ne.s32.totalorder %s46_s4, %s20075_s18  ;;  %p20081_p3 = scmp.lt.s32.totalorder %s20075_s18, %s20075_s18 }
  0x2b   :  { %p20082_p4 = por %p20081_p3, %p20080_p2 }
  0x2d   :  { %p20083_p5 = pnand %p20082_p4, %p20076_p1 }
  0x2f   :  { %20086 = shalt.err (!%p20083_p5)
}
  0x30   :  { %s20123_s19 = smov 256   ;;  %s20124_s20 = smov 16  }
  0x31   :  { %51 = dma.hbm_to_vmem [thread:$0]  %s22105_s3, 4096, %s46_s4, [#allocation5], %s20123_s19, %s20123_s19, %s20124_s20  }
  0x32   :  { %s20125_s23 = smov [#allocation9]  }
  0x33   :  { %s69_s24 = sshll.u32 %s20125_s23, 4  ;;  %s70_s24 = int_to_ptr.vmem [resolvable:$true] %s69_s24 }
  0x34   :  { %s20095_s1 = scalar_lea.vmem %s70_s24, 768  ;;  %p20100_p7 = scmp.lt.s32.totalorder %s70_s24, %s70_s24 }
  0x35   :  { %p20096_p6 = scmp.ne.s32.totalorder %s70_s24, %s20095_s1  ;;  %p20101_p8 = scmp.lt.s32.totalorder %s20095_s1, %s20095_s1 }
  0x37   :  { %p20102_p9 = por %p20101_p8, %p20100_p7 }
  0x39   :  { %p20103_p10 = pnand %p20102_p9, %p20096_p6 }
  0x3b   :  { %20106 = shalt.err (!%p20103_p10)
}
  0x3c   :  { %75 = dma.hbm_to_vmem [thread:$0]  %s22107_s5, 768, %s70_s24, [#allocation8], %s20123_s19, %s20123_s19, %s20124_s20  }
  0x3d   :  { %20107 = dma.done.wait [#allocation3], 100608  }
  0x3e   :  { %20108 = vsyncadd [#allocation3], 4294866688 }
  0x3f   :  { %20109 = dma.done.wait [#allocation5], 36864  }
  0x40   :  { %20110 = vsyncadd [#allocation5], 4294930432 }
  0x41   :  { %20111 = dma.done.wait [#allocation8], 8960  }
  0x42   :  { %20112 = vsyncadd [#allocation8], 4294958336  ;;  %v18726_v0 = vld [vmem:[#allocation2 + $0x78] sm:$0xff]   ;;  %v18730_v4 = vld [vmem:[#allocation2 + $0x70] sm:$0xff]   ;;  %vm2147_vm0 = vcmask 1040384   ;;  %vm22117_vm2 = vcmask 1046528  }
  0x43   :  { %v18727_v1 = vld [vmem:[#allocation2 + $0xf8] sm:$0xff]   ;;  %16278 = vmatprep.subr.bf16.mxu0 %v18726_v0  ;;  %v18731_v5 = vld [vmem:[#allocation2 + $0xf0] sm:$0xff]   ;;  %v18734_v8 = vld [vmem:[#allocation2 + $0x68] sm:$0xff]   ;;  %vm3393_vm6 = vcmask 261120   ;;  %vm20127_vm7 = vmmov 0   ;;  %vm22118_vm8 = vcmask 523264  }
  0x44   :  { %v18728_v2 = vld [vmem:[#allocation2 + $0x38] sm:$0xff]   ;;  %16306 = vmatprep.subr.bf16.mxu1 %v18727_v1  ;;  %v18732_v6 = vld [vmem:[#allocation2 + $0x30] sm:$0xff]   ;;  %v18735_v9 = vld [vmem:[#allocation2 + $0xe8] sm:$0xff]   ;;  %vm22114_vm13 = vcmask 130048  }
  0x45   :  { %v18729_v3 = vld [vmem:[#allocation2 + $0xb8] sm:$0xff]   ;;  %16279 = vmatpush3.bf16.msra.mxu0 %v18728_v2  ;;  %v18733_v7 = vld [vmem:[#allocation2 + $0xb0] sm:$0xff]   ;;  %v18736_v10 = vld [vmem:[#allocation2 + $0x28] sm:$0xff]  }
  0x46   :  { %16307 = vmatpush3.bf16.msra.mxu1 %v18729_v3  ;;  %16280 = vmatprep.subr.bf16.mxu0 %v18730_v4  ;;  %v18737_v11 = vld [vmem:[#allocation2 + $0xa8] sm:$0xff]   ;;  %v18738_v12 = vld [vmem:[#allocation2 + $0x60] sm:$0xff]   ;;  %v18742_v16 = vld [vmem:[#allocation2 + $0x58] sm:$0xff]  }
  0x47   :  { %16308 = vmatprep.subr.bf16.mxu1 %v18731_v5  ;;  %v18739_v13 = vld [vmem:[#allocation2 + $0xe0] sm:$0xff]   ;;  %v18743_v17 = vld [vmem:[#allocation2 + $0xd8] sm:$0xff]   ;;  %v18746_v20 = vld [vmem:[#allocation2 + $0x50] sm:$0xff]  }
  0x48   :  { %v18740_v14 = vld [vmem:[#allocation2 + $0x20] sm:$0xff]   ;;  %v18744_v18 = vld [vmem:[#allocation2 + $0x18] sm:$0xff]   ;;  %v18747_v21 = vld [vmem:[#allocation2 + $0xd0] sm:$0xff]  }
  0x49   :  { %16281 = vmatpush3.bf16.msra.mxu0 %v18732_v6  ;;  %v18741_v15 = vld [vmem:[#allocation2 + $0xa0] sm:$0xff]   ;;  %v18745_v19 = vld [vmem:[#allocation2 + $0x98] sm:$0xff]   ;;  %v18748_v22 = vld [vmem:[#allocation2 + $0x10] sm:$0xff]  }
  0x4a   :  { %16309 = vmatpush3.bf16.msra.mxu1 %v18733_v7  ;;  %16282 = vmatprep.subr.bf16.mxu0 %v18734_v8  ;;  %v18749_v23 = vld [vmem:[#allocation2 + $0x90] sm:$0xff]   ;;  %v18750_v24 = vld [vmem:[#allocation2 + $0x48] sm:$0xff]   ;;  %v18754_v28 = vld [vmem:[#allocation2 + $0x40] sm:$0xff]  }
  0x4b   :  { %16310 = vmatprep.subr.bf16.mxu1 %v18735_v9  ;;  %v18751_v25 = vld [vmem:[#allocation2 + $0xc8] sm:$0xff]   ;;  %v18755_v29 = vld [vmem:[#allocation2 + $0xc0] sm:$0xff]   ;;  %v18764_v36 = vld [vmem:[#allocation2 + $0x178] sm:$0xff]  }
  0x4c   :  { %v18752_v26 = vld [vmem:[#allocation2 + $0x8] sm:$0xff]   ;;  %v18756_v30 = vld [vmem:[#allocation2] sm:$0xff]   ;;  %v18765_v37 = vld [vmem:[#allocation2 + $0x138] sm:$0xff]  }
  0x4d   :  { %16283 = vmatpush3.bf16.msra.mxu0 %v18736_v10  ;;  %v18753_v27 = vld [vmem:[#allocation2 + $0x88] sm:$0xff]   ;;  %v18757_v31 = vld [vmem:[#allocation2 + $0x80] sm:$0xff]   ;;  %v18766_v38 = vld [vmem:[#allocation2 + $0x1f8] sm:$0xff]  }
  0x4e   :  { %16311 = vmatpush3.bf16.msra.mxu1 %v18737_v11  ;;  %16284 = vmatprep.subr.bf16.mxu0 %v18738_v12  ;;  %v20184_v32 = vld [vmem:[%s22102_s0 + $0x4] ss:$40 sps:$4 sm:$0xff]   ;;  %v20195_v34 = vld [vmem:[%s22102_s0] ss:$40 sps:$4 sm:$0xff]   ;;  %v18767_v39 = vld [vmem:[#allocation2 + $0x1b8] sm:$0xff]  }
  0x4f   :  { %16312 = vmatprep.subr.bf16.mxu1 %v18739_v13  ;;  %v20189_v33 = vld [vmem:[%s22102_s0 + $0xc] ss:$40 sps:$4 sm:$0xff]   ;;  %885 = vmatprep.mubr.bf16.mxu0 %v20184_v32  ;;  %v20200_v35 = vld [vmem:[%s22102_s0 + $0x8] ss:$40 sps:$4 sm:$0xff]   ;;  %v18776_v48 = vld [vmem:[#allocation2 + $0x160] sm:$0xff]  }
  0x50   :  { %934 = vmatprep.mubr.bf16.mxu1 %v20189_v33  ;;  %v18768_v40 = vld [vmem:[#allocation2 + $0x170] sm:$0xff]   ;;  %v18772_v44 = vld [vmem:[#allocation2 + $0x168] sm:$0xff]   ;;  %v18777_v49 = vld [vmem:[#allocation2 + $0x120] sm:$0xff]  }
  0x51   :  { %16285 = vmatpush3.bf16.msra.mxu0 %v18740_v14  ;;  %v18769_v41 = vld [vmem:[#allocation2 + $0x130] sm:$0xff]   ;;  %v18773_v45 = vld [vmem:[#allocation2 + $0x128] sm:$0xff]   ;;  %v18778_v50 = vld [vmem:[#allocation2 + $0x1e0] sm:$0xff]  }
  0x52   :  { %16313 = vmatpush3.bf16.msra.mxu1 %v18741_v15  ;;  %16286 = vmatprep.subr.bf16.mxu0 %v18742_v16  ;;  %v18770_v42 = vld [vmem:[#allocation2 + $0x1f0] sm:$0xff]   ;;  %v18774_v46 = vld [vmem:[#allocation2 + $0x1e8] sm:$0xff]   ;;  %v18779_v51 = vld [vmem:[#allocation2 + $0x1a0] sm:$0xff]  }
  0x53   :  { %16314 = vmatprep.subr.bf16.mxu1 %v18743_v17  ;;  %v18771_v43 = vld [vmem:[#allocation2 + $0x1b0] sm:$0xff]   ;;  %v18775_v47 = vld [vmem:[#allocation2 + $0x1a8] sm:$0xff]   ;;  %v18780_v52 = vld [vmem:[#allocation2 + $0x158] sm:$0xff]  }
  0x54   :  { %v18781_v53 = vld [vmem:[#allocation2 + $0x118] sm:$0xff]   ;;  %v18790_v60 = vld [vmem:[#allocation2 + $0x150] sm:$0xff]   ;;  %v18794_v0 = vld [vmem:[#allocation2 + $0x148] sm:$0xff]  }
  0x55   :  { %16287 = vmatpush3.bf16.msra.mxu0 %v18744_v18  ;;  %v20208_v54 = vld [vmem:[%s22102_s0 + $0x54] ss:$40 sps:$4 sm:$0xff]   ;;  %v20219_v57 = vld [vmem:[%s22102_s0 + $0x50] ss:$40 sps:$4 sm:$0xff]   ;;  %v18795_v1 = vld [vmem:[#allocation2 + $0x108] sm:$0xff]  }
  0x56   :  { %16315 = vmatpush3.bf16.msra.mxu1 %v18745_v19  ;;  %16288 = vmatprep.subr.bf16.mxu0 %v18746_v20  ;;  %v20213_v55 = vld [vmem:[%s22102_s0 + $0x5c] ss:$40 sps:$4 sm:$0xff]   ;;  %v20225_v58 = vld [vmem:[%s22102_s0 + $0x58] ss:$40 sps:$4 sm:$0xff]   ;;  %v18791_v61 = vld [vmem:[#allocation2 + $0x110] sm:$0xff]  }
  0x57   :  { %16316 = vmatprep.subr.bf16.mxu1 %v18747_v21  ;;  %v18786_v56 = vld [vmem:[#allocation2 + $0x1d8] sm:$0xff]   ;;  %v18792_v62 = vld [vmem:[#allocation2 + $0x1d0] sm:$0xff]   ;;  %v18796_v2 = vld [vmem:[#allocation2 + $0x1c8] sm:$0xff]  }
  0x58   :  { %v18789_v59 = vld [vmem:[#allocation2 + $0x198] sm:$0xff]   ;;  %v18793_v63 = vld [vmem:[#allocation2 + $0x190] sm:$0xff]   ;;  %v18797_v3 = vld [vmem:[#allocation2 + $0x188] sm:$0xff]  }
  0x59   :  { %16289 = vmatpush3.bf16.msra.mxu0 %v18748_v22  ;;  %v18798_v4 = vld [vmem:[#allocation2 + $0x140] sm:$0xff]   ;;  %v20232_v7 = vld [vmem:[%s22102_s0 + $0x10] ss:$40 sps:$4 sm:$0xff]   ;;  %v20237_v8 = vld [vmem:[%s22102_s0 + $0x14] ss:$40 sps:$4 sm:$0xff]  }
  0x5a   :  { %16317 = vmatpush3.bf16.msra.mxu1 %v18749_v23  ;;  %16290 = vmatprep.subr.bf16.mxu0 %v18750_v24  ;;  %v18799_v5 = vld [vmem:[#allocation2 + $0x100] sm:$0xff]   ;;  %v18805_v10 = vld [vmem:[#allocation2 + $0x278] sm:$0xff]   ;;  %v18812_v16 = vld [vmem:[#allocation2 + $0x270] sm:$0xff]  }
  0x5b   :  { %16318 = vmatprep.subr.bf16.mxu1 %v18751_v25  ;;  %v18800_v6 = vld [vmem:[#allocation2 + $0x1c0] sm:$0xff]   ;;  %v18809_v13 = vld [vmem:[#allocation2 + $0x238] sm:$0xff]   ;;  %v18813_v17 = vld [vmem:[#allocation2 + $0x230] sm:$0xff]  }
  0x5c   :  { %v18804_v9 = vld [vmem:[#allocation2 + $0x180] sm:$0xff]   ;;  %v18810_v14 = vld [vmem:[#allocation2 + $0x578] sm:$0xff]   ;;  %v18814_v18 = vld [vmem:[#allocation2 + $0x570] sm:$0xff]  }
  0x5d   :  { %16291 = vmatpush3.bf16.msra.mxu0 %v18752_v26  ;;  %v20244_v11 = vld [vmem:[%s22102_s0 + $0x18] ss:$40 sps:$4 sm:$0xff]   ;;  %v20249_v12 = vld [vmem:[%s22102_s0 + $0x1c] ss:$40 sps:$4 sm:$0xff]   ;;  %v18817_v20 = vld [vmem:[#allocation2 + $0x530] sm:$0xff]  }
  0x5e   :  { %16319 = vmatpush3.bf16.msra.mxu1 %v18753_v27  ;;  %16292 = vmatprep.subr.bf16.mxu0 %v18754_v28  ;;  %v18811_v15 = vld [vmem:[#allocation2 + $0x538] sm:$0xff]   ;;  %v20256_v19 = vld [vmem:[%s22102_s0 + $0x64] ss:$40 sps:$4 sm:$0xff]   ;;  %v20262_v21 = vld [vmem:[%s22102_s0 + $0x60] ss:$40 sps:$4 sm:$0xff]  }
  0x5f   :  { %16320 = vmatprep.subr.bf16.mxu1 %v18755_v29  ;;  %v18819_v22 = vld [vmem:[#allocation2 + $0x268] sm:$0xff]   ;;  %v18826_v28 = vld [vmem:[#allocation2 + $0x260] sm:$0xff]  }
  0x60   :  { %v20268_v23 = vld [vmem:[%s22102_s0 + $0x6c] ss:$40 sps:$4 sm:$0xff]   ;;  %v20273_v25 = vld [vmem:[%s22102_s0 + $0x68] ss:$40 sps:$4 sm:$0xff]   ;;  %v18827_v29 = vld [vmem:[#allocation2 + $0x220] sm:$0xff]  }
  0x61   :  { %16293 = vmatpush3.bf16.msra.mxu0 %v18756_v30  ;;  %v18822_v24 = vld [vmem:[#allocation2 + $0x228] sm:$0xff]   ;;  %v18828_v30 = vld [vmem:[#allocation2 + $0x560] sm:$0xff]  }
  0x62   :  { %16321 = vmatpush3.bf16.msra.mxu1 %v18757_v31  ;;  %16334 = vmatprep.subr.bf16.mxu0 %v18764_v36  ;;  %v18824_v26 = vld [vmem:[#allocation2 + $0x568] sm:$0xff]   ;;  %v18829_v31 = vld [vmem:[#allocation2 + $0x520] sm:$0xff]   ;;  %v18830_v36 = vld [vmem:[#allocation2 + $0x258] sm:$0xff]  }
  0x63   :  { %16362 = vmatprep.subr.bf16.mxu1 %v18766_v38  ;;  %v18825_v27 = vld [vmem:[#allocation2 + $0x528] sm:$0xff]   ;;  %v18832_v38 = vld [vmem:[#allocation2 + $0x558] sm:$0xff]  }
  0x64   :  { %886 = vmatmul.mubr.bf16.vlgmr.msra.gmra.mxu0 %v20195_v34 }
  0x65   :  { %935 = vmatmul.mubr.bf16.vlgmr.msra.gmra.mxu1 %v20200_v35  ;;  %16335 = vmatpush3.bf16.msra.mxu0 %v18765_v37  ;;  %v18831_v37 = vld [vmem:[#allocation2 + $0x218] sm:$0xff]  }
  0x66   :  { %16363 = vmatpush3.bf16.msra.mxu1 %v18767_v39  ;;  %16336 = vmatprep.subr.bf16.mxu0 %v18768_v40  ;;  %v18833_v39 = vld [vmem:[#allocation2 + $0x518] sm:$0xff]   ;;  %v18834_v40 = vld [vmem:[#allocation2 + $0x250] sm:$0xff]  }
  0x67   :  { %16364 = vmatprep.subr.bf16.mxu1 %v18770_v42  ;;  %893 = vmatprep.mubr.bf16.mxu0 %v20208_v54  ;;  %v18837_v42 = vld [vmem:[#allocation2 + $0x510] sm:$0xff]  }
  0x68   :  { %942 = vmatprep.mubr.bf16.mxu1 %v20213_v55 }
  0x69   :  { %16337 = vmatpush3.bf16.msra.mxu0 %v18769_v41  ;;  %v18835_v41 = vld [vmem:[#allocation2 + $0x210] sm:$0xff]  }
  0x6a   :  { %16365 = vmatpush3.bf16.msra.mxu1 %v18771_v43  ;;  %16338 = vmatprep.subr.bf16.mxu0 %v18772_v44  ;;  %v18838_v43 = vld [vmem:[#allocation2 + $0x248] sm:$0xff]  }
  0x6b   :  { %16366 = vmatprep.subr.bf16.mxu1 %v18774_v46  ;;  %v18839_v44 = vld [vmem:[#allocation2 + $0x208] sm:$0xff]  }
  0x6c   :  { %894 = vmatmul.mubr.bf16.gmra.mxu0 %v20219_v57  ;;  %v18841_v46 = vld [vmem:[#allocation2 + $0x508] sm:$0xff]  }
  0x6d   :  { %16339 = vmatpush3.bf16.msra.mxu0 %v18773_v45  ;;  %943 = vmatmul.mubr.bf16.gmra.mxu1 %v20225_v58  ;;  %v18840_v45 = vld [vmem:[#allocation2 + $0x548] sm:$0xff]  }
  0x6e   :  { %16367 = vmatpush3.bf16.msra.mxu1 %v18775_v47  ;;  %16340 = vmatprep.subr.bf16.mxu0 %v18776_v48  ;;  %v18842_v47 = vld [vmem:[#allocation2 + $0x240] sm:$0xff]  }
  0x6f   :  { %16368 = vmatprep.subr.bf16.mxu1 %v18778_v50  ;;  %983 = vmatprep.mubr.bf16.mxu0 %v20237_v8  ;;  %v18843_v48 = vld [vmem:[#allocation2 + $0x200] sm:$0xff]  }
  0x70   :  { %1032 = vmatprep.mubr.bf16.mxu1 %v20249_v12  ;;  %v20281_v50 = vld [vmem:[%s22102_s0 + $0x20] ss:$40 sps:$4 sm:$0xff]  }
  0x71   :  { %16341 = vmatpush3.bf16.msra.mxu0 %v18777_v49  ;;  %v18844_v49 = vld [vmem:[#allocation2 + $0x540] sm:$0xff]  }
  0x72   :  { %16369 = vmatpush3.bf16.msra.mxu1 %v18779_v51  ;;  %16342 = vmatprep.subr.bf16.mxu0 %v18780_v52  ;;  %v20286_v51 = vld [vmem:[%s22102_s0 + $0x24] ss:$40 sps:$4 sm:$0xff]  }
  0x73   :  { %16370 = vmatprep.subr.bf16.mxu1 %v18786_v56  ;;  %v18848_v52 = vld [vmem:[#allocation2 + $0x500] sm:$0xff]   ;;  %v18850_v56 = vld [vmem:[#allocation2 + $0x5b8] sm:$0xff]  }
  0x75   :  { %16343 = vmatpush3.bf16.msra.mxu0 %v18781_v53  ;;  %v18849_v53 = vld [vmem:[#allocation2 + $0x5f8] sm:$0xff]  }
  0x76   :  { %16371 = vmatpush3.bf16.msra.mxu1 %v18789_v59  ;;  %16344 = vmatprep.subr.bf16.mxu0 %v18790_v60  ;;  %v18851_v59 = vld [vmem:[#allocation2 + $0x678] sm:$0xff]  }
  0x77   :  { %16372 = vmatprep.subr.bf16.mxu1 %v18792_v62  ;;  %v18852_v60 = vld [vmem:[#allocation2 + $0x638] sm:$0xff]   ;;  %v18854_v62 = vld [vmem:[#allocation2 + $0x5b0] sm:$0xff]  }
  0x79   :  { %16345 = vmatpush3.bf16.msra.mxu0 %v18791_v61  ;;  %v18853_v61 = vld [vmem:[#allocation2 + $0x5f0] sm:$0xff]  }
  0x7a   :  { %16373 = vmatpush3.bf16.msra.mxu1 %v18793_v63  ;;  %16346 = vmatprep.subr.bf16.mxu0 %v18794_v0  ;;  %v18855_v63 = vld [vmem:[#allocation2 + $0x670] sm:$0xff]  }
  0x7b   :  { %16374 = vmatprep.subr.bf16.mxu1 %v18796_v2  ;;  %v20295_v0 = vld [vmem:[%s22102_s0 + $0x74] ss:$40 sps:$4 sm:$0xff]   ;;  %v18860_v2 = vld [vmem:[#allocation2 + $0x5e8] sm:$0xff]  }
  0x7d   :  { %16347 = vmatpush3.bf16.msra.mxu0 %v18795_v1  ;;  %v18858_v1 = vld [vmem:[#allocation2 + $0x630] sm:$0xff]  }
  0x7e   :  { %16375 = vmatpush3.bf16.msra.mxu1 %v18797_v3  ;;  %16348 = vmatprep.subr.bf16.mxu0 %v18798_v4  ;;  %v18862_v3 = vld [vmem:[#allocation2 + $0x668] sm:$0xff]  }
  0x7f   :  { %16376 = vmatprep.subr.bf16.mxu1 %v18800_v6  ;;  %v18863_v4 = vld [vmem:[#allocation2 + $0x628] sm:$0xff]   ;;  %v18865_v6 = vld [vmem:[#allocation2 + $0x5a0] sm:$0xff]  }
  0x81   :  { %16349 = vmatpush3.bf16.msra.mxu0 %v18799_v5  ;;  %v18864_v5 = vld [vmem:[#allocation2 + $0x5e0] sm:$0xff]  }
  0x82   :  { %16377 = vmatpush3.bf16.msra.mxu1 %v18804_v9  ;;  %16390 = vmatprep.subr.bf16.mxu0 %v18805_v10  ;;  %v18866_v9 = vld [vmem:[#allocation2 + $0x660] sm:$0xff]  }
  0x83   :  { %16418 = vmatprep.subr.bf16.mxu1 %v18810_v14  ;;  %v18867_v10 = vld [vmem:[#allocation2 + $0x620] sm:$0xff]   ;;  %v18869_v14 = vld [vmem:[#allocation2 + $0x598] sm:$0xff]  }
  0x84   :  { %984 = vmatmul.mubr.bf16.vlgmr.msra.gmra.mxu0 %v20232_v7 }
  0x85   :  { %16391 = vmatpush3.bf16.msra.mxu0 %v18809_v13  ;;  %1033 = vmatmul.mubr.bf16.vlgmr.msra.gmra.mxu1 %v20244_v11  ;;  %v18868_v13 = vld [vmem:[#allocation2 + $0x5d8] sm:$0xff]  }
  0x86   :  { %16419 = vmatpush3.bf16.msra.mxu1 %v18811_v15  ;;  %16392 = vmatprep.subr.bf16.mxu0 %v18812_v16  ;;  %v18871_v15 = vld [vmem:[#allocation2 + $0x618] sm:$0xff]   ;;  %v18873_v16 = vld [vmem:[#allocation2 + $0x590] sm:$0xff]  }
  0x87   :  { %16420 = vmatprep.subr.bf16.mxu1 %v18814_v18  ;;  %991 = vmatprep.mubr.bf16.mxu0 %v20256_v19  ;;  %v18876_v18 = vld [vmem:[#allocation2 + $0x5c8] sm:$0xff]  }
  0x88   :  { %1040 = vmatprep.mubr.bf16.mxu1 %v20268_v23 }
  0x89   :  { %16393 = vmatpush3.bf16.msra.mxu0 %v18813_v17  ;;  %v18875_v17 = vld [vmem:[#allocation2 + $0x610] sm:$0xff]  }
  0x8a   :  { %16421 = vmatpush3.bf16.msra.mxu1 %v18817_v20  ;;  %16394 = vmatprep.subr.bf16.mxu0 %v18819_v22  ;;  %v18877_v20 = vld [vmem:[#allocation2 + $0x588] sm:$0xff]  }
  0x8b   :  { %16422 = vmatprep.subr.bf16.mxu1 %v18824_v26  ;;  %v18878_v22 = vld [vmem:[#allocation2 + $0x648] sm:$0xff]   ;;  %v18880_v26 = vld [vmem:[#allocation2 + $0x5c0] sm:$0xff]  }
  0x8c   :  { %992 = vmatmul.mubr.bf16.gmra.mxu0 %v20262_v21 }
  0x8d   :  { %16395 = vmatpush3.bf16.msra.mxu0 %v18822_v24  ;;  %1041 = vmatmul.mubr.bf16.gmra.mxu1 %v20273_v25  ;;  %v18879_v24 = vld [vmem:[#allocation2 + $0x608] sm:$0xff]  }
  0x8e   :  { %1930 = vmatprep.mubr.bf16.mxu1 %v20184_v32  ;;  %16423 = vmatpush3.bf16.msra.mxu1 %v18825_v27  ;;  %v18836_v32 = vld [vmem:[#allocation2 + $0x550] sm:$0xff]   ;;  %v18881_v27 = vld [vmem:[#allocation2 + $0x580] sm:$0xff]  }
  0x8f   :  { %16396 = vmatprep.subr.bf16.mxu0 %v18826_v28  ;;  %16424 = vmatprep.subr.bf16.mxu1 %v18828_v30  ;;  %v18882_v28 = vld [vmem:[#allocation2 + $0x640] sm:$0xff]   ;;  %v18884_v30 = vld [vmem:[#allocation2 + $0x6f8] sm:$0xff]  }
  0x90   :  { %1081 = vmatprep.mubr.bf16.mxu0 %v20286_v51 }
  0x91   :  { %16397 = vmatpush3.bf16.msra.mxu0 %v18827_v29  ;;  %v18883_v29 = vld [vmem:[#allocation2 + $0x600] sm:$0xff]  }
  0x92   :  { %16425 = vmatpush3.bf16.msra.mxu1 %v18829_v31  ;;  %16398 = vmatprep.subr.bf16.mxu0 %v18830_v36  ;;  %v18885_v31 = vld [vmem:[#allocation2 + $0x6b8] sm:$0xff]  }
  0x93   :  { %16426 = vmatprep.subr.bf16.mxu1 %v18832_v38  ;;  %v18886_v36 = vld [vmem:[#allocation2 + $0x778] sm:$0xff]   ;;  %v18888_v38 = vld [vmem:[#allocation2 + $0x6f0] sm:$0xff]  }
  0x95   :  { %16399 = vmatpush3.bf16.msra.mxu0 %v18831_v37  ;;  %v18887_v37 = vld [vmem:[#allocation2 + $0x738] sm:$0xff]  }
  0x96   :  { %16427 = vmatpush3.bf16.msra.mxu1 %v18833_v39  ;;  %16400 = vmatprep.subr.bf16.mxu0 %v18834_v40  ;;  %v18889_v39 = vld [vmem:[#allocation2 + $0x6b0] sm:$0xff]  }
  0x97   :  { %16428 = vmatprep.subr.bf16.mxu1 %v18836_v32  ;;  %v18890_v40 = vld [vmem:[#allocation2 + $0x770] sm:$0xff]   ;;  %v18893_v32 = vld [vmem:[#allocation2 + $0x6a8] sm:$0xff]  }
  0x99   :  { %16401 = vmatpush3.bf16.msra.mxu0 %v18835_v41  ;;  %v18891_v41 = vld [vmem:[#allocation2 + $0x730] sm:$0xff]  }
  0x9a   :  { %16429 = vmatpush3.bf16.msra.mxu1 %v18837_v42  ;;  %16402 = vmatprep.subr.bf16.mxu0 %v18838_v43  ;;  %v18894_v42 = vld [vmem:[#allocation2 + $0x768] sm:$0xff]   ;;  %v18898_v43 = vld [vmem:[#allocation2 + $0x760] sm:$0xff]  }
  0x9b   :  { %16430 = vmatprep.subr.bf16.mxu1 %v18840_v45  ;;  %v18900_v45 = vld [vmem:[#allocation2 + $0x6d8] sm:$0xff]  }
  0x9d   :  { %16403 = vmatpush3.bf16.msra.mxu0 %v18839_v44  ;;  %v18899_v44 = vld [vmem:[#allocation2 + $0x720] sm:$0xff]  }
  0x9e   :  { %16431 = vmatpush3.bf16.msra.mxu1 %v18841_v46  ;;  %16404 = vmatprep.subr.bf16.mxu0 %v18842_v47  ;;  %v18902_v46 = vld [vmem:[#allocation2 + $0x758] sm:$0xff]   ;;  %v18904_v47 = vld [vmem:[#allocation2 + $0x6d0] sm:$0xff]  }
  0x9f   :  { %16432 = vmatprep.subr.bf16.mxu1 %v18844_v49  ;;  %v18907_v49 = vld [vmem:[#allocation2 + $0x710] sm:$0xff]  }
  0xa1   :  { %16405 = vmatpush3.bf16.msra.mxu0 %v18843_v48  ;;  %v18906_v48 = vld [vmem:[#allocation2 + $0x750] sm:$0xff]  }
  0xa2   :  { %16433 = vmatpush3.bf16.msra.mxu1 %v18848_v52  ;;  %16446 = vmatprep.subr.bf16.mxu0 %v18849_v53  ;;  %v18909_v52 = vld [vmem:[#allocation2 + $0x688] sm:$0xff]  }
  0xa3   :  { %16474 = vmatprep.subr.bf16.mxu1 %v18851_v59  ;;  %v18910_v53 = vld [vmem:[#allocation2 + $0x748] sm:$0xff]   ;;  %v18912_v59 = vld [vmem:[#allocation2 + $0x6c0] sm:$0xff]  }
  0xa4   :  { %1082 = vmatmul.mubr.bf16.vlgmr.msra.gmra.mxu0 %v20281_v50 }
  0xa5   :  { %16447 = vmatpush3.bf16.msra.mxu0 %v18850_v56  ;;  %1931 = vmatmul.mubr.bf16.vlgmr.msra.gmra.mxu1 %v20195_v34  ;;  %v20301_v34 = vld [vmem:[%s22102_s0 + $0x70] ss:$40 sps:$4 sm:$0xff]   ;;  %v18911_v56 = vld [vmem:[#allocation2 + $0x708] sm:$0xff]  }
  0xa6   :  { %16475 = vmatpush3.bf16.msra.mxu1 %v18852_v60  ;;  %1938 = vmatprep.mubr.bf16.mxu1 %v20208_v54  ;;  %v18861_v54 = vld [vmem:[#allocation2 + $0x5a8] sm:$0xff]   ;;  %v18913_v60 = vld [vmem:[#allocation2 + $0x680] sm:$0xff]  }
  0xa7   :  { %16448 = vmatprep.subr.bf16.mxu0 %v18853_v61  ;;  %16476 = vmatprep.subr.bf16.mxu1 %v18855_v63  ;;  %v18914_v61 = vld [vmem:[#allocation2 + $0x740] sm:$0xff]   ;;  %v18916_v63 = vld [vmem:[#allocation2 + $0x2f8] sm:$0xff]  }
  0xa8   :  { %1089 = vmatprep.mubr.bf16.mxu0 %v20295_v0 }
  0xa9   :  { %16449 = vmatpush3.bf16.msra.mxu0 %v18854_v62  ;;  %v18915_v62 = vld [vmem:[#allocation2 + $0x700] sm:$0xff]  }
  0xaa   :  { %16477 = vmatpush3.bf16.msra.mxu1 %v18858_v1  ;;  %16450 = vmatprep.subr.bf16.mxu0 %v18860_v2  ;;  %v18917_v1 = vld [vmem:[#allocation2 + $0x2b8] sm:$0xff]  }
  0xab   :  { %16478 = vmatprep.subr.bf16.mxu1 %v18862_v3  ;;  %v18918_v2 = vld [vmem:[#allocation2 + $0x378] sm:$0xff]   ;;  %v18920_v3 = vld [vmem:[#allocation2 + $0x2f0] sm:$0xff]  }
  0xac   :  { %1090 = vmatmul.mubr.bf16.gmra.mxu0 %v20301_v34 }
  0xad   :  { %1939 = vmatmul.mubr.bf16.gmra.mxu1 %v20219_v57  ;;  %16451 = vmatpush3.bf16.msra.mxu0 %v18861_v54  ;;  %v18870_v57 = vld [vmem:[#allocation2 + $0x658] sm:$0xff]  }
  0xae   :  { %1979 = vmatprep.mubr.bf16.mxu0 %v20189_v33  ;;  %2028 = vmatprep.mubr.bf16.mxu1 %v20237_v8  ;;  %v18872_v33 = vld [vmem:[#allocation2 + $0x5d0] sm:$0xff]   ;;  %v18919_v54 = vld [vmem:[#allocation2 + $0x338] sm:$0xff]  }
  0xaf   :  { %16479 = vmatpush3.bf16.msra.mxu1 %v18863_v4  ;;  %16452 = vmatprep.subr.bf16.mxu0 %v18864_v5  ;;  %v18874_v8 = vld [vmem:[#allocation2 + $0x650] sm:$0xff]  }
  0xb0   :  { %16480 = vmatprep.subr.bf16.mxu1 %v18866_v9  ;;  %v18921_v4 = vld [vmem:[#allocation2 + $0x2b0] sm:$0xff]   ;;  %v18925_v9 = vld [vmem:[#allocation2 + $0x2a8] sm:$0xff]  }
  0xb1   :  { %16453 = vmatpush3.bf16.msra.mxu0 %v18865_v6  ;;  %v18922_v5 = vld [vmem:[#allocation2 + $0x370] sm:$0xff]  }
  0xb2   :  { %16454 = vmatprep.subr.bf16.mxu0 %v18868_v13  ;;  %v18923_v6 = vld [vmem:[#allocation2 + $0x330] sm:$0xff]   ;;  %v18929_v13 = vld [vmem:[#allocation2 + $0x2a0] sm:$0xff]  }
  0xb3   :  { %16481 = vmatpush3.bf16.msra.mxu1 %v18867_v10  ;;  %v19986_v10 = vld [vmem:[%s22102_s0 + $0x4] ss:$40 sps:$4 sm:$0xff]  }
  0xb4   :  { %16482 = vmatprep.subr.bf16.mxu1 %v18870_v57  ;;  %v18931_v57 = vld [vmem:[#allocation2 + $0x320] sm:$0xff]  }
  0xb5   :  { %16455 = vmatpush3.bf16.msra.mxu0 %v18869_v14  ;;  %v19987_v14 = vld [vmem:[%s22102_s0 + $0xc] ss:$40 sps:$4 sm:$0xff]  }
  0xb6   :  { %16456 = vmatprep.subr.bf16.mxu0 %v18872_v33  ;;  %v18933_v33 = vld [vmem:[#allocation2 + $0x298] sm:$0xff]  }
  0xb7   :  { %16483 = vmatpush3.bf16.msra.mxu1 %v18871_v15  ;;  %v18932_v15 = vld [vmem:[#allocation2 + $0x2d8] sm:$0xff]  }
  0xb8   :  { %16484 = vmatprep.subr.bf16.mxu1 %v18874_v8  ;;  %v18936_v8 = vld [vmem:[#allocation2 + $0x2d0] sm:$0xff]  }
  0xb9   :  { %16457 = vmatpush3.bf16.msra.mxu0 %v18873_v16  ;;  %v18934_v16 = vld [vmem:[#allocation2 + $0x358] sm:$0xff]  }
  0xba   :  { %16458 = vmatprep.subr.bf16.mxu0 %v18876_v18  ;;  %v18938_v18 = vld [vmem:[#allocation2 + $0x350] sm:$0xff]  }
  0xbb   :  { %16485 = vmatpush3.bf16.msra.mxu1 %v18875_v17  ;;  %v18937_v17 = vld [vmem:[#allocation2 + $0x290] sm:$0xff]  }
  0xbc   :  { %16486 = vmatprep.subr.bf16.mxu1 %v18878_v22  ;;  %v18940_v22 = vld [vmem:[#allocation2 + $0x2c8] sm:$0xff]  }
  0xbd   :  { %16459 = vmatpush3.bf16.msra.mxu0 %v18877_v20  ;;  %v18939_v20 = vld [vmem:[#allocation2 + $0x310] sm:$0xff]  }
  0xbe   :  { %16460 = vmatprep.subr.bf16.mxu0 %v18880_v26  ;;  %v18942_v26 = vld [vmem:[#allocation2 + $0x348] sm:$0xff]  }
  0xbf   :  { %16487 = vmatpush3.bf16.msra.mxu1 %v18879_v24  ;;  %v18941_v24 = vld [vmem:[#allocation2 + $0x288] sm:$0xff]  }
  0xc0   :  { %16488 = vmatprep.subr.bf16.mxu1 %v18882_v28  ;;  %v18944_v28 = vld [vmem:[#allocation2 + $0x2c0] sm:$0xff]  }
  0xc1   :  { %16461 = vmatpush3.bf16.msra.mxu0 %v18881_v27  ;;  %v18943_v27 = vld [vmem:[#allocation2 + $0x308] sm:$0xff]  }
  0xc2   :  { %16502 = vmatprep.subr.bf16.mxu0 %v18884_v30  ;;  %v18946_v30 = vld [vmem:[#allocation2 + $0x340] sm:$0xff]  }
  0xc3   :  { %16489 = vmatpush3.bf16.msra.mxu1 %v18883_v29  ;;  %v18945_v29 = vld [vmem:[#allocation2 + $0x280] sm:$0xff]  }
  0xc4   :  { %1980 = vmatmul.mubr.bf16.vlgmr.msra.gmra.mxu0 %v20200_v35  ;;  %16530 = vmatprep.subr.bf16.mxu1 %v18886_v36  ;;  %v18892_v35 = vld [vmem:[#allocation2 + $0x6e8] sm:$0xff]   ;;  %v18948_v36 = vld [vmem:[#allocation2 + $0x3f8] sm:$0xff]  }
  0xc5   :  { %16503 = vmatpush3.bf16.msra.mxu0 %v18885_v31  ;;  %1987 = vmatprep.mubr.bf16.mxu0 %v20213_v55  ;;  %v18895_v55 = vld [vmem:[#allocation2 + $0x728] sm:$0xff]   ;;  %v18947_v31 = vld [vmem:[#allocation2 + $0x300] sm:$0xff]  }
  0xc6   :  { %2029 = vmatmul.mubr.bf16.vlgmr.msra.gmra.mxu1 %v20232_v7  ;;  %16504 = vmatprep.subr.bf16.mxu0 %v18888_v38  ;;  %v18896_v7 = vld [vmem:[#allocation2 + $0x6e0] sm:$0xff]  }
  0xc7   :  { %16531 = vmatpush3.bf16.msra.mxu1 %v18887_v37  ;;  %2036 = vmatprep.mubr.bf16.mxu1 %v20256_v19  ;;  %v18897_v19 = vld [vmem:[#allocation2 + $0x6a0] sm:$0xff]   ;;  %v18949_v37 = vld [vmem:[#allocation2 + $0x3b8] sm:$0xff]  }
  0xc8   :  { %16532 = vmatprep.subr.bf16.mxu1 %v18890_v40  ;;  %v19988_v38 = vld [vmem:[%s22102_s0] ss:$40 sps:$4 sm:$0xff]   ;;  %v18951_v40 = vld [vmem:[#allocation2 + $0x438] sm:$0xff]  }
  0xc9   :  { %16505 = vmatpush3.bf16.msra.mxu0 %v18889_v39  ;;  %v18950_v39 = vld [vmem:[#allocation2 + $0x478] sm:$0xff]  }
  0xca   :  { %16506 = vmatprep.subr.bf16.mxu0 %v18892_v35  ;;  %v19990_v35 = vld [vmem:[%s22102_s0 + $0x8] ss:$40 sps:$4 sm:$0xff]  }
  0xcb   :  { %16533 = vmatpush3.bf16.msra.mxu1 %v18891_v41  ;;  %v19989_v41 = vld [vmem:[%s22102_s0 + $0x54] ss:$40 sps:$4 sm:$0xff]  }
  0xcc   :  { %1988 = vmatmul.mubr.bf16.gmra.mxu0 %v20225_v58  ;;  %16534 = vmatprep.subr.bf16.mxu1 %v18894_v42  ;;  %v18901_v58 = vld [vmem:[#allocation2 + $0x698] sm:$0xff]   ;;  %v18953_v42 = vld [vmem:[#allocation2 + $0x3b0] sm:$0xff]  }
  0xcd   :  { %16507 = vmatpush3.bf16.msra.mxu0 %v18893_v32  ;;  %2077 = vmatprep.mubr.bf16.mxu0 %v20249_v12  ;;  %v18903_v12 = vld [vmem:[#allocation2 + $0x718] sm:$0xff]   ;;  %v18952_v32 = vld [vmem:[#allocation2 + $0x3f0] sm:$0xff]  }
  0xce   :  { %2037 = vmatmul.mubr.bf16.gmra.mxu1 %v20262_v21  ;;  %16508 = vmatprep.subr.bf16.mxu0 %v18896_v7  ;;  %v18905_v21 = vld [vmem:[#allocation2 + $0x690] sm:$0xff]  }
  0xcf   :  { %16535 = vmatpush3.bf16.msra.mxu1 %v18895_v55  ;;  %2126 = vmatprep.mubr.bf16.mxu1 %v20286_v51  ;;  %v18908_v51 = vld [vmem:[#allocation2 + $0x6c8] sm:$0xff]   ;;  %v19991_v55 = vld [vmem:[%s22102_s0 + $0x5c] ss:$40 sps:$4 sm:$0xff]   ;;  %v18954_v7 = vld [vmem:[#allocation2 + $0x470] sm:$0xff]  }
  0xd0   :  { %16536 = vmatprep.subr.bf16.mxu1 %v18898_v43  ;;  %v18956_v43 = vld [vmem:[#allocation2 + $0x3e8] sm:$0xff]  }
  0xd1   :  { %16509 = vmatpush3.bf16.msra.mxu0 %v18897_v19  ;;  %v18955_v19 = vld [vmem:[#allocation2 + $0x430] sm:$0xff]  }
  0xd2   :  { %16510 = vmatprep.subr.bf16.mxu0 %v18900_v45  ;;  %v19992_v45 = vld [vmem:[%s22102_s0 + $0x50] ss:$40 sps:$4 sm:$0xff]  }
  0xd3   :  { %16537 = vmatpush3.bf16.msra.mxu1 %v18899_v44  ;;  %v18957_v44 = vld [vmem:[#allocation2 + $0x3a8] sm:$0xff]  }
  0xd4   :  { %16538 = vmatprep.subr.bf16.mxu1 %v18902_v46  ;;  %v18959_v46 = vld [vmem:[#allocation2 + $0x428] sm:$0xff]  }
  0xd5   :  { %16511 = vmatpush3.bf16.msra.mxu0 %v18901_v58  ;;  %v18958_v58 = vld [vmem:[#allocation2 + $0x468] sm:$0xff]  }
  0xd6   :  { %16512 = vmatprep.subr.bf16.mxu0 %v18904_v47  ;;  %v19994_v47 = vld [vmem:[%s22102_s0 + $0x58] ss:$40 sps:$4 sm:$0xff]  }
  0xd7   :  { %16539 = vmatpush3.bf16.msra.mxu1 %v18903_v12  ;;  %v19993_v12 = vld [vmem:[%s22102_s0 + $0x14] ss:$40 sps:$4 sm:$0xff]  }
  0xd8   :  { %16540 = vmatprep.subr.bf16.mxu1 %v18906_v48  ;;  %v18961_v48 = vld [vmem:[#allocation2 + $0x3a0] sm:$0xff]  }
  0xd9   :  { %16513 = vmatpush3.bf16.msra.mxu0 %v18905_v21  ;;  %v18960_v21 = vld [vmem:[#allocation2 + $0x3e0] sm:$0xff]  }
  0xda   :  { %16514 = vmatprep.subr.bf16.mxu0 %v18908_v51  ;;  %v18962_v51 = vld [vmem:[#allocation2 + $0x460] sm:$0xff]  }
  0xdb   :  { %16541 = vmatpush3.bf16.msra.mxu1 %v18907_v49  ;;  %v19995_v49 = vld [vmem:[%s22102_s0 + $0x1c] ss:$40 sps:$4 sm:$0xff]  }
  0xdc   :  { %16542 = vmatprep.subr.bf16.mxu1 %v18910_v53  ;;  %v18964_v53 = vld [vmem:[#allocation2 + $0x3d8] sm:$0xff]  }
  0xdd   :  { %16515 = vmatpush3.bf16.msra.mxu0 %v18909_v52  ;;  %v18963_v52 = vld [vmem:[#allocation2 + $0x420] sm:$0xff]  }
  0xde   :  { %16516 = vmatprep.subr.bf16.mxu0 %v18912_v59  ;;  %v18966_v59 = vld [vmem:[#allocation2 + $0x458] sm:$0xff]  }
  0xdf   :  { %16543 = vmatpush3.bf16.msra.mxu1 %v18911_v56  ;;  %v18965_v56 = vld [vmem:[#allocation2 + $0x398] sm:$0xff]  }
  0xe0   :  { %16544 = vmatprep.subr.bf16.mxu1 %v18914_v61  ;;  %v18968_v61 = vld [vmem:[#allocation2 + $0x3d0] sm:$0xff]  }
  0xe1   :  { %16517 = vmatpush3.bf16.msra.mxu0 %v18913_v60  ;;  %v18967_v60 = vld [vmem:[#allocation2 + $0x418] sm:$0xff]  }
  0xe2   :  { %16558 = vmatprep.subr.bf16.mxu0 %v18916_v63  ;;  %v18970_v63 = vld [vmem:[#allocation2 + $0x450] sm:$0xff]  }
  0xe3   :  { %16545 = vmatpush3.bf16.msra.mxu1 %v18915_v62  ;;  %v18969_v62 = vld [vmem:[#allocation2 + $0x390] sm:$0xff]  }
  0xe4   :  { %2078 = vmatmul.mubr.bf16.vlgmr.msra.gmra.mxu0 %v20244_v11  ;;  %16586 = vmatprep.subr.bf16.mxu1 %v18918_v2  ;;  %v18924_v11 = vld [vmem:[#allocation2 + $0x2e8] sm:$0xff]  }
  0xe5   :  { %16559 = vmatpush3.bf16.msra.mxu0 %v18917_v1  ;;  %2085 = vmatprep.mubr.bf16.mxu0 %v20268_v23  ;;  %v18926_v23 = vld [vmem:[#allocation2 + $0x368] sm:$0xff]  }
  0xe6   :  { %2127 = vmatmul.mubr.bf16.vlgmr.msra.gmra.mxu1 %v20281_v50  ;;  %16560 = vmatprep.subr.bf16.mxu0 %v18920_v3  ;;  %v18927_v50 = vld [vmem:[#allocation2 + $0x328] sm:$0xff]  }
  0xe7   :  { %16587 = vmatpush3.bf16.msra.mxu1 %v18919_v54  ;;  %2134 = vmatprep.mubr.bf16.mxu1 %v20295_v0  ;;  %v18928_v0 = vld [vmem:[#allocation2 + $0x2e0] sm:$0xff]   ;;  %v18971_v54 = vld [vmem:[#allocation2 + $0x410] sm:$0xff]   ;;  %v18972_v3 = vld [vmem:[#allocation2 + $0x3c8] sm:$0xff]  }
  0xe8   :  { %16588 = vmatprep.subr.bf16.mxu1 %v18922_v5 }
  0xe9   :  { %16561 = vmatpush3.bf16.msra.mxu0 %v18921_v4 }
  0xea   :  { %16562 = vmatprep.subr.bf16.mxu0 %v18924_v11 }
  0xeb   :  { %16589 = vmatpush3.bf16.msra.mxu1 %v18923_v6  ;;  %v18973_v6 = vld [vmem:[#allocation2 + $0x388] sm:$0xff]  }
  0xec   :  { %2086 = vmatmul.mubr.bf16.gmra.mxu0 %v20273_v25  ;;  %16590 = vmatprep.subr.bf16.mxu1 %v18926_v23  ;;  %v18930_v25 = vld [vmem:[#allocation2 + $0x360] sm:$0xff]   ;;  %v18974_v23 = vld [vmem:[#allocation2 + $0x448] sm:$0xff]  }
  0xed   :  { %16563 = vmatpush3.bf16.msra.mxu0 %v18925_v9  ;;  %2758 = vmatprep.mubr.bf16.mxu0 %v19986_v10 }
  0xee   :  { %2135 = vmatmul.mubr.bf16.gmra.mxu1 %v20301_v34  ;;  %16564 = vmatprep.subr.bf16.mxu0 %v18928_v0  ;;  %v18935_v34 = vld [vmem:[#allocation2 + $0x318] sm:$0xff]   ;;  %v18975_v0 = vld [vmem:[#allocation2 + $0x408] sm:$0xff]  }
  0xef   :  { %16591 = vmatpush3.bf16.msra.mxu1 %v18927_v50  ;;  %2807 = vmatprep.mubr.bf16.mxu1 %v19987_v14  ;;  %v18976_v14 = vld [vmem:[#allocation2 + $0x3c0] sm:$0xff]  }
  0xf0   :  { %16592 = vmatprep.subr.bf16.mxu1 %v18930_v25 }
  0xf1   :  { %16565 = vmatpush3.bf16.msra.mxu0 %v18929_v13 }
  0xf2   :  { %16566 = vmatprep.subr.bf16.mxu0 %v18932_v15  ;;  %v18977_v15 = vld [vmem:[#allocation2 + $0x380] sm:$0xff]  }
  0xf3   :  { %16593 = vmatpush3.bf16.msra.mxu1 %v18931_v57 }
  0xf4   :  { %16594 = vmatprep.subr.bf16.mxu1 %v18934_v16 }
  0xf5   :  { %16567 = vmatpush3.bf16.msra.mxu0 %v18933_v33 }
  0xf6   :  { %16568 = vmatprep.subr.bf16.mxu0 %v18936_v8  ;;  %v18979_v8 = vld [vmem:[#allocation2 + $0x400] sm:$0xff]  }
  0xf7   :  { %16595 = vmatpush3.bf16.msra.mxu1 %v18935_v34  ;;  %v18978_v34 = vld [vmem:[#allocation2 + $0x440] sm:$0xff]  }
  0xf8   :  { %16596 = vmatprep.subr.bf16.mxu1 %v18938_v18  ;;  %v18980_v18 = vld [vmem:[#allocation2 + $0x4f8] sm:$0xff]  }
  0xf9   :  { %16569 = vmatpush3.bf16.msra.mxu0 %v18937_v17 }
  0xfa   :  { %16570 = vmatprep.subr.bf16.mxu0 %v18940_v22  ;;  %v19996_v22 = vld [vmem:[%s22102_s0 + $0x10] ss:$40 sps:$4 sm:$0xff]  }
  0xfb   :  { %16597 = vmatpush3.bf16.msra.mxu1 %v18939_v20  ;;  %v18981_v20 = vld [vmem:[#allocation2 + $0x4b8] sm:$0xff]  }
  0xfc   :  { %16598 = vmatprep.subr.bf16.mxu1 %v18942_v26  ;;  %v18983_v26 = vld [vmem:[#allocation2 + $0x4b0] sm:$0xff]  }
  0xfd   :  { %16571 = vmatpush3.bf16.msra.mxu0 %v18941_v24  ;;  %v18982_v24 = vld [vmem:[#allocation2 + $0x4f0] sm:$0xff]  }
  0xfe   :  { %16572 = vmatprep.subr.bf16.mxu0 %v18944_v28  ;;  %v19998_v28 = vld [vmem:[%s22102_s0 + $0x18] ss:$40 sps:$4 sm:$0xff]  }
  0xff   :  { %16599 = vmatpush3.bf16.msra.mxu1 %v18943_v27  ;;  %v19997_v27 = vld [vmem:[%s22102_s0 + $0x64] ss:$40 sps:$4 sm:$0xff]  }
 0x100   :  { %16600 = vmatprep.subr.bf16.mxu1 %v18946_v30  ;;  %v19999_v30 = vld [vmem:[%s22102_s0 + $0x6c] ss:$40 sps:$4 sm:$0xff]  }
 0x101   :  { %16573 = vmatpush3.bf16.msra.mxu0 %v18945_v29  ;;  %v18984_v29 = vld [vmem:[#allocation2 + $0x4e8] sm:$0xff]  }
 0x102   :  { %16614 = vmatprep.subr.bf16.mxu0 %v18948_v36  ;;  %v18986_v36 = vld [vmem:[#allocation2 + $0x4e0] sm:$0xff]  }
 0x103   :  { %16601 = vmatpush3.bf16.msra.mxu1 %v18947_v31  ;;  %v18985_v31 = vld [vmem:[#allocation2 + $0x4a8] sm:$0xff]  }
 0x104   :  { %2759 = vmatmul.mubr.bf16.vlgmr.msra.gmra.mxu0 %v19988_v38  ;;  %16642 = vmatprep.subr.bf16.mxu1 %v18950_v39  ;;  %v18987_v38 = vld [vmem:[#allocation2 + $0x4a0] sm:$0xff]  }
 0x105   :  { %16615 = vmatpush3.bf16.msra.mxu0 %v18949_v37  ;;  %2766 = vmatprep.mubr.bf16.mxu0 %v19989_v41  ;;  %v20000_v37 = vld [vmem:[%s22102_s0 + $0x60] ss:$40 sps:$4 sm:$0xff]  }
 0x106   :  { %2808 = vmatmul.mubr.bf16.vlgmr.msra.gmra.mxu1 %v19990_v35  ;;  %16616 = vmatprep.subr.bf16.mxu0 %v18952_v32  ;;  %v20002_v41 = vld [vmem:[%s22102_s0 + $0x68] ss:$40 sps:$4 sm:$0xff]   ;;  %v18988_v35 = vld [vmem:[#allocation2 + $0x4d8] sm:$0xff]  }
 0x107   :  { %16643 = vmatpush3.bf16.msra.mxu1 %v18951_v40  ;;  %2815 = vmatprep.mubr.bf16.mxu1 %v19991_v55  ;;  %v20001_v40 = vld [vmem:[%s22102_s0 + $0x24] ss:$40 sps:$4 sm:$0xff]   ;;  %v18989_v55 = vld [vmem:[#allocation2 + $0x498] sm:$0xff]  }
 0x108   :  { %16644 = vmatprep.subr.bf16.mxu1 %v18954_v7 }
 0x109   :  { %16617 = vmatpush3.bf16.msra.mxu0 %v18953_v42 }
 0x10a   :  { %16618 = vmatprep.subr.bf16.mxu0 %v18956_v43  ;;  %v18990_v43 = vld [vmem:[#allocation2 + $0x4d0] sm:$0xff]  }
 0x10b   :  { %16645 = vmatpush3.bf16.msra.mxu1 %v18955_v19 }
 0x10c   :  { %2767 = vmatmul.mubr.bf16.gmra.mxu0 %v19992_v45  ;;  %16646 = vmatprep.subr.bf16.mxu1 %v18958_v58 }
 0x10d   :  { %16619 = vmatpush3.bf16.msra.mxu0 %v18957_v44  ;;  %2856 = vmatprep.mubr.bf16.mxu0 %v19993_v12  ;;  %v18991_v12 = vld [vmem:[#allocation2 + $0x490] sm:$0xff]  }
 0x10e   :  { %2816 = vmatmul.mubr.bf16.gmra.mxu1 %v19994_v47  ;;  %16620 = vmatprep.subr.bf16.mxu0 %v18960_v21  ;;  %v18992_v21 = vld [vmem:[#allocation2 + $0x4c8] sm:$0xff]  }
 0x10f   :  { %16647 = vmatpush3.bf16.msra.mxu1 %v18959_v46  ;;  %2905 = vmatprep.mubr.bf16.mxu1 %v19995_v49 }
 0x110   :  { %16648 = vmatprep.subr.bf16.mxu1 %v18962_v51 }
 0x111   :  { %16621 = vmatpush3.bf16.msra.mxu0 %v18961_v48 }
 0x112   :  { %16622 = vmatprep.subr.bf16.mxu0 %v18964_v53  ;;  %v18993_v53 = vld [vmem:[#allocation2 + $0x488] sm:$0xff]  }
 0x113   :  { %16649 = vmatpush3.bf16.msra.mxu1 %v18963_v52 }
 0x114   :  { %16650 = vmatprep.subr.bf16.mxu1 %v18966_v59  ;;  %v18995_v59 = vld [vmem:[#allocation2 + $0x480] sm:$0xff]  }
 0x115   :  { %16623 = vmatpush3.bf16.msra.mxu0 %v18965_v56  ;;  %v18994_v56 = vld [vmem:[#allocation2 + $0x4c0] sm:$0xff]  }
 0x116   :  { %16624 = vmatprep.subr.bf16.mxu0 %v18968_v61 }
 0x117   :  { %16651 = vmatpush3.bf16.msra.mxu1 %v18967_v60 }
 0x118   :  { %16652 = vmatprep.subr.bf16.mxu1 %v18970_v63 }
 0x119   :  { %16625 = vmatpush3.bf16.msra.mxu0 %v18969_v62 }
 0x11a   :  { %16626 = vmatprep.subr.bf16.mxu0 %v18972_v3 }
 0x11b   :  { %16653 = vmatpush3.bf16.msra.mxu1 %v18971_v54 }
 0x11c   :  { %16654 = vmatprep.subr.bf16.mxu1 %v18974_v23 }
 0x11d   :  { %16627 = vmatpush3.bf16.msra.mxu0 %v18973_v6 }
 0x11e   :  { %16628 = vmatprep.subr.bf16.mxu0 %v18976_v14 }
 0x11f   :  { %16655 = vmatpush3.bf16.msra.mxu1 %v18975_v0 }
 0x120   :  { %16656 = vmatprep.subr.bf16.mxu1 %v18978_v34 }
 0x121   :  { %16629 = vmatpush3.bf16.msra.mxu0 %v18977_v15 }
 0x122   :  { %16670 = vmatprep.subr.bf16.mxu0 %v18980_v18 }
 0x123   :  { %16657 = vmatpush3.bf16.msra.mxu1 %v18979_v8 }
 0x124   :  { %v16294_v1 = vpop.f32.mrf.mxu0  ;;  %2857 = vmatmul.mubr.bf16.vlgmr.msra.gmra.mxu0 %v19996_v22 }
 0x125   :  { %v16322_v2 = vpop.f32.mrf.mxu1  ;;  %16671 = vmatpush3.bf16.msra.mxu0 %v18981_v20  ;;  %2864 = vmatprep.mubr.bf16.mxu0 %v19997_v27 }
 0x126   :  { %v16295_v4 = vpop.f32.mrf.mxu0  ;;  %2906 = vmatmul.mubr.bf16.vlgmr.msra.gmra.mxu1 %v19998_v28  ;;  %16672 = vmatprep.subr.bf16.mxu0 %v18982_v24 }
 0x127   :  { %v16323_v5 = vpop.f32.mrf.mxu1  ;;  %v16296_v11 = vadd.f32 %v16295_v4, %v16294_v1  ;;  %2913 = vmatprep.mubr.bf16.mxu1 %v19999_v30 }
 0x128   :  { %v16324_v9 = vadd.f32 %v16323_v5, %v16322_v2  ;;  %v16297_v50 = vpop.f32.mrf.mxu0 }
 0x129   :  { %v16325_v10 = vpop.f32.mrf.mxu1  ;;  %16673 = vmatpush3.bf16.msra.mxu0 %v18983_v26 }
 0x12a   :  { %v20351_v13 = vadd.f32 %v16324_v9, %v16296_v11  ;;  %v16298_v25 = vpop.f32.mrf.mxu0  ;;  %16674 = vmatprep.subr.bf16.mxu0 %v18984_v29  ;;  %v20003_v11 = vld [vmem:[%s22102_s0 + $0x20] ss:$40 sps:$4 sm:$0xff]  }
 0x12b   :  { %v16326_v57 = vpop.f32.mrf.mxu1  ;;  %v16299_v33 = vadd.f32 %v16298_v25, %v16297_v50  ;;  %v20004_v50 = vld [vmem:[%s22102_s0 + $0x74] ss:$40 sps:$4 sm:$0xff]  }
 0x12c   :  { %v16327_v16 = vadd.f32 %v16326_v57, %v16325_v10  ;;  %2865 = vmatmul.mubr.bf16.gmra.mxu0 %v20000_v37  ;;  %v16300_v39 = vpop.f32.mrf.mxu0 }
 0x12d   :  { %16675 = vmatpush3.bf16.msra.mxu0 %v18985_v31  ;;  %2954 = vmatprep.mubr.bf16.mxu0 %v20001_v40  ;;  %v16328_v32 = vpop.f32.mrf.mxu1 }
 0x12e   :  { %v20353_v17 = vadd.f32 %v16327_v16, %v16299_v33  ;;  %2914 = vmatmul.mubr.bf16.gmra.mxu1 %v20002_v41  ;;  %16676 = vmatprep.subr.bf16.mxu0 %v18986_v36  ;;  %v16301_v42 = vpop.f32.mrf.mxu0  ;;  %v20005_v16 = vld [vmem:[%s22102_s0 + $0x70] ss:$40 sps:$4 sm:$0xff]  }
 0x12f   :  { %v16302_v7 = vadd.f32 %v16301_v42, %v16300_v39  ;;  %v16329_v19 = vpop.f32.mrf.mxu1 }
 0x130   :  { %v16330_v44 = vadd.f32 %v16329_v19, %v16328_v32  ;;  %v16303_v45 = vpop.f32.mrf.mxu0 }
 0x131   :  { %16677 = vmatpush3.bf16.msra.mxu0 %v18987_v38  ;;  %v16331_v58 = vpop.f32.mrf.mxu1 }
 0x132   :  { %16678 = vmatprep.subr.bf16.mxu0 %v18988_v35  ;;  %v945_v46 = vadd.f32 %v16330_v44, %v16302_v7  ;;  %v16304_v47 = vpop.f32.mrf.mxu0 }
 0x133   :  { %v16305_v48 = vadd.f32 %v16304_v47, %v16303_v45  ;;  %v16332_v49 = vpop.f32.mrf.mxu1 }
 0x134   :  { %v16333_v51 = vadd.f32 %v16332_v49, %v16331_v58  ;;  %v18997_v49 = vld [vmem:[#allocation2 + $0x838] sm:$0xff]  }
 0x135   :  { %16679 = vmatpush3.bf16.msra.mxu0 %v18989_v55 }
 0x136   :  { %16680 = vmatprep.subr.bf16.mxu0 %v18990_v43  ;;  %v948_v52 = vadd.f32 %v16333_v51, %v16305_v48  ;;  %v18996_v48 = vld [vmem:[#allocation2 + $0x7b8] sm:$0xff]   ;;  %v18998_v51 = vld [vmem:[#allocation2 + $0x7b0] sm:$0xff]  }
 0x137   :  { %17346 = vmatprep.subr.bf16.mxu1 %v18996_v48 }
 0x138   :  { %17347 = vmatpush3.bf16.msra.mxu1 %v18996_v48 }
 0x139   :  { %16681 = vmatpush3.bf16.msra.mxu0 %v18991_v12  ;;  %17348 = vmatprep.subr.bf16.mxu1 %v18998_v51 }
 0x13a   :  { %16682 = vmatprep.subr.bf16.mxu0 %v18992_v21 }
 0x13c   :  { %17349 = vmatpush3.bf16.msra.mxu1 %v18998_v51 }
 0x13d   :  { %16683 = vmatpush3.bf16.msra.mxu0 %v18993_v53 }
 0x13e   :  { %16684 = vmatprep.subr.bf16.mxu0 %v18994_v56  ;;  %v18999_v56 = vld [vmem:[#allocation2 + $0x830] sm:$0xff]  }
 0x141   :  { %16685 = vmatpush3.bf16.msra.mxu0 %v18995_v59 }
 0x142   :  { %17366 = vmatprep.subr.bf16.mxu0 %v18997_v49 }
 0x144   :  { %v16350_v60 = vpop.f32.mrf.mxu0  ;;  %2955 = vmatmul.mubr.bf16.vlgmr.msra.gmra.mxu0 %v20003_v11 }
 0x145   :  { %v16378_v63 = vpop.f32.mrf.mxu1  ;;  %2962 = vmatprep.mubr.bf16.mxu0 %v20004_v50  ;;  %17367 = vmatpush3.bf16.msra.mxu0 %v18997_v49 }
 0x146   :  { %v16351_v61 = vpop.f32.mrf.mxu0  ;;  %17368 = vmatprep.subr.bf16.mxu0 %v18999_v56 }
 0x147   :  { %v16352_v62 = vadd.f32 %v16351_v61, %v16350_v60  ;;  %v16379_v54 = vpop.f32.mrf.mxu1 }
 0x148   :  { %v16353_v1 = vpop.f32.mrf.mxu0  ;;  %v16380_v3 = vadd.f32 %v16379_v54, %v16378_v63  ;;  %v19001_v63 = vld [vmem:[#allocation2 + $0x828] sm:$0xff]   ;;  %v19003_v54 = vld [vmem:[#allocation2 + $0x820] sm:$0xff]  }
 0x149   :  { %v986_v2 = vadd.f32 %v16352_v62, %v20351_v13  ;;  %v16381_v6 = vpop.f32.mrf.mxu1  ;;  %17369 = vmatpush3.bf16.msra.mxu0 %v18999_v56  ;;  %v19000_v62 = vld [vmem:[#allocation2 + $0x7a8] sm:$0xff]  }
 0x14a   :  { %v16354_v4 = vpop.f32.mrf.mxu0  ;;  %17350 = vmatprep.subr.bf16.mxu1 %v19000_v62  ;;  %17370 = vmatprep.subr.bf16.mxu0 %v19001_v63 }
 0x14b   :  { %v16355_v5 = vadd.f32 %v16354_v4, %v16353_v1  ;;  %v1035_v9 = vadd.f32 %v16380_v3, %v986_v2  ;;  %v16382_v10 = vpop.f32.mrf.mxu1  ;;  %17351 = vmatpush3.bf16.msra.mxu1 %v19000_v62  ;;  %v19002_v2 = vld [vmem:[#allocation2 + $0x7a0] sm:$0xff]   ;;  %v19004_v4 = vld [vmem:[#allocation2 + $0x798] sm:$0xff]   ;;  %v22133_v62 = vmov 0 }
 0x14c   :  { %v16383_v0 = vadd.f32 %v16382_v10, %v16381_v6  ;;  %v16356_v13 = vpop.f32.mrf.mxu0  ;;  %2963 = vmatmul.mubr.bf16.gmra.mxu0 %v20005_v16  ;;  %17352 = vmatprep.subr.bf16.mxu1 %v19002_v2 }
 0x14d   :  { %v989_v23 = vadd.f32 %v16355_v5, %v20353_v17  ;;  %v16384_v15 = vpop.f32.mrf.mxu1  ;;  %17371 = vmatpush3.bf16.msra.mxu0 %v19001_v63  ;;  %v19005_v5 = vld [vmem:[#allocation2 + $0x818] sm:$0xff]  }
 0x14e   :  { %v16357_v25 = vpop.f32.mrf.mxu0  ;;  %17372 = vmatprep.subr.bf16.mxu0 %v19003_v54 }
 0x14f   :  { %v1038_v14 = vadd.f32 %v16383_v0, %v989_v23  ;;  %v16358_v57 = vadd.f32 %v16357_v25, %v16356_v13  ;;  %v16385_v8 = vpop.f32.mrf.mxu1  ;;  %17353 = vmatpush3.bf16.msra.mxu1 %v19002_v2  ;;  %v19007_v23 = vld [vmem:[#allocation2 + $0x810] sm:$0xff]   ;;  %v19008_v0 = vld [vmem:[#allocation2 + $0x788] sm:$0xff]  }
 0x150   :  { %v16359_v33 = vpop.f32.mrf.mxu0  ;;  %v16386_v17 = vadd.f32 %v16385_v8, %v16384_v15  ;;  %17354 = vmatprep.subr.bf16.mxu1 %v19004_v4  ;;  %v19009_v13 = vld [vmem:[#allocation2 + $0x808] sm:$0xff]   ;;  %v19011_v15 = vld [vmem:[#allocation2 + $0x800] sm:$0xff]   ;;  %v19012_v8 = vld [vmem:[#allocation2 + $0x7f8] sm:$0xff]  }
 0x151   :  { %v994_v34 = vadd.f32 %v16358_v57, %v945_v46  ;;  %v16387_v22 = vpop.f32.mrf.mxu1  ;;  %17373 = vmatpush3.bf16.msra.mxu0 %v19003_v54  ;;  %v19010_v57 = vld [vmem:[#allocation2 + $0x780] sm:$0xff]  }
 0x152   :  { %v16360_v18 = vpop.f32.mrf.mxu0  ;;  %17374 = vmatprep.subr.bf16.mxu0 %v19005_v5 }
 0x153   :  { %v16361_v20 = vadd.f32 %v16360_v18, %v16359_v33  ;;  %v1043_v24 = vadd.f32 %v16386_v17, %v994_v34  ;;  %v16388_v27 = vpop.f32.mrf.mxu1  ;;  %17355 = vmatpush3.bf16.msra.mxu1 %v19004_v4 }
 0x154   :  { %v16389_v28 = vadd.f32 %v16388_v27, %v16387_v22 }
 0x155   :  { %v997_v26 = vadd.f32 %v16361_v20, %v948_v52  ;;  %17375 = vmatpush3.bf16.msra.mxu0 %v19005_v5 }
 0x156   :  { %17376 = vmatprep.subr.bf16.mxu0 %v19007_v23 }
 0x157   :  { %v1046_v29 = vadd.f32 %v16389_v28, %v997_v26 }
 0x159   :  { %17377 = vmatpush3.bf16.msra.mxu0 %v19007_v23 }
 0x15a   :  { %17378 = vmatprep.subr.bf16.mxu0 %v19009_v13 }
 0x15d   :  { %17379 = vmatpush3.bf16.msra.mxu0 %v19009_v13 }
 0x15e   :  { %17380 = vmatprep.subr.bf16.mxu0 %v19011_v15 }
 0x161   :  { %17381 = vmatpush3.bf16.msra.mxu0 %v19011_v15 }
 0x164   :  { %v16406_v30 = vpop.f32.mrf.mxu0 }
 0x165   :  { %v20398_v52 = vpop.f32.mrf.mxu1 }
 0x166   :  { %v16407_v31 = vpop.f32.mrf.mxu0 }
 0x167   :  { %v16408_v36 = vadd.f32 %v16407_v31, %v16406_v30  ;;  %v20403_v59 = vpop.f32.mrf.mxu1 }
 0x168   :  { %v16409_v37 = vpop.f32.mrf.mxu0 }
 0x169   :  { %v20387_v38 = vadd.f32 %v16408_v36, %v1035_v9  ;;  %v20405_v60 = vpop.f32.mrf.mxu1  ;;  %v19006_v9 = vld [vmem:[#allocation2 + $0x790] sm:$0xff]  }
 0x16a   :  { %v16410_v39 = vpop.f32.mrf.mxu0  ;;  %17356 = vmatprep.subr.bf16.mxu1 %v19006_v9 }
 0x16b   :  { %v16411_v40 = vadd.f32 %v16410_v39, %v16409_v37  ;;  %v2148_v35 = vrot.slane %v20387_v38, 7  ;;  %v20407_v61 = vpop.f32.mrf.mxu1  ;;  %17357 = vmatpush3.bf16.msra.mxu1 %v19006_v9 }
 0x16c   :  { %v16412_v32 = vpop.f32.mrf.mxu0  ;;  %17358 = vmatprep.subr.bf16.mxu1 %v19008_v0 }
 0x16d   :  { %v1087_v41 = vadd.f32 %v16411_v40, %v1038_v14  ;;  %v20409_v1 = vpop.f32.mrf.mxu1  ;;  %v2159_v56 = vsel %vm2147_vm0, 0.0, %v2148_v35 }
 0x16e   :  { %v16413_v55 = vpop.f32.mrf.mxu0 }
 0x16f   :  { %v2149_v42 = vrot.slane %v1087_v41, 7  ;;  %v16414_v7 = vadd.f32 %v16413_v55, %v16412_v32  ;;  %v20411_v3 = vpop.f32.mrf.mxu1  ;;  %17359 = vmatpush3.bf16.msra.mxu1 %v19008_v0 }
 0x170   :  { %v16415_v43 = vpop.f32.mrf.mxu0  ;;  %17360 = vmatprep.subr.bf16.mxu1 %v19010_v57 }
 0x171   :  { %v20393_v19 = vsel %vm2147_vm0, %v2148_v35, %v2149_v42  ;;  %v1092_v44 = vadd.f32 %v16414_v7, %v1043_v24  ;;  %v20415_v11 = vpop.f32.mrf.mxu1 }
 0x172   :  { %22128 = vst [vmem:[#allocation13_spill] sm:$0xff] %v20393_v19  ;;  %v16416_v45 = vpop.f32.mrf.mxu0 }
 0x173   :  { %v2151_v58 = vrot.slane %v1092_v44, 7  ;;  %v16417_v46 = vadd.f32 %v16416_v45, %v16415_v43  ;;  %v20419_v10 = vpop.f32.mrf.mxu1  ;;  %17361 = vmatpush3.bf16.msra.mxu1 %v19010_v57  ;;  %v22109_v43 = vlaneseq }
 0x174   :  { %17386 = vmatprep.subr.bf16.mxu1 %v19012_v8 }
 0x175   :  { %v1095_v12 = vadd.f32 %v16417_v46, %v1046_v29  ;;  %v20396_v47 = vsel %vm2147_vm0, %v2149_v42, %v2151_v58 }
 0x176   :  { %22129 = vst [vmem:[#allocation14_spill] sm:$0xff] %v20396_v47 }
 0x177   :  { %v2153_v21 = vrot.slane %v1095_v12, 7 }
 0x179   :  { %v20401_v53 = vsel %vm2147_vm0, %v2151_v58, %v2153_v21  ;;  %v20462_v58 = vshrl.u32 %v22109_v43, 7 }
 0x17a   :  { %22130 = vst [vmem:[#allocation15_spill] sm:$0xff] %v20401_v53 }
 0x17b   :  { %22131 = vst [vmem:[#allocation16_spill] sm:$0xff] %v20462_v58  ;;  %v2186_v21 = vand.u32 15, %v20462_v58  ;;  %v20470_v51 = vadd.s32 16, %v20462_v58  ;;  %v20485_v5 = vadd.s32 8, %v20462_v58 }
 0x17d   :  { %vm20475_vm1 = vcmp.ne.s32.totalorder %v2186_v21, 0  ;;  %v2200_v54 = vand.u32 15, %v20470_v51 }
 0x17e   :  { %v22134_v62 = vsel %vm20475_vm1, 4294967295, %v22133_v62  ;;  %v2234_v4 = vsel %vm20475_vm1, %v2159_v56, 0.0 }
 0x17f   :  { %22135 = vst [vmem:[#allocation18_spill] sm:$0xff] %v22134_v62  ;;  %vm20532_vm3 = vcmp.ne.s32.totalorder %v2200_v54, 0 }
 0x184   :  { %v20413_v6 = vpop.f32.mrf.mxu0 }
 0x186   :  { %v20417_v50 = vpop.f32.mrf.mxu0  ;;  %v20423_v25 = vpop.f32.mrf.mxu1 }
 0x188   :  { %v20421_v14 = vpop.f32.mrf.mxu0  ;;  %v20427_v16 = vpop.f32.mrf.mxu1 }
 0x189   :  { %v16492_v19 = vadd.f32 %v20427_v16, %v20423_v25 }
 0x18a   :  { %v20425_v33 = vpop.f32.mrf.mxu0  ;;  %v20429_v17 = vpop.f32.mrf.mxu1 }
 0x18c   :  { %v16468_v34 = vpop.f32.mrf.mxu0  ;;  %v20431_v20 = vpop.f32.mrf.mxu1 }
 0x18e   :  { %v16469_v18 = vpop.f32.mrf.mxu0  ;;  %v20435_v24 = vpop.f32.mrf.mxu1 }
 0x190   :  { %v20433_v22 = vpop.f32.mrf.mxu0  ;;  %v20439_v27 = vpop.f32.mrf.mxu1 }
 0x192   :  { %v20437_v26 = vpop.f32.mrf.mxu0  ;;  %v20443_v29 = vpop.f32.mrf.mxu1 }
 0x194   :  { %v20445_v31 = vpop.f32.mrf.mxu1 }
 0x1a4   :  { %v20441_v28 = vpop.f32.mrf.mxu0 }
 0x1a6   :  { %v16519_v30 = vpop.f32.mrf.mxu0  ;;  %v20447_v37 = vpop.f32.mrf.mxu1 }
 0x1a8   :  { %v16521_v36 = vpop.f32.mrf.mxu0  ;;  %v20449_v40 = vpop.f32.mrf.mxu1 }
 0x1aa   :  { %v16522_v39 = vpop.f32.mrf.mxu0  ;;  %v20451_v32 = vpop.f32.mrf.mxu1 }
 0x1ac   :  { %v16524_v41 = vpop.f32.mrf.mxu0  ;;  %v20453_v55 = vpop.f32.mrf.mxu1 }
 0x1ae   :  { %v16525_v42 = vpop.f32.mrf.mxu0  ;;  %v20457_v44 = vpop.f32.mrf.mxu1 }
 0x1b0   :  { %v20455_v7 = vpop.f32.mrf.mxu0  ;;  %v20464_v46 = vpop.f32.mrf.mxu1 }
 0x1b2   :  { %v20459_v45 = vpop.f32.mrf.mxu0  ;;  %v20467_v48 = vpop.f32.mrf.mxu1 }
 0x1b3   :  { %22132 = vst [vmem:[#allocation17_spill] sm:$0xff] %v20467_v48 }
 0x1b4   :  { %v20479_v63 = vpop.f32.mrf.mxu1 }
 0x1b5   :  { %22136 = vst [vmem:[#allocation19_spill] sm:$0xff] %v20479_v63  ;;  %v16464_v63 = vadd.f32 %v20417_v50, %v20413_v6  ;;  %v16495_v50 = vadd.f32 %v20431_v20, %v20429_v17 }
 0x1ba   :  { %v22148_v54 = vld [vmem:[#allocation17_spill] sm:$0xff] }
 0x1c4   :  { %v16574_v12 = vpop.f32.mrf.mxu0 }
 0x1c6   :  { %v16575_v49 = vpop.f32.mrf.mxu0  ;;  %v16602_v9 = vpop.f32.mrf.mxu1 }
 0x1c7   :  { %v16576_v25 = vadd.f32 %v16575_v49, %v16574_v12  ;;  %v2193_v12 = vand.u32 15, %v20485_v5 }
 0x1c8   :  { %v16577_v2 = vpop.f32.mrf.mxu0  ;;  %v16603_v38 = vpop.f32.mrf.mxu1 }
 0x1c9   :  { %vm20549_vm4 = vcmp.ne.s32.totalorder %v2193_v12, 15 }
 0x1ca   :  { %v16578_v23 = vpop.f32.mrf.mxu0  ;;  %v20487_v35 = vpop.f32.mrf.mxu1 }
 0x1cb   :  { %22137 = vst [vmem:[#allocation20_spill] sm:$0xff] %v20487_v35 }
 0x1cc   :  { %v16580_v0 = vpop.f32.mrf.mxu0  ;;  %v16606_v57 = vpop.f32.mrf.mxu1 }
 0x1ce   :  { %v16581_v13 = vpop.f32.mrf.mxu0  ;;  %v20491_v8 = vpop.f32.mrf.mxu1 }
 0x1cf   :  { %22139 = vst [vmem:[#allocation22_spill] sm:$0xff] %v20491_v8  ;;  %v16470_v8 = vadd.f32 %v16469_v18, %v16468_v34  ;;  %v16526_v18 = vadd.f32 %v16525_v42, %v16524_v41  ;;  %v16529_v41 = vadd.f32 %v20459_v45, %v20455_v7 }
 0x1d0   :  { %v20489_v15 = vpop.f32.mrf.mxu0  ;;  %v20495_v51 = vpop.f32.mrf.mxu1 }
 0x1d1   :  { %22138 = vst [vmem:[#allocation21_spill] sm:$0xff] %v20489_v15  ;;  %22141 = vst [vmem:[#allocation24_spill] sm:$0xff] %v20495_v51  ;;  %v16467_v15 = vadd.f32 %v20425_v33, %v20421_v14  ;;  %v16436_v51 = vadd.f32 %v20403_v59, %v20398_v52  ;;  %v16498_v52 = vadd.f32 %v20439_v27, %v20435_v24 }
 0x1d2   :  { %v20493_v21 = vpop.f32.mrf.mxu0  ;;  %v20497_v43 = vpop.f32.mrf.mxu1  ;;  %v16473_v59 = vadd.f32 %v20437_v26, %v20433_v22  ;;  %v16548_v24 = vadd.f32 %v20449_v40, %v20447_v37  ;;  %v16551_v26 = vadd.f32 %v20453_v55, %v20451_v32  ;;  %v16582_v32 = vadd.f32 %v16581_v13, %v16580_v0 }
 0x1d3   :  { %22140 = vst [vmem:[#allocation23_spill] sm:$0xff] %v20493_v21  ;;  %22142 = vst [vmem:[#allocation25_spill] sm:$0xff] %v20497_v43  ;;  %v16442_v21 = vadd.f32 %v20411_v3, %v20409_v1  ;;  %v16439_v43 = vadd.f32 %v20407_v61, %v20405_v60  ;;  %v1982_v35 = vadd.f32 %v16464_v63, %v16436_v51 }
 0x1d4   :  { %v20499_v53 = vpop.f32.mrf.mxu1  ;;  %v16445_v1 = vadd.f32 %v20419_v10, %v20415_v11  ;;  %v16520_v60 = vadd.f32 %v16519_v30, %v20441_v28  ;;  %v16523_v61 = vadd.f32 %v16522_v39, %v16521_v36  ;;  %v16501_v11 = vadd.f32 %v20445_v31, %v20443_v29 }
 0x1d5   :  { %22143 = vst [vmem:[#allocation26_spill] sm:$0xff] %v20499_v53  ;;  %v1985_v6 = vadd.f32 %v16467_v15, %v16439_v43  ;;  %v1990_v3 = vadd.f32 %v16470_v8, %v16442_v21  ;;  %v2031_v16 = vadd.f32 %v16492_v19, %v1982_v35  ;;  %v2761_v28 = vadd.f32 %v16576_v25, %v2234_v4  ;;  %v22151_v15 = vld [vmem:[#allocation14_spill] sm:$0xff] }
 0x1d6   :  { %v1993_v43 = vadd.f32 %v16473_v59, %v16445_v1  ;;  %v16604_v30 = vadd.f32 %v16603_v38, %v16602_v9  ;;  %v16579_v19 = vadd.f32 %v16578_v23, %v16577_v2  ;;  %v16554_v39 = vadd.f32 %v20464_v46, %v20457_v44  ;;  %v22146_v2 = vld [vmem:[#allocation13_spill] sm:$0xff]  ;;  %v22147_v46 = vld [vmem:[#allocation20_spill] sm:$0xff]  ;;  %v22149_v9 = vld [vmem:[#allocation19_spill] sm:$0xff] }
 0x1d7   :  { %v2034_v34 = vadd.f32 %v16495_v50, %v1985_v6  ;;  %v2039_v20 = vadd.f32 %v16498_v52, %v1990_v3  ;;  %v2080_v10 = vadd.f32 %v16520_v60, %v2031_v16  ;;  %v16607_v4 = vadd.f32 %v16606_v57, %v22147_v46  ;;  %v22152_v6 = vld [vmem:[#allocation22_spill] sm:$0xff] }
 0x1d8   :  { %v2042_v40 = vadd.f32 %v16501_v11, %v1993_v43  ;;  %v2810_v63 = vadd.f32 %v16604_v30, %v2761_v28  ;;  %v2764_v44 = vadd.f32 %v16579_v19, %v22146_v2  ;;  %v16557_v23 = vadd.f32 %v22149_v9, %v22148_v54  ;;  %v22153_v57 = vld [vmem:[#allocation24_spill] sm:$0xff]  ;;  %v22158_v28 = vld [vmem:[#allocation15_spill] sm:$0xff] }
 0x1d9   :  { %v2083_v27 = vadd.f32 %v16523_v61, %v2034_v34  ;;  %v2088_v36 = vadd.f32 %v16526_v18, %v2039_v20  ;;  %v2129_v42 = vadd.f32 %v16548_v24, %v2080_v10  ;;  %v2236_v0 = vsel %vm20532_vm3, %v22151_v15, 0.0  ;;  %v22156_v61 = vld [vmem:[#allocation21_spill] sm:$0xff] }
 0x1da   :  { %v2091_v45 = vadd.f32 %v16529_v41, %v2042_v40  ;;  %v16610_v50 = vadd.f32 %v22153_v57, %v22152_v6  ;;  %v2813_v60 = vadd.f32 %v16607_v4, %v2764_v44  ;;  %v22157_v25 = vld [vmem:[#allocation23_spill] sm:$0xff]  ;;  %v22159_v19 = vld [vmem:[#allocation25_spill] sm:$0xff] }
 0x1db   :  { %v2132_v49 = vadd.f32 %v16551_v26, %v2083_v27  ;;  %v20539_v7 = vadd.f32 %v16554_v39, %v2088_v36  ;;  %v2165_v51 = vrot.slane %v2129_v42, 1  ;;  %v16585_v16 = vadd.f32 %v22157_v25, %v22156_v61  ;;  %v112_v27 = vld [vmem:[#allocation9] ss:$0 sm:$0xff] }
 0x1dc   :  { %v22160_v36 = vld [vmem:[#allocation26_spill] sm:$0xff] }
 0x1dd   :  { %v2166_v59 = vrot.slane %v2132_v49, 1  ;;  %v2168_v34 = vrot.slane %v20539_v7, 1  ;;  %v2772_v30 = vadd.f32 %v16585_v16, %v22158_v28  ;;  %v16613_v39 = vadd.f32 %v22160_v36, %v22159_v19  ;;  %v19023_v28 = vld [vmem:[#allocation2 + $0xc40] sm:$0xff]   ;;  %v19025_v19 = vld [vmem:[#allocation2 + $0xc30] sm:$0xff]   ;;  %v19026_v36 = vld [vmem:[#allocation2 + $0xc28] sm:$0xff]  }
 0x1df   :  { %v2167_v41 = vsel %vm22117_vm2, %v2165_v51, %v2166_v59  ;;  %v2821_v44 = vadd.f32 %v16613_v39, %v2772_v30  ;;  %v19024_v30 = vld [vmem:[#allocation2 + $0xc38] sm:$0xff]  }
 0x1e4   :  { %v16630_v56 = vpop.f32.mrf.mxu0 }
 0x1e6   :  { %v16631_v62 = vpop.f32.mrf.mxu0  ;;  %v16658_v58 = vpop.f32.mrf.mxu1 }
 0x1e7   :  { %v16632_v37 = vadd.f32 %v16631_v62, %v16630_v56  ;;  %v22150_v62 = vld [vmem:[#allocation16_spill] sm:$0xff]  ;;  %v2769_v56 = vadd.f32 %v16582_v32, %v2236_v0 }
 0x1e8   :  { %v16633_v47 = vpop.f32.mrf.mxu0  ;;  %v16659_v53 = vpop.f32.mrf.mxu1  ;;  %v2181_v35 = vadd.s32 24, %v22150_v62 }
 0x1e9   :  { %v2859_v13 = vadd.f32 %v16632_v37, %v2810_v63  ;;  %v16660_v8 = vadd.f32 %v16659_v53, %v16658_v58  ;;  %v2140_v53 = vadd.f32 %v16557_v23, %v2091_v45  ;;  %v2818_v11 = vadd.f32 %v16610_v50, %v2769_v56 }
 0x1ea   :  { %v16634_v48 = vpop.f32.mrf.mxu0  ;;  %v16661_v33 = vpop.f32.mrf.mxu1  ;;  %v2207_v26 = vand.u32 15, %v2181_v35 }
 0x1eb   :  { %v16635_v21 = vadd.f32 %v16634_v48, %v16633_v47  ;;  %v2908_v48 = vadd.f32 %v16660_v8, %v2859_v13 }
 0x1ec   :  { %v16636_v14 = vpop.f32.mrf.mxu0  ;;  %v16662_v22 = vpop.f32.mrf.mxu1  ;;  %vm20561_vm5 = vcmp.ne.s32.totalorder %v2207_v26, 15  ;;  %v20126_v26 = vmov 0.0  }
 0x1ed   :  { %v2862_v18 = vadd.f32 %v16635_v21, %v2813_v60  ;;  %v16663_v20 = vadd.f32 %v16662_v22, %v16661_v33 }
 0x1ee   :  { %v16637_v17 = vpop.f32.mrf.mxu0  ;;  %v16664_v55 = vpop.f32.mrf.mxu1 }
 0x1ef   :  { %v16638_v47 = vadd.f32 %v16637_v17, %v16636_v14  ;;  %v2169_v14 = vsel %vm22117_vm2, %v2166_v59, %v2168_v34  ;;  %v2170_v17 = vrot.slane %v2140_v53, 1  ;;  %v2911_v22 = vadd.f32 %v16663_v20, %v2862_v18  ;;  %v19015_v18 = vld [vmem:[#allocation2 + $0x7e0] sm:$0xff]   ;;  %v19016_v20 = vld [vmem:[#allocation2 + $0x7d8] sm:$0xff]  }
 0x1f0   :  { %v16639_v29 = vpop.f32.mrf.mxu0  ;;  %v16665_v1 = vpop.f32.mrf.mxu1 }
 0x1f1   :  { %v2867_v40 = vadd.f32 %v16638_v47, %v2818_v11  ;;  %v16666_v42 = vadd.f32 %v16665_v1, %v16664_v55  ;;  %v2176_v45 = vsel %vm22117_vm2, %v2170_v17, 0.0  ;;  %v2243_v55 = vsel %vm20549_vm4, %v2169_v14, 0.0  ;;  %v19013_v47 = vld [vmem:[#allocation2 + $0x7f0] sm:$0xff]   ;;  %v19018_v11 = vld [vmem:[#allocation2 + $0x7c8] sm:$0xff]  }
 0x1f2   :  { %v16640_v38 = vpop.f32.mrf.mxu0  ;;  %v16667_v10 = vpop.f32.mrf.mxu1  ;;  %v2245_v13 = vsel %vm20561_vm5, %v2176_v45, 0.0  ;;  %v2171_v51 = vsel %vm22117_vm2, %v2168_v34, %v2170_v17  ;;  %v20006_v34 = vld [vmem:[#allocation2 + $0x7f8] sm:$0xff]  }
 0x1f3   :  { %v16641_v32 = vadd.f32 %v16640_v38, %v16639_v29  ;;  %v2916_v54 = vadd.f32 %v16666_v42, %v2867_v40 }
 0x1f4   :  { %v16668_v63 = vpop.f32.mrf.mxu1 }
 0x1f5   :  { %v2870_v23 = vadd.f32 %v16641_v32, %v2821_v44  ;;  %v16669_v29 = vadd.f32 %v16668_v63, %v16667_v10  ;;  %v19019_v10 = vld [vmem:[#allocation2 + $0x7c0] sm:$0xff]  }
 0x1f7   :  { %v2919_v6 = vadd.f32 %v16669_v29, %v2870_v23  ;;  %v2985_v23 = vld [vmem:[#allocation9 + $0x1] ss:$0 sm:$0xff] }
 0x204   :  { %v16686_v3 = vpop.f32.mrf.mxu0 }
 0x206   :  { %v16687_v58 = vpop.f32.mrf.mxu0 }
 0x207   :  { %v16688_v43 = vadd.f32 %v16687_v58, %v16686_v3 }
 0x208   :  { %v16689_v24 = vpop.f32.mrf.mxu0 }
 0x209   :  { %v2957_v37 = vadd.f32 %v16688_v43, %v2908_v48  ;;  %v19014_v48 = vld [vmem:[#allocation2 + $0x7e8] sm:$0xff]   ;;  %v19017_v43 = vld [vmem:[#allocation2 + $0x7d0] sm:$0xff]  }
 0x20a   :  { %v16690_v33 = vpop.f32.mrf.mxu0 }
 0x20b   :  { %v2971_v12 = vadd.f32 %v2957_v37, %v2167_v41  ;;  %v16691_v49 = vadd.f32 %v16690_v33, %v16689_v24  ;;  %v19020_v24 = vld [vmem:[#allocation2 + $0xc00] sm:$0xff]  }
 0x20c   :  { %v16692_v2 = vpop.f32.mrf.mxu0 }
 0x20d   :  { %v2960_v46 = vadd.f32 %v16691_v49, %v2911_v22  ;;  %v2975_v7 = vadd.f32 %v2971_v12, %v112_v27 }
 0x20e   :  { %v16693_v9 = vpop.f32.mrf.mxu0 }
 0x20f   :  { %v2972_v38 = vadd.f32 %v2960_v46, %v2243_v55  ;;  %v16694_v35 = vadd.f32 %v16693_v9, %v16692_v2  ;;  %v2979_v21 = vmax.f32 %v2975_v7, 0.0 }
 0x210   :  { %v16695_v15 = vpop.f32.mrf.mxu0 }
 0x211   :  { %v2965_v0 = vadd.f32 %v16694_v35, %v2916_v54  ;;  %v2976_v8 = vadd.f32 %v2972_v38, %v112_v27 }
 0x212   :  { %v16696_v56 = vpop.f32.mrf.mxu0 }
 0x213   :  { %v2973_v57 = vadd.f32 %v2965_v0, %v2171_v51  ;;  %v16697_v50 = vadd.f32 %v16696_v56, %v16695_v15  ;;  %v2980_v1 = vmax.f32 %v2976_v8, 0.0 }
 0x215   :  { %v2977_v3 = vadd.f32 %v2973_v57, %v112_v27  ;;  %v2968_v59 = vadd.f32 %v16697_v50, %v2919_v6  ;;  %v2983_v60 = vpack.c.bf16 %v2980_v1, %v2979_v21 }
 0x217   :  { %v2981_v61 = vmax.f32 %v2977_v3, 0.0  ;;  %v2974_v25 = vadd.f32 %v2968_v59, %v2245_v13  ;;  %17362 = vmatprep.mubr.bf16.mxu1 %v2983_v60  ;;  %17382 = vmatprep.mubr.bf16.mxu0 %v2983_v60 }
 0x219   :  { %v2978_v16 = vadd.f32 %v2974_v25, %v112_v27  ;;  %v19022_v27 = vld [vmem:[#allocation2 + $0xc48] sm:$0xff]  }
 0x21b   :  { %v2982_v53 = vmax.f32 %v2978_v16, 0.0 }
 0x21d   :  { %v2984_v58 = vpack.c.bf16 %v2982_v53, %v2981_v61 }
 0x21f   :  { %17363 = vmatmul.mubr.bf16.vlgmr.msra.gmra.mxu1 %v2984_v58  ;;  %17383 = vmatmul.mubr.bf16.vlgmr.msra.gmra.mxu0 %v2984_v58 }
 0x220   :  { %17387 = vmatpush3.bf16.msra.mxu1 %v20006_v34  ;;  %17402 = vmatprep.mubr.bf16.mxu1 %v2983_v60 }
 0x221   :  { %17388 = vmatprep.subr.bf16.mxu1 %v19013_v47  ;;  %17410 = vmatprep.mubr.msk.bf16.mxu0 %vm3393_vm6, %v19020_v24 }
 0x224   :  { %17389 = vmatpush3.bf16.msra.mxu1 %v19013_v47 }
 0x225   :  { %17390 = vmatprep.subr.bf16.mxu1 %v19014_v48 }
 0x228   :  { %17391 = vmatpush3.bf16.msra.mxu1 %v19014_v48 }
 0x229   :  { %17392 = vmatprep.subr.bf16.mxu1 %v19015_v18 }
 0x22c   :  { %17393 = vmatpush3.bf16.msra.mxu1 %v19015_v18 }
 0x22d   :  { %17394 = vmatprep.subr.bf16.mxu1 %v19016_v20 }
 0x230   :  { %17395 = vmatpush3.bf16.msra.mxu1 %v19016_v20 }
 0x231   :  { %17396 = vmatprep.subr.bf16.mxu1 %v19017_v43 }
 0x234   :  { %17397 = vmatpush3.bf16.msra.mxu1 %v19017_v43 }
 0x235   :  { %17398 = vmatprep.subr.bf16.mxu1 %v19018_v11 }
 0x238   :  { %17399 = vmatpush3.bf16.msra.mxu1 %v19018_v11 }
 0x239   :  { %17400 = vmatprep.subr.bf16.mxu1 %v19019_v10 }
 0x23c   :  { %17401 = vmatpush3.bf16.msra.mxu1 %v19019_v10 }
 0x23d   :  { %17414 = vmatprep.subr.bf16.mxu1 %v20126_v26 }
 0x23f   :  { %17403 = vmatmul.mubr.bf16.vlgmr.msra.gmra.mxu1 %v2984_v58 }
 0x240   :  { %17415 = vmatpush3.bf16.msra.mxu1 %v19022_v27  ;;  %17430 = vmatprep.mubr.msk.bf16.mxu1 %vm20127_vm7, %v20126_v26 }
 0x241   :  { %17416 = vmatprep.subr.bf16.mxu1 %v20126_v26 }
 0x244   :  { %17417 = vmatpush3.bf16.msra.mxu1 %v19023_v28 }
 0x245   :  { %17418 = vmatprep.subr.bf16.mxu1 %v20126_v26 }
 0x248   :  { %17419 = vmatpush3.bf16.msra.mxu1 %v19024_v30 }
 0x249   :  { %17420 = vmatprep.subr.bf16.mxu1 %v20126_v26 }
 0x24c   :  { %17421 = vmatpush3.bf16.msra.mxu1 %v19025_v19  ;;  %v19021_v19 = vld [vmem:[#allocation2 + $0xc08] sm:$0xff]  }
 0x24d   :  { %17422 = vmatprep.subr.bf16.mxu1 %v20126_v26 }
 0x250   :  { %17423 = vmatpush3.bf16.msra.mxu1 %v19026_v36  ;;  %v19027_v36 = vld [vmem:[#allocation2 + $0xc20] sm:$0xff]  }
 0x251   :  { %17424 = vmatprep.subr.bf16.mxu1 %v20126_v26 }
 0x254   :  { %17425 = vmatpush3.bf16.msra.mxu1 %v19027_v36 }
 0x255   :  { %17426 = vmatprep.subr.bf16.mxu1 %v20126_v26 }
 0x2df   :  { %v17364_v39 = vpop.f32.mrf.mxu1  ;;  %v17384_v37 = vpop.f32.mrf.mxu0 }
 0x2e0   :  { %v3235_v22 = vrot.slane %v17364_v39, 7  ;;  %v3251_v2 = vrot.slane %v17384_v37, 1  ;;  %v19028_v39 = vld [vmem:[#allocation2 + $0xc18] sm:$0xff]  }
 0x2e1   :  { %v3084_v41 = vpop.f32.mrf.mxu1  ;;  %v3213_v17 = vpop.f32.mrf.mxu0  ;;  %17427 = vmatpush3.bf16.msra.mxu1 %v19028_v39 }
 0x2e2   :  { %v3232_v32 = vrot.slane %v3084_v41, 7  ;;  %v3248_v9 = vrot.slane %v3213_v17, 1  ;;  %17428 = vmatprep.subr.bf16.mxu1 %v20126_v26  ;;  %v19029_v41 = vld [vmem:[#allocation2 + $0xc10] sm:$0xff]  }
 0x2e3   :  { %v17365_v14 = vpop.f32.mrf.mxu1  ;;  %v17385_v42 = vpop.f32.mrf.mxu0 }
 0x2e4   :  { %v3253_v63 = vrot.slane %v17385_v42, 1  ;;  %v3243_v44 = vsel %vm2147_vm0, 0.0, %v3232_v32  ;;  %v3237_v46 = vrot.slane %v17365_v14, 7 }
 0x2e5   :  { %v3087_v40 = vpop.f32.mrf.mxu1  ;;  %v3216_v12 = vpop.f32.mrf.mxu0  ;;  %v3260_v35 = vsel %vm20475_vm1, %v3243_v44, 0.0  ;;  %17429 = vmatpush3.bf16.msra.mxu1 %v19029_v41  ;;  %v19035_v44 = vld [vmem:[#allocation2 + $0x868] sm:$0xff]  }
 0x2e6   :  { %v3233_v33 = vrot.slane %v3087_v40, 7  ;;  %v3249_v7 = vrot.slane %v3216_v12, 1  ;;  %v3254_v29 = vsel %vm22117_vm2, %v3251_v2, %v3253_v63  ;;  %v3259_v0 = vsel %vm22117_vm2, %v3253_v63, 0.0  ;;  %17458 = vmatprep.subr.bf16.mxu1 %v20126_v26  ;;  %v19031_v12 = vld [vmem:[#allocation2 + $0x878] sm:$0xff]   ;;  %v19033_v63 = vld [vmem:[#allocation2 + $0x870] sm:$0xff]  }
 0x2e7   :  { %v3238_v51 = vsel %vm2147_vm0, %v3235_v22, %v3237_v46  ;;  %v3267_v1 = vsel %vm20561_vm5, %v3259_v0, 0.0  ;;  %v19036_v46 = vld [vmem:[#allocation2 + $0x840] sm:$0xff]  }
 0x2e8   :  { %v3236_v49 = vsel %vm2147_vm0, %v3233_v33, %v3235_v22  ;;  %v3250_v21 = vsel %vm22117_vm2, %v3248_v9, %v3249_v7  ;;  %v3252_v6 = vsel %vm22117_vm2, %v3249_v7, %v3251_v2  ;;  %v3234_v3 = vsel %vm2147_vm0, %v3232_v32, %v3233_v33  ;;  %v19030_v32 = vld [vmem:[#allocation2 + $0x858] sm:$0xff]   ;;  %v19034_v2 = vld [vmem:[#allocation2 + $0x848] sm:$0xff]   ;;  %v19037_v7 = vld [vmem:[#allocation2 + $0x860] sm:$0xff]  }
 0x2e9   :  { %v3262_v45 = vsel %vm20532_vm3, %v3236_v49, 0.0  ;;  %v3265_v25 = vsel %vm20549_vm4, %v3252_v6, 0.0  ;;  %v19032_v49 = vld [vmem:[#allocation2 + $0x850] sm:$0xff]   ;;  %v19041_v6 = vld [vmem:[#allocation2 + $0x880] sm:$0xff]  }
 0x2ff   :  { %v17404_v54 = vpop.f32.mrf.mxu1 }
 0x300   :  { %v3359_v55 = vadd.f32 %v17404_v54, %v3262_v45 }
 0x301   :  { %v3350_v15 = vpop.f32.mrf.mxu1 }
 0x302   :  { %v3367_v13 = vadd.f32 %v3359_v55, %v3254_v29  ;;  %v3351_v8 = vadd.f32 %v3350_v15, %v3260_v35 }
 0x303   :  { %v17405_v56 = vpop.f32.mrf.mxu1 }
 0x304   :  { %v3365_v57 = vadd.f32 %v3351_v8, %v3250_v21  ;;  %v3362_v50 = vadd.f32 %v17405_v56, %v3238_v51  ;;  %v3371_v60 = vadd.f32 %v3367_v13, %v2985_v23  ;;  %v19038_v8 = vld [vmem:[#allocation2 + $0x898] sm:$0xff]   ;;  %v19039_v51 = vld [vmem:[#allocation2 + $0x890] sm:$0xff]   ;;  %v19040_v56 = vld [vmem:[#allocation2 + $0x888] sm:$0xff]  }
 0x305   :  { %v3353_v59 = vpop.f32.mrf.mxu1 }
 0x306   :  { %v3368_v61 = vadd.f32 %v3362_v50, %v3267_v1  ;;  %v3354_v16 = vadd.f32 %v3353_v59, %v3234_v3  ;;  %v3369_v53 = vadd.f32 %v3365_v57, %v2985_v23  ;;  %v3375_v48 = vmax.f32 %v3371_v60, 0.0  ;;  %v19042_v57 = vld [vmem:[#allocation2 + $0x8d8] sm:$0xff]   ;;  %v19044_v1 = vld [vmem:[#allocation2 + $0x8d0] sm:$0xff]   ;;  %v19046_v59 = vld [vmem:[#allocation2 + $0x8c8] sm:$0xff]  }
 0x307   :  { %v19043_v50 = vld [vmem:[#allocation2 + $0x958] sm:$0xff]   ;;  %v19045_v3 = vld [vmem:[#allocation2 + $0x950] sm:$0xff]   ;;  %v19047_v60 = vld [vmem:[#allocation2 + $0x948] sm:$0xff]  }
 0x308   :  { %v3372_v47 = vadd.f32 %v3368_v61, %v2985_v23  ;;  %v3366_v58 = vadd.f32 %v3354_v16, %v3265_v25  ;;  %v3373_v20 = vmax.f32 %v3369_v53, 0.0  ;;  %v19048_v61 = vld [vmem:[#allocation2 + $0x8c0] sm:$0xff]   ;;  %v19050_v16 = vld [vmem:[#allocation2 + $0x8b8] sm:$0xff]  }
 0x309   :  { %v19049_v25 = vld [vmem:[#allocation2 + $0x940] sm:$0xff]   ;;  %v19051_v53 = vld [vmem:[#allocation2 + $0x938] sm:$0xff]  }
 0x30a   :  { %v3376_v34 = vmax.f32 %v3372_v47, 0.0  ;;  %v3370_v18 = vadd.f32 %v3366_v58, %v2985_v23  ;;  %v19052_v47 = vld [vmem:[#allocation2 + $0x8b0] sm:$0xff]  }
 0x30b   :  { %v19053_v58 = vld [vmem:[#allocation2 + $0x930] sm:$0xff]  }
 0x30c   :  { %v20594_v43 = vpack.c.bf16 %v3376_v34, %v3375_v48  ;;  %v3374_v11 = vmax.f32 %v3370_v18, 0.0  ;;  %v19054_v48 = vld [vmem:[#allocation2 + $0x8a8] sm:$0xff]   ;;  %v19056_v18 = vld [vmem:[#allocation2 + $0x8a0] sm:$0xff]  }
 0x30d   :  { %v19055_v34 = vld [vmem:[#allocation2 + $0x928] sm:$0xff]  }
 0x30e   :  { %v14957_v10 = vunpack.c.l.bf16 %v20594_v43  ;;  %v14958_v24 = vunpack.c.h.bf16 %v20594_v43  ;;  %v20598_v27 = vpack.c.bf16 %v3374_v11, %v3373_v20  ;;  %17406 = vmatprep.subr.bf16.mxu0 %v20594_v43  ;;  %v19057_v20 = vld [vmem:[#allocation2 + $0x920] sm:$0xff]  }
 0x30f   :  { %17407 = vmatpush3.bf16.msra.mxu0 %v20594_v43 }
 0x310   :  { %14961 = vst [vmem:[%s22108_s6 + $0x208] sm:$0xff] %v14957_v10  ;;  %14962 = vst [vmem:[%s22108_s6 + $0x308] sm:$0xff] %v14958_v24  ;;  %v14955_v28 = vunpack.c.l.bf16 %v20598_v27  ;;  %v14956_v30 = vunpack.c.h.bf16 %v20598_v27  ;;  %17408 = vmatprep.subr.bf16.mxu0 %v20598_v27 }
 0x312   :  { %14959 = vst [vmem:[%s22108_s6 + $0x8] sm:$0xff] %v14955_v28  ;;  %14960 = vst [vmem:[%s22108_s6 + $0x108] sm:$0xff] %v14956_v30 }
 0x313   :  { %17409 = vmatpush3.bf16.msra.mxu0 %v20598_v27 }
 0x314   :  { %17434 = vmatprep.subr.bf16.mxu0 %v20126_v26 }
 0x316   :  { %17411 = vmatmul.mubr.msk.bf16.vlgmr.msra.gmra.mxu0 %vm3393_vm6, %v19021_v19  ;;  %vm22116_vm6 = vcmask 1043456  }
 0x317   :  { %17442 = vmatprep.mubr.msk.bf16.mxu0 %vm20127_vm7, %v20126_v26  ;;  %17435 = vmatpush3.bf16.msra.mxu0 %v19030_v32 }
 0x318   :  { %17436 = vmatprep.subr.bf16.mxu0 %v20126_v26 }
 0x31b   :  { %17437 = vmatpush3.bf16.msra.mxu0 %v19032_v49 }
 0x31c   :  { %17438 = vmatprep.subr.bf16.mxu0 %v20126_v26 }
 0x31f   :  { %17439 = vmatpush3.bf16.msra.mxu0 %v19034_v2  ;;  %v19708_v2 = vld [vmem:[#allocation2 + $0x14f0] sm:$0xff]  }
 0x320   :  { %17440 = vmatprep.subr.bf16.mxu0 %v20126_v26 }
 0x323   :  { %17441 = vmatpush3.bf16.msra.mxu0 %v19036_v46 }
 0x324   :  { %17446 = vmatprep.subr.bf16.mxu0 %v20126_v26 }
 0x3d6   :  { %v17412_v37 = vpop.f32.mrf.mxu0 }
 0x3d8   :  { %v3434_v14 = vpop.f32.mrf.mxu0 }
 0x3d9   :  { %v3449_v42 = vmax.f32 %v3434_v14, %v17412_v37  ;;  %v3747_v37 = vand.u32 7, %v22150_v62 }
 0x3da   :  { %v17413_v17 = vpop.f32.mrf.mxu0 }
 0x3db   :  { %vm20670_vm9 = vcmp.ne.s32.totalorder %v3747_v37, 0  ;;  %vm20683_vm11 = vcmp.ne.s32.totalorder %v3747_v37, 7 }
 0x3dc   :  { %v3437_v40 = vpop.f32.mrf.mxu0 }
 0x3dd   :  { %v3450_v33 = vmax.f32 %v3437_v40, %v17413_v17  ;;  %v3754_v17 = vand.u32 7, %v20485_v5 }
 0x3df   :  { %v3467_v22 = vpack.c.bf16 %v3450_v33, %v3449_v42  ;;  %vm20675_vm10 = vcmp.ne.s32.totalorder %v3754_v17, 0  ;;  %vm20687_vm12 = vcmp.ne.s32.totalorder %v3754_v17, 7 }
 0x3e1   :  { %17431 = vmatmul.mubr.bf16.vlgmr.msra.gmra.mxu1 %v3467_v22 }
 0x3e2   :  { %17466 = vmatprep.mubr.msk.bf16.mxu1 %vm20127_vm7, %v20126_v26  ;;  %17459 = vmatpush3.bf16.msra.mxu1 %v19031_v12 }
 0x3e3   :  { %17460 = vmatprep.subr.bf16.mxu1 %v20126_v26 }
 0x3e6   :  { %17461 = vmatpush3.bf16.msra.mxu1 %v19033_v63 }
 0x3e7   :  { %17462 = vmatprep.subr.bf16.mxu1 %v20126_v26 }
 0x3ea   :  { %17463 = vmatpush3.bf16.msra.mxu1 %v19035_v44 }
 0x3eb   :  { %17464 = vmatprep.subr.bf16.mxu1 %v20126_v26 }
 0x3ee   :  { %17465 = vmatpush3.bf16.msra.mxu1 %v19037_v7  ;;  %v19710_v7 = vld [vmem:[#allocation2 + $0x14e8] sm:$0xff]  }
 0x3ef   :  { %17490 = vmatprep.subr.bf16.mxu1 %v20126_v26 }
 0x4a1   :  { %v3550_v45 = vpop.f32.mrf.mxu1 }
 0x4a3   :  { %v17432_v54 = vpop.f32.mrf.mxu1 }
 0x4a5   :  { %v3553_v55 = vpop.f32.mrf.mxu1 }
 0x4a6   :  { %v18721_v9 = vpack.i.bf16 %v3553_v55, %v3550_v45 }
 0x4a7   :  { %v17433_v23 = vpop.f32.mrf.mxu1 }
 0x4a8   :  { %18722 = vrot.lane.b32.xlu0 %v18721_v9, %s20120_s13 }
 0x51a   :  { %v18723_v29 = vpop.permute.xlu0 %18722 }
 0x51b   :  { %v18725_v35 = vunpack.i.h.bf16 %v18723_v29  ;;  %v18724_v15 = vunpack.i.l.bf16 %v18723_v29  ;;  %v3568_v29 = vld [vmem:[#allocation9 + $0x2] ss:$0 sm:$0xff] }
 0x51d   :  { %v3566_v0 = vmax.f32 %v3553_v55, %v18725_v35  ;;  %v3565_v13 = vmax.f32 %v3550_v45, %v18724_v15 }
 0x51f   :  { %v3567_v21 = vpack.c.bf16 %v3566_v0, %v3565_v13 }
 0x521   :  { %17443 = vmatmul.mubr.msk.bf16.vlgmr.msra.gmra.mxu0 %vm22118_vm8, %v3567_v21  ;;  %17467 = vmatmul.mubr.msk.bf16.vlgmr.msra.gmra.mxu1 %vm22118_vm8, %v3567_v21 }
 0x522   :  { %17447 = vmatpush3.bf16.msra.mxu0 %v19038_v8  ;;  %17454 = vmatprep.mubr.msk.bf16.mxu0 %vm20127_vm7, %v20126_v26 }
 0x523   :  { %17448 = vmatprep.subr.bf16.mxu0 %v20126_v26  ;;  %17506 = vmatprep.mubr.msk.bf16.mxu1 %vm20127_vm7, %v20126_v26 }
 0x524   :  { %17491 = vmatpush3.bf16.msra.mxu1 %v19043_v50  ;;  %v19059_v50 = vld [vmem:[#allocation2 + $0x910] sm:$0xff]  }
 0x525   :  { %17492 = vmatprep.subr.bf16.mxu1 %v20126_v26 }
 0x526   :  { %17449 = vmatpush3.bf16.msra.mxu0 %v19039_v51 }
 0x527   :  { %17450 = vmatprep.subr.bf16.mxu0 %v20126_v26 }
 0x528   :  { %17493 = vmatpush3.bf16.msra.mxu1 %v19045_v3  ;;  %v19061_v3 = vld [vmem:[#allocation2 + $0x900] sm:$0xff]  }
 0x529   :  { %17494 = vmatprep.subr.bf16.mxu1 %v20126_v26 }
 0x52a   :  { %17451 = vmatpush3.bf16.msra.mxu0 %v19040_v56 }
 0x52b   :  { %17452 = vmatprep.subr.bf16.mxu0 %v20126_v26 }
 0x52c   :  { %17495 = vmatpush3.bf16.msra.mxu1 %v19047_v60  ;;  %v19063_v60 = vld [vmem:[#allocation2 + $0x8f0] sm:$0xff]  }
 0x52d   :  { %17496 = vmatprep.subr.bf16.mxu1 %v20126_v26 }
 0x52e   :  { %17453 = vmatpush3.bf16.msra.mxu0 %v19041_v6  ;;  %v19058_v6 = vld [vmem:[#allocation2 + $0x918] sm:$0xff]  }
 0x52f   :  { %17470 = vmatprep.subr.bf16.mxu0 %v20126_v26 }
 0x530   :  { %17497 = vmatpush3.bf16.msra.mxu1 %v19049_v25  ;;  %v19065_v25 = vld [vmem:[#allocation2 + $0x8e0] sm:$0xff]  }
 0x531   :  { %17455 = vmatmul.mubr.msk.bf16.vlgmr.msra.gmra.mxu0 %vm22118_vm8, %v3567_v21  ;;  %17498 = vmatprep.subr.bf16.mxu1 %v20126_v26 }
 0x532   :  { %17486 = vmatprep.mubr.msk.bf16.mxu0 %vm20127_vm7, %v20126_v26  ;;  %17471 = vmatpush3.bf16.msra.mxu0 %v19042_v57 }
 0x533   :  { %17472 = vmatprep.subr.bf16.mxu0 %v20126_v26 }
 0x534   :  { %17499 = vmatpush3.bf16.msra.mxu1 %v19051_v53 }
 0x535   :  { %17500 = vmatprep.subr.bf16.mxu1 %v20126_v26 }
 0x536   :  { %17473 = vmatpush3.bf16.msra.mxu0 %v19044_v1  ;;  %v19060_v1 = vld [vmem:[#allocation2 + $0x908] sm:$0xff]  }
 0x537   :  { %17474 = vmatprep.subr.bf16.mxu0 %v20126_v26 }
 0x538   :  { %17501 = vmatpush3.bf16.msra.mxu1 %v19053_v58 }
 0x539   :  { %17502 = vmatprep.subr.bf16.mxu1 %v20126_v26 }
 0x53a   :  { %17475 = vmatpush3.bf16.msra.mxu0 %v19046_v59  ;;  %v19062_v59 = vld [vmem:[#allocation2 + $0x8f8] sm:$0xff]  }
 0x53b   :  { %17476 = vmatprep.subr.bf16.mxu0 %v20126_v26 }
 0x53c   :  { %17503 = vmatpush3.bf16.msra.mxu1 %v19055_v34 }
 0x53d   :  { %17504 = vmatprep.subr.bf16.mxu1 %v20126_v26 }
 0x53e   :  { %17477 = vmatpush3.bf16.msra.mxu0 %v19048_v61  ;;  %v19064_v61 = vld [vmem:[#allocation2 + $0x8e8] sm:$0xff]  }
 0x53f   :  { %17478 = vmatprep.subr.bf16.mxu0 %v20126_v26 }
 0x540   :  { %17505 = vmatpush3.bf16.msra.mxu1 %v19057_v20 }
 0x541   :  { %17530 = vmatprep.subr.bf16.mxu1 %v20126_v26 }
 0x542   :  { %17479 = vmatpush3.bf16.msra.mxu0 %v19050_v16 }
 0x543   :  { %17480 = vmatprep.subr.bf16.mxu0 %v20126_v26 }
 0x546   :  { %17481 = vmatpush3.bf16.msra.mxu0 %v19052_v47 }
 0x547   :  { %17482 = vmatprep.subr.bf16.mxu0 %v20126_v26 }
 0x54a   :  { %17483 = vmatpush3.bf16.msra.mxu0 %v19054_v48 }
 0x54b   :  { %17484 = vmatprep.subr.bf16.mxu0 %v20126_v26 }
 0x54e   :  { %17485 = vmatpush3.bf16.msra.mxu0 %v19056_v18 }
 0x54f   :  { %17510 = vmatprep.subr.bf16.mxu0 %v20126_v26 }
 0x5e1   :  { %v3639_v11 = vpop.f32.mrf.mxu0  ;;  %v3833_v10 = vpop.f32.mrf.mxu1 }
 0x5e2   :  { %v3729_v41 = vrot.slane %v3639_v11, 7 }
 0x5e3   :  { %v17444_v24 = vpop.f32.mrf.mxu0  ;;  %v17468_v28 = vpop.f32.mrf.mxu1 }
 0x5e4   :  { %v3734_v42 = vsel %vm2147_vm0, 0.0, %v3729_v41 }
 0x5e5   :  { %v3642_v30 = vpop.f32.mrf.mxu0  ;;  %v3836_v19 = vpop.f32.mrf.mxu1  ;;  %v3769_v49 = vsel %vm20670_vm9, %v3734_v42, 0.0 }
 0x5e6   :  { %v3730_v14 = vrot.slane %v3642_v30, 7  ;;  %v3834_v54 = vadd.f32 %v3833_v10, %v3769_v49 }
 0x5e7   :  { %v17445_v36 = vpop.f32.mrf.mxu0  ;;  %v17469_v39 = vpop.f32.mrf.mxu1 }
 0x5e8   :  { %v3731_v22 = vsel %vm2147_vm0, %v3729_v41, %v3730_v14 }
 0x5e9   :  { %v3770_v5 = vsel %vm20675_vm10, %v3731_v22, 0.0  ;;  %v3847_v22 = vld [vmem:[#allocation9 + $0x3] ss:$0 sm:$0xff] }
 0x5ea   :  { %v3837_v55 = vadd.f32 %v3836_v19, %v3770_v5 }
 0x5f1   :  { %v3720_v40 = vpop.f32.mrf.mxu0 }
 0x5f2   :  { %v3737_v44 = vrot.slane %v3720_v40, 1 }
 0x5f3   :  { %v17456_v12 = vpop.f32.mrf.mxu0 }
 0x5f5   :  { %v3723_v63 = vpop.f32.mrf.mxu0 }
 0x5f6   :  { %v3738_v46 = vrot.slane %v3723_v63, 1 }
 0x5f7   :  { %v17457_v45 = vpop.f32.mrf.mxu0 }
 0x5f8   :  { %v3739_v9 = vsel %vm22117_vm2, %v3737_v44, %v3738_v46  ;;  %v3742_v23 = vsel %vm22117_vm2, %v3738_v46, 0.0 }
 0x5f9   :  { %v3773_v35 = vsel %vm20683_vm11, %v3739_v9, 0.0  ;;  %v3774_v15 = vsel %vm20687_vm12, %v3742_v23, 0.0 }
 0x5fa   :  { %v3840_v0 = vadd.f32 %v3834_v54, %v3773_v35  ;;  %v3841_v13 = vadd.f32 %v3837_v55, %v3774_v15  ;;  %v19067_v35 = vld [vmem:[#allocation2 + $0xc90] sm:$0xff]   ;;  %v19068_v15 = vld [vmem:[#allocation2 + $0xc88] sm:$0xff]  }
 0x5fc   :  { %v3842_v8 = vadd.f32 %v3840_v0, %v3568_v29  ;;  %v3843_v21 = vadd.f32 %v3841_v13, %v3568_v29  ;;  %v19066_v29 = vld [vmem:[#allocation2 + $0xc50] sm:$0xff]   ;;  %v19069_v0 = vld [vmem:[#allocation2 + $0xc80] sm:$0xff]   ;;  %v19070_v13 = vld [vmem:[#allocation2 + $0xc78] sm:$0xff]  }
 0x5fe   :  { %v3844_v51 = vmax.f32 %v3842_v8, 0.0  ;;  %v3845_v56 = vmax.f32 %v3843_v21, 0.0  ;;  %v19071_v8 = vld [vmem:[#allocation2 + $0xc70] sm:$0xff]   ;;  %v19072_v21 = vld [vmem:[#allocation2 + $0xc68] sm:$0xff]  }
 0x600   :  { %v3846_v57 = vpack.c.bf16 %v3845_v56, %v3844_v51  ;;  %v19073_v51 = vld [vmem:[#allocation2 + $0xc60] sm:$0xff]   ;;  %v19074_v56 = vld [vmem:[#allocation2 + $0xc58] sm:$0xff]  }
 0x602   :  { %17487 = vmatmul.mubr.bf16.vlgmr.msra.gmra.mxu0 %v3846_v57  ;;  %17507 = vmatmul.mubr.bf16.vlgmr.msra.gmra.mxu1 %v3846_v57 }
 0x603   :  { %17511 = vmatpush3.bf16.msra.mxu0 %v19058_v6  ;;  %17526 = vmatprep.mubr.msk.bf16.mxu0 %vm20127_vm7, %v20126_v26 }
 0x604   :  { %17512 = vmatprep.subr.bf16.mxu0 %v20126_v26  ;;  %17532 = vmatprep.mubr.msk.bf16.mxu1 %vm20127_vm7, %v20126_v26 }
 0x607   :  { %17513 = vmatpush3.bf16.msra.mxu0 %v19059_v50 }
 0x608   :  { %17514 = vmatprep.subr.bf16.mxu0 %v20126_v26 }
 0x60b   :  { %17515 = vmatpush3.bf16.msra.mxu0 %v19060_v1 }
 0x60c   :  { %17516 = vmatprep.subr.bf16.mxu0 %v20126_v26 }
 0x60f   :  { %17517 = vmatpush3.bf16.msra.mxu0 %v19061_v3 }
 0x610   :  { %17518 = vmatprep.subr.bf16.mxu0 %v20126_v26 }
 0x613   :  { %17519 = vmatpush3.bf16.msra.mxu0 %v19062_v59 }
 0x614   :  { %17520 = vmatprep.subr.bf16.mxu0 %v20126_v26 }
 0x617   :  { %17521 = vmatpush3.bf16.msra.mxu0 %v19063_v60  ;;  %v19075_v60 = vld [vmem:[#allocation2 + $0x978] sm:$0xff]  }
 0x618   :  { %17522 = vmatprep.subr.bf16.mxu0 %v20126_v26 }
 0x61b   :  { %17523 = vmatpush3.bf16.msra.mxu0 %v19064_v61  ;;  %v19076_v61 = vld [vmem:[#allocation2 + $0x998] sm:$0xff]  }
 0x61c   :  { %17524 = vmatprep.subr.bf16.mxu0 %v20126_v26 }
 0x61f   :  { %17525 = vmatpush3.bf16.msra.mxu0 %v19065_v25  ;;  %v19077_v25 = vld [vmem:[#allocation2 + $0x970] sm:$0xff]  }
 0x620   :  { %17556 = vmatprep.subr.bf16.mxu0 %v20126_v26 }
 0x622   :  { %17527 = vmatmul.mubr.bf16.vlgmr.msra.gmra.mxu0 %v3846_v57 }
 0x623   :  { %17564 = vmatprep.mubr.msk.bf16.mxu0 %vm20127_vm7, %v20126_v26  ;;  %17557 = vmatpush3.bf16.msra.mxu0 %v19075_v60 }
 0x624   :  { %17558 = vmatprep.subr.bf16.mxu0 %v20126_v26 }
 0x627   :  { %17559 = vmatpush3.bf16.msra.mxu0 %v19077_v25 }
 0x628   :  { %17560 = vmatprep.subr.bf16.mxu0 %v20126_v26 }
 0x6c2   :  { %v3946_v16 = vpop.f32.mrf.mxu0  ;;  %v4067_v53 = vpop.f32.mrf.mxu1 }
 0x6c3   :  { %v4076_v11 = vrot.slane %v3946_v16, 7  ;;  %v4084_v24 = vrot.slane %v4067_v53, 1  ;;  %v19078_v16 = vld [vmem:[#allocation2 + $0x990] sm:$0xff]   ;;  %v19079_v53 = vld [vmem:[#allocation2 + $0x968] sm:$0xff]  }
 0x6c4   :  { %v17488_v47 = vpop.f32.mrf.mxu0  ;;  %v17508_v58 = vpop.f32.mrf.mxu1  ;;  %17561 = vmatpush3.bf16.msra.mxu0 %v19079_v53 }
 0x6c5   :  { %v4081_v30 = vsel %vm2147_vm0, 0.0, %v4076_v11  ;;  %v19080_v47 = vld [vmem:[#allocation2 + $0x988] sm:$0xff]   ;;  %17562 = vmatprep.subr.bf16.mxu0 %v20126_v26  ;;  %v19081_v58 = vld [vmem:[#allocation2 + $0x960] sm:$0xff]  }
 0x6c6   :  { %v3949_v48 = vpop.f32.mrf.mxu0  ;;  %v4070_v34 = vpop.f32.mrf.mxu1  ;;  %v4090_v36 = vsel %vm20670_vm9, %v4081_v30, 0.0 }
 0x6c7   :  { %v4085_v10 = vrot.slane %v4070_v34, 1  ;;  %v4077_v28 = vrot.slane %v3949_v48, 7  ;;  %v19082_v48 = vld [vmem:[#allocation2 + $0x980] sm:$0xff]  }
 0x6c8   :  { %v17489_v18 = vpop.f32.mrf.mxu0  ;;  %v17509_v20 = vpop.f32.mrf.mxu1  ;;  %17563 = vmatpush3.bf16.msra.mxu0 %v19081_v58 }
 0x6c9   :  { %v4086_v19 = vsel %vm22117_vm2, %v4084_v24, %v4085_v10  ;;  %v4078_v37 = vsel %vm2147_vm0, %v4076_v11, %v4077_v28  ;;  %v4089_v40 = vsel %vm22117_vm2, %v4085_v10, 0.0  ;;  %17568 = vmatprep.subr.bf16.mxu0 %v20126_v26  ;;  %v19083_v28 = vld [vmem:[#allocation2 + $0x9b8] sm:$0xff]  }
 0x6ca   :  { %v4092_v14 = vsel %vm20683_vm11, %v4086_v19, 0.0  ;;  %v4091_v12 = vsel %vm20675_vm10, %v4078_v37, 0.0  ;;  %v4093_v63 = vsel %vm20687_vm12, %v4089_v40, 0.0  ;;  %v19088_v19 = vld [vmem:[#allocation2 + $0xa78] sm:$0xff]   ;;  %v19091_v40 = vld [vmem:[#allocation2 + $0x9e8] sm:$0xff]  }
 0x6cb   :  { %v19087_v37 = vld [vmem:[#allocation2 + $0x9f8] sm:$0xff]  }
 0x6e2   :  { %v4176_v39 = vpop.f32.mrf.mxu0 }
 0x6e3   :  { %v4177_v41 = vadd.f32 %v4176_v39, %v4090_v36  ;;  %v19084_v36 = vld [vmem:[#allocation2 + $0x9b0] sm:$0xff]   ;;  %v19085_v39 = vld [vmem:[#allocation2 + $0x9a8] sm:$0xff]  }
 0x6e4   :  { %v17528_v17 = vpop.f32.mrf.mxu0 }
 0x6e5   :  { %v4183_v42 = vadd.f32 %v4177_v41, %v4092_v14  ;;  %v19086_v41 = vld [vmem:[#allocation2 + $0x9a0] sm:$0xff]   ;;  %v19089_v14 = vld [vmem:[#allocation2 + $0x9f0] sm:$0xff]  }
 0x6e6   :  { %v4179_v49 = vpop.f32.mrf.mxu0  ;;  %v19090_v17 = vld [vmem:[#allocation2 + $0xa70] sm:$0xff]  }
 0x6e7   :  { %v4180_v5 = vadd.f32 %v4179_v49, %v4091_v12  ;;  %v4185_v46 = vadd.f32 %v4183_v42, %v3847_v22  ;;  %v19092_v42 = vld [vmem:[#allocation2 + $0xa68] sm:$0xff]   ;;  %v19094_v12 = vld [vmem:[#allocation2 + $0xa60] sm:$0xff]   ;;  %v19095_v49 = vld [vmem:[#allocation2 + $0x9d8] sm:$0xff]  }
 0x6e8   :  { %v17529_v44 = vpop.f32.mrf.mxu0 }
 0x6e9   :  { %v4184_v45 = vadd.f32 %v4180_v5, %v4093_v63  ;;  %v4187_v55 = vmax.f32 %v4185_v46, 0.0  ;;  %v19096_v5 = vld [vmem:[#allocation2 + $0xa58] sm:$0xff]   ;;  %v19097_v63 = vld [vmem:[#allocation2 + $0x9d0] sm:$0xff]   ;;  %v19099_v46 = vld [vmem:[#allocation2 + $0x9c8] sm:$0xff]  }
 0x6ea   :  { %v19098_v44 = vld [vmem:[#allocation2 + $0xa50] sm:$0xff]  }
 0x6eb   :  { %v4186_v54 = vadd.f32 %v4184_v45, %v3847_v22  ;;  %v19093_v22 = vld [vmem:[#allocation2 + $0x9e0] sm:$0xff]   ;;  %v19100_v45 = vld [vmem:[#allocation2 + $0xa48] sm:$0xff]  }
 0x6ed   :  { %v4188_v9 = vmax.f32 %v4186_v54, 0.0  ;;  %v19101_v54 = vld [vmem:[#allocation2 + $0x9c0] sm:$0xff]  }
 0x6ef   :  { %v20723_v23 = vpack.c.bf16 %v4188_v9, %v4187_v55  ;;  %v19102_v55 = vld [vmem:[#allocation2 + $0xa40] sm:$0xff]  }
 0x6f1   :  { %17531 = vmatpush3.bf16.msra.mxu1 %v20723_v23 }
 0x6f2   :  { %17536 = vmatprep.subr.bf16.mxu1 %v20126_v26 }
 0x6f4   :  { %17533 = vmatmul.mubr.msk.bf16.vlgmr.msra.gmra.mxu1 %vm22114_vm13, %v19066_v29  ;;  %vm22115_vm13 = vcmask 64512  }
 0x6f5   :  { %17537 = vmatpush3.bf16.msra.mxu1 %v19067_v35  ;;  %17552 = vmatprep.mubr.msk.bf16.mxu1 %vm20127_vm7, %v20126_v26 }
 0x6f6   :  { %17538 = vmatprep.subr.bf16.mxu1 %v20126_v26 }
 0x6f9   :  { %17539 = vmatpush3.bf16.msra.mxu1 %v19068_v15 }
 0x6fa   :  { %17540 = vmatprep.subr.bf16.mxu1 %v20126_v26 }
 0x6fd   :  { %17541 = vmatpush3.bf16.msra.mxu1 %v19069_v0 }
 0x6fe   :  { %17542 = vmatprep.subr.bf16.mxu1 %v20126_v26 }
 0x701   :  { %17543 = vmatpush3.bf16.msra.mxu1 %v19070_v13 }
 0x702   :  { %17544 = vmatprep.subr.bf16.mxu1 %v20126_v26 }
 0x705   :  { %17545 = vmatpush3.bf16.msra.mxu1 %v19071_v8 }
 0x706   :  { %17546 = vmatprep.subr.bf16.mxu1 %v20126_v26 }
 0x709   :  { %17547 = vmatpush3.bf16.msra.mxu1 %v19072_v21 }
 0x70a   :  { %17548 = vmatprep.subr.bf16.mxu1 %v20126_v26 }
 0x70d   :  { %17549 = vmatpush3.bf16.msra.mxu1 %v19073_v51 }
 0x70e   :  { %17550 = vmatprep.subr.bf16.mxu1 %v20126_v26 }
 0x711   :  { %17551 = vmatpush3.bf16.msra.mxu1 %v19074_v56  ;;  %v4522_v56 = vand.u32 3, %v22150_v62 }
 0x712   :  { %17580 = vmatprep.subr.bf16.mxu1 %v20126_v26 }
 0x713   :  { %vm20780_vm14 = vcmp.ne.s32.totalorder %v4522_v56, 0  ;;  %vm20786_vm15 = vcmp.ne.s32.totalorder %v4522_v56, 3  ;;  %v4929_v56 = vld [vmem:[#allocation2 + $0xc98] sm:$0xf] }
 0x7b4   :  { %v4235_v6 = vpop.f32.mrf.mxu1 }
 0x7b6   :  { %v17534_v57 = vpop.f32.mrf.mxu1 }
 0x7b8   :  { %v4238_v50 = vpop.f32.mrf.mxu1 }
 0x7b9   :  { %v4242_v1 = vmax.f32 %v4235_v6, %v4238_v50 }
 0x7ba   :  { %v17535_v3 = vpop.f32.mrf.mxu1 }
 0x7bb   :  { %v4259_v59 = vpack.c.bf16 %v4242_v1, %v4242_v1 }
 0x7bd   :  { %17553 = vmatmul.mubr.bf16.vlgmr.msra.gmra.mxu1 %v4259_v59  ;;  %v19538_v59 = vld [vmem:[#allocation2 + $0x11e8] sm:$0xff]  }
 0x7be   :  { %17588 = vmatprep.mubr.msk.bf16.mxu1 %vm20127_vm7, %v20126_v26  ;;  %17581 = vmatpush3.bf16.msra.mxu1 %v19076_v61 }
 0x7bf   :  { %17582 = vmatprep.subr.bf16.mxu1 %v20126_v26 }
 0x7c2   :  { %17583 = vmatpush3.bf16.msra.mxu1 %v19078_v16  ;;  %v4354_v16 = vld [vmem:[#allocation9 + $0x4] ss:$0 sm:$0xff] }
 0x7c3   :  { %17584 = vmatprep.subr.bf16.mxu1 %v20126_v26 }
 0x7c6   :  { %17585 = vmatpush3.bf16.msra.mxu1 %v19080_v47 }
 0x7c7   :  { %17586 = vmatprep.subr.bf16.mxu1 %v20126_v26 }
 0x7ca   :  { %17587 = vmatpush3.bf16.msra.mxu1 %v19082_v48 }
 0x7cb   :  { %17612 = vmatprep.subr.bf16.mxu1 %v20126_v26 }
 0x87d   :  { %v4342_v34 = vpop.f32.mrf.mxu1 }
 0x87e   :  { %4349 = vrot.lane.b32.xlu0 %v4342_v34, %s20120_s13 }
 0x87f   :  { %v17554_v18 = vpop.f32.mrf.mxu1 }
 0x881   :  { %v4345_v20 = vpop.f32.mrf.mxu1 }
 0x882   :  { %v19103_v20 = vld [vmem:[#allocation2 + $0xa38] sm:$0xff]  }
 0x883   :  { %v17555_v11 = vpop.f32.mrf.mxu1 }
 0x8f0   :  { %v4350_v10 = vpop.permute.xlu0 %4349 }
 0x8f1   :  { %v4352_v24 = vmax.f32 %v4342_v34, %v4350_v10  ;;  %v19104_v10 = vld [vmem:[#allocation2 + $0xa30] sm:$0xff]  }
 0x8f3   :  { %v4353_v30 = vpack.c.bf16 %v4352_v24, %v4352_v24  ;;  %v19105_v24 = vld [vmem:[#allocation2 + $0xa28] sm:$0xff]  }
 0x8f5   :  { %17565 = vmatmul.mubr.msk.bf16.vlgmr.msra.gmra.mxu0 %vm22118_vm8, %v4353_v30  ;;  %17589 = vmatmul.mubr.msk.bf16.vlgmr.msra.gmra.mxu1 %vm22118_vm8, %v4353_v30 }
 0x8f6   :  { %17569 = vmatpush3.bf16.msra.mxu0 %v19083_v28  ;;  %17576 = vmatprep.mubr.msk.bf16.mxu0 %vm20127_vm7, %v20126_v26  ;;  %v19106_v28 = vld [vmem:[#allocation2 + $0xa20] sm:$0xff]  }
 0x8f7   :  { %17570 = vmatprep.subr.bf16.mxu0 %v20126_v26  ;;  %17613 = vmatpush3.bf16.msra.mxu1 %v19088_v19  ;;  %v19108_v19 = vld [vmem:[#allocation2 + $0xa10] sm:$0xff]  }
 0x8f8   :  { %17614 = vmatprep.subr.bf16.mxu1 %v20126_v26  ;;  %17628 = vmatprep.mubr.msk.bf16.mxu1 %vm20127_vm7, %v20126_v26 }
 0x8fa   :  { %17571 = vmatpush3.bf16.msra.mxu0 %v19084_v36  ;;  %v19109_v36 = vld [vmem:[#allocation2 + $0xa08] sm:$0xff]  }
 0x8fb   :  { %17572 = vmatprep.subr.bf16.mxu0 %v20126_v26  ;;  %17615 = vmatpush3.bf16.msra.mxu1 %v19090_v17 }
 0x8fc   :  { %17616 = vmatprep.subr.bf16.mxu1 %v20126_v26 }
 0x8fe   :  { %17573 = vmatpush3.bf16.msra.mxu0 %v19085_v39  ;;  %v19110_v39 = vld [vmem:[#allocation2 + $0xa00] sm:$0xff]  }
 0x8ff   :  { %17574 = vmatprep.subr.bf16.mxu0 %v20126_v26  ;;  %17617 = vmatpush3.bf16.msra.mxu1 %v19092_v42 }
 0x900   :  { %17618 = vmatprep.subr.bf16.mxu1 %v20126_v26 }
 0x902   :  { %17575 = vmatpush3.bf16.msra.mxu0 %v19086_v41 }
 0x903   :  { %17592 = vmatprep.subr.bf16.mxu0 %v20126_v26  ;;  %17619 = vmatpush3.bf16.msra.mxu1 %v19094_v12 }
 0x904   :  { %17620 = vmatprep.subr.bf16.mxu1 %v20126_v26 }
 0x905   :  { %17577 = vmatmul.mubr.msk.bf16.vlgmr.msra.gmra.mxu0 %vm22118_vm8, %v4353_v30  ;;  %v19107_v30 = vld [vmem:[#allocation2 + $0xa18] sm:$0xff]  }
 0x906   :  { %17593 = vmatpush3.bf16.msra.mxu0 %v19087_v37  ;;  %17608 = vmatprep.mubr.msk.bf16.mxu0 %vm20127_vm7, %v20126_v26 }
 0x907   :  { %17594 = vmatprep.subr.bf16.mxu0 %v20126_v26  ;;  %17621 = vmatpush3.bf16.msra.mxu1 %v19096_v5 }
 0x908   :  { %17622 = vmatprep.subr.bf16.mxu1 %v20126_v26 }
 0x90a   :  { %17595 = vmatpush3.bf16.msra.mxu0 %v19089_v14 }
 0x90b   :  { %17596 = vmatprep.subr.bf16.mxu0 %v20126_v26  ;;  %17623 = vmatpush3.bf16.msra.mxu1 %v19098_v44 }
 0x90c   :  { %17624 = vmatprep.subr.bf16.mxu1 %v20126_v26 }
 0x90e   :  { %17597 = vmatpush3.bf16.msra.mxu0 %v19091_v40 }
 0x90f   :  { %17598 = vmatprep.subr.bf16.mxu0 %v20126_v26  ;;  %17625 = vmatpush3.bf16.msra.mxu1 %v19100_v45 }
 0x910   :  { %17626 = vmatprep.subr.bf16.mxu1 %v20126_v26 }
 0x912   :  { %17599 = vmatpush3.bf16.msra.mxu0 %v19093_v22 }
 0x913   :  { %17600 = vmatprep.subr.bf16.mxu0 %v20126_v26  ;;  %17627 = vmatpush3.bf16.msra.mxu1 %v19102_v55  ;;  %v4602_v55 = vld [vmem:[#allocation9 + $0x5] ss:$0 sm:$0xff] }
 0x914   :  { %17652 = vmatprep.subr.bf16.mxu1 %v20126_v26 }
 0x916   :  { %17601 = vmatpush3.bf16.msra.mxu0 %v19095_v49 }
 0x917   :  { %17602 = vmatprep.subr.bf16.mxu0 %v20126_v26 }
 0x91a   :  { %17603 = vmatpush3.bf16.msra.mxu0 %v19097_v63 }
 0x91b   :  { %17604 = vmatprep.subr.bf16.mxu0 %v20126_v26 }
 0x91e   :  { %17605 = vmatpush3.bf16.msra.mxu0 %v19099_v46 }
 0x91f   :  { %17606 = vmatprep.subr.bf16.mxu0 %v20126_v26 }
 0x922   :  { %17607 = vmatpush3.bf16.msra.mxu0 %v19101_v54 }
 0x923   :  { %17632 = vmatprep.subr.bf16.mxu0 %v20126_v26 }
 0x9b5   :  { %v4424_v9 = vpop.f32.mrf.mxu0  ;;  %v4592_v29 = vpop.f32.mrf.mxu1 }
 0x9b6   :  { %v4511_v51 = vrot.slane %v4424_v9, 7 }
 0x9b7   :  { %v17566_v35 = vpop.f32.mrf.mxu0  ;;  %v17590_v15 = vpop.f32.mrf.mxu1 }
 0x9b8   :  { %v4513_v6 = vsel %vm2147_vm0, 0.0, %v4511_v51 }
 0x9b9   :  { %v4427_v0 = vpop.f32.mrf.mxu0  ;;  %v4595_v13 = vpop.f32.mrf.mxu1  ;;  %v4531_v50 = vsel %vm20780_vm14, %v4513_v6, 0.0  ;;  %v19111_v6 = vld [vmem:[#allocation2 + $0xcd8] sm:$0xff]  }
 0x9ba   :  { %v4593_v61 = vadd.f32 %v4592_v29, %v4531_v50  ;;  %v19112_v50 = vld [vmem:[#allocation2 + $0xcd0] sm:$0xff]  }
 0x9bb   :  { %v17567_v8 = vpop.f32.mrf.mxu0  ;;  %v17591_v21 = vpop.f32.mrf.mxu1 }
 0x9c5   :  { %v4504_v1 = vpop.f32.mrf.mxu0 }
 0x9c6   :  { %v4515_v3 = vrot.slane %v4504_v1, 1  ;;  %v19113_v1 = vld [vmem:[#allocation2 + $0xcc8] sm:$0xff]  }
 0x9c7   :  { %v17578_v60 = vpop.f32.mrf.mxu0 }
 0x9c8   :  { %v4517_v25 = vsel %vm22117_vm2, %v4515_v3, 0.0  ;;  %v19114_v3 = vld [vmem:[#allocation2 + $0xcc0] sm:$0xff]   ;;  %v19115_v60 = vld [vmem:[#allocation2 + $0xcb8] sm:$0xff]  }
 0x9c9   :  { %v4533_v53 = vsel %vm20786_vm15, %v4517_v25, 0.0  ;;  %v4507_v47 = vpop.f32.mrf.mxu0  ;;  %v19117_v25 = vld [vmem:[#allocation2 + $0xca8] sm:$0xff]  }
 0x9ca   :  { %v4598_v58 = vadd.f32 %v4593_v61, %v4533_v53  ;;  %v19116_v61 = vld [vmem:[#allocation2 + $0xcb0] sm:$0xff]  }
 0x9cb   :  { %v17579_v48 = vpop.f32.mrf.mxu0 }
 0x9cc   :  { %v4599_v34 = vadd.f32 %v4598_v58, %v4354_v16  ;;  %v19118_v16 = vld [vmem:[#allocation2 + $0xca0] sm:$0xff]  }
 0x9ce   :  { %v4600_v18 = vmax.f32 %v4599_v34, 0.0 }
 0x9d0   :  { %v4601_v11 = vpack.c.bf16 %v4600_v18, %v4600_v18 }
 0x9d2   :  { %17609 = vmatmul.mubr.bf16.vlgmr.msra.gmra.mxu0 %v4601_v11  ;;  %17629 = vmatmul.mubr.bf16.vlgmr.msra.gmra.mxu1 %v4601_v11 }
 0x9d3   :  { %17633 = vmatpush3.bf16.msra.mxu0 %v19103_v20  ;;  %17648 = vmatprep.mubr.msk.bf16.mxu0 %vm20127_vm7, %v20126_v26 }
 0x9d4   :  { %17634 = vmatprep.subr.bf16.mxu0 %v20126_v26  ;;  %17654 = vmatprep.mubr.msk.bf16.mxu1 %vm20127_vm7, %v20126_v26 }
 0x9d7   :  { %17635 = vmatpush3.bf16.msra.mxu0 %v19104_v10  ;;  %v19120_v10 = vld [vmem:[#allocation2 + $0xad8] sm:$0xff]  }
 0x9d8   :  { %17636 = vmatprep.subr.bf16.mxu0 %v20126_v26 }
 0x9db   :  { %17637 = vmatpush3.bf16.msra.mxu0 %v19105_v24  ;;  %v19121_v24 = vld [vmem:[#allocation2 + $0xa90] sm:$0xff]  }
 0x9dc   :  { %17638 = vmatprep.subr.bf16.mxu0 %v20126_v26 }
 0x9df   :  { %17639 = vmatpush3.bf16.msra.mxu0 %v19106_v28  ;;  %v19122_v28 = vld [vmem:[#allocation2 + $0xad0] sm:$0xff]  }
 0x9e0   :  { %17640 = vmatprep.subr.bf16.mxu0 %v20126_v26 }
 0x9e3   :  { %17641 = vmatpush3.bf16.msra.mxu0 %v19107_v30  ;;  %v19123_v30 = vld [vmem:[#allocation2 + $0xa88] sm:$0xff]  }
 0x9e4   :  { %17642 = vmatprep.subr.bf16.mxu0 %v20126_v26 }
 0x9e7   :  { %17643 = vmatpush3.bf16.msra.mxu0 %v19108_v19  ;;  %v19124_v19 = vld [vmem:[#allocation2 + $0xac8] sm:$0xff]  }
 0x9e8   :  { %17644 = vmatprep.subr.bf16.mxu0 %v20126_v26 }
 0x9eb   :  { %17645 = vmatpush3.bf16.msra.mxu0 %v19109_v36  ;;  %v19125_v36 = vld [vmem:[#allocation2 + $0xa80] sm:$0xff]  }
 0x9ec   :  { %17646 = vmatprep.subr.bf16.mxu0 %v20126_v26 }
 0x9ef   :  { %17647 = vmatpush3.bf16.msra.mxu0 %v19110_v39  ;;  %v19126_v39 = vld [vmem:[#allocation2 + $0xac0] sm:$0xff]  }
 0x9f0   :  { %17678 = vmatprep.subr.bf16.mxu0 %v20126_v26 }
 0x9f2   :  { %17649 = vmatmul.mubr.bf16.vlgmr.msra.gmra.mxu0 %v4601_v11  ;;  %v19119_v11 = vld [vmem:[#allocation2 + $0xa98] sm:$0xff]  }
 0x9f3   :  { %17686 = vmatprep.mubr.msk.bf16.mxu0 %vm20127_vm7, %v20126_v26  ;;  %17679 = vmatpush3.bf16.msra.mxu0 %v19119_v11 }
 0x9f4   :  { %17680 = vmatprep.subr.bf16.mxu0 %v20126_v26 }
 0x9f7   :  { %17681 = vmatpush3.bf16.msra.mxu0 %v19121_v24  ;;  %v19369_v24 = vld [vmem:[#allocation2 + $0xee0] sm:$0xff]  }
 0x9f8   :  { %17682 = vmatprep.subr.bf16.mxu0 %v20126_v26 }
 0x9fb   :  { %17683 = vmatpush3.bf16.msra.mxu0 %v19123_v30 }
 0x9fc   :  { %17684 = vmatprep.subr.bf16.mxu0 %v20126_v26 }
 0x9ff   :  { %17685 = vmatpush3.bf16.msra.mxu0 %v19125_v36  ;;  %v5093_v36 = vld [vmem:[#allocation9 + $0x6] ss:$0 sm:$0xff] }
 0xa00   :  { %17702 = vmatprep.subr.bf16.mxu0 %v20126_v26 }
 0xa92   :  { %v4701_v41 = vpop.f32.mrf.mxu0  ;;  %v4821_v37 = vpop.f32.mrf.mxu1 }
 0xa93   :  { %v4828_v49 = vrot.slane %v4701_v41, 7  ;;  %v4832_v5 = vrot.slane %v4821_v37, 1 }
 0xa94   :  { %v17610_v14 = vpop.f32.mrf.mxu0  ;;  %v17630_v17 = vpop.f32.mrf.mxu1 }
 0xa95   :  { %v4830_v63 = vsel %vm2147_vm0, 0.0, %v4828_v49  ;;  %v4834_v44 = vsel %vm22117_vm2, %v4832_v5, 0.0  ;;  %v19131_v49 = vld [vmem:[#allocation2 + $0xb18] sm:$0xff]   ;;  %v19128_v5 = vld [vmem:[#allocation2 + $0xab0] sm:$0xff]  }
 0xa96   :  { %v4704_v40 = vpop.f32.mrf.mxu0  ;;  %v4824_v42 = vpop.f32.mrf.mxu1  ;;  %v4835_v46 = vsel %vm20780_vm14, %v4830_v63, 0.0  ;;  %v4836_v9 = vsel %vm20786_vm15, %v4834_v44, 0.0  ;;  %v19133_v63 = vld [vmem:[#allocation2 + $0xb10] sm:$0xff]   ;;  %v19129_v44 = vld [vmem:[#allocation2 + $0xaa8] sm:$0xff]  }
 0xa98   :  { %v17611_v22 = vpop.f32.mrf.mxu0  ;;  %v17631_v12 = vpop.f32.mrf.mxu1 }
 0xa99   :  { %v19127_v22 = vld [vmem:[#allocation2 + $0xab8] sm:$0xff]  }
 0xab2   :  { %v4919_v45 = vpop.f32.mrf.mxu0 }
 0xab3   :  { %v4920_v54 = vadd.f32 %v4919_v45, %v4835_v46  ;;  %v19130_v46 = vld [vmem:[#allocation2 + $0xaa0] sm:$0xff]   ;;  %v19132_v45 = vld [vmem:[#allocation2 + $0xb98] sm:$0xff]  }
 0xab4   :  { %v17650_v29 = vpop.f32.mrf.mxu0 }
 0xab5   :  { %v4925_v35 = vadd.f32 %v4920_v54, %v4836_v9  ;;  %v19134_v54 = vld [vmem:[#allocation2 + $0xb90] sm:$0xff]   ;;  %v19136_v9 = vld [vmem:[#allocation2 + $0xb88] sm:$0xff]   ;;  %v19137_v29 = vld [vmem:[#allocation2 + $0xb00] sm:$0xff]  }
 0xab6   :  { %v4922_v15 = vpop.f32.mrf.mxu0 }
 0xab7   :  { %v4926_v0 = vadd.f32 %v4925_v35, %v4602_v55  ;;  %v19135_v55 = vld [vmem:[#allocation2 + $0xb08] sm:$0xff]   ;;  %v19138_v35 = vld [vmem:[#allocation2 + $0xb80] sm:$0xff]   ;;  %v19139_v15 = vld [vmem:[#allocation2 + $0xaf8] sm:$0xff]  }
 0xab8   :  { %v17651_v13 = vpop.f32.mrf.mxu0 }
 0xab9   :  { %v4927_v8 = vmax.f32 %v4926_v0, 0.0  ;;  %v19140_v0 = vld [vmem:[#allocation2 + $0xb78] sm:$0xff]   ;;  %v19141_v13 = vld [vmem:[#allocation2 + $0xaf0] sm:$0xff]  }
 0xabb   :  { %v20813_v21 = vpack.c.bf16 %v4927_v8, %v4927_v8  ;;  %v19142_v8 = vld [vmem:[#allocation2 + $0xb70] sm:$0xff]  }
 0xabd   :  { %v20817_v51 = vsel %vm22116_vm6, %v20813_v21, 0 }
 0xabe   :  { %17653 = vmatpush3.bf16.msra.mxu1 %v20817_v51 }
 0xabf   :  { %17658 = vmatprep.subr.bf16.mxu1 %v20126_v26 }
 0xac1   :  { %17655 = vmatmul.mubr.msk.bf16.vlgmr.msra.gmra.mxu1 %vm22115_vm13, %v4929_v56  ;;  %v19143_v56 = vld [vmem:[#allocation2 + $0xae8] sm:$0xff]   ;;  %vm22119_vm13 = vcmask 1042432  }
 0xac2   :  { %17659 = vmatpush3.bf16.msra.mxu1 %v19111_v6  ;;  %17674 = vmatprep.mubr.msk.bf16.mxu1 %vm20127_vm7, %v20126_v26  ;;  %v19144_v6 = vld [vmem:[#allocation2 + $0xb68] sm:$0xff]  }
 0xac3   :  { %17660 = vmatprep.subr.bf16.mxu1 %v20126_v26 }
 0xac6   :  { %17661 = vmatpush3.bf16.msra.mxu1 %v19112_v50  ;;  %v19145_v50 = vld [vmem:[#allocation2 + $0xae0] sm:$0xff]  }
 0xac7   :  { %17662 = vmatprep.subr.bf16.mxu1 %v20126_v26 }
 0xaca   :  { %17663 = vmatpush3.bf16.msra.mxu1 %v19113_v1  ;;  %v19146_v1 = vld [vmem:[#allocation2 + $0xb60] sm:$0xff]  }
 0xacb   :  { %17664 = vmatprep.subr.bf16.mxu1 %v20126_v26 }
 0xace   :  { %17665 = vmatpush3.bf16.msra.mxu1 %v19114_v3 }
 0xacf   :  { %17666 = vmatprep.subr.bf16.mxu1 %v20126_v26 }
 0xad2   :  { %17667 = vmatpush3.bf16.msra.mxu1 %v19115_v60 }
 0xad3   :  { %17668 = vmatprep.subr.bf16.mxu1 %v20126_v26 }
 0xad6   :  { %17669 = vmatpush3.bf16.msra.mxu1 %v19116_v61 }
 0xad7   :  { %17670 = vmatprep.subr.bf16.mxu1 %v20126_v26 }
 0xada   :  { %17671 = vmatpush3.bf16.msra.mxu1 %v19117_v25 }
 0xadb   :  { %17672 = vmatprep.subr.bf16.mxu1 %v20126_v26 }
 0xade   :  { %17673 = vmatpush3.bf16.msra.mxu1 %v19118_v16 }
 0xadf   :  { %17690 = vmatprep.subr.bf16.mxu1 %v20126_v26 }
 0xb81   :  { %v4972_v53 = vpop.f32.mrf.mxu1 }
 0xb82   :  { %v4979_v47 = vrot.slane %v4972_v53, 4 }
 0xb83   :  { %v17656_v58 = vpop.f32.mrf.mxu1 }
 0xb84   :  { %v4981_v48 = vmax.f32 %v4972_v53, %v4979_v47 }
 0xb85   :  { %v4975_v34 = vpop.f32.mrf.mxu1 }
 0xb86   :  { %v4998_v18 = vpack.c.bf16 %v4981_v48, %v4981_v48  ;;  %v5262_v34 = vand.u32 1, %v22150_v62 }
 0xb87   :  { %v17657_v20 = vpop.f32.mrf.mxu1 }
 0xb88   :  { %17675 = vmatmul.mubr.bf16.vlgmr.msra.gmra.mxu1 %v4998_v18  ;;  %vm20874_vm6 = vcmp.ne.s32.totalorder %v5262_v34, 0  ;;  %vm20879_vm2 = vcmp.ne.s32.totalorder %v5262_v34, 1 }
 0xb89   :  { %17698 = vmatprep.mubr.msk.bf16.mxu1 %vm20127_vm7, %v20126_v26  ;;  %17691 = vmatpush3.bf16.msra.mxu1 %v19120_v10 }
 0xb8a   :  { %17692 = vmatprep.subr.bf16.mxu1 %v20126_v26 }
 0xb8d   :  { %17693 = vmatpush3.bf16.msra.mxu1 %v19122_v28 }
 0xb8e   :  { %17694 = vmatprep.subr.bf16.mxu1 %v20126_v26 }
 0xb91   :  { %17695 = vmatpush3.bf16.msra.mxu1 %v19124_v19 }
 0xb92   :  { %17696 = vmatprep.subr.bf16.mxu1 %v20126_v26 }
 0xb95   :  { %17697 = vmatpush3.bf16.msra.mxu1 %v19126_v39 }
 0xb96   :  { %17714 = vmatprep.subr.bf16.mxu1 %v20126_v26 }
 0xc48   :  { %v5081_v41 = vpop.f32.mrf.mxu1 }
 0xc49   :  { %5088 = vrot.lane.b32.xlu1 %v5081_v41, %s20120_s13 }
 0xc4a   :  { %v17676_v37 = vpop.f32.mrf.mxu1 }
 0xc4c   :  { %v5084_v14 = vpop.f32.mrf.mxu1 }
 0xc4e   :  { %v17677_v17 = vpop.f32.mrf.mxu1 }
 0xcbb   :  { %v5089_v40 = vpop.permute.xlu1 %5088 }
 0xcbc   :  { %v5091_v42 = vmax.f32 %v5081_v41, %v5089_v40 }
 0xcbe   :  { %v5092_v12 = vpack.c.bf16 %v5091_v42, %v5091_v42 }
 0xcc0   :  { %17687 = vmatmul.mubr.msk.bf16.vlgmr.msra.gmra.mxu0 %vm22118_vm8, %v5092_v12  ;;  %17699 = vmatmul.mubr.msk.bf16.vlgmr.msra.gmra.mxu1 %vm22118_vm8, %v5092_v12 }
 0xcc1   :  { %17703 = vmatpush3.bf16.msra.mxu0 %v19127_v22  ;;  %17710 = vmatprep.mubr.msk.bf16.mxu0 %vm20127_vm7, %v20126_v26  ;;  %v19147_v22 = vld [vmem:[#allocation2 + $0xb58] sm:$0xff]  }
 0xcc2   :  { %17704 = vmatprep.subr.bf16.mxu0 %v20126_v26  ;;  %17715 = vmatpush3.bf16.msra.mxu1 %v19131_v49  ;;  %v19148_v49 = vld [vmem:[#allocation2 + $0xb50] sm:$0xff]  }
 0xcc3   :  { %17716 = vmatprep.subr.bf16.mxu1 %v20126_v26  ;;  %17730 = vmatprep.mubr.msk.bf16.mxu1 %vm20127_vm7, %v20126_v26 }
 0xcc5   :  { %17705 = vmatpush3.bf16.msra.mxu0 %v19128_v5  ;;  %v19149_v5 = vld [vmem:[#allocation2 + $0xb48] sm:$0xff]  }
 0xcc6   :  { %17706 = vmatprep.subr.bf16.mxu0 %v20126_v26  ;;  %17717 = vmatpush3.bf16.msra.mxu1 %v19133_v63  ;;  %v19150_v63 = vld [vmem:[#allocation2 + $0xb40] sm:$0xff]  }
 0xcc7   :  { %17718 = vmatprep.subr.bf16.mxu1 %v20126_v26 }
 0xcc9   :  { %17707 = vmatpush3.bf16.msra.mxu0 %v19129_v44  ;;  %v19151_v44 = vld [vmem:[#allocation2 + $0xb38] sm:$0xff]  }
 0xcca   :  { %17708 = vmatprep.subr.bf16.mxu0 %v20126_v26  ;;  %17719 = vmatpush3.bf16.msra.mxu1 %v19135_v55 }
 0xccb   :  { %17720 = vmatprep.subr.bf16.mxu1 %v20126_v26 }
 0xccd   :  { %17709 = vmatpush3.bf16.msra.mxu0 %v19130_v46  ;;  %v19152_v46 = vld [vmem:[#allocation2 + $0xb30] sm:$0xff]  }
 0xcce   :  { %17734 = vmatprep.subr.bf16.mxu0 %v20126_v26  ;;  %17721 = vmatpush3.bf16.msra.mxu1 %v19137_v29 }
 0xccf   :  { %17722 = vmatprep.subr.bf16.mxu1 %v20126_v26 }
 0xcd0   :  { %17711 = vmatmul.mubr.msk.bf16.vlgmr.msra.gmra.mxu0 %vm22118_vm8, %v5092_v12  ;;  %vm22122_vm8 = vcmask 1041408  }
 0xcd1   :  { %17735 = vmatpush3.bf16.msra.mxu0 %v19132_v45  ;;  %17750 = vmatprep.mubr.msk.bf16.mxu0 %vm20127_vm7, %v20126_v26  ;;  %v19153_v45 = vld [vmem:[#allocation2 + $0xb28] sm:$0xff]  }
 0xcd2   :  { %17736 = vmatprep.subr.bf16.mxu0 %v20126_v26  ;;  %17723 = vmatpush3.bf16.msra.mxu1 %v19139_v15 }
 0xcd3   :  { %17724 = vmatprep.subr.bf16.mxu1 %v20126_v26 }
 0xcd5   :  { %17737 = vmatpush3.bf16.msra.mxu0 %v19134_v54  ;;  %v19154_v54 = vld [vmem:[#allocation2 + $0xb20] sm:$0xff]  }
 0xcd6   :  { %17738 = vmatprep.subr.bf16.mxu0 %v20126_v26  ;;  %17725 = vmatpush3.bf16.msra.mxu1 %v19141_v13 }
 0xcd7   :  { %17726 = vmatprep.subr.bf16.mxu1 %v20126_v26 }
 0xcd9   :  { %17739 = vmatpush3.bf16.msra.mxu0 %v19136_v9 }
 0xcda   :  { %17740 = vmatprep.subr.bf16.mxu0 %v20126_v26  ;;  %17727 = vmatpush3.bf16.msra.mxu1 %v19143_v56 }
 0xcdb   :  { %17728 = vmatprep.subr.bf16.mxu1 %v20126_v26 }
 0xcdd   :  { %17741 = vmatpush3.bf16.msra.mxu0 %v19138_v35 }
 0xcde   :  { %17742 = vmatprep.subr.bf16.mxu0 %v20126_v26  ;;  %17729 = vmatpush3.bf16.msra.mxu1 %v19145_v50 }
 0xcdf   :  { %17754 = vmatprep.subr.bf16.mxu1 %v20126_v26 }
 0xce1   :  { %17743 = vmatpush3.bf16.msra.mxu0 %v19140_v0 }
 0xce2   :  { %17744 = vmatprep.subr.bf16.mxu0 %v20126_v26 }
 0xce5   :  { %17745 = vmatpush3.bf16.msra.mxu0 %v19142_v8 }
 0xce6   :  { %17746 = vmatprep.subr.bf16.mxu0 %v20126_v26 }
 0xce9   :  { %17747 = vmatpush3.bf16.msra.mxu0 %v19144_v6 }
 0xcea   :  { %17748 = vmatprep.subr.bf16.mxu0 %v20126_v26 }
 0xced   :  { %17749 = vmatpush3.bf16.msra.mxu0 %v19146_v1 }
 0xcee   :  { %17774 = vmatprep.subr.bf16.mxu0 %v20126_v26 }
 0xd80   :  { %v5163_v3 = vpop.f32.mrf.mxu0  ;;  %v5243_v60 = vpop.f32.mrf.mxu1 }
 0xd81   :  { %v5250_v48 = vrot.slane %v5163_v3, 7  ;;  %v5254_v18 = vrot.slane %v5243_v60, 1 }
 0xd82   :  { %v17688_v61 = vpop.f32.mrf.mxu0  ;;  %v17700_v25 = vpop.f32.mrf.mxu1 }
 0xd83   :  { %v5252_v20 = vsel %vm2147_vm0, 0.0, %v5250_v48  ;;  %v5257_v10 = vsel %vm22119_vm13, %v5254_v18, 0.0  ;;  %v5342_v25 = vld [vmem:[#allocation9 + $0x7] ss:$0 sm:$0xff] }
 0xd84   :  { %v5166_v16 = vpop.f32.mrf.mxu0  ;;  %v5246_v53 = vpop.f32.mrf.mxu1  ;;  %v5271_v28 = vsel %vm20874_vm6, %v5252_v20, 0.0  ;;  %v5273_v39 = vsel %vm20879_vm2, %v5257_v10, 0.0 }
 0xd86   :  { %v17689_v47 = vpop.f32.mrf.mxu0  ;;  %v17701_v58 = vpop.f32.mrf.mxu1 }
 0xd90   :  { %v5332_v30 = vpop.f32.mrf.mxu0 }
 0xd91   :  { %v5333_v19 = vadd.f32 %v5332_v30, %v5271_v28  ;;  %v5669_v28 = vld [vmem:[#allocation2 + $0xce0] sm:$0x3] }
 0xd92   :  { %v17712_v41 = vpop.f32.mrf.mxu0  ;;  %v19155_v30 = vld [vmem:[#allocation2 + $0xd20] sm:$0xff]  }
 0xd93   :  { %v5338_v37 = vadd.f32 %v5333_v19, %v5273_v39  ;;  %v19156_v19 = vld [vmem:[#allocation2 + $0xd18] sm:$0xff]   ;;  %v19158_v39 = vld [vmem:[#allocation2 + $0xd08] sm:$0xff]   ;;  %v19159_v41 = vld [vmem:[#allocation2 + $0xd00] sm:$0xff]  }
 0xd94   :  { %v5335_v14 = vpop.f32.mrf.mxu0 }
 0xd95   :  { %v5339_v17 = vadd.f32 %v5338_v37, %v5093_v36  ;;  %v19157_v36 = vld [vmem:[#allocation2 + $0xd10] sm:$0xff]   ;;  %v19160_v37 = vld [vmem:[#allocation2 + $0xcf8] sm:$0xff]  }
 0xd96   :  { %v17713_v40 = vpop.f32.mrf.mxu0  ;;  %v19161_v14 = vld [vmem:[#allocation2 + $0xcf0] sm:$0xff]  }
 0xd97   :  { %v5340_v42 = vmax.f32 %v5339_v17, 0.0  ;;  %v19162_v17 = vld [vmem:[#allocation2 + $0xce8] sm:$0xff]  }
 0xd99   :  { %v5341_v12 = vpack.c.bf16 %v5340_v42, %v5340_v42 }
 0xd9b   :  { %17731 = vmatmul.mubr.bf16.vlgmr.msra.gmra.mxu1 %v5341_v12  ;;  %17751 = vmatmul.mubr.bf16.vlgmr.msra.gmra.mxu0 %v5341_v12 }
 0xd9c   :  { %17755 = vmatpush3.bf16.msra.mxu1 %v19147_v22  ;;  %17770 = vmatprep.mubr.msk.bf16.mxu1 %vm20127_vm7, %v20126_v26 }
 0xd9d   :  { %17756 = vmatprep.subr.bf16.mxu1 %v20126_v26  ;;  %17776 = vmatprep.mubr.msk.bf16.mxu0 %vm20127_vm7, %v20126_v26 }
 0xda0   :  { %17757 = vmatpush3.bf16.msra.mxu1 %v19148_v49 }
 0xda1   :  { %17758 = vmatprep.subr.bf16.mxu1 %v20126_v26 }
 0xda4   :  { %17759 = vmatpush3.bf16.msra.mxu1 %v19149_v5 }
 0xda5   :  { %17760 = vmatprep.subr.bf16.mxu1 %v20126_v26 }
 0xda8   :  { %17761 = vmatpush3.bf16.msra.mxu1 %v19150_v63 }
 0xda9   :  { %17762 = vmatprep.subr.bf16.mxu1 %v20126_v26 }
 0xdac   :  { %17763 = vmatpush3.bf16.msra.mxu1 %v19151_v44  ;;  %v19163_v44 = vld [vmem:[#allocation2 + $0xbb8] sm:$0xff]  }
 0xdad   :  { %17764 = vmatprep.subr.bf16.mxu1 %v20126_v26 }
 0xdb0   :  { %17765 = vmatpush3.bf16.msra.mxu1 %v19152_v46  ;;  %v19164_v46 = vld [vmem:[#allocation2 + $0xbb0] sm:$0xff]  }
 0xdb1   :  { %17766 = vmatprep.subr.bf16.mxu1 %v20126_v26 }
 0xdb4   :  { %17767 = vmatpush3.bf16.msra.mxu1 %v19153_v45  ;;  %v19165_v45 = vld [vmem:[#allocation2 + $0xba8] sm:$0xff]  }
 0xdb5   :  { %17768 = vmatprep.subr.bf16.mxu1 %v20126_v26 }
 0xdb8   :  { %17769 = vmatpush3.bf16.msra.mxu1 %v19154_v54  ;;  %v19166_v54 = vld [vmem:[#allocation2 + $0xba0] sm:$0xff]  }
 0xdb9   :  { %17800 = vmatprep.subr.bf16.mxu1 %v20126_v26 }
 0xdbb   :  { %17771 = vmatmul.mubr.bf16.vlgmr.msra.gmra.mxu1 %v5341_v12 }
 0xdbc   :  { %17808 = vmatprep.mubr.msk.bf16.mxu1 %vm20127_vm7, %v20126_v26  ;;  %17801 = vmatpush3.bf16.msra.mxu1 %v19163_v44  ;;  %v19196_v44 = vld [vmem:[#allocation4] ss:$8 sps:$4 sm:$0xff]  }
 0xdbd   :  { %17802 = vmatprep.subr.bf16.mxu1 %v20126_v26 }
 0xdc0   :  { %17803 = vmatpush3.bf16.msra.mxu1 %v19164_v46  ;;  %v19201_v46 = vld [vmem:[#allocation4 + $0xf4] ss:$8 sps:$4 sm:$0xff]  }
 0xdc1   :  { %17804 = vmatprep.subr.bf16.mxu1 %v20126_v26 }
 0xdc4   :  { %17805 = vmatpush3.bf16.msra.mxu1 %v19165_v45  ;;  %v19199_v45 = vld [vmem:[#allocation4 + $0xf0] ss:$8 sps:$4 sm:$0xff]  }
 0xdc5   :  { %17806 = vmatprep.subr.bf16.mxu1 %v20126_v26 }
 0xdc8   :  { %17807 = vmatpush3.bf16.msra.mxu1 %v19166_v54  ;;  %v19204_v54 = vld [vmem:[#allocation4 + $0xe4] ss:$8 sps:$4 sm:$0xff]  }
 0xdc9   :  { %17832 = vmatprep.subr.bf16.mxu1 %v20126_v26 }
 0xe5b   :  { %v5441_v55 = vpop.f32.mrf.mxu1  ;;  %v5561_v9 = vpop.f32.mrf.mxu0 }
 0xe5c   :  { %v5568_v56 = vrot.slane %v5441_v55, 7  ;;  %v5572_v6 = vrot.slane %v5561_v9, 1  ;;  %v19167_v55 = vld [vmem:[#allocation2 + $0xbf8] sm:$0xff]   ;;  %v19168_v9 = vld [vmem:[#allocation2 + $0xbf0] sm:$0xff]  }
 0xe5d   :  { %v17732_v29 = vpop.f32.mrf.mxu1  ;;  %v17752_v35 = vpop.f32.mrf.mxu0 }
 0xe5e   :  { %v5570_v50 = vsel %vm2147_vm0, 0.0, %v5568_v56  ;;  %v5574_v1 = vsel %vm22119_vm13, %v5572_v6, 0.0  ;;  %vm22120_vm13 = vcmask 31744   ;;  %v19169_v29 = vld [vmem:[#allocation2 + $0xbe8] sm:$0xff]   ;;  %v19171_v56 = vld [vmem:[#allocation2 + $0xbd8] sm:$0xff]   ;;  %v19172_v6 = vld [vmem:[#allocation2 + $0xbd0] sm:$0xff]  }
 0xe5f   :  { %v5444_v15 = vpop.f32.mrf.mxu1  ;;  %v5564_v0 = vpop.f32.mrf.mxu0  ;;  %v5575_v3 = vsel %vm20874_vm6, %v5570_v50, 0.0  ;;  %v5576_v16 = vsel %vm20879_vm2, %v5574_v1, 0.0  ;;  %v19173_v50 = vld [vmem:[#allocation2 + $0xbc8] sm:$0xff]  }
 0xe60   :  { %v19170_v0 = vld [vmem:[#allocation2 + $0xbe0] sm:$0xff]  }
 0xe61   :  { %v17733_v13 = vpop.f32.mrf.mxu1  ;;  %v17753_v8 = vpop.f32.mrf.mxu0 }
 0xe7b   :  { %v5659_v60 = vpop.f32.mrf.mxu1 }
 0xe7c   :  { %v5660_v61 = vadd.f32 %v5659_v60, %v5575_v3 }
 0xe7d   :  { %v17772_v53 = vpop.f32.mrf.mxu1 }
 0xe7e   :  { %v5665_v47 = vadd.f32 %v5660_v61, %v5576_v16  ;;  %v19174_v61 = vld [vmem:[#allocation2 + $0xbc0] sm:$0xff]  }
 0xe7f   :  { %v5662_v58 = vpop.f32.mrf.mxu1  ;;  %v5833_v16 = vld [vmem:[#allocation9 + $0x10] ss:$0 sm:$0xff] }
 0xe80   :  { %v5666_v48 = vadd.f32 %v5665_v47, %v5342_v25  ;;  %v19177_v25 = vld [vmem:[#allocation4 + $0x74] ss:$8 sps:$4 sm:$0xff]  }
 0xe81   :  { %v17773_v34 = vpop.f32.mrf.mxu1 }
 0xe82   :  { %v5667_v18 = vmax.f32 %v5666_v48, 0.0 }
 0xe84   :  { %v20907_v20 = vpack.c.bf16 %v5667_v18, %v5667_v18  ;;  %v19175_v18 = vld [vmem:[#allocation4 + $0x70] ss:$8 sps:$4 sm:$0xff]  }
 0xe86   :  { %v20911_v10 = vsel %vm22122_vm8, %v20907_v20, 0 }
 0xe87   :  { %22180 = vst [vmem:[#allocation13_spill] sm:$0xff] %v20911_v10  ;;  %17775 = vmatpush3.bf16.msra.mxu0 %v20911_v10 }
 0xe88   :  { %17780 = vmatprep.subr.bf16.mxu0 %v20126_v26 }
 0xe8a   :  { %17777 = vmatmul.mubr.msk.bf16.vlgmr.msra.gmra.mxu0 %vm22120_vm13, %v5669_v28  ;;  %vm22181_vm13 = vcmask 523264  }
 0xe8b   :  { %17781 = vmatpush3.bf16.msra.mxu0 %v19155_v30  ;;  %17796 = vmatprep.mubr.msk.bf16.mxu0 %vm20127_vm7, %v20126_v26  ;;  %v19180_v30 = vld [vmem:[#allocation4 + $0x64] ss:$8 sps:$4 sm:$0xff]  }
 0xe8c   :  { %17782 = vmatprep.subr.bf16.mxu0 %v20126_v26 }
 0xe8f   :  { %17783 = vmatpush3.bf16.msra.mxu0 %v19156_v19 }
 0xe90   :  { %17784 = vmatprep.subr.bf16.mxu0 %v20126_v26 }
 0xe93   :  { %17785 = vmatpush3.bf16.msra.mxu0 %v19157_v36  ;;  %v19178_v36 = vld [vmem:[#allocation4 + $0x60] ss:$8 sps:$4 sm:$0xff]  }
 0xe94   :  { %17786 = vmatprep.subr.bf16.mxu0 %v20126_v26 }
 0xe97   :  { %17787 = vmatpush3.bf16.msra.mxu0 %v19158_v39  ;;  %v22123_v39 = vmov 0  }
 0xe98   :  { %17788 = vmatprep.subr.bf16.mxu0 %v20126_v26 }
 0xe9b   :  { %17789 = vmatpush3.bf16.msra.mxu0 %v19159_v41  ;;  %v19183_v41 = vld [vmem:[#allocation4 + $0x54] ss:$8 sps:$4 sm:$0xff]  }
 0xe9c   :  { %17790 = vmatprep.subr.bf16.mxu0 %v20126_v26 }
 0xe9f   :  { %17791 = vmatpush3.bf16.msra.mxu0 %v19160_v37  ;;  %v19181_v37 = vld [vmem:[#allocation4 + $0x50] ss:$8 sps:$4 sm:$0xff]  }
 0xea0   :  { %17792 = vmatprep.subr.bf16.mxu0 %v20126_v26 }
 0xea3   :  { %17793 = vmatpush3.bf16.msra.mxu0 %v19161_v14  ;;  %v19186_v14 = vld [vmem:[#allocation4 + $0x44] ss:$8 sps:$4 sm:$0xff]  }
 0xea4   :  { %17794 = vmatprep.subr.bf16.mxu0 %v20126_v26 }
 0xea7   :  { %17795 = vmatpush3.bf16.msra.mxu0 %v19162_v17  ;;  %v19184_v17 = vld [vmem:[#allocation4 + $0x40] ss:$8 sps:$4 sm:$0xff]  }
 0xea8   :  { %17812 = vmatprep.subr.bf16.mxu0 %v20126_v26 }
 0xf4a   :  { %v5712_v40 = vpop.f32.mrf.mxu0 }
 0xf4b   :  { %v5719_v42 = vrot.slane %v5712_v40, 2 }
 0xf4c   :  { %v17778_v22 = vpop.f32.mrf.mxu0 }
 0xf4d   :  { %v5721_v12 = vmax.f32 %v5712_v40, %v5719_v42  ;;  %v19189_v40 = vld [vmem:[#allocation4 + $0x34] ss:$8 sps:$4 sm:$0xff]   ;;  %v19187_v42 = vld [vmem:[#allocation4 + $0x30] ss:$8 sps:$4 sm:$0xff]   ;;  %v19192_v22 = vld [vmem:[#allocation4 + $0x24] ss:$8 sps:$4 sm:$0xff]  }
 0xf4e   :  { %v5715_v49 = vpop.f32.mrf.mxu0 }
 0xf4f   :  { %v5738_v5 = vpack.c.bf16 %v5721_v12, %v5721_v12  ;;  %v19190_v12 = vld [vmem:[#allocation4 + $0x20] ss:$8 sps:$4 sm:$0xff]   ;;  %v19195_v49 = vld [vmem:[#allocation4 + $0x14] ss:$8 sps:$4 sm:$0xff]  }
 0xf50   :  { %v17779_v63 = vpop.f32.mrf.mxu0 }
 0xf51   :  { %17797 = vmatmul.mubr.bf16.vlgmr.msra.gmra.mxu0 %v5738_v5  ;;  %v19193_v5 = vld [vmem:[#allocation4 + $0x10] ss:$8 sps:$4 sm:$0xff]   ;;  %v19198_v63 = vld [vmem:[#allocation4 + $0x4] ss:$8 sps:$4 sm:$0xff]  }
 0xf52   :  { %17828 = vmatprep.mubr.msk.bf16.mxu0 %vm20127_vm7, %v20126_v26  ;;  %17813 = vmatpush3.bf16.msra.mxu0 %v19167_v55  ;;  %v19202_v55 = vld [vmem:[#allocation4 + $0xe0] ss:$8 sps:$4 sm:$0xff]  }
 0xf53   :  { %17814 = vmatprep.subr.bf16.mxu0 %v20126_v26 }
 0xf56   :  { %17815 = vmatpush3.bf16.msra.mxu0 %v19168_v9  ;;  %v19207_v9 = vld [vmem:[#allocation4 + $0xd4] ss:$8 sps:$4 sm:$0xff]  }
 0xf57   :  { %17816 = vmatprep.subr.bf16.mxu0 %v20126_v26 }
 0xf5a   :  { %17817 = vmatpush3.bf16.msra.mxu0 %v19169_v29  ;;  %v19205_v29 = vld [vmem:[#allocation4 + $0xd0] ss:$8 sps:$4 sm:$0xff]  }
 0xf5b   :  { %17818 = vmatprep.subr.bf16.mxu0 %v20126_v26 }
 0xf5e   :  { %17819 = vmatpush3.bf16.msra.mxu0 %v19170_v0  ;;  %v19213_v0 = vld [vmem:[#allocation4 + $0xb4] ss:$8 sps:$4 sm:$0xff]  }
 0xf5f   :  { %17820 = vmatprep.subr.bf16.mxu0 %v20126_v26 }
 0xf62   :  { %17821 = vmatpush3.bf16.msra.mxu0 %v19171_v56  ;;  %v19214_v56 = vld [vmem:[#allocation4 + $0xa0] ss:$8 sps:$4 sm:$0xff]  }
 0xf63   :  { %17822 = vmatprep.subr.bf16.mxu0 %v20126_v26 }
 0xf66   :  { %17823 = vmatpush3.bf16.msra.mxu0 %v19172_v6  ;;  %v19219_v6 = vld [vmem:[#allocation4 + $0x94] ss:$8 sps:$4 sm:$0xff]  }
 0xf67   :  { %17824 = vmatprep.subr.bf16.mxu0 %v20126_v26 }
 0xf6a   :  { %17825 = vmatpush3.bf16.msra.mxu0 %v19173_v50  ;;  %v19217_v50 = vld [vmem:[#allocation4 + $0x90] ss:$8 sps:$4 sm:$0xff]  }
 0xf6b   :  { %17826 = vmatprep.subr.bf16.mxu0 %v20126_v26 }
 0xf6e   :  { %17827 = vmatpush3.bf16.msra.mxu0 %v19174_v61  ;;  %v19223_v61 = vld [vmem:[#allocation4 + $0x170] ss:$8 sps:$4 sm:$0xff]  }
 0xf6f   :  { %6300 = vmatprep.subr.bf16.mxu0 %v19177_v25  ;;  %v19228_v25 = vld [vmem:[#allocation4 + $0x164] ss:$8 sps:$4 sm:$0xff]  }
0x1011   :  { %v5821_v35 = vpop.f32.mrf.mxu0 }
0x1012   :  { %5828 = vrot.lane.b32.xlu1 %v5821_v35, %s20120_s13 }
0x1013   :  { %v17798_v15 = vpop.f32.mrf.mxu0 }
0x1014   :  { %v19208_v15 = vld [vmem:[#allocation4 + $0xc0] ss:$8 sps:$4 sm:$0xff]  }
0x1015   :  { %v5824_v13 = vpop.f32.mrf.mxu0 }
0x1016   :  { %v19211_v13 = vld [vmem:[#allocation4 + $0xb0] ss:$8 sps:$4 sm:$0xff]  }
0x1017   :  { %v17799_v8 = vpop.f32.mrf.mxu0 }
0x1018   :  { %v19216_v8 = vld [vmem:[#allocation4 + $0xa4] ss:$8 sps:$4 sm:$0xff]  }
0x1084   :  { %v5829_v1 = vpop.permute.xlu1 %5828 }
0x1085   :  { %v5831_v3 = vmax.f32 %v5821_v35, %v5829_v1  ;;  %v19210_v35 = vld [vmem:[#allocation4 + $0xc4] ss:$8 sps:$4 sm:$0xff]  }
0x1086   :  { %v19222_v1 = vld [vmem:[#allocation4 + $0x84] ss:$8 sps:$4 sm:$0xff]  }
0x1087   :  { %v5832_v60 = vpack.c.bf16 %v5831_v3, %v5831_v3  ;;  %v19220_v3 = vld [vmem:[#allocation4 + $0x80] ss:$8 sps:$4 sm:$0xff]  }
0x1089   :  { %17809 = vmatmul.mubr.msk.bf16.vlgmr.msra.gmra.mxu1 %vm22181_vm13, %v5832_v60  ;;  %v19225_v60 = vld [vmem:[#allocation4 + $0x174] ss:$8 sps:$4 sm:$0xff]   ;;  %vm22121_vm13 = vcmask 15360  }
0x108a   :  { %17834 = vmatprep.mubr.msk.bf16.mxu1 %vm20127_vm7, %v20126_v26 }
0x1149   :  { %v5903_v53 = vpop.f32.mrf.mxu1 }
0x114a   :  { %v5904_v47 = vadd.f32 %v5903_v53, %v5833_v16  ;;  %v19226_v16 = vld [vmem:[#allocation4 + $0x160] ss:$8 sps:$4 sm:$0xff]   ;;  %v19231_v53 = vld [vmem:[#allocation4 + $0x154] ss:$8 sps:$4 sm:$0xff]  }
0x114b   :  { %v17810_v58 = vpop.f32.mrf.mxu1 }
0x114c   :  { %v5909_v48 = vmax.f32 %v5904_v47, 0.0  ;;  %v19229_v47 = vld [vmem:[#allocation4 + $0x150] ss:$8 sps:$4 sm:$0xff]   ;;  %v19234_v58 = vld [vmem:[#allocation4 + $0x144] ss:$8 sps:$4 sm:$0xff]  }
0x114d   :  { %v5906_v34 = vpop.f32.mrf.mxu1 }
0x114e   :  { %v5910_v28 = vpack.c.bf16 %v5909_v48, %v5909_v48  ;;  %v19232_v48 = vld [vmem:[#allocation4 + $0x140] ss:$8 sps:$4 sm:$0xff]   ;;  %v19237_v34 = vld [vmem:[#allocation4 + $0x134] ss:$8 sps:$4 sm:$0xff]  }
0x114f   :  { %v17811_v19 = vpop.f32.mrf.mxu1 }
0x1150   :  { %17829 = vmatmul.mubr.bf16.vlgmr.msra.gmra.mxu0 %v5910_v28  ;;  %v19240_v28 = vld [vmem:[#allocation4 + $0x124] ss:$8 sps:$4 sm:$0xff]   ;;  %v19243_v19 = vld [vmem:[#allocation4 + $0x114] ss:$8 sps:$4 sm:$0xff]  }
0x1151   :  { %6301 = vmatpush1.bf16.msra.mxu0 %v19175_v18  ;;  %6332 = vmatprep.mubr.bf16.mxu0 %v22123_v39  ;;  %v19235_v18 = vld [vmem:[#allocation4 + $0x130] ss:$8 sps:$4 sm:$0xff]  }
0x1152   :  { %6302 = vmatprep.subr.bf16.mxu0 %v19180_v30  ;;  %v19238_v30 = vld [vmem:[#allocation4 + $0x120] ss:$8 sps:$4 sm:$0xff]  }
0x1155   :  { %6303 = vmatpush1.bf16.msra.mxu0 %v19178_v36  ;;  %v19241_v36 = vld [vmem:[#allocation4 + $0x110] ss:$8 sps:$4 sm:$0xff]  }
0x1156   :  { %6304 = vmatprep.subr.bf16.mxu0 %v19183_v41  ;;  %v19246_v41 = vld [vmem:[#allocation4 + $0x104] ss:$8 sps:$4 sm:$0xff]  }
0x1159   :  { %6305 = vmatpush1.bf16.msra.mxu0 %v19181_v37  ;;  %v19244_v37 = vld [vmem:[#allocation4 + $0x100] ss:$8 sps:$4 sm:$0xff]  }
0x115a   :  { %6306 = vmatprep.subr.bf16.mxu0 %v19186_v14  ;;  %v5911_v14 = vld [vmem:[#allocation9 + $0x11] ss:$0 sm:$0xff] }
0x115d   :  { %6307 = vmatpush1.bf16.msra.mxu0 %v19184_v17 }
0x115e   :  { %6308 = vmatprep.subr.bf16.mxu0 %v19189_v40 }
0x1161   :  { %6309 = vmatpush1.bf16.msra.mxu0 %v19187_v42 }
0x1162   :  { %6310 = vmatprep.subr.bf16.mxu0 %v19192_v22 }
0x1165   :  { %6311 = vmatpush1.bf16.msra.mxu0 %v19190_v12 }
0x1166   :  { %6312 = vmatprep.subr.bf16.mxu0 %v19195_v49 }
0x1169   :  { %6313 = vmatpush1.bf16.msra.mxu0 %v19193_v5  ;;  %v19249_v5 = vld [vmem:[#allocation4 + $0x1f4] ss:$8 sps:$4 sm:$0xff]  }
0x116a   :  { %6314 = vmatprep.subr.bf16.mxu0 %v19198_v63 }
0x116d   :  { %6315 = vmatpush1.bf16.msra.mxu0 %v19196_v44 }
0x116e   :  { %6574 = vmatprep.subr.bf16.mxu0 %v19201_v46  ;;  %v6018_v46 = vld [vmem:[#allocation2 + $0xea8] sm:$0x3] }
0x1170   :  { %6333 = vmatmul.mubr.bf16.vlgmr.msra.gmra.mxu0 %v20907_v20 }
0x1171   :  { %6575 = vmatpush1.bf16.msra.mxu0 %v19199_v45  ;;  %6606 = vmatprep.mubr.bf16.mxu0 %v22123_v39  ;;  %v19247_v45 = vld [vmem:[#allocation4 + $0x1f0] ss:$8 sps:$4 sm:$0xff]  }
0x1172   :  { %6576 = vmatprep.subr.bf16.mxu0 %v19204_v54  ;;  %v19252_v54 = vld [vmem:[#allocation4 + $0x1e4] ss:$8 sps:$4 sm:$0xff]  }
0x1175   :  { %6577 = vmatpush1.bf16.msra.mxu0 %v19202_v55  ;;  %v19250_v55 = vld [vmem:[#allocation4 + $0x1e0] ss:$8 sps:$4 sm:$0xff]  }
0x1176   :  { %6578 = vmatprep.subr.bf16.mxu0 %v19207_v9  ;;  %v19255_v9 = vld [vmem:[#allocation4 + $0x1d4] ss:$8 sps:$4 sm:$0xff]  }
0x1179   :  { %6579 = vmatpush1.bf16.msra.mxu0 %v19205_v29  ;;  %v19253_v29 = vld [vmem:[#allocation4 + $0x1d0] ss:$8 sps:$4 sm:$0xff]  }
0x117a   :  { %6580 = vmatprep.subr.bf16.mxu0 %v19210_v35  ;;  %v19258_v35 = vld [vmem:[#allocation4 + $0x1c4] ss:$8 sps:$4 sm:$0xff]  }
0x117d   :  { %6581 = vmatpush1.bf16.msra.mxu0 %v19208_v15  ;;  %v19256_v15 = vld [vmem:[#allocation4 + $0x1c0] ss:$8 sps:$4 sm:$0xff]  }
0x117e   :  { %6582 = vmatprep.subr.bf16.mxu0 %v19213_v0  ;;  %v19261_v0 = vld [vmem:[#allocation4 + $0x1b4] ss:$8 sps:$4 sm:$0xff]  }
0x1181   :  { %6583 = vmatpush1.bf16.msra.mxu0 %v19211_v13  ;;  %v19259_v13 = vld [vmem:[#allocation4 + $0x1b0] ss:$8 sps:$4 sm:$0xff]  }
0x1182   :  { %6584 = vmatprep.subr.bf16.mxu0 %v19216_v8  ;;  %v19264_v8 = vld [vmem:[#allocation4 + $0x1a4] ss:$8 sps:$4 sm:$0xff]  }
0x1185   :  { %6585 = vmatpush1.bf16.msra.mxu0 %v19214_v56  ;;  %v19262_v56 = vld [vmem:[#allocation4 + $0x1a0] ss:$8 sps:$4 sm:$0xff]  }
0x1186   :  { %6586 = vmatprep.subr.bf16.mxu0 %v19219_v6  ;;  %v19267_v6 = vld [vmem:[#allocation4 + $0x194] ss:$8 sps:$4 sm:$0xff]  }
0x1189   :  { %6587 = vmatpush1.bf16.msra.mxu0 %v19217_v50 }
0x118a   :  { %6588 = vmatprep.subr.bf16.mxu0 %v19222_v1  ;;  %v19265_v1 = vld [vmem:[#allocation4 + $0x190] ss:$8 sps:$4 sm:$0xff]  }
0x118d   :  { %6589 = vmatpush1.bf16.msra.mxu0 %v19220_v3  ;;  %v19270_v3 = vld [vmem:[#allocation4 + $0x184] ss:$8 sps:$4 sm:$0xff]  }
0x118e   :  { %6848 = vmatprep.subr.bf16.mxu0 %v19225_v60 }
0x1190   :  { %6607 = vmatmul.mubr.bf16.vlgmr.msra.gmra.mxu0 %v20907_v20 }
0x1191   :  { %6849 = vmatpush1.bf16.msra.mxu0 %v19223_v61  ;;  %6880 = vmatprep.mubr.bf16.mxu0 %v22123_v39 }
0x1192   :  { %6850 = vmatprep.subr.bf16.mxu0 %v19228_v25  ;;  %v19268_v25 = vld [vmem:[#allocation4 + $0x180] ss:$8 sps:$4 sm:$0xff]  }
0x1195   :  { %6851 = vmatpush1.bf16.msra.mxu0 %v19226_v16 }
0x1196   :  { %6852 = vmatprep.subr.bf16.mxu0 %v19231_v53 }
0x1199   :  { %6853 = vmatpush1.bf16.msra.mxu0 %v19229_v47 }
0x119a   :  { %6854 = vmatprep.subr.bf16.mxu0 %v19234_v58 }
0x119d   :  { %6855 = vmatpush1.bf16.msra.mxu0 %v19232_v48 }
0x119e   :  { %6856 = vmatprep.subr.bf16.mxu0 %v19237_v34  ;;  %v19273_v34 = vld [vmem:[#allocation4 + $0x274] ss:$8 sps:$4 sm:$0xff]  }
0x11a1   :  { %6857 = vmatpush1.bf16.msra.mxu0 %v19235_v18 }
0x11a2   :  { %6858 = vmatprep.subr.bf16.mxu0 %v19240_v28 }
0x11a5   :  { %6859 = vmatpush1.bf16.msra.mxu0 %v19238_v30 }
0x11a6   :  { %6860 = vmatprep.subr.bf16.mxu0 %v19243_v19 }
0x11a9   :  { %6861 = vmatpush1.bf16.msra.mxu0 %v19241_v36 }
0x11aa   :  { %6862 = vmatprep.subr.bf16.mxu0 %v19246_v41  ;;  %v19271_v41 = vld [vmem:[#allocation4 + $0x270] ss:$8 sps:$4 sm:$0xff]  }
0x11ad   :  { %6863 = vmatpush1.bf16.msra.mxu0 %v19244_v37 }
0x11ae   :  { %17858 = vmatprep.subr.bf16.mxu0 %v20126_v26 }
0x11b0   :  { %6881 = vmatmul.mubr.bf16.vlgmr.msra.gmra.mxu0 %v20907_v20 }
0x11b1   :  { %17874 = vmatprep.mubr.msk.bf16.mxu0 %vm20127_vm7, %v20126_v26 }
0x1210   :  { %v6010_v17 = vpop.f32.mrf.mxu0 }
0x1211   :  { %v6011_v40 = vadd.f32 %v6010_v17, %v5911_v14  ;;  %v19276_v14 = vld [vmem:[#allocation4 + $0x264] ss:$8 sps:$4 sm:$0xff]  }
0x1212   :  { %v17830_v42 = vpop.f32.mrf.mxu0 }
0x1213   :  { %v6016_v22 = vmax.f32 %v6011_v40, 0.0  ;;  %v19274_v42 = vld [vmem:[#allocation4 + $0x260] ss:$8 sps:$4 sm:$0xff]  }
0x1214   :  { %v6013_v12 = vpop.f32.mrf.mxu0 }
0x1215   :  { %v20952_v49 = vpack.c.bf16 %v6016_v22, %v6016_v22  ;;  %v19279_v22 = vld [vmem:[#allocation4 + $0x254] ss:$8 sps:$4 sm:$0xff]  }
0x1216   :  { %v17831_v63 = vpop.f32.mrf.mxu0 }
0x1217   :  { %22182 = vst [vmem:[#allocation20_spill] sm:$0xff] %v20952_v49  ;;  %v20956_v44 = vsel %vm2147_vm0, %v20952_v49, 0  ;;  %v19282_v63 = vld [vmem:[#allocation4 + $0x244] ss:$8 sps:$4 sm:$0xff]  }
0x1218   :  { %22183 = vst [vmem:[#allocation17_spill] sm:$0xff] %v20956_v44  ;;  %17833 = vmatpush3.bf16.msra.mxu1 %v20956_v44 }
0x1219   :  { %6179 = vmatprep.subr.bf16.mxu1 %v19249_v5  ;;  %v19277_v5 = vld [vmem:[#allocation4 + $0x250] ss:$8 sps:$4 sm:$0xff]  }
0x121b   :  { %17835 = vmatmul.mubr.msk.bf16.vlgmr.msra.gmra.mxu1 %vm22121_vm13, %v6018_v46  ;;  %v19280_v46 = vld [vmem:[#allocation4 + $0x240] ss:$8 sps:$4 sm:$0xff]   ;;  %vm22184_vm13 = vcmask 1042432  }
0x121c   :  { %6180 = vmatpush1.bf16.msra.mxu1 %v19247_v45  ;;  %6211 = vmatprep.mubr.bf16.mxu1 %v22123_v39  ;;  %v19285_v45 = vld [vmem:[#allocation4 + $0x234] ss:$8 sps:$4 sm:$0xff]   ;;  %vm22185_vm8 = vmmov %vm22184_vm13 }
0x121d   :  { %6181 = vmatprep.subr.bf16.mxu1 %v19252_v54  ;;  %v19283_v54 = vld [vmem:[#allocation4 + $0x230] ss:$8 sps:$4 sm:$0xff]  }
0x1220   :  { %6182 = vmatpush1.bf16.msra.mxu1 %v19250_v55  ;;  %v19288_v55 = vld [vmem:[#allocation4 + $0x224] ss:$8 sps:$4 sm:$0xff]  }
0x1221   :  { %6183 = vmatprep.subr.bf16.mxu1 %v19255_v9  ;;  %v19286_v9 = vld [vmem:[#allocation4 + $0x220] ss:$8 sps:$4 sm:$0xff]  }
0x1224   :  { %6184 = vmatpush1.bf16.msra.mxu1 %v19253_v29  ;;  %v19291_v29 = vld [vmem:[#allocation4 + $0x214] ss:$8 sps:$4 sm:$0xff]  }
0x1225   :  { %6185 = vmatprep.subr.bf16.mxu1 %v19258_v35  ;;  %v19289_v35 = vld [vmem:[#allocation4 + $0x210] ss:$8 sps:$4 sm:$0xff]  }
0x1228   :  { %6186 = vmatpush1.bf16.msra.mxu1 %v19256_v15  ;;  %v19294_v15 = vld [vmem:[#allocation4 + $0x204] ss:$8 sps:$4 sm:$0xff]  }
0x1229   :  { %6187 = vmatprep.subr.bf16.mxu1 %v19261_v0  ;;  %v19292_v0 = vld [vmem:[#allocation4 + $0x200] ss:$8 sps:$4 sm:$0xff]  }
0x122c   :  { %6188 = vmatpush1.bf16.msra.mxu1 %v19259_v13  ;;  %v19297_v13 = vld [vmem:[#allocation4 + $0x2f4] ss:$8 sps:$4 sm:$0xff]  }
0x122d   :  { %6189 = vmatprep.subr.bf16.mxu1 %v19264_v8  ;;  %v19295_v8 = vld [vmem:[#allocation4 + $0x2f0] ss:$8 sps:$4 sm:$0xff]  }
0x1230   :  { %v20961_v50 = vpop.f32.mrf.mxu0  ;;  %6190 = vmatpush1.bf16.msra.mxu1 %v19262_v56  ;;  %v19300_v56 = vld [vmem:[#allocation4 + $0x2e4] ss:$8 sps:$4 sm:$0xff]  }
0x1231   :  { %6191 = vmatprep.subr.bf16.mxu1 %v19267_v6  ;;  %v19298_v6 = vld [vmem:[#allocation4 + $0x2e0] ss:$8 sps:$4 sm:$0xff]  }
0x1232   :  { %v20963_v60 = vpop.f32.mrf.mxu0 }
0x1234   :  { %v6338_v61 = vpop.f32.mrf.mxu0  ;;  %6192 = vmatpush1.bf16.msra.mxu1 %v19265_v1  ;;  %v19303_v1 = vld [vmem:[#allocation4 + $0x2d4] ss:$8 sps:$4 sm:$0xff]  }
0x1235   :  { %6193 = vmatprep.subr.bf16.mxu1 %v19270_v3  ;;  %v19301_v3 = vld [vmem:[#allocation4 + $0x2d0] ss:$8 sps:$4 sm:$0xff]   ;;  %v19306_v61 = vld [vmem:[#allocation4 + $0x2c4] ss:$8 sps:$4 sm:$0xff]  }
0x1236   :  { %v6339_v16 = vpop.f32.mrf.mxu0 }
0x1237   :  { %v19309_v16 = vld [vmem:[#allocation4 + $0x2b4] ss:$8 sps:$4 sm:$0xff]  }
0x1238   :  { %6194 = vmatpush1.bf16.msra.mxu1 %v19268_v25  ;;  %v19304_v25 = vld [vmem:[#allocation4 + $0x2c0] ss:$8 sps:$4 sm:$0xff]  }
0x1239   :  { %6453 = vmatprep.subr.bf16.mxu1 %v19273_v34  ;;  %v19310_v34 = vld [vmem:[#allocation4 + $0x2a0] ss:$8 sps:$4 sm:$0xff]  }
0x1250   :  { %v20965_v53 = vpop.f32.mrf.mxu0 }
0x1252   :  { %v20967_v47 = vpop.f32.mrf.mxu0 }
0x1254   :  { %v6612_v58 = vpop.f32.mrf.mxu0 }
0x1255   :  { %v19307_v58 = vld [vmem:[#allocation4 + $0x2b0] ss:$8 sps:$4 sm:$0xff]  }
0x1256   :  { %v6613_v48 = vpop.f32.mrf.mxu0 }
0x1257   :  { %v19312_v48 = vld [vmem:[#allocation4 + $0x2a4] ss:$8 sps:$4 sm:$0xff]  }
0x1270   :  { %v20969_v18 = vpop.f32.mrf.mxu0 }
0x1272   :  { %v20971_v28 = vpop.f32.mrf.mxu0 }
0x1274   :  { %v6886_v30 = vpop.f32.mrf.mxu0 }
0x1275   :  { %v19315_v30 = vld [vmem:[#allocation4 + $0x294] ss:$8 sps:$4 sm:$0xff]  }
0x1276   :  { %v6887_v19 = vpop.f32.mrf.mxu0 }
0x1277   :  { %v19313_v19 = vld [vmem:[#allocation4 + $0x290] ss:$8 sps:$4 sm:$0xff]  }
0x12db   :  { %v6060_v36 = vpop.f32.mrf.mxu1 }
0x12dc   :  { %v20973_v37 = vpack.c.bf16 %v6060_v36, %v6060_v36  ;;  %v19318_v36 = vld [vmem:[#allocation4 + $0x284] ss:$8 sps:$4 sm:$0xff]  }
0x12dd   :  { %v17836_v17 = vpop.f32.mrf.mxu1 }
0x12de   :  { %6212 = vmatmul.mubr.bf16.vlgmr.msra.gmra.mxu1 %v20973_v37  ;;  %v19320_v17 = vld [vmem:[#allocation2 + $0xe20] sm:$0xff]  }
0x12df   :  { %6454 = vmatpush1.bf16.msra.mxu1 %v19271_v41  ;;  %v6063_v40 = vpop.f32.mrf.mxu1  ;;  %6485 = vmatprep.mubr.bf16.mxu1 %v22123_v39  ;;  %v19316_v41 = vld [vmem:[#allocation4 + $0x280] ss:$8 sps:$4 sm:$0xff]  }
0x12e0   :  { %6455 = vmatprep.subr.bf16.mxu1 %v19276_v14  ;;  %v19319_v14 = vld [vmem:[#allocation2 + $0xd60] sm:$0xff]   ;;  %17859 = vmatpush3.bf16.msra.mxu0 %v19320_v17  ;;  %v19321_v40 = vld [vmem:[#allocation2 + $0xd58] sm:$0xff]   ;;  %v21008_v17 = vsub.s32 1, %v22150_v62 }
0x12e1   :  { %v17837_v12 = vpop.f32.mrf.mxu1  ;;  %17860 = vmatprep.subr.bf16.mxu0 %v20126_v26 }
0x12e2   :  { %v19324_v12 = vld [vmem:[#allocation2 + $0xe10] sm:$0xff]  }
0x12e3   :  { %6456 = vmatpush1.bf16.msra.mxu1 %v19274_v42  ;;  %v19322_v42 = vld [vmem:[#allocation2 + $0xe18] sm:$0xff]  }
0x12e4   :  { %6457 = vmatprep.subr.bf16.mxu1 %v19279_v22  ;;  %17861 = vmatpush3.bf16.msra.mxu0 %v19322_v42  ;;  %v19323_v22 = vld [vmem:[#allocation2 + $0xd50] sm:$0xff]  }
0x12e5   :  { %17862 = vmatprep.subr.bf16.mxu0 %v20126_v26 }
0x12e7   :  { %6458 = vmatpush1.bf16.msra.mxu1 %v19277_v5  ;;  %v19326_v5 = vld [vmem:[#allocation2 + $0xe08] sm:$0xff]  }
0x12e8   :  { %6459 = vmatprep.subr.bf16.mxu1 %v19282_v63  ;;  %17863 = vmatpush3.bf16.msra.mxu0 %v19324_v12  ;;  %v19327_v63 = vld [vmem:[#allocation2 + $0xd40] sm:$0xff]  }
0x12e9   :  { %17864 = vmatprep.subr.bf16.mxu0 %v20126_v26 }
0x12eb   :  { %6460 = vmatpush1.bf16.msra.mxu1 %v19280_v46  ;;  %v19328_v46 = vld [vmem:[#allocation2 + $0xe00] sm:$0xff]  }
0x12ec   :  { %6461 = vmatprep.subr.bf16.mxu1 %v19285_v45  ;;  %17865 = vmatpush3.bf16.msra.mxu0 %v19326_v5  ;;  %v19329_v45 = vld [vmem:[#allocation2 + $0xd38] sm:$0xff]  }
0x12ed   :  { %17866 = vmatprep.subr.bf16.mxu0 %v20126_v26 }
0x12ef   :  { %6462 = vmatpush1.bf16.msra.mxu1 %v19283_v54  ;;  %v19330_v54 = vld [vmem:[#allocation2 + $0xdf8] sm:$0xff]  }
0x12f0   :  { %6463 = vmatprep.subr.bf16.mxu1 %v19288_v55  ;;  %17867 = vmatpush3.bf16.msra.mxu0 %v19328_v46  ;;  %v19331_v55 = vld [vmem:[#allocation2 + $0xd30] sm:$0xff]  }
0x12f1   :  { %17868 = vmatprep.subr.bf16.mxu0 %v20126_v26 }
0x12f3   :  { %6464 = vmatpush1.bf16.msra.mxu1 %v19286_v9  ;;  %v19332_v9 = vld [vmem:[#allocation2 + $0xdf0] sm:$0xff]  }
0x12f4   :  { %6465 = vmatprep.subr.bf16.mxu1 %v19291_v29  ;;  %17869 = vmatpush3.bf16.msra.mxu0 %v19330_v54  ;;  %v19333_v29 = vld [vmem:[#allocation2 + $0xd28] sm:$0xff]  }
0x12f5   :  { %17870 = vmatprep.subr.bf16.mxu0 %v20126_v26 }
0x12f7   :  { %6466 = vmatpush1.bf16.msra.mxu1 %v19289_v35  ;;  %v19334_v35 = vld [vmem:[#allocation2 + $0xde8] sm:$0xff]  }
0x12f8   :  { %6467 = vmatprep.subr.bf16.mxu1 %v19294_v15  ;;  %17871 = vmatpush3.bf16.msra.mxu0 %v19332_v9 }
0x12f9   :  { %17872 = vmatprep.subr.bf16.mxu0 %v20126_v26 }
0x12fb   :  { %6468 = vmatpush1.bf16.msra.mxu1 %v19292_v0 }
0x12fc   :  { %6727 = vmatprep.subr.bf16.mxu1 %v19297_v13  ;;  %17873 = vmatpush3.bf16.msra.mxu0 %v19334_v35 }
0x12fd   :  { %17898 = vmatprep.subr.bf16.mxu0 %v20126_v26 }
0x12fe   :  { %6486 = vmatmul.mubr.bf16.vlgmr.msra.gmra.mxu1 %v20973_v37 }
0x12ff   :  { %6728 = vmatpush1.bf16.msra.mxu1 %v19295_v8  ;;  %6759 = vmatprep.mubr.bf16.mxu1 %v22123_v39 }
0x1300   :  { %6729 = vmatprep.subr.bf16.mxu1 %v19300_v56 }
0x1303   :  { %6730 = vmatpush1.bf16.msra.mxu1 %v19298_v6 }
0x1304   :  { %6731 = vmatprep.subr.bf16.mxu1 %v19303_v1 }
0x1307   :  { %6732 = vmatpush1.bf16.msra.mxu1 %v19301_v3 }
0x1308   :  { %6733 = vmatprep.subr.bf16.mxu1 %v19306_v61 }
0x130b   :  { %6734 = vmatpush1.bf16.msra.mxu1 %v19304_v25 }
0x130c   :  { %6735 = vmatprep.subr.bf16.mxu1 %v19309_v16 }
0x130f   :  { %6736 = vmatpush1.bf16.msra.mxu1 %v19307_v58 }
0x1310   :  { %6737 = vmatprep.subr.bf16.mxu1 %v19312_v48 }
0x1313   :  { %6738 = vmatpush1.bf16.msra.mxu1 %v19310_v34 }
0x1314   :  { %6739 = vmatprep.subr.bf16.mxu1 %v19315_v30 }
0x1317   :  { %6740 = vmatpush1.bf16.msra.mxu1 %v19313_v19 }
0x1318   :  { %6741 = vmatprep.subr.bf16.mxu1 %v19318_v36  ;;  %v21005_v36 = vsub.s32 0, %v22150_v62 }
0x131b   :  { %6742 = vmatpush1.bf16.msra.mxu1 %v19316_v41  ;;  %v6914_v41 = vld [vmem:[#allocation9 + $0x12] ss:$8 sm:$0x3] }
0x131c   :  { %17838 = vmatprep.subr.bf16.mxu1 %v20126_v26  ;;  %v6923_v54 = vrot.slane %v6914_v41, %v21008_v17 }
0x131e   :  { %6760 = vmatmul.mubr.bf16.vlgmr.msra.gmra.mxu1 %v20973_v37  ;;  %v19325_v37 = vld [vmem:[#allocation2 + $0xd48] sm:$0xff]  }
0x131f   :  { %17854 = vmatprep.mubr.msk.bf16.mxu1 %vm20127_vm7, %v20126_v26  ;;  %17839 = vmatpush3.bf16.msra.mxu1 %v19319_v14 }
0x1320   :  { %17840 = vmatprep.subr.bf16.mxu1 %v20126_v26 }
0x1323   :  { %17841 = vmatpush3.bf16.msra.mxu1 %v19321_v40 }
0x1324   :  { %17842 = vmatprep.subr.bf16.mxu1 %v20126_v26 }
0x1327   :  { %17843 = vmatpush3.bf16.msra.mxu1 %v19323_v22 }
0x1328   :  { %17844 = vmatprep.subr.bf16.mxu1 %v20126_v26 }
0x132b   :  { %17845 = vmatpush3.bf16.msra.mxu1 %v19325_v37  ;;  %v6919_v37 = vrot.slane %v6914_v41, %v21005_v36  ;;  %v19347_v41 = vld [vmem:[#allocation2 + $0xd70] sm:$0xff]  }
0x132c   :  { %17846 = vmatprep.subr.bf16.mxu1 %v20126_v26 }
0x132f   :  { %17847 = vmatpush3.bf16.msra.mxu1 %v19327_v63 }
0x1330   :  { %17848 = vmatprep.subr.bf16.mxu1 %v20126_v26 }
0x1333   :  { %17849 = vmatpush3.bf16.msra.mxu1 %v19329_v45 }
0x1334   :  { %17850 = vmatprep.subr.bf16.mxu1 %v20126_v26 }
0x1337   :  { %17851 = vmatpush3.bf16.msra.mxu1 %v19331_v55 }
0x1338   :  { %17852 = vmatprep.subr.bf16.mxu1 %v20126_v26 }
0x133b   :  { %17853 = vmatpush3.bf16.msra.mxu1 %v19333_v29 }
0x133c   :  { %17878 = vmatprep.subr.bf16.mxu1 %v20126_v26 }
0x139e   :  { %v6213_v15 = vpop.f32.mrf.mxu1 }
0x139f   :  { %v6335_v61 = vadd.f32 %v20961_v50, %v6213_v15 }
0x13a0   :  { %v6215_v0 = vpop.f32.mrf.mxu1 }
0x13a1   :  { %v6337_v25 = vadd.f32 %v20963_v60, %v6215_v0  ;;  %v6891_v16 = vrot.slane %v6335_v61, 7  ;;  %v19335_v0 = vld [vmem:[#allocation2 + $0xda0] sm:$0xff]   ;;  %v19339_v61 = vld [vmem:[#allocation2 + $0xd90] sm:$0xff]  }
0x13a2   :  { %v6217_v13 = vpop.f32.mrf.mxu1 }
0x13a3   :  { %v6892_v58 = vrot.slane %v6337_v25, 7  ;;  %v6895_v34 = vsel %vm2147_vm0, 0.0, %v6891_v16  ;;  %v19340_v25 = vld [vmem:[#allocation2 + $0xe50] sm:$0xff]   ;;  %v19341_v16 = vld [vmem:[#allocation2 + $0xd88] sm:$0xff]  }
0x13a4   :  { %v6218_v8 = vpop.f32.mrf.mxu1 }
0x13a5   :  { %v6896_v50 = vsel %vm2147_vm0, 0.0, %v6892_v58  ;;  %v19342_v58 = vld [vmem:[#allocation2 + $0xe48] sm:$0xff]  }
0x13a6   :  { %v6906_v62 = vsel %vm20874_vm6, %v6896_v50, 0.0  ;;  %v19349_v50 = vld [vmem:[#allocation2 + $0xd68] sm:$0xff]  }
0x13be   :  { %v6487_v56 = vpop.f32.mrf.mxu1 }
0x13bf   :  { %v6609_v30 = vadd.f32 %v20965_v53, %v6487_v56  ;;  %v6905_v53 = vsel %vm20874_vm6, %v6895_v34, 0.0  ;;  %v19336_v56 = vld [vmem:[#allocation2 + $0xe60] sm:$0xff]  }
0x13c0   :  { %v6489_v6 = vpop.f32.mrf.mxu1  ;;  %v19344_v34 = vld [vmem:[#allocation2 + $0xe40] sm:$0xff]  }
0x13c1   :  { %v6611_v60 = vadd.f32 %v20967_v47, %v6489_v6 }
0x13c2   :  { %v6491_v1 = vpop.f32.mrf.mxu1 }
0x13c3   :  { %v6910_v46 = vadd.f32 %v6906_v62, %v6611_v60  ;;  %v19337_v1 = vld [vmem:[#allocation2 + $0xd98] sm:$0xff]   ;;  %v19350_v60 = vld [vmem:[#allocation2 + $0xe28] sm:$0xff]   ;;  %v19359_v62 = vld [vmem:[#allocation2 + $0xdc0] sm:$0xff]  }
0x13c4   :  { %v6492_v3 = vpop.f32.mrf.mxu1 }
0x13c5   :  { %v19338_v3 = vld [vmem:[#allocation2 + $0xe58] sm:$0xff]  }
0x13de   :  { %v6761_v48 = vpop.f32.mrf.mxu1 }
0x13df   :  { %v6883_v19 = vadd.f32 %v20969_v18, %v6761_v48  ;;  %v6909_v18 = vadd.f32 %v6905_v53, %v6609_v30  ;;  %v19343_v48 = vld [vmem:[#allocation2 + $0xd80] sm:$0xff]   ;;  %v19345_v30 = vld [vmem:[#allocation2 + $0xd78] sm:$0xff]  }
0x13e0   :  { %v6763_v14 = vpop.f32.mrf.mxu1  ;;  %v19353_v53 = vld [vmem:[#allocation2 + $0xdd8] sm:$0xff]  }
0x13e1   :  { %v6899_v40 = vrot.slane %v6883_v19, 1  ;;  %v6885_v42 = vadd.f32 %v20971_v28, %v6763_v14  ;;  %v19346_v19 = vld [vmem:[#allocation2 + $0xe38] sm:$0xff]   ;;  %v19348_v14 = vld [vmem:[#allocation2 + $0xe30] sm:$0xff]  }
0x13e2   :  { %v6765_v22 = vpop.f32.mrf.mxu1 }
0x13e3   :  { %v6903_v12 = vsel %vm22184_vm13, %v6899_v40, 0.0  ;;  %v6900_v5 = vrot.slane %v6885_v42, 1  ;;  %v19351_v40 = vld [vmem:[#allocation2 + $0xde0] sm:$0xff]   ;;  %v19354_v22 = vld [vmem:[#allocation2 + $0xe98] sm:$0xff]   ;;  %vm22186_vm13 = vmmov %vm22185_vm8 }
0x13e4   :  { %v6907_v63 = vsel %vm20879_vm2, %v6903_v12, 0.0  ;;  %v6766_v47 = vpop.f32.mrf.mxu1  ;;  %v19352_v42 = vld [vmem:[#allocation2 + $0xea0] sm:$0xff]   ;;  %v19356_v12 = vld [vmem:[#allocation2 + $0xe90] sm:$0xff]  }
0x13e5   :  { %v6911_v45 = vadd.f32 %v6909_v18, %v6907_v63  ;;  %v6904_v28 = vsel %vm22185_vm8, %v6900_v5, 0.0  ;;  %v19355_v18 = vld [vmem:[#allocation2 + $0xdd0] sm:$0xff]   ;;  %v19358_v5 = vld [vmem:[#allocation2 + $0xe88] sm:$0xff]   ;;  %v19360_v63 = vld [vmem:[#allocation2 + $0xe80] sm:$0xff]  }
0x13e6   :  { %v6908_v55 = vsel %vm20879_vm2, %v6904_v28, 0.0  ;;  %v19361_v47 = vld [vmem:[#allocation2 + $0xdb8] sm:$0xff]   ;;  %v19364_v28 = vld [vmem:[#allocation2 + $0xe70] sm:$0xff]  }
0x13e7   :  { %v6926_v9 = vadd.f32 %v6919_v37, %v6911_v45  ;;  %v6912_v29 = vadd.f32 %v6910_v46, %v6908_v55  ;;  %v19357_v37 = vld [vmem:[#allocation2 + $0xdc8] sm:$0xff]   ;;  %v19362_v46 = vld [vmem:[#allocation2 + $0xe78] sm:$0xff]   ;;  %v19363_v45 = vld [vmem:[#allocation2 + $0xdb0] sm:$0xff]  }
0x13e8   :  { %v19366_v55 = vld [vmem:[#allocation2 + $0xe68] sm:$0xff]  }
0x13e9   :  { %v6928_v35 = vmax.f32 %v6926_v9, 0.0  ;;  %v6927_v15 = vadd.f32 %v6923_v54, %v6912_v29  ;;  %v19365_v54 = vld [vmem:[#allocation2 + $0xda8] sm:$0xff]   ;;  %v19370_v29 = vld [vmem:[#allocation2 + $0xfa0] sm:$0xff]  }
0x13ea   :  { %v19368_v9 = vld [vmem:[#allocation2 + $0xfa8] sm:$0xff]  }
0x13eb   :  { %v21025_v13 = vpack.c.bf16 %v6928_v35, %v6928_v35  ;;  %v6929_v8 = vmax.f32 %v6927_v15, 0.0  ;;  %v19372_v35 = vld [vmem:[#allocation2 + $0xf98] sm:$0xff]   ;;  %v19374_v15 = vld [vmem:[#allocation2 + $0xf90] sm:$0xff]  }
0x13ed   :  { %v21027_v6 = vpack.c.bf16 %v6929_v8, %v6929_v8  ;;  %17855 = vmatmul.mubr.bf16.vlgmr.msra.gmra.mxu1 %v21025_v13  ;;  %v19380_v8 = vld [vmem:[#allocation2 + $0xf78] sm:$0xff]  }
0x13ee   :  { %17879 = vmatpush3.bf16.msra.mxu1 %v19335_v0  ;;  %17894 = vmatprep.mubr.msk.bf16.mxu1 %vm20127_vm7, %v20126_v26  ;;  %v19376_v0 = vld [vmem:[#allocation2 + $0xf88] sm:$0xff]  }
0x13ef   :  { %17875 = vmatmul.mubr.bf16.vlgmr.msra.gmra.mxu0 %v21027_v6  ;;  %17880 = vmatprep.subr.bf16.mxu1 %v20126_v26 }
0x13f0   :  { %17899 = vmatpush3.bf16.msra.mxu0 %v19336_v56  ;;  %17914 = vmatprep.mubr.msk.bf16.mxu0 %vm20127_vm7, %v20126_v26 }
0x13f1   :  { %17900 = vmatprep.subr.bf16.mxu0 %v20126_v26 }
0x13f2   :  { %17881 = vmatpush3.bf16.msra.mxu1 %v19337_v1 }
0x13f3   :  { %17882 = vmatprep.subr.bf16.mxu1 %v20126_v26 }
0x13f4   :  { %17901 = vmatpush3.bf16.msra.mxu0 %v19338_v3 }
0x13f5   :  { %17902 = vmatprep.subr.bf16.mxu0 %v20126_v26 }
0x13f6   :  { %17883 = vmatpush3.bf16.msra.mxu1 %v19339_v61 }
0x13f7   :  { %17884 = vmatprep.subr.bf16.mxu1 %v20126_v26 }
0x13f8   :  { %17903 = vmatpush3.bf16.msra.mxu0 %v19340_v25 }
0x13f9   :  { %17904 = vmatprep.subr.bf16.mxu0 %v20126_v26 }
0x13fa   :  { %17885 = vmatpush3.bf16.msra.mxu1 %v19341_v16 }
0x13fb   :  { %17886 = vmatprep.subr.bf16.mxu1 %v20126_v26 }
0x13fc   :  { %17905 = vmatpush3.bf16.msra.mxu0 %v19342_v58 }
0x13fd   :  { %17906 = vmatprep.subr.bf16.mxu0 %v20126_v26 }
0x13fe   :  { %17887 = vmatpush3.bf16.msra.mxu1 %v19343_v48 }
0x13ff   :  { %17888 = vmatprep.subr.bf16.mxu1 %v20126_v26 }
0x1400   :  { %17907 = vmatpush3.bf16.msra.mxu0 %v19344_v34 }
0x1401   :  { %17908 = vmatprep.subr.bf16.mxu0 %v20126_v26 }
0x1402   :  { %17889 = vmatpush3.bf16.msra.mxu1 %v19345_v30 }
0x1403   :  { %17890 = vmatprep.subr.bf16.mxu1 %v20126_v26 }
0x1404   :  { %17909 = vmatpush3.bf16.msra.mxu0 %v19346_v19 }
0x1405   :  { %17910 = vmatprep.subr.bf16.mxu0 %v20126_v26 }
0x1406   :  { %17891 = vmatpush3.bf16.msra.mxu1 %v19347_v41 }
0x1407   :  { %17892 = vmatprep.subr.bf16.mxu1 %v20126_v26 }
0x1408   :  { %17911 = vmatpush3.bf16.msra.mxu0 %v19348_v14 }
0x1409   :  { %17912 = vmatprep.subr.bf16.mxu0 %v20126_v26 }
0x140a   :  { %17893 = vmatpush3.bf16.msra.mxu1 %v19349_v50 }
0x140b   :  { %17918 = vmatprep.subr.bf16.mxu1 %v20126_v26 }
0x140c   :  { %17913 = vmatpush3.bf16.msra.mxu0 %v19350_v60 }
0x140d   :  { %17895 = vmatmul.mubr.bf16.vlgmr.msra.gmra.mxu1 %v21025_v13  ;;  %17938 = vmatprep.subr.bf16.mxu0 %v20126_v26 }
0x140e   :  { %17919 = vmatpush3.bf16.msra.mxu1 %v19351_v40  ;;  %17934 = vmatprep.mubr.msk.bf16.mxu1 %vm20127_vm7, %v20126_v26 }
0x140f   :  { %17915 = vmatmul.mubr.bf16.vlgmr.msra.gmra.mxu0 %v21027_v6  ;;  %17920 = vmatprep.subr.bf16.mxu1 %v20126_v26 }
0x1410   :  { %17939 = vmatpush3.bf16.msra.mxu0 %v19352_v42  ;;  %17954 = vmatprep.mubr.msk.bf16.mxu0 %vm20127_vm7, %v20126_v26 }
0x1411   :  { %17940 = vmatprep.subr.bf16.mxu0 %v20126_v26 }
0x1412   :  { %17921 = vmatpush3.bf16.msra.mxu1 %v19353_v53 }
0x1413   :  { %17922 = vmatprep.subr.bf16.mxu1 %v20126_v26 }
0x1414   :  { %17941 = vmatpush3.bf16.msra.mxu0 %v19354_v22 }
0x1415   :  { %17942 = vmatprep.subr.bf16.mxu0 %v20126_v26 }
0x1416   :  { %17923 = vmatpush3.bf16.msra.mxu1 %v19355_v18  ;;  %v7581_v18 = vld [vmem:[#allocation9 + $0x13] ss:$8 sm:$0x3] }
0x1417   :  { %17924 = vmatprep.subr.bf16.mxu1 %v20126_v26 }
0x1418   :  { %17943 = vmatpush3.bf16.msra.mxu0 %v19356_v12 }
0x1419   :  { %17944 = vmatprep.subr.bf16.mxu0 %v20126_v26 }
0x141a   :  { %17925 = vmatpush3.bf16.msra.mxu1 %v19357_v37 }
0x141b   :  { %17926 = vmatprep.subr.bf16.mxu1 %v20126_v26 }
0x141c   :  { %17945 = vmatpush3.bf16.msra.mxu0 %v19358_v5 }
0x141d   :  { %17946 = vmatprep.subr.bf16.mxu0 %v20126_v26 }
0x141e   :  { %17927 = vmatpush3.bf16.msra.mxu1 %v19359_v62 }
0x141f   :  { %17928 = vmatprep.subr.bf16.mxu1 %v20126_v26 }
0x1420   :  { %17947 = vmatpush3.bf16.msra.mxu0 %v19360_v63 }
0x1421   :  { %17948 = vmatprep.subr.bf16.mxu0 %v20126_v26 }
0x1422   :  { %17929 = vmatpush3.bf16.msra.mxu1 %v19361_v47 }
0x1423   :  { %17930 = vmatprep.subr.bf16.mxu1 %v20126_v26 }
0x1424   :  { %17949 = vmatpush3.bf16.msra.mxu0 %v19362_v46 }
0x1425   :  { %17950 = vmatprep.subr.bf16.mxu0 %v20126_v26 }
0x1426   :  { %17931 = vmatpush3.bf16.msra.mxu1 %v19363_v45 }
0x1427   :  { %17932 = vmatprep.subr.bf16.mxu1 %v20126_v26 }
0x1428   :  { %17951 = vmatpush3.bf16.msra.mxu0 %v19364_v28  ;;  %v7586_v28 = vrot.slane %v7581_v18, %v21005_v36 }
0x1429   :  { %17952 = vmatprep.subr.bf16.mxu0 %v20126_v26 }
0x142a   :  { %17933 = vmatpush3.bf16.msra.mxu1 %v19365_v54 }
0x142c   :  { %17953 = vmatpush3.bf16.msra.mxu0 %v19366_v55 }
0x142d   :  { %17935 = vmatmul.mubr.bf16.vlgmr.msra.gmra.mxu1 %v21025_v13  ;;  %17978 = vmatprep.subr.bf16.mxu0 %v20126_v26  ;;  %v19378_v13 = vld [vmem:[#allocation2 + $0xf80] sm:$0xff]  }
0x142e   :  { %7641 = vmatprep.mubr.bf16.mxu1 %v22123_v39 }
0x142f   :  { %17955 = vmatmul.mubr.bf16.vlgmr.msra.gmra.mxu0 %v21027_v6 }
0x1430   :  { %17994 = vmatprep.mubr.msk.bf16.mxu0 %vm20127_vm7, %v20126_v26  ;;  %17979 = vmatpush3.bf16.msra.mxu0 %v19368_v9 }
0x1431   :  { %17980 = vmatprep.subr.bf16.mxu0 %v20126_v26 }
0x1434   :  { %17981 = vmatpush3.bf16.msra.mxu0 %v19370_v29 }
0x1435   :  { %17982 = vmatprep.subr.bf16.mxu0 %v20126_v26 }
0x1438   :  { %17983 = vmatpush3.bf16.msra.mxu0 %v19372_v35 }
0x1439   :  { %17984 = vmatprep.subr.bf16.mxu0 %v20126_v26 }
0x143c   :  { %17985 = vmatpush3.bf16.msra.mxu0 %v19374_v15 }
0x143d   :  { %17986 = vmatprep.subr.bf16.mxu0 %v20126_v26 }
0x1440   :  { %17987 = vmatpush3.bf16.msra.mxu0 %v19376_v0 }
0x1441   :  { %17988 = vmatprep.subr.bf16.mxu0 %v20126_v26 }
0x1444   :  { %17989 = vmatpush3.bf16.msra.mxu0 %v19378_v13  ;;  %v7590_v13 = vrot.slane %v7581_v18, %v21008_v17 }
0x1445   :  { %17990 = vmatprep.subr.bf16.mxu0 %v20126_v26 }
0x1448   :  { %17991 = vmatpush3.bf16.msra.mxu0 %v19380_v8 }
0x1449   :  { %17992 = vmatprep.subr.bf16.mxu0 %v20126_v26 }
0x14ad   :  { %v7030_v56 = vpop.f32.mrf.mxu1 }
0x14ae   :  { %v7558_v40 = vrot.slane %v7030_v56, 7 }
0x14af   :  { %v17856_v6 = vpop.f32.mrf.mxu1  ;;  %v7134_v1 = vpop.f32.mrf.mxu0 }
0x14b0   :  { %v7559_v42 = vrot.slane %v7134_v1, 7  ;;  %v7562_v53 = vsel %vm2147_vm0, 0.0, %v7558_v40  ;;  %v19379_v40 = vld [vmem:[#allocation2 + $0xeb8] sm:$0xff]  }
0x14b1   :  { %v7033_v3 = vpop.f32.mrf.mxu1  ;;  %v17876_v61 = vpop.f32.mrf.mxu0  ;;  %v7572_v5 = vsel %vm20874_vm6, %v7562_v53, 0.0  ;;  %v19382_v53 = vld [vmem:[#allocation2 + $0xf70] sm:$0xff]  }
0x14b2   :  { %v7563_v12 = vsel %vm2147_vm0, 0.0, %v7559_v42  ;;  %v19381_v42 = vld [vmem:[#allocation2 + $0xeb0] sm:$0xff]   ;;  %17993 = vmatpush3.bf16.msra.mxu0 %v19382_v53 }
0x14b3   :  { %v17857_v25 = vpop.f32.mrf.mxu1  ;;  %v7137_v16 = vpop.f32.mrf.mxu0  ;;  %v7573_v54 = vsel %vm20874_vm6, %v7563_v12, 0.0  ;;  %vm22187_vm6 = vcmask 1041408   ;;  %17998 = vmatprep.subr.bf16.mxu0 %v20126_v26  ;;  %v19383_v12 = vld [vmem:[#allocation4 + $0x370] ss:$8 sps:$4 sm:$0xff]   ;;  %v19427_v53 = vld [vmem:[#allocation2 + $0xfd0] sm:$0xff]  }
0x14b5   :  { %v17877_v58 = vpop.f32.mrf.mxu0 }
0x14cd   :  { %v7238_v48 = vpop.f32.mrf.mxu1 }
0x14ce   :  { %v7576_v47 = vadd.f32 %v7572_v5, %v7238_v48  ;;  %v19389_v5 = vld [vmem:[#allocation4 + $0x364] ss:$8 sps:$4 sm:$0xff]  }
0x14cf   :  { %v17896_v34 = vpop.f32.mrf.mxu1  ;;  %v7342_v30 = vpop.f32.mrf.mxu0 }
0x14d0   :  { %v7577_v35 = vadd.f32 %v7573_v54, %v7342_v30  ;;  %v7599_v30 = vld [vmem:[#allocation2 + $0x11b0] sm:$0xf] }
0x14d1   :  { %v7241_v19 = vpop.f32.mrf.mxu1  ;;  %v17916_v41 = vpop.f32.mrf.mxu0 }
0x14d2   :  { %v19367_v19 = vld [vmem:[#allocation2 + $0xee8] sm:$0xff]   ;;  %v19371_v41 = vld [vmem:[#allocation2 + $0xed8] sm:$0xff]  }
0x14d3   :  { %v17897_v14 = vpop.f32.mrf.mxu1  ;;  %v7345_v50 = vpop.f32.mrf.mxu0 }
0x14d4   :  { %v19373_v14 = vld [vmem:[#allocation2 + $0xed0] sm:$0xff]   ;;  %v19375_v50 = vld [vmem:[#allocation2 + $0xec8] sm:$0xff]  }
0x14d5   :  { %v17917_v60 = vpop.f32.mrf.mxu0 }
0x14d6   :  { %v19377_v60 = vld [vmem:[#allocation2 + $0xec0] sm:$0xff]  }
0x14ed   :  { %v7446_v22 = vpop.f32.mrf.mxu1 }
0x14ee   :  { %v7566_v37 = vrot.slane %v7446_v22, 1  ;;  %v19385_v22 = vld [vmem:[#allocation4 + $0x374] ss:$8 sps:$4 sm:$0xff]  }
0x14ef   :  { %v17936_v62 = vpop.f32.mrf.mxu1  ;;  %v7550_v63 = vpop.f32.mrf.mxu0 }
0x14f0   :  { %v7570_v46 = vsel %vm22185_vm8, %v7566_v37, 0.0  ;;  %v7567_v45 = vrot.slane %v7550_v63, 1  ;;  %vm22188_vm8 = vmmov %vm22187_vm6  ;;  %v19386_v63 = vld [vmem:[#allocation2 + $0xf28] sm:$0xff]  }
0x14f1   :  { %v7574_v55 = vsel %vm20879_vm2, %v7570_v46, 0.0  ;;  %v7449_v9 = vpop.f32.mrf.mxu1  ;;  %v17956_v29 = vpop.f32.mrf.mxu0 }
0x14f2   :  { %v7578_v15 = vadd.f32 %v7576_v47, %v7574_v55  ;;  %v7571_v0 = vsel %vm22186_vm13, %v7567_v45, 0.0  ;;  %v19387_v45 = vld [vmem:[#allocation4 + $0x360] ss:$8 sps:$4 sm:$0xff]   ;;  %v19390_v55 = vld [vmem:[#allocation2 + $0xf20] sm:$0xff]   ;;  %v19397_v29 = vld [vmem:[#allocation4 + $0x344] ss:$8 sps:$4 sm:$0xff]  }
0x14f3   :  { %v7575_v8 = vsel %vm20879_vm2, %v7571_v0, 0.0  ;;  %v17937_v56 = vpop.f32.mrf.mxu1  ;;  %v7553_v6 = vpop.f32.mrf.mxu0  ;;  %vm22189_vm2 = vcmask 31744   ;;  %v19391_v9 = vld [vmem:[#allocation4 + $0x350] ss:$8 sps:$4 sm:$0xff]   ;;  %v19401_v0 = vld [vmem:[#allocation4 + $0x334] ss:$8 sps:$4 sm:$0xff]  }
0x14f4   :  { %v7579_v1 = vadd.f32 %v7577_v35, %v7575_v8  ;;  %v7593_v3 = vadd.f32 %v7586_v28, %v7578_v15  ;;  %v19393_v28 = vld [vmem:[#allocation4 + $0x354] ss:$8 sps:$4 sm:$0xff]   ;;  %v19394_v35 = vld [vmem:[#allocation2 + $0xf18] sm:$0xff]   ;;  %v19399_v8 = vld [vmem:[#allocation4 + $0x330] ss:$8 sps:$4 sm:$0xff]   ;;  %vm22190_vm13 = vcmask 1046528  }
0x14f5   :  { %v17957_v11 = vpop.f32.mrf.mxu0  ;;  %v19395_v15 = vld [vmem:[#allocation4 + $0x340] ss:$8 sps:$4 sm:$0xff]   ;;  %v19405_v56 = vld [vmem:[#allocation4 + $0x324] ss:$8 sps:$4 sm:$0xff]   ;;  %v19402_v6 = vld [vmem:[#allocation2 + $0xf08] sm:$0xff]  }
0x14f6   :  { %v7594_v61 = vadd.f32 %v7590_v13, %v7579_v1  ;;  %v7595_v25 = vmax.f32 %v7593_v3, 0.0  ;;  %v19398_v13 = vld [vmem:[#allocation2 + $0xf10] sm:$0xff]   ;;  %v19409_v3 = vld [vmem:[#allocation4 + $0x314] ss:$8 sps:$4 sm:$0xff]  }
0x14f7   :  { %v19403_v1 = vld [vmem:[#allocation4 + $0x320] ss:$8 sps:$4 sm:$0xff]   ;;  %v19406_v11 = vld [vmem:[#allocation2 + $0xf00] sm:$0xff]  }
0x14f8   :  { %v7596_v16 = vmax.f32 %v7594_v61, 0.0  ;;  %v7597_v58 = vpack.c.bf16 %v7595_v25, %v7595_v25  ;;  %v19407_v61 = vld [vmem:[#allocation4 + $0x310] ss:$8 sps:$4 sm:$0xff]   ;;  %v19413_v25 = vld [vmem:[#allocation4 + $0x304] ss:$8 sps:$4 sm:$0xff]  }
0x14fa   :  { %v7598_v48 = vpack.c.bf16 %v7596_v16, %v7596_v16  ;;  %v7604_v34 = vsel %vm22188_vm8, %v7597_v58, 0  ;;  %v19410_v16 = vld [vmem:[#allocation2 + $0xef8] sm:$0xff]  }
0x14fb   :  { %v19411_v58 = vld [vmem:[#allocation4 + $0x300] ss:$8 sps:$4 sm:$0xff]  }
0x14fc   :  { %15689 = vmatprep.subr.msk.bf16.mxu1 %vm22187_vm6, %v7598_v48  ;;  %v19414_v48 = vld [vmem:[#allocation2 + $0xef0] sm:$0xff]   ;;  %vm22191_vm6 = vmmov %vm22190_vm13 }
0x14fd   :  { %7624 = vmatpush1.bf16.msra.mxu1 %v7604_v34  ;;  %v19418_v34 = vld [vmem:[#allocation4 + $0x3f4] ss:$8 sps:$4 sm:$0xff]   ;;  %vm22192_vm8 = vmmov %vm22191_vm6 }
0x14fe   :  { %17958 = vmatprep.subr.bf16.mxu1 %v20126_v26 }
0x1500   :  { %15690 = vmatmul.mubr.msk.bf16.vlgmr.msra.gmra.mxu1 %vm22189_vm2, %v7599_v30  ;;  %v19415_v30 = vld [vmem:[#allocation2 + $0xfe8] sm:$0xff]   ;;  %vm22193_vm2 = vmmov %vm22191_vm6 }
0x1501   :  { %17959 = vmatpush3.bf16.msra.mxu1 %v19367_v19  ;;  %17974 = vmatprep.mubr.msk.bf16.mxu1 %vm20127_vm7, %v20126_v26  ;;  %v19416_v19 = vld [vmem:[#allocation4 + $0x3f0] ss:$8 sps:$4 sm:$0xff]  }
0x1502   :  { %17960 = vmatprep.subr.bf16.mxu1 %v20126_v26 }
0x1505   :  { %17961 = vmatpush3.bf16.msra.mxu1 %v19369_v24  ;;  %v19422_v24 = vld [vmem:[#allocation4 + $0x3e4] ss:$8 sps:$4 sm:$0xff]  }
0x1506   :  { %17962 = vmatprep.subr.bf16.mxu1 %v20126_v26 }
0x1509   :  { %17963 = vmatpush3.bf16.msra.mxu1 %v19371_v41  ;;  %v19419_v41 = vld [vmem:[#allocation2 + $0xfe0] sm:$0xff]  }
0x150a   :  { %17964 = vmatprep.subr.bf16.mxu1 %v20126_v26 }
0x150d   :  { %17965 = vmatpush3.bf16.msra.mxu1 %v19373_v14  ;;  %v19420_v14 = vld [vmem:[#allocation4 + $0x3e0] ss:$8 sps:$4 sm:$0xff]  }
0x150e   :  { %17966 = vmatprep.subr.bf16.mxu1 %v20126_v26 }
0x1511   :  { %17967 = vmatpush3.bf16.msra.mxu1 %v19375_v50  ;;  %v19426_v50 = vld [vmem:[#allocation4 + $0x3d4] ss:$8 sps:$4 sm:$0xff]  }
0x1512   :  { %17968 = vmatprep.subr.bf16.mxu1 %v20126_v26 }
0x1515   :  { %17969 = vmatpush3.bf16.msra.mxu1 %v19377_v60  ;;  %v19423_v60 = vld [vmem:[#allocation2 + $0xfd8] sm:$0xff]  }
0x1516   :  { %17970 = vmatprep.subr.bf16.mxu1 %v20126_v26 }
0x1519   :  { %17971 = vmatpush3.bf16.msra.mxu1 %v19379_v40  ;;  %v19424_v40 = vld [vmem:[#allocation4 + $0x3d0] ss:$8 sps:$4 sm:$0xff]  }
0x151a   :  { %17972 = vmatprep.subr.bf16.mxu1 %v20126_v26 }
0x151d   :  { %17973 = vmatpush3.bf16.msra.mxu1 %v19381_v42  ;;  %v19430_v42 = vld [vmem:[#allocation4 + $0x3c4] ss:$8 sps:$4 sm:$0xff]  }
0x151e   :  { %7956 = vmatprep.subr.bf16.mxu1 %v19385_v22  ;;  %v19428_v22 = vld [vmem:[#allocation4 + $0x3c0] ss:$8 sps:$4 sm:$0xff]  }
0x15c0   :  { %v7643_v18 = vpop.f32.mrf.mxu1 }
0x15c1   :  { %v21112_v37 = vpack.c.bf16 %v7643_v18, %v7643_v18  ;;  %v19434_v18 = vld [vmem:[#allocation4 + $0x3b4] ss:$8 sps:$4 sm:$0xff]  }
0x15c2   :  { %v7645_v62 = vpop.f32.mrf.mxu1 }
0x15c3   :  { %v21114_v47 = vpack.c.bf16 %v7645_v62, %v7645_v62  ;;  %17975 = vmatmul.mubr.bf16.vlgmr.msra.gmra.mxu1 %v21112_v37  ;;  %v19438_v62 = vld [vmem:[#allocation4 + $0x3a4] ss:$8 sps:$4 sm:$0xff]  }
0x15c4   :  { %7957 = vmatpush1.bf16.msra.mxu1 %v19383_v12  ;;  %v7647_v46 = vpop.f32.mrf.mxu1  ;;  %7988 = vmatprep.mubr.bf16.mxu1 %v22123_v39  ;;  %v19431_v12 = vld [vmem:[#allocation2 + $0xfc8] sm:$0xff]  }
0x15c5   :  { %17995 = vmatmul.mubr.bf16.vlgmr.msra.gmra.mxu0 %v21114_v47  ;;  %7958 = vmatprep.subr.bf16.mxu1 %v19389_v5  ;;  %v19432_v5 = vld [vmem:[#allocation4 + $0x3b0] ss:$8 sps:$4 sm:$0xff]   ;;  %v19436_v46 = vld [vmem:[#allocation4 + $0x3a0] ss:$8 sps:$4 sm:$0xff]  }
0x15c6   :  { %17999 = vmatpush3.bf16.msra.mxu0 %v19386_v63  ;;  %v7648_v54 = vpop.f32.mrf.mxu1  ;;  %18014 = vmatprep.mubr.msk.bf16.mxu0 %vm20127_vm7, %v20126_v26  ;;  %v19435_v63 = vld [vmem:[#allocation2 + $0xfc0] sm:$0xff]  }
0x15c7   :  { %18000 = vmatprep.subr.bf16.mxu0 %v20126_v26  ;;  %v19440_v54 = vld [vmem:[#allocation4 + $0x390] ss:$8 sps:$4 sm:$0xff]  }
0x15c8   :  { %7959 = vmatpush1.bf16.msra.mxu1 %v19387_v45  ;;  %v19442_v45 = vld [vmem:[#allocation4 + $0x394] ss:$8 sps:$4 sm:$0xff]  }
0x15c9   :  { %7960 = vmatprep.subr.bf16.mxu1 %v19393_v28  ;;  %v19439_v28 = vld [vmem:[#allocation2 + $0xfb8] sm:$0xff]  }
0x15ca   :  { %18001 = vmatpush3.bf16.msra.mxu0 %v19390_v55  ;;  %v19446_v55 = vld [vmem:[#allocation4 + $0x384] ss:$8 sps:$4 sm:$0xff]  }
0x15cb   :  { %18002 = vmatprep.subr.bf16.mxu0 %v20126_v26 }
0x15cc   :  { %7961 = vmatpush1.bf16.msra.mxu1 %v19391_v9  ;;  %v19443_v9 = vld [vmem:[#allocation2 + $0xfb0] sm:$0xff]  }
0x15cd   :  { %7962 = vmatprep.subr.bf16.mxu1 %v19397_v29  ;;  %v19444_v29 = vld [vmem:[#allocation4 + $0x380] ss:$8 sps:$4 sm:$0xff]  }
0x15ce   :  { %18003 = vmatpush3.bf16.msra.mxu0 %v19394_v35  ;;  %v19447_v35 = vld [vmem:[#allocation2 + $0xf68] sm:$0xff]  }
0x15cf   :  { %18004 = vmatprep.subr.bf16.mxu0 %v20126_v26 }
0x15d0   :  { %7963 = vmatpush1.bf16.msra.mxu1 %v19395_v15  ;;  %v19448_v15 = vld [vmem:[#allocation2 + $0x1028] sm:$0xff]  }
0x15d1   :  { %7964 = vmatprep.subr.bf16.mxu1 %v19401_v0  ;;  %v19449_v0 = vld [vmem:[#allocation2 + $0xf60] sm:$0xff]  }
0x15d2   :  { %18005 = vmatpush3.bf16.msra.mxu0 %v19398_v13  ;;  %v19450_v13 = vld [vmem:[#allocation2 + $0x1020] sm:$0xff]  }
0x15d3   :  { %18006 = vmatprep.subr.bf16.mxu0 %v20126_v26 }
0x15d4   :  { %7965 = vmatpush1.bf16.msra.mxu1 %v19399_v8  ;;  %v19451_v8 = vld [vmem:[#allocation2 + $0xf58] sm:$0xff]  }
0x15d5   :  { %7966 = vmatprep.subr.bf16.mxu1 %v19405_v56  ;;  %v19452_v56 = vld [vmem:[#allocation2 + $0x1018] sm:$0xff]  }
0x15d6   :  { %18007 = vmatpush3.bf16.msra.mxu0 %v19402_v6  ;;  %v19453_v6 = vld [vmem:[#allocation2 + $0xf50] sm:$0xff]  }
0x15d7   :  { %18008 = vmatprep.subr.bf16.mxu0 %v20126_v26 }
0x15d8   :  { %7967 = vmatpush1.bf16.msra.mxu1 %v19403_v1  ;;  %v19454_v1 = vld [vmem:[#allocation2 + $0x1010] sm:$0xff]  }
0x15d9   :  { %7968 = vmatprep.subr.bf16.mxu1 %v19409_v3  ;;  %v19455_v3 = vld [vmem:[#allocation2 + $0xf48] sm:$0xff]  }
0x15da   :  { %18009 = vmatpush3.bf16.msra.mxu0 %v19406_v11  ;;  %v19456_v11 = vld [vmem:[#allocation2 + $0x1008] sm:$0xff]  }
0x15db   :  { %18010 = vmatprep.subr.bf16.mxu0 %v20126_v26 }
0x15dc   :  { %7969 = vmatpush1.bf16.msra.mxu1 %v19407_v61  ;;  %v19457_v61 = vld [vmem:[#allocation2 + $0xf40] sm:$0xff]  }
0x15dd   :  { %7970 = vmatprep.subr.bf16.mxu1 %v19413_v25  ;;  %v19458_v25 = vld [vmem:[#allocation2 + $0x1000] sm:$0xff]  }
0x15de   :  { %18011 = vmatpush3.bf16.msra.mxu0 %v19410_v16  ;;  %v19459_v16 = vld [vmem:[#allocation2 + $0xf38] sm:$0xff]  }
0x15df   :  { %18012 = vmatprep.subr.bf16.mxu0 %v20126_v26 }
0x15e0   :  { %7971 = vmatpush1.bf16.msra.mxu1 %v19411_v58  ;;  %v19460_v58 = vld [vmem:[#allocation2 + $0xff8] sm:$0xff]  }
0x15e1   :  { %18018 = vmatprep.subr.bf16.mxu1 %v20126_v26 }
0x15e2   :  { %18013 = vmatpush3.bf16.msra.mxu0 %v19414_v48  ;;  %v19461_v48 = vld [vmem:[#allocation2 + $0xf30] sm:$0xff]  }
0x15e3   :  { %7989 = vmatmul.mubr.bf16.vlgmr.msra.gmra.mxu1 %v20813_v21  ;;  %8301 = vmatprep.subr.bf16.mxu0 %v19418_v34  ;;  %v19465_v34 = vld [vmem:[#allocation4 + $0x474] ss:$8 sps:$4 sm:$0xff]  }
0x15e4   :  { %18019 = vmatpush3.bf16.msra.mxu1 %v19415_v30  ;;  %18034 = vmatprep.mubr.msk.bf16.mxu1 %vm20127_vm7, %v20126_v26  ;;  %v19462_v30 = vld [vmem:[#allocation2 + $0xff0] sm:$0xff]  }
0x15e5   :  { %18015 = vmatmul.mubr.bf16.vlgmr.msra.gmra.mxu0 %v21112_v37  ;;  %18020 = vmatprep.subr.bf16.mxu1 %v20126_v26 }
0x15e6   :  { %8302 = vmatpush1.bf16.msra.mxu0 %v19416_v19  ;;  %8333 = vmatprep.mubr.bf16.mxu0 %v22123_v39  ;;  %v19463_v19 = vld [vmem:[#allocation4 + $0x470] ss:$8 sps:$4 sm:$0xff]  }
0x15e7   :  { %8303 = vmatprep.subr.bf16.mxu0 %v19422_v24  ;;  %v19468_v24 = vld [vmem:[#allocation4 + $0x464] ss:$8 sps:$4 sm:$0xff]  }
0x15e8   :  { %18021 = vmatpush3.bf16.msra.mxu1 %v19419_v41  ;;  %v19466_v41 = vld [vmem:[#allocation4 + $0x460] ss:$8 sps:$4 sm:$0xff]  }
0x15e9   :  { %18022 = vmatprep.subr.bf16.mxu1 %v20126_v26 }
0x15ea   :  { %8304 = vmatpush1.bf16.msra.mxu0 %v19420_v14  ;;  %v19471_v14 = vld [vmem:[#allocation4 + $0x454] ss:$8 sps:$4 sm:$0xff]  }
0x15eb   :  { %8305 = vmatprep.subr.bf16.mxu0 %v19426_v50  ;;  %v19469_v50 = vld [vmem:[#allocation4 + $0x450] ss:$8 sps:$4 sm:$0xff]  }
0x15ec   :  { %18023 = vmatpush3.bf16.msra.mxu1 %v19423_v60  ;;  %v19474_v60 = vld [vmem:[#allocation4 + $0x444] ss:$8 sps:$4 sm:$0xff]  }
0x15ed   :  { %18024 = vmatprep.subr.bf16.mxu1 %v20126_v26 }
0x15ee   :  { %8306 = vmatpush1.bf16.msra.mxu0 %v19424_v40  ;;  %v19472_v40 = vld [vmem:[#allocation4 + $0x440] ss:$8 sps:$4 sm:$0xff]  }
0x15ef   :  { %8307 = vmatprep.subr.bf16.mxu0 %v19430_v42  ;;  %v19475_v42 = vld [vmem:[#allocation4 + $0x430] ss:$8 sps:$4 sm:$0xff]  }
0x15f0   :  { %18025 = vmatpush3.bf16.msra.mxu1 %v19427_v53  ;;  %v19480_v53 = vld [vmem:[#allocation4 + $0x424] ss:$8 sps:$4 sm:$0xff]  }
0x15f1   :  { %18026 = vmatprep.subr.bf16.mxu1 %v20126_v26 }
0x15f2   :  { %8308 = vmatpush1.bf16.msra.mxu0 %v19428_v22  ;;  %v19478_v22 = vld [vmem:[#allocation4 + $0x420] ss:$8 sps:$4 sm:$0xff]  }
0x15f3   :  { %8309 = vmatprep.subr.bf16.mxu0 %v19434_v18  ;;  %v19481_v18 = vld [vmem:[#allocation4 + $0x410] ss:$8 sps:$4 sm:$0xff]  }
0x15f4   :  { %18027 = vmatpush3.bf16.msra.mxu1 %v19431_v12  ;;  %v19486_v12 = vld [vmem:[#allocation4 + $0x404] ss:$8 sps:$4 sm:$0xff]  }
0x15f5   :  { %18028 = vmatprep.subr.bf16.mxu1 %v20126_v26 }
0x15f6   :  { %8310 = vmatpush1.bf16.msra.mxu0 %v19432_v5  ;;  %v19484_v5 = vld [vmem:[#allocation4 + $0x400] ss:$8 sps:$4 sm:$0xff]  }
0x15f7   :  { %8311 = vmatprep.subr.bf16.mxu0 %v19438_v62  ;;  %v19487_v62 = vld [vmem:[#allocation2 + $0x1068] sm:$0xff]  }
0x15f8   :  { %18029 = vmatpush3.bf16.msra.mxu1 %v19435_v63  ;;  %v19488_v63 = vld [vmem:[#allocation2 + $0x1128] sm:$0xff]  }
0x15f9   :  { %18030 = vmatprep.subr.bf16.mxu1 %v20126_v26 }
0x15fa   :  { %8312 = vmatpush1.bf16.msra.mxu0 %v19436_v46  ;;  %v19489_v46 = vld [vmem:[#allocation2 + $0x1060] sm:$0xff]  }
0x15fb   :  { %8313 = vmatprep.subr.bf16.mxu0 %v19442_v45  ;;  %v19490_v45 = vld [vmem:[#allocation2 + $0x1120] sm:$0xff]  }
0x15fc   :  { %18031 = vmatpush3.bf16.msra.mxu1 %v19439_v28  ;;  %v19491_v28 = vld [vmem:[#allocation2 + $0x1058] sm:$0xff]  }
0x15fd   :  { %18032 = vmatprep.subr.bf16.mxu1 %v20126_v26 }
0x15fe   :  { %8314 = vmatpush1.bf16.msra.mxu0 %v19440_v54  ;;  %v19492_v54 = vld [vmem:[#allocation2 + $0x1118] sm:$0xff]  }
0x15ff   :  { %8315 = vmatprep.subr.bf16.mxu0 %v19446_v55  ;;  %v19493_v55 = vld [vmem:[#allocation2 + $0x1050] sm:$0xff]  }
0x1600   :  { %18033 = vmatpush3.bf16.msra.mxu1 %v19443_v9  ;;  %v19494_v9 = vld [vmem:[#allocation2 + $0x1110] sm:$0xff]  }
0x1601   :  { %18038 = vmatprep.subr.bf16.mxu1 %v20126_v26 }
0x1602   :  { %8316 = vmatpush1.bf16.msra.mxu0 %v19444_v29  ;;  %v19495_v29 = vld [vmem:[#allocation2 + $0x1048] sm:$0xff]  }
0x1603   :  { %18035 = vmatmul.mubr.bf16.vlgmr.msra.gmra.mxu1 %v21114_v47  ;;  %18058 = vmatprep.subr.bf16.mxu0 %v20126_v26 }
0x1604   :  { %18039 = vmatpush3.bf16.msra.mxu1 %v19447_v35  ;;  %18054 = vmatprep.mubr.msk.bf16.mxu1 %vm20127_vm7, %v20126_v26  ;;  %v19496_v35 = vld [vmem:[#allocation2 + $0x1108] sm:$0xff]  }
0x1605   :  { %8334 = vmatmul.mubr.bf16.vlgmr.msra.gmra.mxu0 %v20813_v21  ;;  %18040 = vmatprep.subr.bf16.mxu1 %v20126_v26 }
0x1606   :  { %18059 = vmatpush3.bf16.msra.mxu0 %v19448_v15  ;;  %18074 = vmatprep.mubr.msk.bf16.mxu0 %vm20127_vm7, %v20126_v26 }
0x1607   :  { %18060 = vmatprep.subr.bf16.mxu0 %v20126_v26 }
0x1608   :  { %18041 = vmatpush3.bf16.msra.mxu1 %v19449_v0  ;;  %v19497_v0 = vld [vmem:[#allocation2 + $0x1040] sm:$0xff]  }
0x1609   :  { %18042 = vmatprep.subr.bf16.mxu1 %v20126_v26 }
0x160a   :  { %18061 = vmatpush3.bf16.msra.mxu0 %v19450_v13 }
0x160b   :  { %18062 = vmatprep.subr.bf16.mxu0 %v20126_v26 }
0x160c   :  { %18043 = vmatpush3.bf16.msra.mxu1 %v19451_v8 }
0x160d   :  { %18044 = vmatprep.subr.bf16.mxu1 %v20126_v26 }
0x160e   :  { %18063 = vmatpush3.bf16.msra.mxu0 %v19452_v56  ;;  %v19498_v56 = vld [vmem:[#allocation2 + $0x1100] sm:$0xff]  }
0x160f   :  { %18064 = vmatprep.subr.bf16.mxu0 %v20126_v26 }
0x1610   :  { %18045 = vmatpush3.bf16.msra.mxu1 %v19453_v6 }
0x1611   :  { %18046 = vmatprep.subr.bf16.mxu1 %v20126_v26 }
0x1612   :  { %18065 = vmatpush3.bf16.msra.mxu0 %v19454_v1 }
0x1613   :  { %18066 = vmatprep.subr.bf16.mxu0 %v20126_v26 }
0x1614   :  { %18047 = vmatpush3.bf16.msra.mxu1 %v19455_v3  ;;  %v19499_v3 = vld [vmem:[#allocation2 + $0x1038] sm:$0xff]  }
0x1615   :  { %18048 = vmatprep.subr.bf16.mxu1 %v20126_v26 }
0x1616   :  { %18067 = vmatpush3.bf16.msra.mxu0 %v19456_v11 }
0x1617   :  { %18068 = vmatprep.subr.bf16.mxu0 %v20126_v26 }
0x1618   :  { %18049 = vmatpush3.bf16.msra.mxu1 %v19457_v61 }
0x1619   :  { %18050 = vmatprep.subr.bf16.mxu1 %v20126_v26 }
0x161a   :  { %18069 = vmatpush3.bf16.msra.mxu0 %v19458_v25  ;;  %v19500_v25 = vld [vmem:[#allocation2 + $0x10f8] sm:$0xff]  }
0x161b   :  { %18070 = vmatprep.subr.bf16.mxu0 %v20126_v26 }
0x161c   :  { %18051 = vmatpush3.bf16.msra.mxu1 %v19459_v16 }
0x161d   :  { %18052 = vmatprep.subr.bf16.mxu1 %v20126_v26 }
0x161e   :  { %18071 = vmatpush3.bf16.msra.mxu0 %v19460_v58  ;;  %v19501_v58 = vld [vmem:[#allocation2 + $0x1030] sm:$0xff]  }
0x161f   :  { %18072 = vmatprep.subr.bf16.mxu0 %v20126_v26 }
0x1620   :  { %18053 = vmatpush3.bf16.msra.mxu1 %v19461_v48  ;;  %v19502_v48 = vld [vmem:[#allocation2 + $0x10f0] sm:$0xff]  }
0x1621   :  { %8646 = vmatprep.subr.bf16.mxu1 %v19465_v34 }
0x1622   :  { %18073 = vmatpush3.bf16.msra.mxu0 %v19462_v30 }
0x1623   :  { %18055 = vmatmul.mubr.bf16.vlgmr.msra.gmra.mxu1 %v21112_v37  ;;  %18078 = vmatprep.subr.bf16.mxu0 %v20126_v26  ;;  %v19477_v37 = vld [vmem:[#allocation4 + $0x434] ss:$8 sps:$4 sm:$0xff]  }
0x1624   :  { %8647 = vmatpush1.bf16.msra.mxu1 %v19463_v19  ;;  %8678 = vmatprep.mubr.bf16.mxu1 %v22123_v39 }
0x1625   :  { %18075 = vmatmul.mubr.bf16.vlgmr.msra.gmra.mxu0 %v21114_v47  ;;  %8648 = vmatprep.subr.bf16.mxu1 %v19468_v24  ;;  %v19483_v47 = vld [vmem:[#allocation4 + $0x414] ss:$8 sps:$4 sm:$0xff]  }
0x1626   :  { %18094 = vmatprep.mubr.msk.bf16.mxu0 %vm20127_vm7, %v20126_v26  ;;  %18079 = vmatpush3.bf16.msra.mxu0 %v19487_v62 }
0x1627   :  { %18080 = vmatprep.subr.bf16.mxu0 %v20126_v26 }
0x1628   :  { %8649 = vmatpush1.bf16.msra.mxu1 %v19466_v41 }
0x1629   :  { %8650 = vmatprep.subr.bf16.mxu1 %v19471_v14 }
0x162a   :  { %18081 = vmatpush3.bf16.msra.mxu0 %v19489_v46 }
0x162b   :  { %18082 = vmatprep.subr.bf16.mxu0 %v20126_v26 }
0x162c   :  { %8651 = vmatpush1.bf16.msra.mxu1 %v19469_v50 }
0x162d   :  { %8652 = vmatprep.subr.bf16.mxu1 %v19474_v60 }
0x162e   :  { %18083 = vmatpush3.bf16.msra.mxu0 %v19491_v28 }
0x162f   :  { %18084 = vmatprep.subr.bf16.mxu0 %v20126_v26 }
0x1630   :  { %8653 = vmatpush1.bf16.msra.mxu1 %v19472_v40 }
0x1631   :  { %8654 = vmatprep.subr.bf16.mxu1 %v19477_v37 }
0x1632   :  { %18085 = vmatpush3.bf16.msra.mxu0 %v19493_v55 }
0x1633   :  { %18086 = vmatprep.subr.bf16.mxu0 %v20126_v26 }
0x1634   :  { %8655 = vmatpush1.bf16.msra.mxu1 %v19475_v42 }
0x1635   :  { %8656 = vmatprep.subr.bf16.mxu1 %v19480_v53 }
0x1636   :  { %18087 = vmatpush3.bf16.msra.mxu0 %v19495_v29 }
0x1637   :  { %18088 = vmatprep.subr.bf16.mxu0 %v20126_v26 }
0x1638   :  { %8657 = vmatpush1.bf16.msra.mxu1 %v19478_v22 }
0x1639   :  { %8658 = vmatprep.subr.bf16.mxu1 %v19483_v47 }
0x163a   :  { %18089 = vmatpush3.bf16.msra.mxu0 %v19497_v0 }
0x163b   :  { %18090 = vmatprep.subr.bf16.mxu0 %v20126_v26 }
0x163c   :  { %8659 = vmatpush1.bf16.msra.mxu1 %v19481_v18 }
0x163d   :  { %8660 = vmatprep.subr.bf16.mxu1 %v19486_v12 }
0x163e   :  { %18091 = vmatpush3.bf16.msra.mxu0 %v19499_v3 }
0x163f   :  { %18092 = vmatprep.subr.bf16.mxu0 %v20126_v26 }
0x1640   :  { %8661 = vmatpush1.bf16.msra.mxu1 %v19484_v5 }
0x1641   :  { %18098 = vmatprep.subr.bf16.mxu1 %v20126_v26 }
0x1642   :  { %18093 = vmatpush3.bf16.msra.mxu0 %v19501_v58 }
0x1643   :  { %8679 = vmatmul.mubr.bf16.vlgmr.msra.gmra.mxu1 %v20813_v21  ;;  %18118 = vmatprep.subr.bf16.mxu0 %v20126_v26 }
0x1644   :  { %18114 = vmatprep.mubr.msk.bf16.mxu1 %vm20127_vm7, %v20126_v26  ;;  %18099 = vmatpush3.bf16.msra.mxu1 %v19488_v63 }
0x1645   :  { %18100 = vmatprep.subr.bf16.mxu1 %v20126_v26 }
0x1648   :  { %18101 = vmatpush3.bf16.msra.mxu1 %v19490_v45 }
0x1649   :  { %18102 = vmatprep.subr.bf16.mxu1 %v20126_v26 }
0x164c   :  { %18103 = vmatpush3.bf16.msra.mxu1 %v19492_v54 }
0x164d   :  { %18104 = vmatprep.subr.bf16.mxu1 %v20126_v26 }
0x1650   :  { %18105 = vmatpush3.bf16.msra.mxu1 %v19494_v9 }
0x1651   :  { %18106 = vmatprep.subr.bf16.mxu1 %v20126_v26 }
0x1654   :  { %18107 = vmatpush3.bf16.msra.mxu1 %v19496_v35 }
0x1655   :  { %18108 = vmatprep.subr.bf16.mxu1 %v20126_v26 }
0x1658   :  { %18109 = vmatpush3.bf16.msra.mxu1 %v19498_v56 }
0x1659   :  { %18110 = vmatprep.subr.bf16.mxu1 %v20126_v26 }
0x165c   :  { %18111 = vmatpush3.bf16.msra.mxu1 %v19500_v25 }
0x165d   :  { %18112 = vmatprep.subr.bf16.mxu1 %v20126_v26 }
0x1660   :  { %18113 = vmatpush3.bf16.msra.mxu1 %v19502_v48 }
0x1661   :  { %18138 = vmatprep.subr.bf16.mxu1 %v20126_v26 }
0x1683   :  { %v7765_v15 = vpop.f32.mrf.mxu1 }
0x1685   :  { %v17976_v13 = vpop.f32.mrf.mxu1  ;;  %v7870_v8 = vpop.f32.mrf.mxu0 }
0x1687   :  { %v7768_v6 = vpop.f32.mrf.mxu1  ;;  %v17996_v1 = vpop.f32.mrf.mxu0 }
0x1689   :  { %v17977_v11 = vpop.f32.mrf.mxu1  ;;  %v7873_v61 = vpop.f32.mrf.mxu0 }
0x168b   :  { %v17997_v16 = vpop.f32.mrf.mxu0 }
0x168c   :  { %v8712_v16 = vld [vmem:[#allocation9 + $0x14] ss:$8 sm:$0x3] }
0x16a3   :  { %v7990_v34 = vpop.f32.mrf.mxu1 }
0x16a4   :  { %v7991_v30 = vadd.f32 %v7990_v34, %v7765_v15 }
0x16a5   :  { %v7992_v19 = vpop.f32.mrf.mxu1  ;;  %v8111_v24 = vpop.f32.mrf.mxu0 }
0x16a6   :  { %v7993_v41 = vadd.f32 %v7992_v19, %v7870_v8  ;;  %v8689_v42 = vrot.slane %v7991_v30, 7 }
0x16a7   :  { %v7994_v14 = vpop.f32.mrf.mxu1  ;;  %v18016_v50 = vpop.f32.mrf.mxu0 }
0x16a8   :  { %v8690_v53 = vrot.slane %v7993_v41, 7  ;;  %v8693_v47 = vsel %vm2147_vm0, 0.0, %v8689_v42 }
0x16a9   :  { %v7995_v60 = vpop.f32.mrf.mxu1  ;;  %v8114_v40 = vpop.f32.mrf.mxu0  ;;  %v8703_v63 = vsel %vm20780_vm14, %v8693_v47, 0.0 }
0x16aa   :  { %v8694_v5 = vsel %vm2147_vm0, 0.0, %v8690_v53 }
0x16ab   :  { %v18017_v37 = vpop.f32.mrf.mxu0  ;;  %v8704_v55 = vsel %vm20780_vm14, %v8694_v5, 0.0 }
0x16ac   :  { %v8721_v37 = vrot.slane %v8712_v16, %v21008_v17 }
0x16c3   :  { %v8215_v22 = vpop.f32.mrf.mxu1 }
0x16c5   :  { %v18036_v18 = vpop.f32.mrf.mxu1  ;;  %v8335_v12 = vpop.f32.mrf.mxu0 }
0x16c6   :  { %v8336_v62 = vadd.f32 %v8335_v12, %v8111_v24  ;;  %v8717_v24 = vrot.slane %v8712_v16, %v21005_v36  ;;  %v19503_v12 = vld [vmem:[#allocation2 + $0x10a8] sm:$0xff]   ;;  %v19523_v16 = vld [vmem:[#allocation2 + $0x10d8] sm:$0xff]  }
0x16c7   :  { %v8218_v46 = vpop.f32.mrf.mxu1  ;;  %v8337_v45 = vpop.f32.mrf.mxu0 }
0x16c8   :  { %v8707_v28 = vadd.f32 %v8703_v63, %v8336_v62  ;;  %v8338_v54 = vadd.f32 %v8337_v45, %v8215_v22  ;;  %v19504_v63 = vld [vmem:[#allocation2 + $0x1168] sm:$0xff]   ;;  %v19505_v45 = vld [vmem:[#allocation2 + $0x10a0] sm:$0xff]  }
0x16c9   :  { %v18037_v9 = vpop.f32.mrf.mxu1  ;;  %v8339_v29 = vpop.f32.mrf.mxu0 }
0x16ca   :  { %v8708_v35 = vadd.f32 %v8704_v55, %v8338_v54  ;;  %v19507_v54 = vld [vmem:[#allocation2 + $0x1098] sm:$0xff]   ;;  %v19509_v9 = vld [vmem:[#allocation2 + $0x1090] sm:$0xff]  }
0x16cb   :  { %v8340_v15 = vpop.f32.mrf.mxu0  ;;  %v19508_v55 = vld [vmem:[#allocation2 + $0x1158] sm:$0xff]   ;;  %v19510_v29 = vld [vmem:[#allocation2 + $0x1150] sm:$0xff]  }
0x16cc   :  { %v19512_v15 = vld [vmem:[#allocation2 + $0x1148] sm:$0xff]  }
0x16e3   :  { %v8456_v0 = vpop.f32.mrf.mxu1 }
0x16e5   :  { %v18056_v13 = vpop.f32.mrf.mxu1  ;;  %v8560_v8 = vpop.f32.mrf.mxu0 }
0x16e6   :  { %v19514_v13 = vld [vmem:[#allocation2 + $0x1140] sm:$0xff]  }
0x16e7   :  { %v8459_v56 = vpop.f32.mrf.mxu1  ;;  %v18076_v6 = vpop.f32.mrf.mxu0 }
0x16e8   :  { %v19516_v56 = vld [vmem:[#allocation2 + $0x1138] sm:$0xff]   ;;  %v19517_v6 = vld [vmem:[#allocation2 + $0x1070] sm:$0xff]  }
0x16e9   :  { %v18057_v1 = vpop.f32.mrf.mxu1  ;;  %v8563_v3 = vpop.f32.mrf.mxu0 }
0x16ea   :  { %v19518_v1 = vld [vmem:[#allocation2 + $0x1130] sm:$0xff]   ;;  %v19519_v3 = vld [vmem:[#allocation2 + $0x10e8] sm:$0xff]  }
0x16eb   :  { %v18077_v11 = vpop.f32.mrf.mxu0 }
0x16ec   :  { %v19520_v11 = vld [vmem:[#allocation2 + $0x11a8] sm:$0xff]  }
0x1703   :  { %v8680_v61 = vpop.f32.mrf.mxu1 }
0x1704   :  { %v8681_v25 = vadd.f32 %v8680_v61, %v8456_v0  ;;  %v19513_v0 = vld [vmem:[#allocation2 + $0x1080] sm:$0xff]  }
0x1705   :  { %v8682_v58 = vpop.f32.mrf.mxu1  ;;  %v19521_v61 = vld [vmem:[#allocation2 + $0x10e0] sm:$0xff]  }
0x1706   :  { %v8697_v48 = vrot.slane %v8681_v25, 1  ;;  %v8683_v34 = vadd.f32 %v8682_v58, %v8560_v8  ;;  %v19515_v8 = vld [vmem:[#allocation2 + $0x1078] sm:$0xff]   ;;  %v19522_v25 = vld [vmem:[#allocation2 + $0x11a0] sm:$0xff]  }
0x1707   :  { %v8684_v30 = vpop.f32.mrf.mxu1  ;;  %v19524_v58 = vld [vmem:[#allocation2 + $0x1198] sm:$0xff]  }
0x1708   :  { %v8701_v19 = vsel %vm22190_vm13, %v8697_v48, 0.0  ;;  %v8698_v41 = vrot.slane %v8683_v34, 1  ;;  %v19525_v48 = vld [vmem:[#allocation2 + $0x10d0] sm:$0xff]   ;;  %v19527_v30 = vld [vmem:[#allocation2 + $0x10c8] sm:$0xff]  }
0x1709   :  { %v8705_v14 = vsel %vm20786_vm15, %v8701_v19, 0.0  ;;  %v8685_v50 = vpop.f32.mrf.mxu1  ;;  %v19526_v34 = vld [vmem:[#allocation2 + $0x1190] sm:$0xff]   ;;  %v19528_v19 = vld [vmem:[#allocation2 + $0x1188] sm:$0xff]  }
0x170a   :  { %v8709_v60 = vadd.f32 %v8707_v28, %v8705_v14  ;;  %v8702_v40 = vsel %vm22191_vm6, %v8698_v41, 0.0  ;;  %v19506_v28 = vld [vmem:[#allocation2 + $0x1160] sm:$0xff]   ;;  %v19531_v14 = vld [vmem:[#allocation2 + $0x10b8] sm:$0xff]   ;;  %vm22197_vm6 = vmmov %vm22193_vm2 }
0x170b   :  { %v8706_v42 = vsel %vm20786_vm15, %v8702_v40, 0.0  ;;  %v19530_v41 = vld [vmem:[#allocation2 + $0x1180] sm:$0xff]   ;;  %v19532_v50 = vld [vmem:[#allocation2 + $0x1178] sm:$0xff]   ;;  %v19534_v40 = vld [vmem:[#allocation2 + $0x1170] sm:$0xff]  }
0x170c   :  { %v8724_v53 = vadd.f32 %v8717_v24, %v8709_v60  ;;  %v8710_v22 = vadd.f32 %v8708_v35, %v8706_v42  ;;  %v19511_v35 = vld [vmem:[#allocation2 + $0x1088] sm:$0xff]   ;;  %v19529_v24 = vld [vmem:[#allocation2 + $0x10c0] sm:$0xff]   ;;  %v19533_v60 = vld [vmem:[#allocation2 + $0x10b0] sm:$0xff]  }
0x170d   :  { %v19539_v42 = vld [vmem:[#allocation2 + $0x12a8] sm:$0xff]  }
0x170e   :  { %v8726_v47 = vmax.f32 %v8724_v53, 0.0  ;;  %v8725_v18 = vadd.f32 %v8721_v37, %v8710_v22  ;;  %v19537_v37 = vld [vmem:[#allocation2 + $0x12b0] sm:$0xff]   ;;  %v19541_v53 = vld [vmem:[#allocation2 + $0x12a0] sm:$0xff]   ;;  %v19543_v22 = vld [vmem:[#allocation2 + $0x1298] sm:$0xff]  }
0x1710   :  { %v21203_v5 = vpack.c.bf16 %v8726_v47, %v8726_v47  ;;  %v8727_v62 = vmax.f32 %v8725_v18, 0.0  ;;  %v19545_v47 = vld [vmem:[#allocation2 + $0x1290] sm:$0xff]   ;;  %v19547_v18 = vld [vmem:[#allocation2 + $0x1288] sm:$0xff]  }
0x1712   :  { %v21205_v46 = vpack.c.bf16 %v8727_v62, %v8727_v62  ;;  %18095 = vmatmul.mubr.bf16.vlgmr.msra.gmra.mxu0 %v21203_v5 }
0x1713   :  { %18119 = vmatpush3.bf16.msra.mxu0 %v19503_v12  ;;  %18134 = vmatprep.mubr.msk.bf16.mxu0 %vm20127_vm7, %v20126_v26 }
0x1714   :  { %18115 = vmatmul.mubr.bf16.vlgmr.msra.gmra.mxu1 %v21205_v46  ;;  %18120 = vmatprep.subr.bf16.mxu0 %v20126_v26 }
0x1715   :  { %18139 = vmatpush3.bf16.msra.mxu1 %v19504_v63  ;;  %18154 = vmatprep.mubr.msk.bf16.mxu1 %vm20127_vm7, %v20126_v26 }
0x1716   :  { %18140 = vmatprep.subr.bf16.mxu1 %v20126_v26 }
0x1717   :  { %18121 = vmatpush3.bf16.msra.mxu0 %v19505_v45 }
0x1718   :  { %18122 = vmatprep.subr.bf16.mxu0 %v20126_v26 }
0x1719   :  { %18141 = vmatpush3.bf16.msra.mxu1 %v19506_v28 }
0x171a   :  { %18142 = vmatprep.subr.bf16.mxu1 %v20126_v26 }
0x171b   :  { %18123 = vmatpush3.bf16.msra.mxu0 %v19507_v54 }
0x171c   :  { %18124 = vmatprep.subr.bf16.mxu0 %v20126_v26 }
0x171d   :  { %18143 = vmatpush3.bf16.msra.mxu1 %v19508_v55 }
0x171e   :  { %18144 = vmatprep.subr.bf16.mxu1 %v20126_v26 }
0x171f   :  { %18125 = vmatpush3.bf16.msra.mxu0 %v19509_v9 }
0x1720   :  { %18126 = vmatprep.subr.bf16.mxu0 %v20126_v26 }
0x1721   :  { %18145 = vmatpush3.bf16.msra.mxu1 %v19510_v29 }
0x1722   :  { %18146 = vmatprep.subr.bf16.mxu1 %v20126_v26 }
0x1723   :  { %18127 = vmatpush3.bf16.msra.mxu0 %v19511_v35 }
0x1724   :  { %18128 = vmatprep.subr.bf16.mxu0 %v20126_v26 }
0x1725   :  { %18147 = vmatpush3.bf16.msra.mxu1 %v19512_v15 }
0x1726   :  { %18148 = vmatprep.subr.bf16.mxu1 %v20126_v26 }
0x1727   :  { %18129 = vmatpush3.bf16.msra.mxu0 %v19513_v0 }
0x1728   :  { %18130 = vmatprep.subr.bf16.mxu0 %v20126_v26 }
0x1729   :  { %18149 = vmatpush3.bf16.msra.mxu1 %v19514_v13 }
0x172a   :  { %18150 = vmatprep.subr.bf16.mxu1 %v20126_v26 }
0x172b   :  { %18131 = vmatpush3.bf16.msra.mxu0 %v19515_v8 }
0x172c   :  { %18132 = vmatprep.subr.bf16.mxu0 %v20126_v26 }
0x172d   :  { %18151 = vmatpush3.bf16.msra.mxu1 %v19516_v56 }
0x172e   :  { %18152 = vmatprep.subr.bf16.mxu1 %v20126_v26 }
0x172f   :  { %18133 = vmatpush3.bf16.msra.mxu0 %v19517_v6 }
0x1730   :  { %18158 = vmatprep.subr.bf16.mxu0 %v20126_v26 }
0x1731   :  { %18153 = vmatpush3.bf16.msra.mxu1 %v19518_v1 }
0x1732   :  { %18135 = vmatmul.mubr.bf16.vlgmr.msra.gmra.mxu0 %v21203_v5  ;;  %18178 = vmatprep.subr.bf16.mxu1 %v20126_v26 }
0x1733   :  { %18159 = vmatpush3.bf16.msra.mxu0 %v19519_v3  ;;  %18174 = vmatprep.mubr.msk.bf16.mxu0 %vm20127_vm7, %v20126_v26 }
0x1734   :  { %18155 = vmatmul.mubr.bf16.vlgmr.msra.gmra.mxu1 %v21205_v46  ;;  %18160 = vmatprep.subr.bf16.mxu0 %v20126_v26 }
0x1735   :  { %18179 = vmatpush3.bf16.msra.mxu1 %v19520_v11  ;;  %18194 = vmatprep.mubr.msk.bf16.mxu1 %vm20127_vm7, %v20126_v26  ;;  %v9379_v11 = vld [vmem:[#allocation9 + $0x15] ss:$8 sm:$0x3] }
0x1736   :  { %18180 = vmatprep.subr.bf16.mxu1 %v20126_v26 }
0x1737   :  { %18161 = vmatpush3.bf16.msra.mxu0 %v19521_v61 }
0x1738   :  { %18162 = vmatprep.subr.bf16.mxu0 %v20126_v26 }
0x1739   :  { %18181 = vmatpush3.bf16.msra.mxu1 %v19522_v25 }
0x173a   :  { %18182 = vmatprep.subr.bf16.mxu1 %v20126_v26 }
0x173b   :  { %18163 = vmatpush3.bf16.msra.mxu0 %v19523_v16 }
0x173c   :  { %18164 = vmatprep.subr.bf16.mxu0 %v20126_v26 }
0x173d   :  { %18183 = vmatpush3.bf16.msra.mxu1 %v19524_v58 }
0x173e   :  { %18184 = vmatprep.subr.bf16.mxu1 %v20126_v26 }
0x173f   :  { %18165 = vmatpush3.bf16.msra.mxu0 %v19525_v48 }
0x1740   :  { %18166 = vmatprep.subr.bf16.mxu0 %v20126_v26 }
0x1741   :  { %18185 = vmatpush3.bf16.msra.mxu1 %v19526_v34 }
0x1742   :  { %18186 = vmatprep.subr.bf16.mxu1 %v20126_v26 }
0x1743   :  { %18167 = vmatpush3.bf16.msra.mxu0 %v19527_v30 }
0x1744   :  { %18168 = vmatprep.subr.bf16.mxu0 %v20126_v26 }
0x1745   :  { %18187 = vmatpush3.bf16.msra.mxu1 %v19528_v19 }
0x1746   :  { %18188 = vmatprep.subr.bf16.mxu1 %v20126_v26 }
0x1747   :  { %18169 = vmatpush3.bf16.msra.mxu0 %v19529_v24  ;;  %v9384_v24 = vrot.slane %v9379_v11, %v21005_v36 }
0x1748   :  { %18170 = vmatprep.subr.bf16.mxu0 %v20126_v26 }
0x1749   :  { %18189 = vmatpush3.bf16.msra.mxu1 %v19530_v41 }
0x174a   :  { %18190 = vmatprep.subr.bf16.mxu1 %v20126_v26 }
0x174b   :  { %18171 = vmatpush3.bf16.msra.mxu0 %v19531_v14 }
0x174c   :  { %18172 = vmatprep.subr.bf16.mxu0 %v20126_v26 }
0x174d   :  { %18191 = vmatpush3.bf16.msra.mxu1 %v19532_v50 }
0x174e   :  { %18192 = vmatprep.subr.bf16.mxu1 %v20126_v26 }
0x174f   :  { %18173 = vmatpush3.bf16.msra.mxu0 %v19533_v60 }
0x1751   :  { %18193 = vmatpush3.bf16.msra.mxu1 %v19534_v40 }
0x1752   :  { %18175 = vmatmul.mubr.bf16.vlgmr.msra.gmra.mxu0 %v21203_v5  ;;  %18218 = vmatprep.subr.bf16.mxu1 %v20126_v26 }
0x1753   :  { %9445 = vmatprep.mubr.bf16.mxu0 %v22123_v39 }
0x1754   :  { %18195 = vmatmul.mubr.bf16.vlgmr.msra.gmra.mxu1 %v21205_v46 }
0x1755   :  { %18234 = vmatprep.mubr.msk.bf16.mxu1 %vm20127_vm7, %v20126_v26  ;;  %18219 = vmatpush3.bf16.msra.mxu1 %v19537_v37 }
0x1756   :  { %18220 = vmatprep.subr.bf16.mxu1 %v20126_v26 }
0x1759   :  { %18221 = vmatpush3.bf16.msra.mxu1 %v19539_v42 }
0x175a   :  { %18222 = vmatprep.subr.bf16.mxu1 %v20126_v26 }
0x175d   :  { %18223 = vmatpush3.bf16.msra.mxu1 %v19541_v53  ;;  %v9388_v53 = vrot.slane %v9379_v11, %v21008_v17 }
0x175e   :  { %18224 = vmatprep.subr.bf16.mxu1 %v20126_v26 }
0x1761   :  { %18225 = vmatpush3.bf16.msra.mxu1 %v19543_v22 }
0x1762   :  { %18226 = vmatprep.subr.bf16.mxu1 %v20126_v26 }
0x1765   :  { %18227 = vmatpush3.bf16.msra.mxu1 %v19545_v47 }
0x1766   :  { %18228 = vmatprep.subr.bf16.mxu1 %v20126_v26 }
0x1769   :  { %18229 = vmatpush3.bf16.msra.mxu1 %v19547_v18 }
0x176a   :  { %18230 = vmatprep.subr.bf16.mxu1 %v20126_v26 }
0x17d2   :  { %v8828_v12 = vpop.f32.mrf.mxu0 }
0x17d3   :  { %v9356_v56 = vrot.slane %v8828_v12, 7 }
0x17d4   :  { %v18096_v5 = vpop.f32.mrf.mxu0  ;;  %v8932_v62 = vpop.f32.mrf.mxu1 }
0x17d5   :  { %v9357_v6 = vrot.slane %v8932_v62, 7  ;;  %v9360_v1 = vsel %vm2147_vm0, 0.0, %v9356_v56  ;;  %v19550_v56 = vld [vmem:[#allocation2 + $0x11b8] sm:$0xff]  }
0x17d6   :  { %v8831_v63 = vpop.f32.mrf.mxu0  ;;  %v18116_v46 = vpop.f32.mrf.mxu1  ;;  %v9370_v16 = vsel %vm20780_vm14, %v9360_v1, 0.0  ;;  %v19554_v1 = vld [vmem:[#allocation4 + $0x4f4] ss:$8 sps:$4 sm:$0xff]  }
0x17d7   :  { %v9361_v61 = vsel %vm2147_vm0, 0.0, %v9357_v6  ;;  %v19551_v6 = vld [vmem:[#allocation2 + $0x1278] sm:$0xff]  }
0x17d8   :  { %v18097_v45 = vpop.f32.mrf.mxu0  ;;  %v8935_v28 = vpop.f32.mrf.mxu1  ;;  %v9371_v41 = vsel %vm20780_vm14, %v9361_v61, 0.0  ;;  %vm22194_vm14 = vcmask 1043456  }
0x17d9   :  { %vm22195_vm13 = vmmov %vm22194_vm14 }
0x17da   :  { %v18117_v54 = vpop.f32.mrf.mxu1 }
0x17f2   :  { %v9036_v55 = vpop.f32.mrf.mxu0 }
0x17f3   :  { %v9374_v34 = vadd.f32 %v9370_v16, %v9036_v55  ;;  %v19535_v55 = vld [vmem:[#allocation2 + $0x14b8] sm:$0xff]  }
0x17f4   :  { %v18136_v9 = vpop.f32.mrf.mxu0  ;;  %v9140_v29 = vpop.f32.mrf.mxu1 }
0x17f5   :  { %v9375_v40 = vadd.f32 %v9371_v41, %v9140_v29  ;;  %v19536_v9 = vld [vmem:[#allocation2 + $0x11f0] sm:$0xff]   ;;  %v19540_v29 = vld [vmem:[#allocation2 + $0x11e0] sm:$0xff]   ;;  %v19559_v41 = vld [vmem:[#allocation2 + $0x1228] sm:$0xff]  }
0x17f6   :  { %v9039_v35 = vpop.f32.mrf.mxu0  ;;  %v18156_v15 = vpop.f32.mrf.mxu1 }
0x17f7   :  { %v19542_v35 = vld [vmem:[#allocation2 + $0x11d8] sm:$0xff]   ;;  %v19544_v15 = vld [vmem:[#allocation2 + $0x11d0] sm:$0xff]  }
0x17f8   :  { %v18137_v0 = vpop.f32.mrf.mxu0  ;;  %v9143_v13 = vpop.f32.mrf.mxu1 }
0x17f9   :  { %v19546_v0 = vld [vmem:[#allocation2 + $0x11c8] sm:$0xff]   ;;  %v19548_v13 = vld [vmem:[#allocation2 + $0x11c0] sm:$0xff]  }
0x17fa   :  { %v18157_v8 = vpop.f32.mrf.mxu1 }
0x17fb   :  { %v19549_v8 = vld [vmem:[#allocation2 + $0x1280] sm:$0xff]  }
0x17fc   :  { %18231 = vmatpush3.bf16.msra.mxu1 %v19549_v8  ;;  %v19596_v8 = vld [vmem:[#allocation2 + $0x12d8] sm:$0xff]  }
0x17fd   :  { %18232 = vmatprep.subr.bf16.mxu1 %v20126_v26 }
0x1800   :  { %18233 = vmatpush3.bf16.msra.mxu1 %v19551_v6  ;;  %v19603_v6 = vld [vmem:[#allocation4 + $0x534] ss:$8 sps:$4 sm:$0xff]  }
0x1801   :  { %18238 = vmatprep.subr.bf16.mxu1 %v20126_v26 }
0x1812   :  { %v9244_v3 = vpop.f32.mrf.mxu0 }
0x1813   :  { %v9364_v25 = vrot.slane %v9244_v3, 1 }
0x1814   :  { %v18176_v58 = vpop.f32.mrf.mxu0  ;;  %v9348_v48 = vpop.f32.mrf.mxu1 }
0x1815   :  { %v9368_v30 = vsel %vm22192_vm8, %v9364_v25, 0.0  ;;  %v9365_v19 = vrot.slane %v9348_v48, 1  ;;  %v19552_v25 = vld [vmem:[#allocation4 + $0x4f0] ss:$8 sps:$4 sm:$0xff]   ;;  %v19558_v58 = vld [vmem:[#allocation4 + $0x4e4] ss:$8 sps:$4 sm:$0xff]   ;;  %vm22198_vm8 = vmmov %vm22193_vm2 }
0x1816   :  { %v9372_v14 = vsel %vm20786_vm15, %v9368_v30, 0.0  ;;  %v9247_v50 = vpop.f32.mrf.mxu0  ;;  %v18196_v60 = vpop.f32.mrf.mxu1 }
0x1817   :  { %v9376_v37 = vadd.f32 %v9374_v34, %v9372_v14  ;;  %v9369_v42 = vsel %vm22193_vm2, %v9365_v19, 0.0  ;;  %v19555_v34 = vld [vmem:[#allocation2 + $0x1230] sm:$0xff]   ;;  %v19560_v14 = vld [vmem:[#allocation4 + $0x4d0] ss:$8 sps:$4 sm:$0xff]  }
0x1818   :  { %v9373_v22 = vsel %vm20786_vm15, %v9369_v42, 0.0  ;;  %v18177_v47 = vpop.f32.mrf.mxu0  ;;  %v9351_v18 = vpop.f32.mrf.mxu1  ;;  %vm22196_vm15 = vcmask 64512   ;;  %v19556_v19 = vld [vmem:[#allocation4 + $0x4e0] ss:$8 sps:$4 sm:$0xff]   ;;  %v19566_v50 = vld [vmem:[#allocation4 + $0x4c4] ss:$8 sps:$4 sm:$0xff]  }
0x1819   :  { %v9377_v12 = vadd.f32 %v9375_v40, %v9373_v22  ;;  %v9391_v5 = vadd.f32 %v9384_v24, %v9376_v37  ;;  %v19562_v24 = vld [vmem:[#allocation4 + $0x4d4] ss:$8 sps:$4 sm:$0xff]   ;;  %v19564_v40 = vld [vmem:[#allocation4 + $0x4c0] ss:$8 sps:$4 sm:$0xff]   ;;  %v19574_v22 = vld [vmem:[#allocation4 + $0x4a4] ss:$8 sps:$4 sm:$0xff]  }
0x181a   :  { %v18197_v57 = vpop.f32.mrf.mxu1  ;;  %v19563_v60 = vld [vmem:[#allocation2 + $0x1220] sm:$0xff]   ;;  %v19567_v42 = vld [vmem:[#allocation2 + $0x1218] sm:$0xff]   ;;  %v19571_v47 = vld [vmem:[#allocation2 + $0x1210] sm:$0xff]  }
0x181b   :  { %v9392_v62 = vadd.f32 %v9388_v53, %v9377_v12  ;;  %v9393_v63 = vmax.f32 %v9391_v5, 0.0  ;;  %v19570_v37 = vld [vmem:[#allocation4 + $0x4b4] ss:$8 sps:$4 sm:$0xff]   ;;  %v19568_v53 = vld [vmem:[#allocation4 + $0x4b0] ss:$8 sps:$4 sm:$0xff]  }
0x181c   :  { %v19572_v18 = vld [vmem:[#allocation4 + $0x4a0] ss:$8 sps:$4 sm:$0xff]   ;;  %v19578_v12 = vld [vmem:[#allocation4 + $0x494] ss:$8 sps:$4 sm:$0xff]   ;;  %v19576_v57 = vld [vmem:[#allocation4 + $0x490] ss:$8 sps:$4 sm:$0xff]  }
0x181d   :  { %v9394_v46 = vmax.f32 %v9392_v62, 0.0  ;;  %v9395_v45 = vpack.c.bf16 %v9393_v63, %v9393_v63  ;;  %v19575_v5 = vld [vmem:[#allocation2 + $0x1208] sm:$0xff]   ;;  %v19582_v62 = vld [vmem:[#allocation4 + $0x484] ss:$8 sps:$4 sm:$0xff]   ;;  %v19579_v63 = vld [vmem:[#allocation2 + $0x1200] sm:$0xff]  }
0x181f   :  { %v9396_v28 = vpack.c.bf16 %v9394_v46, %v9394_v46  ;;  %v9408_v54 = vsel %vm22195_vm13, %v9395_v45, 0  ;;  %v19580_v46 = vld [vmem:[#allocation4 + $0x480] ss:$8 sps:$4 sm:$0xff]   ;;  %vm22201_vm13 = vmmov %vm22193_vm2 }
0x1820   :  { %v19583_v45 = vld [vmem:[#allocation2 + $0x11f8] sm:$0xff]  }
0x1821   :  { %15836 = vmatprep.subr.msk.bf16.mxu0 %vm22194_vm14, %v9396_v28  ;;  %v19587_v28 = vld [vmem:[#allocation4 + $0x574] ss:$8 sps:$4 sm:$0xff]   ;;  %vm22199_vm14 = vmmov %vm22193_vm2 }
0x1822   :  { %9428 = vmatpush1.bf16.msra.mxu0 %v9408_v54  ;;  %v19584_v54 = vld [vmem:[#allocation2 + $0x12f0] sm:$0xff]  }
0x1823   :  { %18198 = vmatprep.subr.bf16.mxu0 %v20126_v26 }
0x1825   :  { %15837 = vmatmul.mubr.msk.bf16.vlgmr.msra.gmra.mxu0 %vm22196_vm15, %v19535_v55  ;;  %v19585_v55 = vld [vmem:[#allocation4 + $0x570] ss:$8 sps:$4 sm:$0xff]   ;;  %vm22206_vm15 = vmmov %vm22193_vm2 }
0x1826   :  { %18199 = vmatpush3.bf16.msra.mxu0 %v19536_v9  ;;  %18214 = vmatprep.mubr.msk.bf16.mxu0 %vm20127_vm7, %v20126_v26  ;;  %v19591_v9 = vld [vmem:[#allocation4 + $0x564] ss:$8 sps:$4 sm:$0xff]  }
0x1827   :  { %18200 = vmatprep.subr.bf16.mxu0 %v20126_v26 }
0x182a   :  { %18201 = vmatpush3.bf16.msra.mxu0 %v19538_v59  ;;  %v19588_v59 = vld [vmem:[#allocation2 + $0x12e8] sm:$0xff]  }
0x182b   :  { %18202 = vmatprep.subr.bf16.mxu0 %v20126_v26 }
0x182e   :  { %18203 = vmatpush3.bf16.msra.mxu0 %v19540_v29  ;;  %v19589_v29 = vld [vmem:[#allocation4 + $0x560] ss:$8 sps:$4 sm:$0xff]  }
0x182f   :  { %18204 = vmatprep.subr.bf16.mxu0 %v20126_v26 }
0x1832   :  { %18205 = vmatpush3.bf16.msra.mxu0 %v19542_v35  ;;  %v19595_v35 = vld [vmem:[#allocation4 + $0x554] ss:$8 sps:$4 sm:$0xff]  }
0x1833   :  { %18206 = vmatprep.subr.bf16.mxu0 %v20126_v26 }
0x1836   :  { %18207 = vmatpush3.bf16.msra.mxu0 %v19544_v15  ;;  %v19592_v15 = vld [vmem:[#allocation2 + $0x12e0] sm:$0xff]  }
0x1837   :  { %18208 = vmatprep.subr.bf16.mxu0 %v20126_v26 }
0x183a   :  { %18209 = vmatpush3.bf16.msra.mxu0 %v19546_v0  ;;  %v19593_v0 = vld [vmem:[#allocation4 + $0x550] ss:$8 sps:$4 sm:$0xff]  }
0x183b   :  { %18210 = vmatprep.subr.bf16.mxu0 %v20126_v26 }
0x183e   :  { %18211 = vmatpush3.bf16.msra.mxu0 %v19548_v13  ;;  %v19599_v13 = vld [vmem:[#allocation4 + $0x544] ss:$8 sps:$4 sm:$0xff]  }
0x183f   :  { %18212 = vmatprep.subr.bf16.mxu0 %v20126_v26 }
0x1842   :  { %18213 = vmatpush3.bf16.msra.mxu0 %v19550_v56  ;;  %v19597_v56 = vld [vmem:[#allocation4 + $0x540] ss:$8 sps:$4 sm:$0xff]  }
0x1843   :  { %9764 = vmatprep.subr.bf16.mxu0 %v19554_v1  ;;  %v19600_v1 = vld [vmem:[#allocation2 + $0x12d0] sm:$0xff]  }
0x18e5   :  { %v9447_v3 = vpop.f32.mrf.mxu0 }
0x18e7   :  { %v9449_v11 = vpop.f32.mrf.mxu0 }
0x18e9   :  { %v9451_v61 = vpop.f32.mrf.mxu0 }
0x18ea   :  { %v21290_v16 = vpack.c.bf16 %v9451_v61, %v9447_v3  ;;  %v19601_v3 = vld [vmem:[#allocation4 + $0x530] ss:$8 sps:$4 sm:$0xff]  }
0x18eb   :  { %v9453_v48 = vpop.f32.mrf.mxu0  ;;  %v19604_v61 = vld [vmem:[#allocation2 + $0x12c8] sm:$0xff]  }
0x18ec   :  { %v21292_v30 = vpack.c.bf16 %v9453_v48, %v9449_v11  ;;  %18215 = vmatmul.mubr.bf16.vlgmr.msra.gmra.mxu0 %v21290_v16  ;;  %v19607_v11 = vld [vmem:[#allocation4 + $0x524] ss:$8 sps:$4 sm:$0xff]   ;;  %v19608_v48 = vld [vmem:[#allocation2 + $0x12c0] sm:$0xff]  }
0x18ed   :  { %9765 = vmatpush1.bf16.msra.mxu0 %v19552_v25  ;;  %9796 = vmatprep.mubr.bf16.mxu0 %v22123_v39  ;;  %v19605_v25 = vld [vmem:[#allocation4 + $0x520] ss:$8 sps:$4 sm:$0xff]  }
0x18ee   :  { %18235 = vmatmul.mubr.bf16.vlgmr.msra.gmra.mxu1 %v21292_v30  ;;  %9766 = vmatprep.subr.bf16.mxu0 %v19558_v58  ;;  %v19611_v58 = vld [vmem:[#allocation4 + $0x514] ss:$8 sps:$4 sm:$0xff]  }
0x18ef   :  { %18239 = vmatpush3.bf16.msra.mxu1 %v19555_v34  ;;  %18254 = vmatprep.mubr.msk.bf16.mxu1 %vm20127_vm7, %v20126_v26  ;;  %v19609_v34 = vld [vmem:[#allocation4 + $0x510] ss:$8 sps:$4 sm:$0xff]  }
0x18f0   :  { %18240 = vmatprep.subr.bf16.mxu1 %v20126_v26 }
0x18f1   :  { %9767 = vmatpush1.bf16.msra.mxu0 %v19556_v19  ;;  %v19615_v19 = vld [vmem:[#allocation4 + $0x504] ss:$8 sps:$4 sm:$0xff]  }
0x18f2   :  { %9768 = vmatprep.subr.bf16.mxu0 %v19562_v24  ;;  %v19612_v24 = vld [vmem:[#allocation2 + $0x12b8] sm:$0xff]  }
0x18f3   :  { %18241 = vmatpush3.bf16.msra.mxu1 %v19559_v41  ;;  %v19613_v41 = vld [vmem:[#allocation4 + $0x500] ss:$8 sps:$4 sm:$0xff]  }
0x18f4   :  { %18242 = vmatprep.subr.bf16.mxu1 %v20126_v26 }
0x18f5   :  { %9769 = vmatpush1.bf16.msra.mxu0 %v19560_v14  ;;  %v19616_v14 = vld [vmem:[#allocation2 + $0x1270] sm:$0xff]  }
0x18f6   :  { %9770 = vmatprep.subr.bf16.mxu0 %v19566_v50  ;;  %v19617_v50 = vld [vmem:[#allocation2 + $0x1330] sm:$0xff]  }
0x18f7   :  { %18243 = vmatpush3.bf16.msra.mxu1 %v19563_v60  ;;  %v19618_v60 = vld [vmem:[#allocation2 + $0x1268] sm:$0xff]  }
0x18f8   :  { %18244 = vmatprep.subr.bf16.mxu1 %v20126_v26 }
0x18f9   :  { %9771 = vmatpush1.bf16.msra.mxu0 %v19564_v40  ;;  %v19619_v40 = vld [vmem:[#allocation2 + $0x1328] sm:$0xff]  }
0x18fa   :  { %9772 = vmatprep.subr.bf16.mxu0 %v19570_v37  ;;  %v19620_v37 = vld [vmem:[#allocation2 + $0x1260] sm:$0xff]  }
0x18fb   :  { %18245 = vmatpush3.bf16.msra.mxu1 %v19567_v42  ;;  %v19621_v42 = vld [vmem:[#allocation2 + $0x1320] sm:$0xff]  }
0x18fc   :  { %18246 = vmatprep.subr.bf16.mxu1 %v20126_v26 }
0x18fd   :  { %9773 = vmatpush1.bf16.msra.mxu0 %v19568_v53  ;;  %v19622_v53 = vld [vmem:[#allocation2 + $0x1258] sm:$0xff]  }
0x18fe   :  { %9774 = vmatprep.subr.bf16.mxu0 %v19574_v22  ;;  %v19623_v22 = vld [vmem:[#allocation2 + $0x1318] sm:$0xff]  }
0x18ff   :  { %18247 = vmatpush3.bf16.msra.mxu1 %v19571_v47  ;;  %v19624_v47 = vld [vmem:[#allocation2 + $0x1250] sm:$0xff]  }
0x1900   :  { %18248 = vmatprep.subr.bf16.mxu1 %v20126_v26 }
0x1901   :  { %9775 = vmatpush1.bf16.msra.mxu0 %v19572_v18  ;;  %v19625_v18 = vld [vmem:[#allocation2 + $0x1310] sm:$0xff]  }
0x1902   :  { %9776 = vmatprep.subr.bf16.mxu0 %v19578_v12  ;;  %v19626_v12 = vld [vmem:[#allocation2 + $0x1248] sm:$0xff]  }
0x1903   :  { %18249 = vmatpush3.bf16.msra.mxu1 %v19575_v5  ;;  %v19627_v5 = vld [vmem:[#allocation2 + $0x1308] sm:$0xff]  }
0x1904   :  { %18250 = vmatprep.subr.bf16.mxu1 %v20126_v26 }
0x1905   :  { %9777 = vmatpush1.bf16.msra.mxu0 %v19576_v57  ;;  %v19628_v57 = vld [vmem:[#allocation2 + $0x1240] sm:$0xff]  }
0x1906   :  { %9778 = vmatprep.subr.bf16.mxu0 %v19582_v62  ;;  %v19629_v62 = vld [vmem:[#allocation2 + $0x1300] sm:$0xff]  }
0x1907   :  { %18251 = vmatpush3.bf16.msra.mxu1 %v19579_v63  ;;  %v19630_v63 = vld [vmem:[#allocation2 + $0x1238] sm:$0xff]  }
0x1908   :  { %18252 = vmatprep.subr.bf16.mxu1 %v20126_v26 }
0x1909   :  { %9779 = vmatpush1.bf16.msra.mxu0 %v19580_v46  ;;  %v19634_v46 = vld [vmem:[#allocation4 + $0x5f4] ss:$8 sps:$4 sm:$0xff]  }
0x190a   :  { %18258 = vmatprep.subr.bf16.mxu0 %v20126_v26 }
0x190b   :  { %18253 = vmatpush3.bf16.msra.mxu1 %v19583_v45  ;;  %v19631_v45 = vld [vmem:[#allocation2 + $0x12f8] sm:$0xff]  }
0x190c   :  { %9797 = vmatmul.mubr.bf16.vlgmr.msra.gmra.mxu0 %v20723_v23  ;;  %10113 = vmatprep.subr.bf16.mxu1 %v19587_v28  ;;  %v19632_v28 = vld [vmem:[#allocation4 + $0x5f0] ss:$8 sps:$4 sm:$0xff]  }
0x190d   :  { %18259 = vmatpush3.bf16.msra.mxu0 %v19584_v54  ;;  %18274 = vmatprep.mubr.msk.bf16.mxu0 %vm20127_vm7, %v20126_v26  ;;  %v19637_v54 = vld [vmem:[#allocation4 + $0x5e4] ss:$8 sps:$4 sm:$0xff]  }
0x190e   :  { %18255 = vmatmul.mubr.bf16.vlgmr.msra.gmra.mxu1 %v21290_v16  ;;  %18260 = vmatprep.subr.bf16.mxu0 %v20126_v26 }
0x190f   :  { %10114 = vmatpush1.bf16.msra.mxu1 %v19585_v55  ;;  %10145 = vmatprep.mubr.bf16.mxu1 %v22123_v39  ;;  %v19635_v55 = vld [vmem:[#allocation4 + $0x5e0] ss:$8 sps:$4 sm:$0xff]  }
0x1910   :  { %10115 = vmatprep.subr.bf16.mxu1 %v19591_v9  ;;  %v19640_v9 = vld [vmem:[#allocation4 + $0x5d4] ss:$8 sps:$4 sm:$0xff]  }
0x1911   :  { %18261 = vmatpush3.bf16.msra.mxu0 %v19588_v59  ;;  %v19638_v59 = vld [vmem:[#allocation4 + $0x5d0] ss:$8 sps:$4 sm:$0xff]  }
0x1912   :  { %18262 = vmatprep.subr.bf16.mxu0 %v20126_v26 }
0x1913   :  { %10116 = vmatpush1.bf16.msra.mxu1 %v19589_v29  ;;  %v19643_v29 = vld [vmem:[#allocation4 + $0x5c4] ss:$8 sps:$4 sm:$0xff]  }
0x1914   :  { %10117 = vmatprep.subr.bf16.mxu1 %v19595_v35  ;;  %v19641_v35 = vld [vmem:[#allocation4 + $0x5c0] ss:$8 sps:$4 sm:$0xff]  }
0x1915   :  { %18263 = vmatpush3.bf16.msra.mxu0 %v19592_v15  ;;  %v19644_v15 = vld [vmem:[#allocation4 + $0x5b0] ss:$8 sps:$4 sm:$0xff]  }
0x1916   :  { %18264 = vmatprep.subr.bf16.mxu0 %v20126_v26 }
0x1917   :  { %10118 = vmatpush1.bf16.msra.mxu1 %v19593_v0  ;;  %v19649_v0 = vld [vmem:[#allocation4 + $0x5a4] ss:$8 sps:$4 sm:$0xff]  }
0x1918   :  { %10119 = vmatprep.subr.bf16.mxu1 %v19599_v13  ;;  %v19647_v13 = vld [vmem:[#allocation4 + $0x5a0] ss:$8 sps:$4 sm:$0xff]  }
0x1919   :  { %18265 = vmatpush3.bf16.msra.mxu0 %v19596_v8  ;;  %v19650_v8 = vld [vmem:[#allocation4 + $0x590] ss:$8 sps:$4 sm:$0xff]  }
0x191a   :  { %18266 = vmatprep.subr.bf16.mxu0 %v20126_v26 }
0x191b   :  { %10120 = vmatpush1.bf16.msra.mxu1 %v19597_v56  ;;  %v19655_v56 = vld [vmem:[#allocation4 + $0x584] ss:$8 sps:$4 sm:$0xff]  }
0x191c   :  { %10121 = vmatprep.subr.bf16.mxu1 %v19603_v6  ;;  %v19653_v6 = vld [vmem:[#allocation4 + $0x580] ss:$8 sps:$4 sm:$0xff]  }
0x191d   :  { %18267 = vmatpush3.bf16.msra.mxu0 %v19600_v1  ;;  %v19656_v1 = vld [vmem:[#allocation2 + $0x1370] sm:$0xff]  }
0x191e   :  { %18268 = vmatprep.subr.bf16.mxu0 %v20126_v26 }
0x191f   :  { %10122 = vmatpush1.bf16.msra.mxu1 %v19601_v3  ;;  %v19657_v3 = vld [vmem:[#allocation2 + $0x1430] sm:$0xff]  }
0x1920   :  { %10123 = vmatprep.subr.bf16.mxu1 %v19607_v11  ;;  %v19658_v11 = vld [vmem:[#allocation2 + $0x1368] sm:$0xff]  }
0x1921   :  { %18269 = vmatpush3.bf16.msra.mxu0 %v19604_v61  ;;  %v19659_v61 = vld [vmem:[#allocation2 + $0x1428] sm:$0xff]  }
0x1922   :  { %18270 = vmatprep.subr.bf16.mxu0 %v20126_v26 }
0x1923   :  { %10124 = vmatpush1.bf16.msra.mxu1 %v19605_v25  ;;  %v19660_v25 = vld [vmem:[#allocation2 + $0x1360] sm:$0xff]  }
0x1924   :  { %10125 = vmatprep.subr.bf16.mxu1 %v19611_v58  ;;  %v19661_v58 = vld [vmem:[#allocation2 + $0x1420] sm:$0xff]  }
0x1925   :  { %18271 = vmatpush3.bf16.msra.mxu0 %v19608_v48  ;;  %v19662_v48 = vld [vmem:[#allocation2 + $0x1358] sm:$0xff]  }
0x1926   :  { %18272 = vmatprep.subr.bf16.mxu0 %v20126_v26 }
0x1927   :  { %10126 = vmatpush1.bf16.msra.mxu1 %v19609_v34  ;;  %v19663_v34 = vld [vmem:[#allocation2 + $0x1418] sm:$0xff]  }
0x1928   :  { %10127 = vmatprep.subr.bf16.mxu1 %v19615_v19 }
0x1929   :  { %18273 = vmatpush3.bf16.msra.mxu0 %v19612_v24  ;;  %v19664_v24 = vld [vmem:[#allocation2 + $0x1350] sm:$0xff]  }
0x192a   :  { %18278 = vmatprep.subr.bf16.mxu0 %v20126_v26 }
0x192b   :  { %10128 = vmatpush1.bf16.msra.mxu1 %v19613_v41 }
0x192c   :  { %18275 = vmatmul.mubr.bf16.vlgmr.msra.gmra.mxu0 %v21292_v30  ;;  %18298 = vmatprep.subr.bf16.mxu1 %v20126_v26 }
0x192d   :  { %18279 = vmatpush3.bf16.msra.mxu0 %v19616_v14  ;;  %18294 = vmatprep.mubr.msk.bf16.mxu0 %vm20127_vm7, %v20126_v26 }
0x192e   :  { %10146 = vmatmul.mubr.bf16.vlgmr.msra.gmra.mxu1 %v20723_v23  ;;  %18280 = vmatprep.subr.bf16.mxu0 %v20126_v26 }
0x192f   :  { %18299 = vmatpush3.bf16.msra.mxu1 %v19617_v50  ;;  %18314 = vmatprep.mubr.msk.bf16.mxu1 %vm20127_vm7, %v20126_v26  ;;  %v19665_v50 = vld [vmem:[#allocation2 + $0x1410] sm:$0xff]  }
0x1930   :  { %18300 = vmatprep.subr.bf16.mxu1 %v20126_v26 }
0x1931   :  { %18281 = vmatpush3.bf16.msra.mxu0 %v19618_v60 }
0x1932   :  { %18282 = vmatprep.subr.bf16.mxu0 %v20126_v26 }
0x1933   :  { %18301 = vmatpush3.bf16.msra.mxu1 %v19619_v40 }
0x1934   :  { %18302 = vmatprep.subr.bf16.mxu1 %v20126_v26 }
0x1935   :  { %18283 = vmatpush3.bf16.msra.mxu0 %v19620_v37  ;;  %v19666_v37 = vld [vmem:[#allocation2 + $0x1348] sm:$0xff]  }
0x1936   :  { %18284 = vmatprep.subr.bf16.mxu0 %v20126_v26 }
0x1937   :  { %18303 = vmatpush3.bf16.msra.mxu1 %v19621_v42 }
0x1938   :  { %18304 = vmatprep.subr.bf16.mxu1 %v20126_v26 }
0x1939   :  { %18285 = vmatpush3.bf16.msra.mxu0 %v19622_v53 }
0x193a   :  { %18286 = vmatprep.subr.bf16.mxu0 %v20126_v26 }
0x193b   :  { %18305 = vmatpush3.bf16.msra.mxu1 %v19623_v22  ;;  %v19667_v22 = vld [vmem:[#allocation2 + $0x1408] sm:$0xff]  }
0x193c   :  { %18306 = vmatprep.subr.bf16.mxu1 %v20126_v26 }
0x193d   :  { %18287 = vmatpush3.bf16.msra.mxu0 %v19624_v47 }
0x193e   :  { %18288 = vmatprep.subr.bf16.mxu0 %v20126_v26 }
0x193f   :  { %18307 = vmatpush3.bf16.msra.mxu1 %v19625_v18  ;;  %v19668_v18 = vld [vmem:[#allocation2 + $0x1340] sm:$0xff]  }
0x1940   :  { %18308 = vmatprep.subr.bf16.mxu1 %v20126_v26 }
0x1941   :  { %18289 = vmatpush3.bf16.msra.mxu0 %v19626_v12  ;;  %v19669_v12 = vld [vmem:[#allocation2 + $0x1400] sm:$0xff]  }
0x1942   :  { %18290 = vmatprep.subr.bf16.mxu0 %v20126_v26 }
0x1943   :  { %18309 = vmatpush3.bf16.msra.mxu1 %v19627_v5  ;;  %v19670_v5 = vld [vmem:[#allocation2 + $0x1338] sm:$0xff]  }
0x1944   :  { %18310 = vmatprep.subr.bf16.mxu1 %v20126_v26 }
0x1945   :  { %18291 = vmatpush3.bf16.msra.mxu0 %v19628_v57  ;;  %v19671_v57 = vld [vmem:[#allocation2 + $0x13f8] sm:$0xff]  }
0x1946   :  { %18292 = vmatprep.subr.bf16.mxu0 %v20126_v26 }
0x1947   :  { %18311 = vmatpush3.bf16.msra.mxu1 %v19629_v62 }
0x1948   :  { %18312 = vmatprep.subr.bf16.mxu1 %v20126_v26 }
0x1949   :  { %18293 = vmatpush3.bf16.msra.mxu0 %v19630_v63 }
0x194a   :  { %10462 = vmatprep.subr.bf16.mxu0 %v19634_v46 }
0x194b   :  { %18313 = vmatpush3.bf16.msra.mxu1 %v19631_v45 }
0x194c   :  { %18295 = vmatmul.mubr.bf16.vlgmr.msra.gmra.mxu0 %v21290_v16  ;;  %18318 = vmatprep.subr.bf16.mxu1 %v20126_v26  ;;  %v19646_v16 = vld [vmem:[#allocation4 + $0x5b4] ss:$8 sps:$4 sm:$0xff]  }
0x194d   :  { %10463 = vmatpush1.bf16.msra.mxu0 %v19632_v28  ;;  %10494 = vmatprep.mubr.bf16.mxu0 %v22123_v39 }
0x194e   :  { %18315 = vmatmul.mubr.bf16.vlgmr.msra.gmra.mxu1 %v21292_v30  ;;  %10464 = vmatprep.subr.bf16.mxu0 %v19637_v54  ;;  %v19652_v30 = vld [vmem:[#allocation4 + $0x594] ss:$8 sps:$4 sm:$0xff]  }
0x194f   :  { %18334 = vmatprep.mubr.msk.bf16.mxu1 %vm20127_vm7, %v20126_v26  ;;  %18319 = vmatpush3.bf16.msra.mxu1 %v19656_v1 }
0x1950   :  { %18320 = vmatprep.subr.bf16.mxu1 %v20126_v26 }
0x1951   :  { %10465 = vmatpush1.bf16.msra.mxu0 %v19635_v55 }
0x1952   :  { %10466 = vmatprep.subr.bf16.mxu0 %v19640_v9 }
0x1953   :  { %18321 = vmatpush3.bf16.msra.mxu1 %v19658_v11 }
0x1954   :  { %18322 = vmatprep.subr.bf16.mxu1 %v20126_v26 }
0x1955   :  { %10467 = vmatpush1.bf16.msra.mxu0 %v19638_v59 }
0x1956   :  { %10468 = vmatprep.subr.bf16.mxu0 %v19643_v29 }
0x1957   :  { %18323 = vmatpush3.bf16.msra.mxu1 %v19660_v25 }
0x1958   :  { %18324 = vmatprep.subr.bf16.mxu1 %v20126_v26 }
0x1959   :  { %10469 = vmatpush1.bf16.msra.mxu0 %v19641_v35 }
0x195a   :  { %10470 = vmatprep.subr.bf16.mxu0 %v19646_v16 }
0x195b   :  { %18325 = vmatpush3.bf16.msra.mxu1 %v19662_v48 }
0x195c   :  { %18326 = vmatprep.subr.bf16.mxu1 %v20126_v26 }
0x195d   :  { %10471 = vmatpush1.bf16.msra.mxu0 %v19644_v15 }
0x195e   :  { %10472 = vmatprep.subr.bf16.mxu0 %v19649_v0 }
0x195f   :  { %18327 = vmatpush3.bf16.msra.mxu1 %v19664_v24 }
0x1960   :  { %18328 = vmatprep.subr.bf16.mxu1 %v20126_v26 }
0x1961   :  { %10473 = vmatpush1.bf16.msra.mxu0 %v19647_v13 }
0x1962   :  { %10474 = vmatprep.subr.bf16.mxu0 %v19652_v30 }
0x1963   :  { %18329 = vmatpush3.bf16.msra.mxu1 %v19666_v37 }
0x1964   :  { %18330 = vmatprep.subr.bf16.mxu1 %v20126_v26 }
0x1965   :  { %10475 = vmatpush1.bf16.msra.mxu0 %v19650_v8 }
0x1966   :  { %10476 = vmatprep.subr.bf16.mxu0 %v19655_v56 }
0x1967   :  { %18331 = vmatpush3.bf16.msra.mxu1 %v19668_v18 }
0x1968   :  { %18332 = vmatprep.subr.bf16.mxu1 %v20126_v26 }
0x1969   :  { %10477 = vmatpush1.bf16.msra.mxu0 %v19653_v6 }
0x196a   :  { %18338 = vmatprep.subr.bf16.mxu0 %v20126_v26 }
0x196b   :  { %18333 = vmatpush3.bf16.msra.mxu1 %v19670_v5 }
0x196c   :  { %10495 = vmatmul.mubr.bf16.vlgmr.msra.gmra.mxu0 %v20723_v23  ;;  %18358 = vmatprep.subr.bf16.mxu1 %v20126_v26 }
0x196d   :  { %18354 = vmatprep.mubr.msk.bf16.mxu0 %vm20127_vm7, %v20126_v26  ;;  %18339 = vmatpush3.bf16.msra.mxu0 %v19657_v3 }
0x196e   :  { %18340 = vmatprep.subr.bf16.mxu0 %v20126_v26 }
0x1971   :  { %18341 = vmatpush3.bf16.msra.mxu0 %v19659_v61 }
0x1972   :  { %18342 = vmatprep.subr.bf16.mxu0 %v20126_v26 }
0x1975   :  { %18343 = vmatpush3.bf16.msra.mxu0 %v19661_v58 }
0x1976   :  { %18344 = vmatprep.subr.bf16.mxu0 %v20126_v26 }
0x1979   :  { %18345 = vmatpush3.bf16.msra.mxu0 %v19663_v34 }
0x197a   :  { %18346 = vmatprep.subr.bf16.mxu0 %v20126_v26 }
0x197d   :  { %18347 = vmatpush3.bf16.msra.mxu0 %v19665_v50 }
0x197e   :  { %18348 = vmatprep.subr.bf16.mxu0 %v20126_v26 }
0x1981   :  { %18349 = vmatpush3.bf16.msra.mxu0 %v19667_v22 }
0x1982   :  { %18350 = vmatprep.subr.bf16.mxu0 %v20126_v26 }
0x1985   :  { %18351 = vmatpush3.bf16.msra.mxu0 %v19669_v12 }
0x1986   :  { %18352 = vmatprep.subr.bf16.mxu0 %v20126_v26 }
0x1989   :  { %18353 = vmatpush3.bf16.msra.mxu0 %v19671_v57 }
0x198a   :  { %18378 = vmatprep.subr.bf16.mxu0 %v20126_v26 }
0x19ac   :  { %v9571_v19 = vpop.f32.mrf.mxu0 }
0x19ae   :  { %v18216_v41 = vpop.f32.mrf.mxu0  ;;  %v9677_v14 = vpop.f32.mrf.mxu1 }
0x19b0   :  { %v9574_v60 = vpop.f32.mrf.mxu0  ;;  %v18236_v40 = vpop.f32.mrf.mxu1 }
0x19b2   :  { %v18217_v42 = vpop.f32.mrf.mxu0  ;;  %v9680_v53 = vpop.f32.mrf.mxu1 }
0x19b4   :  { %v18237_v47 = vpop.f32.mrf.mxu1 }
0x19cc   :  { %v9798_v62 = vpop.f32.mrf.mxu0 }
0x19cd   :  { %v9799_v63 = vadd.f32 %v9798_v62, %v9571_v19 }
0x19ce   :  { %v9800_v46 = vpop.f32.mrf.mxu0  ;;  %v9921_v45 = vpop.f32.mrf.mxu1 }
0x19cf   :  { %v9801_v28 = vadd.f32 %v9800_v46, %v9677_v14  ;;  %v10509_v35 = vrot.slane %v9799_v63, 7 }
0x19d0   :  { %v9802_v54 = vpop.f32.mrf.mxu0  ;;  %v18256_v55 = vpop.f32.mrf.mxu1 }
0x19d1   :  { %v9803_v9 = vadd.f32 %v9802_v54, %v9574_v60  ;;  %v10510_v13 = vrot.slane %v9801_v28, 7  ;;  %v10519_v1 = vsel %vm2147_vm0, 0.0, %v10509_v35 }
0x19d2   :  { %v9804_v59 = vpop.f32.mrf.mxu0  ;;  %v9924_v29 = vpop.f32.mrf.mxu1  ;;  %v10537_v58 = vsel %vm20670_vm9, %v10519_v1, 0.0 }
0x19d3   :  { %v10511_v16 = vrot.slane %v9803_v9, 7  ;;  %v9805_v15 = vadd.f32 %v9804_v59, %v9680_v53  ;;  %v10520_v61 = vsel %vm2147_vm0, 0.0, %v10510_v13 }
0x19d4   :  { %v18257_v0 = vpop.f32.mrf.mxu1  ;;  %v10538_v41 = vsel %vm20670_vm9, %v10520_v61, 0.0 }
0x19d5   :  { %v10513_v30 = vrot.slane %v9805_v15, 7  ;;  %v10512_v8 = vsel %vm2147_vm0, %v10509_v35, %v10511_v16  ;;  %v10554_v16 = vld [vmem:[#allocation9 + $0x16] ss:$8 sm:$0x3] }
0x19d6   :  { %v10539_v37 = vsel %vm20675_vm10, %v10512_v8, 0.0  ;;  %v10559_v8 = vrot.slane %v10554_v16, %v21005_v36 }
0x19d7   :  { %v10514_v56 = vsel %vm2147_vm0, %v10510_v13, %v10513_v30 }
0x19d8   :  { %v10540_v47 = vsel %vm20675_vm10, %v10514_v56, 0.0 }
0x19ec   :  { %v10026_v6 = vpop.f32.mrf.mxu0 }
0x19ee   :  { %v18276_v3 = vpop.f32.mrf.mxu0  ;;  %v10147_v11 = vpop.f32.mrf.mxu1 }
0x19ef   :  { %v10148_v25 = vadd.f32 %v10147_v11, %v9921_v45 }
0x19f0   :  { %v10029_v48 = vpop.f32.mrf.mxu0  ;;  %v10149_v34 = vpop.f32.mrf.mxu1 }
0x19f1   :  { %v10545_v19 = vadd.f32 %v10537_v58, %v10148_v25  ;;  %v10150_v24 = vadd.f32 %v10149_v34, %v10026_v6  ;;  %v10563_v25 = vrot.slane %v10554_v16, %v21008_v17  ;;  %v19684_v16 = vld [vmem:[#allocation2 + $0x1380] sm:$0xff]  }
0x19f2   :  { %v18277_v14 = vpop.f32.mrf.mxu0  ;;  %v10151_v50 = vpop.f32.mrf.mxu1 }
0x19f3   :  { %v10546_v60 = vadd.f32 %v10538_v41, %v10150_v24  ;;  %v10152_v40 = vadd.f32 %v10151_v50, %v9924_v29 }
0x19f4   :  { %v10153_v42 = vpop.f32.mrf.mxu1 }
0x19f5   :  { %v10547_v53 = vadd.f32 %v10539_v37, %v10152_v40  ;;  %v10154_v22 = vadd.f32 %v10153_v42, %v10029_v48 }
0x19f7   :  { %v10548_v18 = vadd.f32 %v10540_v47, %v10154_v22 }
0x1a0c   :  { %v10270_v12 = vpop.f32.mrf.mxu0 }
0x1a0e   :  { %v18296_v5 = vpop.f32.mrf.mxu0  ;;  %v10375_v57 = vpop.f32.mrf.mxu1 }
0x1a10   :  { %v10273_v62 = vpop.f32.mrf.mxu0  ;;  %v18316_v63 = vpop.f32.mrf.mxu1 }
0x1a11   :  { %v19673_v63 = vld [vmem:[#allocation2 + $0x1470] sm:$0xff]  }
0x1a12   :  { %v18297_v46 = vpop.f32.mrf.mxu0  ;;  %v10378_v45 = vpop.f32.mrf.mxu1 }
0x1a14   :  { %v18317_v28 = vpop.f32.mrf.mxu1 }
0x1a15   :  { %v19677_v28 = vld [vmem:[#allocation2 + $0x1460] sm:$0xff]  }
0x1a2c   :  { %v10496_v54 = vpop.f32.mrf.mxu0 }
0x1a2d   :  { %v10497_v9 = vadd.f32 %v10496_v54, %v10270_v12  ;;  %v19678_v54 = vld [vmem:[#allocation2 + $0x1398] sm:$0xff]  }
0x1a2e   :  { %v10498_v55 = vpop.f32.mrf.mxu0 }
0x1a2f   :  { %v10499_v29 = vadd.f32 %v10498_v55, %v10375_v57  ;;  %v10525_v0 = vrot.slane %v10497_v9, 1  ;;  %v19679_v55 = vld [vmem:[#allocation2 + $0x1458] sm:$0xff]   ;;  %v19680_v9 = vld [vmem:[#allocation2 + $0x1390] sm:$0xff]  }
0x1a30   :  { %v10500_v59 = vpop.f32.mrf.mxu0 }
0x1a31   :  { %v10501_v35 = vadd.f32 %v10500_v59, %v10273_v62  ;;  %v10528_v56 = vrot.slane %v10499_v29, 1  ;;  %v19681_v59 = vld [vmem:[#allocation2 + $0x1450] sm:$0xff]   ;;  %v19682_v29 = vld [vmem:[#allocation2 + $0x1388] sm:$0xff]  }
0x1a32   :  { %v10502_v15 = vpop.f32.mrf.mxu0 }
0x1a33   :  { %v10526_v13 = vrot.slane %v10501_v35, 1  ;;  %v10503_v30 = vadd.f32 %v10502_v15, %v10378_v45  ;;  %v19674_v45 = vld [vmem:[#allocation2 + $0x13a8] sm:$0xff]   ;;  %v19685_v15 = vld [vmem:[#allocation2 + $0x1440] sm:$0xff]  }
0x1a34   :  { %v19683_v35 = vld [vmem:[#allocation2 + $0x1448] sm:$0xff]  }
0x1a35   :  { %v10527_v6 = vsel %vm22197_vm6, %v10525_v0, %v10526_v13  ;;  %v10535_v1 = vsel %vm22198_vm8, %v10526_v13, 0.0  ;;  %v10529_v3 = vrot.slane %v10503_v30, 1  ;;  %v19686_v0 = vld [vmem:[#allocation2 + $0x1378] sm:$0xff]   ;;  %v19688_v30 = vld [vmem:[#allocation2 + $0x13f0] sm:$0xff]   ;;  %vm22207_vm6 = vmmov %vm22193_vm2 }
0x1a36   :  { %v10541_v11 = vsel %vm20683_vm11, %v10527_v6, 0.0  ;;  %v10543_v61 = vsel %vm20687_vm12, %v10535_v1, 0.0  ;;  %v19687_v13 = vld [vmem:[#allocation2 + $0x1438] sm:$0xff]   ;;  %v19691_v6 = vld [vmem:[#allocation2 + $0x14a8] sm:$0xff]   ;;  %v19692_v1 = vld [vmem:[#allocation2 + $0x13e0] sm:$0xff]  }
0x1a37   :  { %v10549_v58 = vadd.f32 %v10545_v19, %v10541_v11  ;;  %v10551_v48 = vadd.f32 %v10547_v53, %v10543_v61  ;;  %v10530_v34 = vsel %vm22193_vm2, %v10528_v56, %v10529_v3  ;;  %v10536_v24 = vsel %vm22199_vm14, %v10529_v3, 0.0  ;;  %v19672_v19 = vld [vmem:[#allocation2 + $0x13b0] sm:$0xff]   ;;  %v19690_v56 = vld [vmem:[#allocation2 + $0x13e8] sm:$0xff]   ;;  %v19693_v3 = vld [vmem:[#allocation2 + $0x14a0] sm:$0xff]  }
0x1a38   :  { %v10542_v41 = vsel %vm20683_vm11, %v10530_v34, 0.0  ;;  %v10544_v14 = vsel %vm20687_vm12, %v10536_v24, 0.0  ;;  %v19694_v11 = vld [vmem:[#allocation2 + $0x13d8] sm:$0xff]   ;;  %v19699_v34 = vld [vmem:[#allocation2 + $0x1488] sm:$0xff]   ;;  %v19700_v24 = vld [vmem:[#allocation2 + $0x13c0] sm:$0xff]  }
0x1a39   :  { %v10566_v50 = vadd.f32 %v10559_v8, %v10549_v58  ;;  %v10568_v40 = vadd.f32 %v10559_v8, %v10551_v48  ;;  %v10550_v37 = vadd.f32 %v10546_v60, %v10542_v41  ;;  %v10552_v42 = vadd.f32 %v10548_v18, %v10544_v14  ;;  %v19675_v60 = vld [vmem:[#allocation2 + $0x1468] sm:$0xff]   ;;  %v19676_v18 = vld [vmem:[#allocation2 + $0x13a0] sm:$0xff]   ;;  %v19689_v8 = vld [vmem:[#allocation2 + $0x14b0] sm:$0xff]  }
0x1a3a   :  { %v19695_v61 = vld [vmem:[#allocation2 + $0x1498] sm:$0xff]   ;;  %v19697_v58 = vld [vmem:[#allocation2 + $0x1490] sm:$0xff]   ;;  %v19698_v48 = vld [vmem:[#allocation2 + $0x13c8] sm:$0xff]  }
0x1a3b   :  { %v10570_v22 = vmax.f32 %v10566_v50, 0.0  ;;  %v10572_v47 = vmax.f32 %v10568_v40, 0.0  ;;  %v10567_v12 = vadd.f32 %v10563_v25, %v10550_v37  ;;  %v10569_v5 = vadd.f32 %v10563_v25, %v10552_v42  ;;  %v19696_v25 = vld [vmem:[#allocation2 + $0x13d0] sm:$0xff]   ;;  %v19701_v41 = vld [vmem:[#allocation2 + $0x1480] sm:$0xff]   ;;  %v19702_v14 = vld [vmem:[#allocation2 + $0x13b8] sm:$0xff]  }
0x1a3c   :  { %v19703_v50 = vld [vmem:[#allocation2 + $0x1478] sm:$0xff]   ;;  %v19709_v37 = vld [vmem:[#allocation2 + $0x15b0] sm:$0xff]   ;;  %v19711_v42 = vld [vmem:[#allocation2 + $0x15a8] sm:$0xff]  }
0x1a3d   :  { %v21393_v53 = vpack.c.bf16 %v10572_v47, %v10570_v22  ;;  %v10571_v57 = vmax.f32 %v10567_v12, 0.0  ;;  %v10573_v62 = vmax.f32 %v10569_v5, 0.0  ;;  %v19707_v40 = vld [vmem:[#allocation2 + $0x15b8] sm:$0xff]   ;;  %v19713_v22 = vld [vmem:[#allocation2 + $0x15a0] sm:$0xff]   ;;  %vm22208_vm8 = vmmov %vm22193_vm2 }
0x1a3e   :  { %vm22209_vm14 = vmmov %vm22193_vm2 }
0x1a3f   :  { %v21395_v46 = vpack.c.bf16 %v10573_v62, %v10571_v57  ;;  %18335 = vmatmul.mubr.bf16.vlgmr.msra.gmra.mxu1 %v21393_v53 }
0x1a40   :  { %18359 = vmatpush3.bf16.msra.mxu1 %v19672_v19  ;;  %18374 = vmatprep.mubr.msk.bf16.mxu1 %vm20127_vm7, %v20126_v26 }
0x1a41   :  { %18355 = vmatmul.mubr.bf16.vlgmr.msra.gmra.mxu0 %v21395_v46  ;;  %18360 = vmatprep.subr.bf16.mxu1 %v20126_v26 }
0x1a42   :  { %18379 = vmatpush3.bf16.msra.mxu0 %v19673_v63  ;;  %18394 = vmatprep.mubr.msk.bf16.mxu0 %vm20127_vm7, %v20126_v26 }
0x1a43   :  { %18380 = vmatprep.subr.bf16.mxu0 %v20126_v26 }
0x1a44   :  { %18361 = vmatpush3.bf16.msra.mxu1 %v19674_v45 }
0x1a45   :  { %18362 = vmatprep.subr.bf16.mxu1 %v20126_v26 }
0x1a46   :  { %18381 = vmatpush3.bf16.msra.mxu0 %v19675_v60 }
0x1a47   :  { %18382 = vmatprep.subr.bf16.mxu0 %v20126_v26 }
0x1a48   :  { %18363 = vmatpush3.bf16.msra.mxu1 %v19676_v18 }
0x1a49   :  { %18364 = vmatprep.subr.bf16.mxu1 %v20126_v26 }
0x1a4a   :  { %18383 = vmatpush3.bf16.msra.mxu0 %v19677_v28 }
0x1a4b   :  { %18384 = vmatprep.subr.bf16.mxu0 %v20126_v26 }
0x1a4c   :  { %18365 = vmatpush3.bf16.msra.mxu1 %v19678_v54 }
0x1a4d   :  { %18366 = vmatprep.subr.bf16.mxu1 %v20126_v26 }
0x1a4e   :  { %18385 = vmatpush3.bf16.msra.mxu0 %v19679_v55 }
0x1a4f   :  { %18386 = vmatprep.subr.bf16.mxu0 %v20126_v26 }
0x1a50   :  { %18367 = vmatpush3.bf16.msra.mxu1 %v19680_v9 }
0x1a51   :  { %18368 = vmatprep.subr.bf16.mxu1 %v20126_v26 }
0x1a52   :  { %18387 = vmatpush3.bf16.msra.mxu0 %v19681_v59 }
0x1a53   :  { %18388 = vmatprep.subr.bf16.mxu0 %v20126_v26 }
0x1a54   :  { %18369 = vmatpush3.bf16.msra.mxu1 %v19682_v29 }
0x1a55   :  { %18370 = vmatprep.subr.bf16.mxu1 %v20126_v26 }
0x1a56   :  { %18389 = vmatpush3.bf16.msra.mxu0 %v19683_v35 }
0x1a57   :  { %18390 = vmatprep.subr.bf16.mxu0 %v20126_v26 }
0x1a58   :  { %18371 = vmatpush3.bf16.msra.mxu1 %v19684_v16 }
0x1a59   :  { %18372 = vmatprep.subr.bf16.mxu1 %v20126_v26 }
0x1a5a   :  { %18391 = vmatpush3.bf16.msra.mxu0 %v19685_v15 }
0x1a5b   :  { %18392 = vmatprep.subr.bf16.mxu0 %v20126_v26 }
0x1a5c   :  { %18373 = vmatpush3.bf16.msra.mxu1 %v19686_v0  ;;  %v11255_v0 = vld [vmem:[#allocation9 + $0x17] ss:$8 sm:$0x3] }
0x1a5d   :  { %18398 = vmatprep.subr.bf16.mxu1 %v20126_v26 }
0x1a5e   :  { %18393 = vmatpush3.bf16.msra.mxu0 %v19687_v13 }
0x1a5f   :  { %18375 = vmatmul.mubr.bf16.vlgmr.msra.gmra.mxu1 %v21393_v53  ;;  %18418 = vmatprep.subr.bf16.mxu0 %v20126_v26 }
0x1a60   :  { %18399 = vmatpush3.bf16.msra.mxu1 %v19688_v30  ;;  %18414 = vmatprep.mubr.msk.bf16.mxu1 %vm20127_vm7, %v20126_v26 }
0x1a61   :  { %18395 = vmatmul.mubr.bf16.vlgmr.msra.gmra.mxu0 %v21395_v46  ;;  %18400 = vmatprep.subr.bf16.mxu1 %v20126_v26 }
0x1a62   :  { %18419 = vmatpush3.bf16.msra.mxu0 %v19689_v8  ;;  %18434 = vmatprep.mubr.msk.bf16.mxu0 %vm20127_vm7, %v20126_v26  ;;  %vm22200_vm7 = vmmov %vm22193_vm2 }
0x1a63   :  { %18420 = vmatprep.subr.bf16.mxu0 %v20126_v26 }
0x1a64   :  { %18401 = vmatpush3.bf16.msra.mxu1 %v19690_v56 }
0x1a65   :  { %18402 = vmatprep.subr.bf16.mxu1 %v20126_v26 }
0x1a66   :  { %18421 = vmatpush3.bf16.msra.mxu0 %v19691_v6 }
0x1a67   :  { %18422 = vmatprep.subr.bf16.mxu0 %v20126_v26 }
0x1a68   :  { %18403 = vmatpush3.bf16.msra.mxu1 %v19692_v1 }
0x1a69   :  { %18404 = vmatprep.subr.bf16.mxu1 %v20126_v26 }
0x1a6a   :  { %18423 = vmatpush3.bf16.msra.mxu0 %v19693_v3  ;;  %v11260_v3 = vrot.slane %v11255_v0, %v21005_v36 }
0x1a6b   :  { %18424 = vmatprep.subr.bf16.mxu0 %v20126_v26 }
0x1a6c   :  { %18405 = vmatpush3.bf16.msra.mxu1 %v19694_v11 }
0x1a6d   :  { %18406 = vmatprep.subr.bf16.mxu1 %v20126_v26 }
0x1a6e   :  { %18425 = vmatpush3.bf16.msra.mxu0 %v19695_v61  ;;  %v11264_v61 = vrot.slane %v11255_v0, %v21008_v17 }
0x1a6f   :  { %18426 = vmatprep.subr.bf16.mxu0 %v20126_v26 }
0x1a70   :  { %18407 = vmatpush3.bf16.msra.mxu1 %v19696_v25 }
0x1a71   :  { %18408 = vmatprep.subr.bf16.mxu1 %v20126_v26 }
0x1a72   :  { %18427 = vmatpush3.bf16.msra.mxu0 %v19697_v58 }
0x1a73   :  { %18428 = vmatprep.subr.bf16.mxu0 %v20126_v26 }
0x1a74   :  { %18409 = vmatpush3.bf16.msra.mxu1 %v19698_v48 }
0x1a75   :  { %18410 = vmatprep.subr.bf16.mxu1 %v20126_v26 }
0x1a76   :  { %18429 = vmatpush3.bf16.msra.mxu0 %v19699_v34 }
0x1a77   :  { %18430 = vmatprep.subr.bf16.mxu0 %v20126_v26 }
0x1a78   :  { %18411 = vmatpush3.bf16.msra.mxu1 %v19700_v24 }
0x1a79   :  { %18412 = vmatprep.subr.bf16.mxu1 %v20126_v26 }
0x1a7a   :  { %18431 = vmatpush3.bf16.msra.mxu0 %v19701_v41 }
0x1a7b   :  { %18432 = vmatprep.subr.bf16.mxu0 %v20126_v26 }
0x1a7c   :  { %18413 = vmatpush3.bf16.msra.mxu1 %v19702_v14 }
0x1a7e   :  { %18433 = vmatpush3.bf16.msra.mxu0 %v19703_v50 }
0x1a7f   :  { %18415 = vmatmul.mubr.bf16.vlgmr.msra.gmra.mxu1 %v21393_v53  ;;  %18458 = vmatprep.subr.bf16.mxu0 %v19707_v40 }
0x1a80   :  { %11329 = vmatprep.mubr.bf16.mxu1 %v22123_v39 }
0x1a81   :  { %18435 = vmatmul.mubr.bf16.vlgmr.msra.gmra.mxu0 %v21395_v46 }
0x1a82   :  { %18459 = vmatpush3.bf16.msra.mxu0 %v19707_v40 }
0x1a83   :  { %18460 = vmatprep.subr.bf16.mxu0 %v19709_v37 }
0x1a86   :  { %18461 = vmatpush3.bf16.msra.mxu0 %v19709_v37 }
0x1a87   :  { %18462 = vmatprep.subr.bf16.mxu0 %v19711_v42 }
0x1a8a   :  { %18463 = vmatpush3.bf16.msra.mxu0 %v19711_v42 }
0x1a8b   :  { %18464 = vmatprep.subr.bf16.mxu0 %v19713_v22 }
0x1a8e   :  { %18465 = vmatpush3.bf16.msra.mxu0 %v19713_v22 }
0x1aff   :  { %v10674_v26 = vpop.f32.mrf.mxu1 }
0x1b00   :  { %v11210_v53 = vrot.slane %v10674_v26, 7 }
0x1b01   :  { %v18336_v47 = vpop.f32.mrf.mxu1  ;;  %v10779_v12 = vpop.f32.mrf.mxu0 }
0x1b02   :  { %v11211_v35 = vrot.slane %v10779_v12, 7  ;;  %v11220_v13 = vsel %vm2147_vm0, 0.0, %v11210_v53 }
0x1b03   :  { %v10677_v5 = vpop.f32.mrf.mxu1  ;;  %v18356_v19 = vpop.f32.mrf.mxu0  ;;  %v11238_v25 = vsel %vm20670_vm9, %v11220_v13, 0.0  ;;  %v19706_v13 = vld [vmem:[#allocation2 + $0x14f8] sm:$0xff]  }
0x1b04   :  { %v11212_v57 = vrot.slane %v10677_v5, 7  ;;  %v11221_v56 = vsel %vm2147_vm0, 0.0, %v11211_v35 }
0x1b05   :  { %v18337_v62 = vpop.f32.mrf.mxu1  ;;  %v10782_v63 = vpop.f32.mrf.mxu0  ;;  %v11239_v41 = vsel %vm20670_vm9, %v11221_v56, 0.0  ;;  %vm22202_vm9 = vmmov %vm22193_vm2  ;;  %v19712_v56 = vld [vmem:[#allocation2 + $0x14e0] sm:$0xff]  }
0x1b06   :  { %v11213_v46 = vsel %vm2147_vm0, %v11210_v53, %v11212_v57  ;;  %v11214_v16 = vrot.slane %v10782_v63, 7 }
0x1b07   :  { %v18357_v45 = vpop.f32.mrf.mxu0  ;;  %v11240_v58 = vsel %vm20675_vm10, %v11213_v46, 0.0 }
0x1b08   :  { %v11215_v6 = vsel %vm2147_vm0, %v11211_v35, %v11214_v16 }
0x1b09   :  { %v11241_v50 = vsel %vm20675_vm10, %v11215_v6, 0.0  ;;  %vm22203_vm10 = vmmov %vm22193_vm2  ;;  %v19714_v6 = vld [vmem:[#allocation2 + $0x14d8] sm:$0xff]  }
0x1b1f   :  { %v10884_v60 = vpop.f32.mrf.mxu1 }
0x1b20   :  { %v11246_v24 = vadd.f32 %v11238_v25, %v10884_v60  ;;  %v19719_v25 = vld [vmem:[#allocation2 + $0x1588] sm:$0xff]  }
0x1b21   :  { %v18376_v18 = vpop.f32.mrf.mxu1  ;;  %v10989_v28 = vpop.f32.mrf.mxu0 }
0x1b22   :  { %v11247_v12 = vadd.f32 %v11239_v41, %v10989_v28 }
0x1b23   :  { %v10887_v54 = vpop.f32.mrf.mxu1  ;;  %v18396_v55 = vpop.f32.mrf.mxu0 }
0x1b24   :  { %v11248_v14 = vadd.f32 %v11240_v58, %v10887_v54  ;;  %v19720_v58 = vld [vmem:[#allocation2 + $0x14c0] sm:$0xff]  }
0x1b25   :  { %v18377_v9 = vpop.f32.mrf.mxu1  ;;  %v10992_v59 = vpop.f32.mrf.mxu0 }
0x1b26   :  { %v11249_v5 = vadd.f32 %v11241_v50, %v10992_v59 }
0x1b27   :  { %v18397_v29 = vpop.f32.mrf.mxu0 }
0x1b3f   :  { %v11094_v15 = vpop.f32.mrf.mxu1 }
0x1b40   :  { %v11226_v48 = vrot.slane %v11094_v15, 1 }
0x1b41   :  { %v18416_v30 = vpop.f32.mrf.mxu1  ;;  %v11199_v8 = vpop.f32.mrf.mxu0 }
0x1b42   :  { %v11229_v42 = vrot.slane %v11199_v8, 1  ;;  %v19704_v30 = vld [vmem:[#allocation2 + $0x17c0] sm:$0xff]   ;;  %v19705_v8 = vld [vmem:[#allocation2 + $0x17c8] sm:$0xff]  }
0x1b43   :  { %v11097_v1 = vpop.f32.mrf.mxu1  ;;  %v18436_v11 = vpop.f32.mrf.mxu0 }
0x1b44   :  { %v11227_v34 = vrot.slane %v11097_v1, 1  ;;  %v19715_v1 = vld [vmem:[#allocation2 + $0x1598] sm:$0xff]   ;;  %v19717_v11 = vld [vmem:[#allocation2 + $0x1590] sm:$0xff]  }
0x1b45   :  { %v18417_v40 = vpop.f32.mrf.mxu1  ;;  %v11202_v37 = vpop.f32.mrf.mxu0  ;;  %18466 = vmatprep.subr.bf16.mxu0 %v19715_v1 }
0x1b46   :  { %v11228_v22 = vsel %vm22200_vm7, %v11226_v48, %v11227_v34  ;;  %v11236_v26 = vsel %vm22201_vm13, %v11227_v34, 0.0  ;;  %v11230_v47 = vrot.slane %v11202_v37, 1  ;;  %18467 = vmatpush3.bf16.msra.mxu0 %v19715_v1  ;;  %v19721_v48 = vld [vmem:[#allocation2 + $0x1580] sm:$0xff]   ;;  %v19762_v1 = vld [vmem:[#allocation2 + $0x15e8] sm:$0xff]   ;;  %vm22210_vm7 = vmmov %vm22193_vm2 }
0x1b47   :  { %v11242_v19 = vsel %vm20683_vm11, %v11228_v22, 0.0  ;;  %v11244_v33 = vsel %vm20687_vm12, %v11236_v26, 0.0  ;;  %v18437_v53 = vpop.f32.mrf.mxu0  ;;  %18468 = vmatprep.subr.bf16.mxu0 %v19717_v11  ;;  %v19724_v34 = vld [vmem:[#allocation4 + $0x674] ss:$8 sps:$4 sm:$0xff]   ;;  %vm22211_vm13 = vmmov %vm22193_vm2 }
0x1b48   :  { %v11250_v57 = vadd.f32 %v11246_v24, %v11242_v19  ;;  %v11252_v32 = vadd.f32 %v11248_v14, %v11244_v33  ;;  %v11231_v62 = vsel %vm22202_vm9, %v11229_v42, %v11230_v47  ;;  %v11237_v63 = vsel %vm22203_vm10, %v11230_v47, 0.0  ;;  %v19725_v24 = vld [vmem:[#allocation2 + $0x1538] sm:$0xff]   ;;  %vm22212_vm9 = vmmov %vm22193_vm2 }
0x1b49   :  { %v11243_v46 = vsel %vm20683_vm11, %v11231_v62, 0.0  ;;  %v11245_v45 = vsel %vm20687_vm12, %v11237_v63, 0.0  ;;  %vm22204_vm11 = vcmask 130048   ;;  %v19728_v19 = vld [vmem:[#allocation4 + $0x664] ss:$8 sps:$4 sm:$0xff]   ;;  %v19733_v63 = vld [vmem:[#allocation2 + $0x1528] sm:$0xff]  }
0x1b4a   :  { %v11267_v60 = vadd.f32 %v11260_v3, %v11250_v57  ;;  %v11269_v18 = vadd.f32 %v11260_v3, %v11252_v32  ;;  %v11251_v28 = vadd.f32 %v11247_v12, %v11243_v46  ;;  %v11253_v54 = vadd.f32 %v11249_v5, %v11245_v45  ;;  %vm22205_vm12 = vmmov %vm22204_vm11  ;;  %v19716_v3 = vld [vmem:[#allocation2 + $0x14d0] sm:$0xff]   ;;  %18469 = vmatpush3.bf16.msra.mxu0 %v19717_v11  ;;  %v19722_v12 = vld [vmem:[#allocation4 + $0x670] ss:$8 sps:$4 sm:$0xff]  }
0x1b4b   :  { %18470 = vmatprep.subr.bf16.mxu0 %v19719_v25  ;;  %v19729_v57 = vld [vmem:[#allocation2 + $0x1530] sm:$0xff]   ;;  %v19732_v62 = vld [vmem:[#allocation4 + $0x654] ss:$8 sps:$4 sm:$0xff]   ;;  %v19730_v46 = vld [vmem:[#allocation4 + $0x650] ss:$8 sps:$4 sm:$0xff]   ;;  %vm22213_vm10 = vcmask 1043456  }
0x1b4c   :  { %v11273_v55 = vmax.f32 %v11269_v18, 0.0  ;;  %v11268_v9 = vadd.f32 %v11264_v61, %v11251_v28  ;;  %v11270_v59 = vadd.f32 %v11264_v61, %v11253_v54  ;;  %v11271_v29 = vmax.f32 %v11267_v60, 0.0  ;;  %v19718_v61 = vld [vmem:[#allocation2 + $0x14c8] sm:$0xff]   ;;  %v19726_v32 = vld [vmem:[#allocation4 + $0x660] ss:$8 sps:$4 sm:$0xff]   ;;  %v19737_v60 = vld [vmem:[#allocation2 + $0x1520] sm:$0xff]  }
0x1b4d   :  { %v19736_v45 = vld [vmem:[#allocation4 + $0x644] ss:$8 sps:$4 sm:$0xff]   ;;  %v19734_v18 = vld [vmem:[#allocation4 + $0x640] ss:$8 sps:$4 sm:$0xff]   ;;  %v19740_v28 = vld [vmem:[#allocation4 + $0x634] ss:$8 sps:$4 sm:$0xff]  }
0x1b4e   :  { %v11272_v35 = vmax.f32 %v11268_v9, 0.0  ;;  %v11274_v16 = vmax.f32 %v11270_v59, 0.0  ;;  %v11275_v15 = vpack.c.bf16 %v11273_v55, %v11271_v29  ;;  %18471 = vmatpush3.bf16.msra.mxu0 %v19719_v25  ;;  %v19741_v54 = vld [vmem:[#allocation2 + $0x1518] sm:$0xff]   ;;  %v19738_v55 = vld [vmem:[#allocation4 + $0x630] ss:$8 sps:$4 sm:$0xff]   ;;  %v19745_v59 = vld [vmem:[#allocation2 + $0x1510] sm:$0xff]  }
0x1b4f   :  { %18472 = vmatprep.subr.bf16.mxu0 %v19721_v48  ;;  %v19744_v9 = vld [vmem:[#allocation4 + $0x624] ss:$8 sps:$4 sm:$0xff]   ;;  %v19742_v29 = vld [vmem:[#allocation4 + $0x620] ss:$8 sps:$4 sm:$0xff]   ;;  %v19765_v11 = vld [vmem:[#allocation4 + $0x6d4] ss:$8 sps:$4 sm:$0xff]  }
0x1b50   :  { %v11276_v0 = vpack.c.bf16 %v11274_v16, %v11272_v35  ;;  %v19748_v35 = vld [vmem:[#allocation4 + $0x614] ss:$8 sps:$4 sm:$0xff]   ;;  %v19763_v25 = vld [vmem:[#allocation4 + $0x6d0] ss:$8 sps:$4 sm:$0xff]  }
0x1b51   :  { %v19749_v16 = vld [vmem:[#allocation2 + $0x1508] sm:$0xff]  }
0x1b52   :  { %11311 = vmatprep.subr.bf16.mxu1 %v11276_v0  ;;  %18473 = vmatpush3.bf16.msra.mxu0 %v19721_v48  ;;  %v19752_v0 = vld [vmem:[#allocation4 + $0x604] ss:$8 sps:$4 sm:$0xff]  }
0x1b53   :  { %11312 = vmatpush1.bf16.msra.mxu1 %v11275_v15  ;;  %18478 = vmatprep.subr.bf16.mxu0 %v19725_v24  ;;  %v19746_v15 = vld [vmem:[#allocation4 + $0x610] ss:$8 sps:$4 sm:$0xff]   ;;  %v19770_v48 = vld [vmem:[#allocation2 + $0x15d8] sm:$0xff]  }
0x1b54   :  { %18438 = vmatprep.subr.bf16.mxu1 %v19706_v13 }
0x1b56   :  { %15984 = vmatmul.mubr.msk.bf16.vlgmr.msra.gmra.mxu1 %vm22204_vm11, %v19704_v30  ;;  %v19750_v30 = vld [vmem:[#allocation4 + $0x600] ss:$8 sps:$4 sm:$0xff]  }
0x1b57   :  { %11339 = vmatprep.mubr.bf16.mxu1 %v22123_v39  ;;  %18439 = vmatpush3.bf16.msra.mxu1 %v19706_v13  ;;  %v19753_v13 = vld [vmem:[#allocation2 + $0x1500] sm:$0xff]  }
0x1b58   :  { %18440 = vmatprep.subr.bf16.mxu1 %v19708_v2 }
0x1b5b   :  { %18441 = vmatpush3.bf16.msra.mxu1 %v19708_v2  ;;  %v19754_v2 = vld [vmem:[#allocation2 + $0x15f8] sm:$0xff]  }
0x1b5c   :  { %18442 = vmatprep.subr.bf16.mxu1 %v19710_v7 }
0x1b5e   :  { %15985 = vmatmul.mubr.msk.bf16.gmra.mxu1 %vm22205_vm12, %v19705_v8  ;;  %v19758_v8 = vld [vmem:[#allocation2 + $0x15f0] sm:$0xff]   ;;  %vm22214_vm12 = vmmov %vm22204_vm11 }
0x1b5f   :  { %18443 = vmatpush3.bf16.msra.mxu1 %v19710_v7  ;;  %v19757_v7 = vld [vmem:[#allocation4 + $0x6f4] ss:$8 sps:$4 sm:$0xff]  }
0x1b60   :  { %18444 = vmatprep.subr.bf16.mxu1 %v19712_v56 }
0x1b63   :  { %18445 = vmatpush3.bf16.msra.mxu1 %v19712_v56  ;;  %v19755_v56 = vld [vmem:[#allocation4 + $0x6f0] ss:$8 sps:$4 sm:$0xff]  }
0x1b64   :  { %18446 = vmatprep.subr.bf16.mxu1 %v19714_v6 }
0x1b67   :  { %18447 = vmatpush3.bf16.msra.mxu1 %v19714_v6  ;;  %v19761_v6 = vld [vmem:[#allocation4 + $0x6e4] ss:$8 sps:$4 sm:$0xff]  }
0x1b68   :  { %18448 = vmatprep.subr.bf16.mxu1 %v19716_v3 }
0x1b6b   :  { %18449 = vmatpush3.bf16.msra.mxu1 %v19716_v3  ;;  %v19759_v3 = vld [vmem:[#allocation4 + $0x6e0] ss:$8 sps:$4 sm:$0xff]  }
0x1b6c   :  { %18450 = vmatprep.subr.bf16.mxu1 %v19718_v61 }
0x1b6f   :  { %18451 = vmatpush3.bf16.msra.mxu1 %v19718_v61  ;;  %v19766_v61 = vld [vmem:[#allocation2 + $0x15e0] sm:$0xff]  }
0x1b70   :  { %18452 = vmatprep.subr.bf16.mxu1 %v19720_v58 }
0x1b73   :  { %18453 = vmatpush3.bf16.msra.mxu1 %v19720_v58  ;;  %v19769_v58 = vld [vmem:[#allocation4 + $0x6c4] ss:$8 sps:$4 sm:$0xff]  }
0x1b74   :  { %11676 = vmatprep.subr.bf16.mxu1 %v19724_v34  ;;  %v19767_v34 = vld [vmem:[#allocation4 + $0x6c0] ss:$8 sps:$4 sm:$0xff]  }
0x1c16   :  { %v11331_v41 = vpop.f32.mrf.mxu1 }
0x1c18   :  { %v11333_v14 = vpop.f32.mrf.mxu1 }
0x1c1a   :  { %v11335_v50 = vpop.f32.mrf.mxu1 }
0x1c1b   :  { %v21471_v40 = vpack.c.bf16 %v11335_v50, %v11331_v41  ;;  %v19774_v41 = vld [vmem:[#allocation2 + $0x15d0] sm:$0xff]  }
0x1c1c   :  { %v11337_v37 = vpop.f32.mrf.mxu1  ;;  %v19777_v50 = vld [vmem:[#allocation4 + $0x6a4] ss:$8 sps:$4 sm:$0xff]  }
0x1c1d   :  { %v21473_v42 = vpack.c.bf16 %v11337_v37, %v11333_v14  ;;  %18454 = vmatprep.mubr.bf16.mxu1 %v21471_v40  ;;  %v19771_v14 = vld [vmem:[#allocation4 + $0x6b0] ss:$8 sps:$4 sm:$0xff]  }
0x1c1e   :  { %v11341_v22 = vpop.f32.mrf.mxu1  ;;  %v19778_v37 = vld [vmem:[#allocation2 + $0x15c8] sm:$0xff]  }
0x1c1f   :  { %18474 = vmatprep.mubr.bf16.mxu0 %v21473_v42 }
0x1c20   :  { %v11343_v26 = vpop.f32.mrf.mxu1 }
0x1c22   :  { %v11345_v47 = vpop.f32.mrf.mxu1 }
0x1c23   :  { %v21477_v5 = vpack.c.bf16 %v11345_v47, %v11341_v22  ;;  %v19775_v22 = vld [vmem:[#allocation4 + $0x6a0] ss:$8 sps:$4 sm:$0xff]   ;;  %v19782_v47 = vld [vmem:[#allocation2 + $0x15c0] sm:$0xff]  }
0x1c24   :  { %v11347_v33 = vpop.f32.mrf.mxu1 }
0x1c25   :  { %v21479_v53 = vpack.c.bf16 %v11347_v33, %v11343_v26  ;;  %18455 = vmatmul.mubr.bf16.vlgmr.msra.gmra.mxu1 %v21477_v5  ;;  %v19781_v26 = vld [vmem:[#allocation4 + $0x694] ss:$8 sps:$4 sm:$0xff]   ;;  %v19786_v33 = vld [vmem:[#allocation2 + $0x1578] sm:$0xff]  }
0x1c26   :  { %11677 = vmatpush1.bf16.msra.mxu1 %v19722_v12  ;;  %11708 = vmatprep.mubr.bf16.mxu1 %v22123_v39  ;;  %v19779_v12 = vld [vmem:[#allocation4 + $0x690] ss:$8 sps:$4 sm:$0xff]  }
0x1c27   :  { %18475 = vmatmul.mubr.bf16.vlgmr.msra.gmra.mxu0 %v21479_v53  ;;  %11678 = vmatprep.subr.bf16.mxu1 %v19728_v19  ;;  %v19785_v19 = vld [vmem:[#allocation4 + $0x684] ss:$8 sps:$4 sm:$0xff]  }
0x1c28   :  { %18479 = vmatpush3.bf16.msra.mxu0 %v19725_v24  ;;  %18494 = vmatprep.mubr.bf16.mxu0 %v21471_v40  ;;  %v19773_v24 = vld [vmem:[#allocation4 + $0x6b4] ss:$8 sps:$4 sm:$0xff]  }
0x1c29   :  { %18480 = vmatprep.subr.bf16.mxu0 %v19729_v57 }
0x1c2a   :  { %11679 = vmatpush1.bf16.msra.mxu1 %v19726_v32  ;;  %v19787_v32 = vld [vmem:[#allocation2 + $0x1638] sm:$0xff]  }
0x1c2b   :  { %11680 = vmatprep.subr.bf16.mxu1 %v19732_v62  ;;  %v19788_v62 = vld [vmem:[#allocation2 + $0x1570] sm:$0xff]  }
0x1c2c   :  { %18481 = vmatpush3.bf16.msra.mxu0 %v19729_v57  ;;  %v19783_v57 = vld [vmem:[#allocation4 + $0x680] ss:$8 sps:$4 sm:$0xff]  }
0x1c2d   :  { %18482 = vmatprep.subr.bf16.mxu0 %v19733_v63 }
0x1c2e   :  { %11681 = vmatpush1.bf16.msra.mxu1 %v19730_v46  ;;  %v19790_v46 = vld [vmem:[#allocation2 + $0x1568] sm:$0xff]  }
0x1c2f   :  { %11682 = vmatprep.subr.bf16.mxu1 %v19736_v45  ;;  %v19791_v45 = vld [vmem:[#allocation2 + $0x1628] sm:$0xff]  }
0x1c30   :  { %18483 = vmatpush3.bf16.msra.mxu0 %v19733_v63  ;;  %v19789_v63 = vld [vmem:[#allocation2 + $0x1630] sm:$0xff]  }
0x1c31   :  { %18484 = vmatprep.subr.bf16.mxu0 %v19737_v60 }
0x1c32   :  { %11683 = vmatpush1.bf16.msra.mxu1 %v19734_v18  ;;  %v19793_v18 = vld [vmem:[#allocation2 + $0x1620] sm:$0xff]  }
0x1c33   :  { %11684 = vmatprep.subr.bf16.mxu1 %v19740_v28  ;;  %v19795_v28 = vld [vmem:[#allocation2 + $0x1618] sm:$0xff]  }
0x1c34   :  { %18485 = vmatpush3.bf16.msra.mxu0 %v19737_v60  ;;  %v19792_v60 = vld [vmem:[#allocation2 + $0x1560] sm:$0xff]  }
0x1c35   :  { %18486 = vmatprep.subr.bf16.mxu0 %v19741_v54 }
0x1c36   :  { %11685 = vmatpush1.bf16.msra.mxu1 %v19738_v55  ;;  %v19797_v55 = vld [vmem:[#allocation2 + $0x1610] sm:$0xff]  }
0x1c37   :  { %11686 = vmatprep.subr.bf16.mxu1 %v19744_v9  ;;  %v19798_v9 = vld [vmem:[#allocation2 + $0x1548] sm:$0xff]  }
0x1c38   :  { %18487 = vmatpush3.bf16.msra.mxu0 %v19741_v54  ;;  %v19796_v54 = vld [vmem:[#allocation2 + $0x1550] sm:$0xff]  }
0x1c39   :  { %18488 = vmatprep.subr.bf16.mxu0 %v19745_v59 }
0x1c3a   :  { %11687 = vmatpush1.bf16.msra.mxu1 %v19742_v29  ;;  %v19800_v29 = vld [vmem:[#allocation2 + $0x1540] sm:$0xff]  }
0x1c3b   :  { %11688 = vmatprep.subr.bf16.mxu1 %v19748_v35  ;;  %v19804_v35 = vld [vmem:[#allocation4 + $0x774] ss:$8 sps:$4 sm:$0xff]  }
0x1c3c   :  { %18489 = vmatpush3.bf16.msra.mxu0 %v19745_v59  ;;  %v19799_v59 = vld [vmem:[#allocation2 + $0x1608] sm:$0xff]  }
0x1c3d   :  { %18490 = vmatprep.subr.bf16.mxu0 %v19749_v16 }
0x1c3e   :  { %11689 = vmatpush1.bf16.msra.mxu1 %v19746_v15  ;;  %v19807_v15 = vld [vmem:[#allocation4 + $0x764] ss:$8 sps:$4 sm:$0xff]  }
0x1c3f   :  { %11690 = vmatprep.subr.bf16.mxu1 %v19752_v0  ;;  %v19805_v0 = vld [vmem:[#allocation4 + $0x760] ss:$8 sps:$4 sm:$0xff]  }
0x1c40   :  { %18491 = vmatpush3.bf16.msra.mxu0 %v19749_v16  ;;  %v19802_v16 = vld [vmem:[#allocation4 + $0x770] ss:$8 sps:$4 sm:$0xff]  }
0x1c41   :  { %18492 = vmatprep.subr.bf16.mxu0 %v19753_v13 }
0x1c42   :  { %11691 = vmatpush1.bf16.msra.mxu1 %v19750_v30  ;;  %v19808_v30 = vld [vmem:[#allocation4 + $0x750] ss:$8 sps:$4 sm:$0xff]  }
0x1c43   :  { %18498 = vmatprep.subr.bf16.mxu1 %v19754_v2 }
0x1c44   :  { %18493 = vmatpush3.bf16.msra.mxu0 %v19753_v13  ;;  %v19810_v13 = vld [vmem:[#allocation4 + $0x754] ss:$8 sps:$4 sm:$0xff]  }
0x1c45   :  { %11709 = vmatmul.mubr.bf16.vlgmr.msra.gmra.mxu1 %v20598_v27  ;;  %12051 = vmatprep.subr.bf16.mxu0 %v19757_v7  ;;  %v19811_v7 = vld [vmem:[#allocation4 + $0x740] ss:$8 sps:$4 sm:$0xff]  }
0x1c46   :  { %18499 = vmatpush3.bf16.msra.mxu1 %v19754_v2  ;;  %11718 = vmatprep.mubr.bf16.mxu1 %v22123_v39  ;;  %v19813_v2 = vld [vmem:[#allocation4 + $0x744] ss:$8 sps:$4 sm:$0xff]  }
0x1c47   :  { %18495 = vmatmul.mubr.bf16.vlgmr.msra.gmra.mxu0 %v21477_v5  ;;  %18500 = vmatprep.subr.bf16.mxu1 %v19758_v8 }
0x1c48   :  { %12052 = vmatpush1.bf16.msra.mxu0 %v19755_v56  ;;  %12083 = vmatprep.mubr.bf16.mxu0 %v22123_v39  ;;  %v19814_v56 = vld [vmem:[#allocation4 + $0x730] ss:$8 sps:$4 sm:$0xff]  }
0x1c49   :  { %12053 = vmatprep.subr.bf16.mxu0 %v19761_v6  ;;  %v19817_v6 = vld [vmem:[#allocation4 + $0x720] ss:$8 sps:$4 sm:$0xff]  }
0x1c4a   :  { %18501 = vmatpush3.bf16.msra.mxu1 %v19758_v8  ;;  %v19816_v8 = vld [vmem:[#allocation4 + $0x734] ss:$8 sps:$4 sm:$0xff]  }
0x1c4b   :  { %18502 = vmatprep.subr.bf16.mxu1 %v19762_v1 }
0x1c4c   :  { %12054 = vmatpush1.bf16.msra.mxu0 %v19759_v3  ;;  %v19825_v3 = vld [vmem:[#allocation4 + $0x704] ss:$8 sps:$4 sm:$0xff]  }
0x1c4d   :  { %11719 = vmatmul.mubr.bf16.gmra.mxu1 %v20594_v43  ;;  %12055 = vmatprep.subr.bf16.mxu0 %v19765_v11  ;;  %v19823_v11 = vld [vmem:[#allocation4 + $0x700] ss:$8 sps:$4 sm:$0xff]  }
0x1c4e   :  { %18503 = vmatpush3.bf16.msra.mxu1 %v19762_v1  ;;  %18514 = vmatprep.mubr.bf16.mxu1 %v21473_v42  ;;  %v19822_v1 = vld [vmem:[#allocation4 + $0x714] ss:$8 sps:$4 sm:$0xff]  }
0x1c4f   :  { %18504 = vmatprep.subr.bf16.mxu1 %v19766_v61 }
0x1c50   :  { %12056 = vmatpush1.bf16.msra.mxu0 %v19763_v25  ;;  %v19827_v25 = vld [vmem:[#allocation2 + $0x1738] sm:$0xff]  }
0x1c51   :  { %12057 = vmatprep.subr.bf16.mxu0 %v19769_v58  ;;  %v19828_v58 = vld [vmem:[#allocation2 + $0x1670] sm:$0xff]  }
0x1c52   :  { %18505 = vmatpush3.bf16.msra.mxu1 %v19766_v61  ;;  %v19826_v61 = vld [vmem:[#allocation2 + $0x1678] sm:$0xff]  }
0x1c53   :  { %18506 = vmatprep.subr.bf16.mxu1 %v19770_v48 }
0x1c54   :  { %12058 = vmatpush1.bf16.msra.mxu0 %v19767_v34  ;;  %v19830_v34 = vld [vmem:[#allocation2 + $0x1668] sm:$0xff]  }
0x1c55   :  { %12059 = vmatprep.subr.bf16.mxu0 %v19773_v24  ;;  %v19831_v24 = vld [vmem:[#allocation2 + $0x1728] sm:$0xff]  }
0x1c56   :  { %18507 = vmatpush3.bf16.msra.mxu1 %v19770_v48  ;;  %v19829_v48 = vld [vmem:[#allocation2 + $0x1730] sm:$0xff]  }
0x1c57   :  { %18508 = vmatprep.subr.bf16.mxu1 %v19774_v41 }
0x1c58   :  { %12060 = vmatpush1.bf16.msra.mxu0 %v19771_v14  ;;  %v19835_v14 = vld [vmem:[#allocation2 + $0x1718] sm:$0xff]  }
0x1c59   :  { %12061 = vmatprep.subr.bf16.mxu0 %v19777_v50  ;;  %v19836_v50 = vld [vmem:[#allocation2 + $0x1650] sm:$0xff]  }
0x1c5a   :  { %18509 = vmatpush3.bf16.msra.mxu1 %v19774_v41  ;;  %v19834_v41 = vld [vmem:[#allocation2 + $0x1658] sm:$0xff]  }
0x1c5b   :  { %18510 = vmatprep.subr.bf16.mxu1 %v19778_v37 }
0x1c5c   :  { %12062 = vmatpush1.bf16.msra.mxu0 %v19775_v22  ;;  %v19838_v22 = vld [vmem:[#allocation2 + $0x1648] sm:$0xff]  }
0x1c5d   :  { %12063 = vmatprep.subr.bf16.mxu0 %v19781_v26  ;;  %v19839_v26 = vld [vmem:[#allocation2 + $0x1708] sm:$0xff]  }
0x1c5e   :  { %18511 = vmatpush3.bf16.msra.mxu1 %v19778_v37  ;;  %v19837_v37 = vld [vmem:[#allocation2 + $0x1710] sm:$0xff]  }
0x1c5f   :  { %18512 = vmatprep.subr.bf16.mxu1 %v19782_v47 }
0x1c60   :  { %12064 = vmatpush1.bf16.msra.mxu0 %v19779_v12  ;;  %v19841_v12 = vld [vmem:[#allocation2 + $0x1700] sm:$0xff]  }
0x1c61   :  { %12065 = vmatprep.subr.bf16.mxu0 %v19785_v19  ;;  %v21503_v19 = vld [vmem:[#allocation2 + $0x16b8] sm:$0xff]  }
0x1c62   :  { %18513 = vmatpush3.bf16.msra.mxu1 %v19782_v47  ;;  %v19840_v47 = vld [vmem:[#allocation2 + $0x1640] sm:$0xff]  }
0x1c63   :  { %18518 = vmatprep.subr.bf16.mxu1 %v19786_v33 }
0x1c64   :  { %12066 = vmatpush1.bf16.msra.mxu0 %v19783_v57 }
0x1c65   :  { %18515 = vmatmul.mubr.bf16.vlgmr.msra.gmra.mxu1 %v21479_v53  ;;  %18538 = vmatprep.subr.bf16.mxu0 %v19787_v32 }
0x1c66   :  { %18519 = vmatpush3.bf16.msra.mxu1 %v19786_v33  ;;  %18534 = vmatprep.mubr.bf16.mxu1 %v21471_v40  ;;  %v19794_v40 = vld [vmem:[#allocation2 + $0x1558] sm:$0xff]  }
0x1c67   :  { %12084 = vmatmul.mubr.bf16.vlgmr.msra.gmra.mxu0 %v20598_v27  ;;  %18520 = vmatprep.subr.bf16.mxu1 %v19788_v62  ;;  %v21506_v33 = vld [vmem:[#allocation2 + $0x1778] sm:$0xff]  }
0x1c68   :  { %18539 = vmatpush3.bf16.msra.mxu0 %v19787_v32  ;;  %12093 = vmatprep.mubr.bf16.mxu0 %v22123_v39 }
0x1c69   :  { %18540 = vmatprep.subr.bf16.mxu0 %v19789_v63 }
0x1c6a   :  { %18521 = vmatpush3.bf16.msra.mxu1 %v19788_v62 }
0x1c6b   :  { %18522 = vmatprep.subr.bf16.mxu1 %v19790_v46 }
0x1c6c   :  { %18541 = vmatpush3.bf16.msra.mxu0 %v19789_v63 }
0x1c6d   :  { %18542 = vmatprep.subr.bf16.mxu0 %v19791_v45 }
0x1c6e   :  { %18523 = vmatpush3.bf16.msra.mxu1 %v19790_v46 }
0x1c6f   :  { %12094 = vmatmul.mubr.bf16.gmra.mxu0 %v20594_v43  ;;  %18524 = vmatprep.subr.bf16.mxu1 %v19792_v60 }
0x1c70   :  { %18543 = vmatpush3.bf16.msra.mxu0 %v19791_v45  ;;  %18554 = vmatprep.mubr.bf16.mxu0 %v21473_v42  ;;  %v19801_v42 = vld [vmem:[#allocation2 + $0x1600] sm:$0xff]  }
0x1c71   :  { %18544 = vmatprep.subr.bf16.mxu0 %v19793_v18 }
0x1c72   :  { %18525 = vmatpush3.bf16.msra.mxu1 %v19792_v60 }
0x1c73   :  { %18526 = vmatprep.subr.bf16.mxu1 %v19794_v40 }
0x1c74   :  { %18545 = vmatpush3.bf16.msra.mxu0 %v19793_v18 }
0x1c75   :  { %18546 = vmatprep.subr.bf16.mxu0 %v19795_v28 }
0x1c76   :  { %18527 = vmatpush3.bf16.msra.mxu1 %v19794_v40 }
0x1c77   :  { %18528 = vmatprep.subr.bf16.mxu1 %v19796_v54 }
0x1c78   :  { %18547 = vmatpush3.bf16.msra.mxu0 %v19795_v28 }
0x1c79   :  { %18548 = vmatprep.subr.bf16.mxu0 %v19797_v55 }
0x1c7a   :  { %18529 = vmatpush3.bf16.msra.mxu1 %v19796_v54 }
0x1c7b   :  { %18530 = vmatprep.subr.bf16.mxu1 %v19798_v9 }
0x1c7c   :  { %18549 = vmatpush3.bf16.msra.mxu0 %v19797_v55 }
0x1c7d   :  { %18550 = vmatprep.subr.bf16.mxu0 %v19799_v59 }
0x1c7e   :  { %18531 = vmatpush3.bf16.msra.mxu1 %v19798_v9 }
0x1c7f   :  { %18532 = vmatprep.subr.bf16.mxu1 %v19800_v29 }
0x1c80   :  { %18551 = vmatpush3.bf16.msra.mxu0 %v19799_v59 }
0x1c81   :  { %18552 = vmatprep.subr.bf16.mxu0 %v19801_v42 }
0x1c82   :  { %18533 = vmatpush3.bf16.msra.mxu1 %v19800_v29 }
0x1c83   :  { %12426 = vmatprep.subr.bf16.mxu1 %v19804_v35 }
0x1c84   :  { %18553 = vmatpush3.bf16.msra.mxu0 %v19801_v42 }
0x1c85   :  { %18535 = vmatmul.mubr.bf16.vlgmr.msra.gmra.mxu1 %v21477_v5  ;;  %v19819_v5 = vld [vmem:[#allocation4 + $0x724] ss:$8 sps:$4 sm:$0xff]   ;;  %18558 = vmatprep.subr.bf16.mxu0 %v19826_v61 }
0x1c86   :  { %12427 = vmatpush1.bf16.msra.mxu1 %v19802_v16  ;;  %12458 = vmatprep.mubr.bf16.mxu1 %v22123_v39 }
0x1c87   :  { %18555 = vmatmul.mubr.bf16.vlgmr.msra.gmra.mxu0 %v21479_v53  ;;  %12428 = vmatprep.subr.bf16.mxu1 %v19807_v15  ;;  %v19820_v53 = vld [vmem:[#allocation4 + $0x710] ss:$8 sps:$4 sm:$0xff]  }
0x1c88   :  { %18559 = vmatpush3.bf16.msra.mxu0 %v19826_v61 }
0x1c89   :  { %18560 = vmatprep.subr.bf16.mxu0 %v19828_v58 }
0x1c8a   :  { %12429 = vmatpush1.bf16.msra.mxu1 %v19805_v0 }
0x1c8b   :  { %12430 = vmatprep.subr.bf16.mxu1 %v19810_v13 }
0x1c8c   :  { %18561 = vmatpush3.bf16.msra.mxu0 %v19828_v58 }
0x1c8d   :  { %18562 = vmatprep.subr.bf16.mxu0 %v19830_v34 }
0x1c8e   :  { %12431 = vmatpush1.bf16.msra.mxu1 %v19808_v30 }
0x1c8f   :  { %12432 = vmatprep.subr.bf16.mxu1 %v19813_v2 }
0x1c90   :  { %18563 = vmatpush3.bf16.msra.mxu0 %v19830_v34 }
0x1c92   :  { %12433 = vmatpush1.bf16.msra.mxu1 %v19811_v7 }
0x1c93   :  { %12434 = vmatprep.subr.bf16.mxu1 %v19816_v8 }
0x1c96   :  { %12435 = vmatpush1.bf16.msra.mxu1 %v19814_v56 }
0x1c97   :  { %12436 = vmatprep.subr.bf16.mxu1 %v19819_v5 }
0x1c9a   :  { %12437 = vmatpush1.bf16.msra.mxu1 %v19817_v6 }
0x1c9b   :  { %12438 = vmatprep.subr.bf16.mxu1 %v19822_v1 }
0x1c9e   :  { %12439 = vmatpush1.bf16.msra.mxu1 %v19820_v53 }
0x1c9f   :  { %12440 = vmatprep.subr.bf16.mxu1 %v19825_v3 }
0x1ca2   :  { %12441 = vmatpush1.bf16.msra.mxu1 %v19823_v11 }
0x1ca3   :  { %18578 = vmatprep.subr.bf16.mxu1 %v19827_v25 }
0x1ca5   :  { %12459 = vmatmul.mubr.bf16.vlgmr.msra.gmra.mxu1 %v20598_v27  ;;  %v19832_v27 = vld [vmem:[#allocation2 + $0x1660] sm:$0xff]  }
0x1ca6   :  { %12468 = vmatprep.mubr.bf16.mxu1 %v22123_v39  ;;  %18579 = vmatpush3.bf16.msra.mxu1 %v19827_v25  ;;  %v12576_v39 = vld [vmem:[#allocation9 + $0x20] ss:$8 sm:$0x3] }
0x1ca7   :  { %18580 = vmatprep.subr.bf16.mxu1 %v19829_v48  ;;  %18564 = vmatprep.subr.bf16.mxu0 %v19832_v27 }
0x1ca8   :  { %18565 = vmatpush3.bf16.msra.mxu0 %v19832_v27 }
0x1ca9   :  { %18566 = vmatprep.subr.bf16.mxu0 %v19834_v41 }
0x1caa   :  { %18581 = vmatpush3.bf16.msra.mxu1 %v19829_v48 }
0x1cab   :  { %18582 = vmatprep.subr.bf16.mxu1 %v19831_v24 }
0x1cac   :  { %18567 = vmatpush3.bf16.msra.mxu0 %v19834_v41 }
0x1cad   :  { %12469 = vmatmul.mubr.bf16.gmra.mxu1 %v20594_v43  ;;  %v19833_v43 = vld [vmem:[#allocation2 + $0x1720] sm:$0xff]   ;;  %18568 = vmatprep.subr.bf16.mxu0 %v19836_v50 }
0x1cae   :  { %18583 = vmatpush3.bf16.msra.mxu1 %v19831_v24 }
0x1caf   :  { %18584 = vmatprep.subr.bf16.mxu1 %v19833_v43 }
0x1cb0   :  { %18569 = vmatpush3.bf16.msra.mxu0 %v19836_v50 }
0x1cb1   :  { %18570 = vmatprep.subr.bf16.mxu0 %v19838_v22 }
0x1cb2   :  { %18585 = vmatpush3.bf16.msra.mxu1 %v19833_v43 }
0x1cb3   :  { %18586 = vmatprep.subr.bf16.mxu1 %v19835_v14 }
0x1cb4   :  { %18571 = vmatpush3.bf16.msra.mxu0 %v19838_v22 }
0x1cb5   :  { %18572 = vmatprep.subr.bf16.mxu0 %v19840_v47 }
0x1cb6   :  { %18587 = vmatpush3.bf16.msra.mxu1 %v19835_v14 }
0x1cb7   :  { %18588 = vmatprep.subr.bf16.mxu1 %v19837_v37 }
0x1cb8   :  { %18573 = vmatpush3.bf16.msra.mxu0 %v19840_v47 }
0x1cb9   :  { %18598 = vmatprep.subr.bf16.mxu0 %v21503_v19 }
0x1cba   :  { %18589 = vmatpush3.bf16.msra.mxu1 %v19837_v37 }
0x1cbb   :  { %18590 = vmatprep.subr.bf16.mxu1 %v19839_v26 }
0x1cbe   :  { %18591 = vmatpush3.bf16.msra.mxu1 %v19839_v26 }
0x1cbf   :  { %18592 = vmatprep.subr.bf16.mxu1 %v19841_v12 }
0x1cc2   :  { %18593 = vmatpush3.bf16.msra.mxu1 %v19841_v12 }
0x1cc3   :  { %18618 = vmatprep.subr.bf16.mxu1 %v21506_v33 }
0x1ce5   :  { %v18456_v57 = vpop.f32.mrf.mxu1 }
0x1ce7   :  { %v11466_v32 = vpop.f32.mrf.mxu1  ;;  %v18476_v62 = vpop.f32.mrf.mxu0 }
0x1ce9   :  { %v18457_v63 = vpop.f32.mrf.mxu1  ;;  %v11581_v46 = vpop.f32.mrf.mxu0 }
0x1ceb   :  { %v11469_v45 = vpop.f32.mrf.mxu1  ;;  %v18477_v18 = vpop.f32.mrf.mxu0 }
0x1ced   :  { %v11584_v28 = vpop.f32.mrf.mxu0 }
0x1d05   :  { %v11710_v60 = vpop.f32.mrf.mxu1 }
0x1d06   :  { %v11711_v58 = vadd.f32 %v11710_v60, %v11466_v32 }
0x1d07   :  { %v11712_v40 = vpop.f32.mrf.mxu1  ;;  %v21509_v54 = vpop.f32.mrf.mxu0 }
0x1d08   :  { %v11713_v48 = vadd.f32 %v11712_v40, %v11581_v46  ;;  %v12487_v41 = vrot.slane %v11711_v58, 7  ;;  %v21539_v58 = vrot.slane %v12576_v39, %v21008_v17 }
0x1d09   :  { %v11714_v55 = vpop.f32.mrf.mxu1  ;;  %v11843_v9 = vpop.f32.mrf.mxu0 }
0x1d0a   :  { %v11715_v14 = vadd.f32 %v11714_v55, %v11469_v45  ;;  %v12488_v37 = vrot.slane %v11713_v48, 7  ;;  %v12509_v10 = vsel %vm2147_vm0, 0.0, %v12487_v41 }
0x1d0b   :  { %v11716_v59 = vpop.f32.mrf.mxu1  ;;  %v21511_v29 = vpop.f32.mrf.mxu0 }
0x1d0c   :  { %v11717_v50 = vadd.f32 %v11716_v59, %v11584_v28  ;;  %v12489_v32 = vrot.slane %v11715_v14, 7  ;;  %v12510_v60 = vsel %vm2147_vm0, 0.0, %v12488_v37 }
0x1d0d   :  { %v11720_v42 = vpop.f32.mrf.mxu1  ;;  %v21513_v35 = vpop.f32.mrf.mxu0  ;;  %v12544_v48 = vsel %vm20475_vm1, %v12510_v60, 0.0 }
0x1d0e   :  { %v11721_v27 = vadd.f32 %v18456_v57, %v11720_v42  ;;  %v12491_v46 = vrot.slane %v11717_v50, 7 }
0x1d0f   :  { %v11722_v16 = vpop.f32.mrf.mxu1 }
0x1d10   :  { %v11723_v43 = vadd.f32 %v18476_v62, %v11722_v16  ;;  %v12493_v47 = vrot.slane %v11721_v27, 7  ;;  %v21532_v62 = vrot.slane %v12576_v39, %v21005_v36  ;;  %v12543_v16 = vsel %vm20475_vm1, %v12509_v10, 0.0 }
0x1d11   :  { %v11724_v0 = vpop.f32.mrf.mxu1  ;;  %v12490_v27 = vsel %vm2147_vm0, %v12487_v41, %v12489_v32  ;;  %v12492_v14 = vsel %vm2147_vm0, %v12488_v37, %v12491_v46 }
0x1d12   :  { %v12495_v12 = vrot.slane %v11723_v43, 7  ;;  %v11725_v44 = vadd.f32 %v18457_v63, %v11724_v0  ;;  %v12494_v28 = vsel %vm2147_vm0, %v12489_v32, %v12493_v47 }
0x1d13   :  { %v11726_v30 = vpop.f32.mrf.mxu1 }
0x1d14   :  { %v11727_v45 = vadd.f32 %v18477_v18, %v11726_v30  ;;  %v12496_v55 = vsel %vm2147_vm0, %v12491_v46, %v12495_v12  ;;  %v12497_v42 = vrot.slane %v11725_v44, 7 }
0x1d15   :  { %v12548_v10 = vsel %vm20532_vm3, %v12496_v55, 0.0 }
0x1d16   :  { %v12499_v39 = vrot.slane %v11727_v45, 7 }
0x1d25   :  { %v21515_v2 = vpop.f32.mrf.mxu1 }
0x1d27   :  { %v12085_v15 = vpop.f32.mrf.mxu0  ;;  %v11956_v8 = vpop.f32.mrf.mxu1 }
0x1d28   :  { %v12086_v63 = vadd.f32 %v12085_v15, %v11843_v9 }
0x1d29   :  { %v12087_v13 = vpop.f32.mrf.mxu0  ;;  %v21517_v5 = vpop.f32.mrf.mxu1 }
0x1d2a   :  { %v12088_v43 = vadd.f32 %v12087_v13, %v11956_v8  ;;  %v12559_v60 = vadd.f32 %v12543_v16, %v12086_v63  ;;  %v12498_v13 = vsel %vm2147_vm0, %v12493_v47, %v12497_v42 }
0x1d2b   :  { %v12089_v7 = vpop.f32.mrf.mxu0  ;;  %v11959_v1 = vpop.f32.mrf.mxu1 }
0x1d2c   :  { %v12090_v41 = vadd.f32 %v12089_v7, %v21513_v35  ;;  %v12500_v35 = vsel %vm2147_vm0, %v12495_v12, %v12499_v39 }
0x1d2d   :  { %v12091_v56 = vpop.f32.mrf.mxu0 }
0x1d2e   :  { %v12561_v47 = vadd.f32 %v12490_v27, %v12090_v41 }
0x1d2f   :  { %v21519_v6 = vpop.f32.mrf.mxu0 }
0x1d31   :  { %v21521_v53 = vpop.f32.mrf.mxu0 }
0x1d32   :  { %v12098_v45 = vadd.f32 %v21515_v2, %v21521_v53 }
0x1d33   :  { %v21523_v11 = vpop.f32.mrf.mxu0 }
0x1d34   :  { %v12100_v42 = vadd.f32 %v21511_v29, %v21523_v11 }
0x1d35   :  { %v21525_v25 = vpop.f32.mrf.mxu0 }
0x1d45   :  { %v18536_v3 = vpop.f32.mrf.mxu1 }
0x1d47   :  { %v12218_v61 = vpop.f32.mrf.mxu1  ;;  %v18556_v34 = vpop.f32.mrf.mxu0 }
0x1d49   :  { %v21527_v24 = vpop.f32.mrf.mxu1  ;;  %v12331_v22 = vpop.f32.mrf.mxu0 }
0x1d4b   :  { %v12221_v26 = vpop.f32.mrf.mxu1  ;;  %v18557_v40 = vpop.f32.mrf.mxu0 }
0x1d4d   :  { %v12334_v44 = vpop.f32.mrf.mxu0 }
0x1d65   :  { %v12460_v49 = vpop.f32.mrf.mxu1 }
0x1d66   :  { %v12461_v59 = vadd.f32 %v12460_v49, %v12218_v61  ;;  %v12547_v49 = vsel %vm20532_vm3, %v12494_v28, 0.0  ;;  %v12096_v28 = vadd.f32 %v21509_v54, %v21519_v6 }
0x1d67   :  { %v12462_v57 = vpop.f32.mrf.mxu1 }
0x1d68   :  { %v12463_v18 = vadd.f32 %v12462_v57, %v12331_v22  ;;  %v12519_v15 = vrot.slane %v12461_v59, 1  ;;  %v12092_v22 = vadd.f32 %v12091_v56, %v11959_v1  ;;  %v12560_v57 = vadd.f32 %v12544_v48, %v12088_v43 }
0x1d69   :  { %v12464_v0 = vpop.f32.mrf.mxu1  ;;  %v12563_v12 = vadd.f32 %v12547_v49, %v12096_v28 }
0x1d6a   :  { %v12465_v30 = vadd.f32 %v12464_v0, %v12221_v26  ;;  %v12522_v37 = vrot.slane %v12463_v18, 1  ;;  %v12562_v6 = vadd.f32 %v12492_v14, %v12092_v22  ;;  %v12564_v0 = vadd.f32 %v12548_v10, %v12098_v45 }
0x1d6b   :  { %v12466_v9 = vpop.f32.mrf.mxu1  ;;  %v12565_v18 = vadd.f32 %v12498_v13, %v12100_v42 }
0x1d6c   :  { %v12520_v61 = vrot.slane %v12465_v30, 1  ;;  %v12467_v50 = vadd.f32 %v12466_v9, %v12334_v44 }
0x1d6d   :  { %v12470_v8 = vpop.f32.mrf.mxu1 }
0x1d6e   :  { %v12521_v26 = vsel %vm22206_vm15, %v12519_v15, %v12520_v61  ;;  %v12523_v32 = vrot.slane %v12467_v50, 1  ;;  %v12471_v46 = vadd.f32 %v18536_v3, %v12470_v8  ;;  %v12102_v3 = vadd.f32 %v21517_v5, %v21525_v25  ;;  %vm22216_vm15 = vmmov %vm22193_vm2 }
0x1d6f   :  { %v12567_v55 = vadd.f32 %v12559_v60, %v12521_v26  ;;  %v12472_v59 = vpop.f32.mrf.mxu1 }
0x1d70   :  { %v12524_v7 = vsel %vm22207_vm6, %v12522_v37, %v12523_v32  ;;  %v12525_v56 = vrot.slane %v12471_v46, 1  ;;  %v12473_v1 = vadd.f32 %v18556_v34, %v12472_v59  ;;  %v12566_v30 = vadd.f32 %v12500_v35, %v12102_v3  ;;  %v19845_v3 = vld [vmem:[#allocation2 + $0x1770] sm:$0xff]  }
0x1d71   :  { %v12568_v63 = vadd.f32 %v12560_v57, %v12524_v7  ;;  %v12474_v54 = vpop.f32.mrf.mxu1  ;;  %v12588_v27 = vadd.f32 %v21532_v62, %v12567_v55 }
0x1d72   :  { %v12526_v2 = vsel %vm22208_vm8, %v12520_v61, %v12525_v56  ;;  %v12527_v53 = vrot.slane %v12473_v1, 1  ;;  %v12475_v16 = vadd.f32 %v21527_v24, %v12474_v54  ;;  %v19848_v54 = vld [vmem:[#allocation2 + $0x16a0] sm:$0xff]  }
0x1d73   :  { %v12553_v34 = vsel %vm20549_vm4, %v12526_v2, 0.0  ;;  %v12476_v48 = vpop.f32.mrf.mxu1  ;;  %v12589_v24 = vadd.f32 %v21539_v58, %v12568_v63  ;;  %v19847_v63 = vld [vmem:[#allocation2 + $0x1768] sm:$0xff]   ;;  %v19851_v2 = vld [vmem:[#allocation2 + $0x1758] sm:$0xff]  }
0x1d74   :  { %v12569_v29 = vadd.f32 %v12561_v47, %v12553_v34  ;;  %v12528_v11 = vsel %vm22193_vm2, %v12523_v32, %v12527_v53  ;;  %v12529_v5 = vrot.slane %v12475_v16, 1  ;;  %v12477_v25 = vadd.f32 %v18557_v40, %v12476_v48  ;;  %v19854_v16 = vld [vmem:[#allocation2 + $0x1688] sm:$0xff]   ;;  %v19857_v34 = vld [vmem:[#allocation2 + $0x1740] sm:$0xff]   ;;  %v19858_v48 = vld [vmem:[#allocation2 + $0x16f8] sm:$0xff]  }
0x1d75   :  { %v12554_v43 = vsel %vm20549_vm4, %v12528_v11, 0.0  ;;  %v12596_v40 = vmax.f32 %v12588_v27, 0.0  ;;  %v12597_v46 = vmax.f32 %v12589_v24, 0.0  ;;  %v19859_v27 = vld [vmem:[#allocation2 + $0x17b8] sm:$0xff]   ;;  %v19861_v11 = vld [vmem:[#allocation2 + $0x17b0] sm:$0xff]  }
0x1d76   :  { %v12570_v14 = vadd.f32 %v12562_v6, %v12554_v43  ;;  %v12530_v49 = vsel %vm22209_vm14, %v12525_v56, %v12529_v5  ;;  %v12541_v10 = vsel %vm22210_vm7, %v12529_v5, 0.0  ;;  %v12531_v44 = vrot.slane %v12477_v25, 1  ;;  %v19849_v6 = vld [vmem:[#allocation2 + $0x1760] sm:$0xff]   ;;  %v19862_v5 = vld [vmem:[#allocation2 + $0x16e8] sm:$0xff]   ;;  %v19866_v43 = vld [vmem:[#allocation2 + $0x16d8] sm:$0xff]  }
0x1d77   :  { %v12557_v9 = vsel %vm20561_vm5, %v12541_v10, 0.0  ;;  %v12571_v39 = vadd.f32 %v12563_v12, %v12530_v49  ;;  %v12590_v15 = vadd.f32 %v21532_v62, %v12569_v29  ;;  %v19855_v12 = vld [vmem:[#allocation2 + $0x1748] sm:$0xff]   ;;  %v19860_v29 = vld [vmem:[#allocation2 + $0x16f0] sm:$0xff]   ;;  %v19867_v24 = vld [vmem:[#allocation2 + $0x1798] sm:$0xff]  }
0x1d78   :  { %v12573_v61 = vadd.f32 %v12565_v18, %v12557_v9  ;;  %v12532_v50 = vsel %vm22211_vm13, %v12527_v53, %v12531_v44  ;;  %v12542_v60 = vsel %vm22212_vm9, %v12531_v44, 0.0  ;;  %v12591_v41 = vadd.f32 %v21539_v58, %v12570_v14  ;;  %v19852_v53 = vld [vmem:[#allocation2 + $0x1690] sm:$0xff]   ;;  %v19863_v25 = vld [vmem:[#allocation2 + $0x17a8] sm:$0xff]   ;;  %v19864_v18 = vld [vmem:[#allocation2 + $0x16e0] sm:$0xff]  }
0x1d79   :  { %v12592_v22 = vadd.f32 %v21532_v62, %v12571_v39  ;;  %v12558_v13 = vsel %vm20561_vm5, %v12542_v60, 0.0  ;;  %v12572_v8 = vadd.f32 %v12564_v0, %v12532_v50  ;;  %v12598_v37 = vmax.f32 %v12590_v15, 0.0  ;;  %v19856_v0 = vld [vmem:[#allocation2 + $0x1680] sm:$0xff]   ;;  %v19868_v14 = vld [vmem:[#allocation2 + $0x16d0] sm:$0xff]   ;;  %v19870_v10 = vld [vmem:[#allocation2 + $0x16c8] sm:$0xff]  }
0x1d7a   :  { %v12594_v26 = vadd.f32 %v21532_v62, %v12573_v61  ;;  %v12574_v32 = vadd.f32 %v12566_v30, %v12558_v13  ;;  %v12599_v57 = vmax.f32 %v12591_v41, 0.0  ;;  %v19844_v62 = vld [vmem:[#allocation2 + $0x16b0] sm:$0xff]   ;;  %v19865_v30 = vld [vmem:[#allocation2 + $0x17a0] sm:$0xff]   ;;  %v19871_v44 = vld [vmem:[#allocation2 + $0x1788] sm:$0xff]   ;;  %vm22226_vm13 = vcmask 1041408  }
0x1d7b   :  { %v12600_v28 = vmax.f32 %v12592_v22, 0.0  ;;  %v12593_v45 = vadd.f32 %v21539_v58, %v12572_v8  ;;  %v21584_v55 = vpack.c.bf16 %v12598_v37, %v12596_v40  ;;  %v19869_v49 = vld [vmem:[#allocation2 + $0x1790] sm:$0xff]   ;;  %v19872_v9 = vld [vmem:[#allocation2 + $0x16c0] sm:$0xff]   ;;  %v19874_v15 = vld [vmem:[#allocation2 + $0x1848] sm:$0xff]  }
0x1d7c   :  { %v12602_v59 = vmax.f32 %v12594_v26, 0.0  ;;  %v12595_v35 = vadd.f32 %v21539_v58, %v12574_v32  ;;  %v21587_v7 = vpack.c.bf16 %v12599_v57, %v12597_v46  ;;  %v19846_v58 = vld [vmem:[#allocation2 + $0x16a8] sm:$0xff]   ;;  %v19873_v39 = vld [vmem:[#allocation2 + $0x1780] sm:$0xff]   ;;  %v19878_v60 = vld [vmem:[#allocation2 + $0x1838] sm:$0xff]  }
0x1d7d   :  { %v12601_v56 = vmax.f32 %v12593_v45, 0.0  ;;  %18574 = vmatprep.mubr.bf16.mxu0 %v21584_v55  ;;  %v19875_v40 = vld [vmem:[#allocation2 + $0x1808] sm:$0xff]   ;;  %v19876_v61 = vld [vmem:[#allocation2 + $0x1840] sm:$0xff]   ;;  %v19879_v41 = vld [vmem:[#allocation2 + $0x17f8] sm:$0xff]  }
0x1d7e   :  { %v21590_v1 = vpack.c.bf16 %v12602_v59, %v12600_v28  ;;  %v12603_v47 = vmax.f32 %v12595_v35, 0.0  ;;  %18594 = vmatprep.mubr.bf16.mxu1 %v21587_v7  ;;  %v19877_v50 = vld [vmem:[#allocation2 + $0x1800] sm:$0xff]   ;;  %v19880_v22 = vld [vmem:[#allocation2 + $0x1830] sm:$0xff]   ;;  %v19882_v8 = vld [vmem:[#allocation2 + $0x1828] sm:$0xff]   ;;  %v22215_v59 = vmov 0  }
0x1d7f   :  { %v19881_v13 = vld [vmem:[#allocation2 + $0x17f0] sm:$0xff]   ;;  %v19883_v37 = vld [vmem:[#allocation2 + $0x17e8] sm:$0xff]   ;;  %v19884_v26 = vld [vmem:[#allocation2 + $0x1820] sm:$0xff]  }
0x1d80   :  { %v21593_v42 = vpack.c.bf16 %v12603_v47, %v12601_v56  ;;  %18575 = vmatmul.mubr.bf16.vlgmr.msra.gmra.mxu0 %v21590_v1  ;;  %v19885_v32 = vld [vmem:[#allocation2 + $0x17e0] sm:$0xff]   ;;  %v19886_v46 = vld [vmem:[#allocation2 + $0x1818] sm:$0xff]   ;;  %v19889_v28 = vld [vmem:[#allocation2 + $0x17d0] sm:$0xff]  }
0x1d81   :  { %18599 = vmatpush3.bf16.msra.mxu0 %v21503_v19  ;;  %18614 = vmatprep.mubr.bf16.mxu0 %v21584_v55  ;;  %v19850_v19 = vld [vmem:[#allocation2 + $0x1698] sm:$0xff]   ;;  %v19890_v45 = vld [vmem:[#allocation2 + $0x1850] sm:$0xff]   ;;  %v19918_v35 = vld [vmem:[#allocation4 + $0x7f0] ss:$8 sps:$4 sm:$0xff]  }
0x1d82   :  { %18595 = vmatmul.mubr.bf16.vlgmr.msra.gmra.mxu1 %v21593_v42  ;;  %18600 = vmatprep.subr.bf16.mxu0 %v19844_v62  ;;  %v19887_v57 = vld [vmem:[#allocation2 + $0x17d8] sm:$0xff]   ;;  %v19926_v47 = vld [vmem:[#allocation4 + $0x7d4] ss:$8 sps:$4 sm:$0xff]  }
0x1d83   :  { %18619 = vmatpush3.bf16.msra.mxu1 %v21506_v33  ;;  %18634 = vmatprep.mubr.bf16.mxu1 %v21587_v7  ;;  %v19853_v33 = vld [vmem:[#allocation2 + $0x1750] sm:$0xff]  }
0x1d84   :  { %18620 = vmatprep.subr.bf16.mxu1 %v19845_v3  ;;  %v19923_v56 = vld [vmem:[#allocation4 + $0x7e4] ss:$8 sps:$4 sm:$0xff]  }
0x1d85   :  { %18601 = vmatpush3.bf16.msra.mxu0 %v19844_v62  ;;  %v19924_v62 = vld [vmem:[#allocation4 + $0x7d0] ss:$8 sps:$4 sm:$0xff]  }
0x1d86   :  { %18602 = vmatprep.subr.bf16.mxu0 %v19846_v58 }
0x1d87   :  { %18621 = vmatpush3.bf16.msra.mxu1 %v19845_v3  ;;  %v19932_v3 = vld [vmem:[#allocation4 + $0x7b4] ss:$8 sps:$4 sm:$0xff]  }
0x1d88   :  { %18622 = vmatprep.subr.bf16.mxu1 %v19847_v63 }
0x1d89   :  { %18603 = vmatpush3.bf16.msra.mxu0 %v19846_v58  ;;  %v19930_v58 = vld [vmem:[#allocation4 + $0x7b0] ss:$8 sps:$4 sm:$0xff]  }
0x1d8a   :  { %18604 = vmatprep.subr.bf16.mxu0 %v19848_v54 }
0x1d8b   :  { %18623 = vmatpush3.bf16.msra.mxu1 %v19847_v63  ;;  %v19935_v63 = vld [vmem:[#allocation4 + $0x7a4] ss:$8 sps:$4 sm:$0xff]  }
0x1d8c   :  { %18624 = vmatprep.subr.bf16.mxu1 %v19849_v6 }
0x1d8d   :  { %18605 = vmatpush3.bf16.msra.mxu0 %v19848_v54  ;;  %v19933_v54 = vld [vmem:[#allocation4 + $0x7a0] ss:$8 sps:$4 sm:$0xff]  }
0x1d8e   :  { %18606 = vmatprep.subr.bf16.mxu0 %v19850_v19 }
0x1d8f   :  { %18625 = vmatpush3.bf16.msra.mxu1 %v19849_v6  ;;  %v19938_v6 = vld [vmem:[#allocation4 + $0x794] ss:$8 sps:$4 sm:$0xff]  }
0x1d90   :  { %18626 = vmatprep.subr.bf16.mxu1 %v19851_v2 }
0x1d91   :  { %18607 = vmatpush3.bf16.msra.mxu0 %v19850_v19  ;;  %v19936_v19 = vld [vmem:[#allocation4 + $0x790] ss:$8 sps:$4 sm:$0xff]  }
0x1d92   :  { %18608 = vmatprep.subr.bf16.mxu0 %v19852_v53 }
0x1d93   :  { %18627 = vmatpush3.bf16.msra.mxu1 %v19851_v2  ;;  %v19941_v2 = vld [vmem:[#allocation4 + $0x784] ss:$8 sps:$4 sm:$0xff]  }
0x1d94   :  { %18628 = vmatprep.subr.bf16.mxu1 %v19853_v33 }
0x1d95   :  { %18609 = vmatpush3.bf16.msra.mxu0 %v19852_v53  ;;  %v19939_v53 = vld [vmem:[#allocation4 + $0x780] ss:$8 sps:$4 sm:$0xff]  }
0x1d96   :  { %18610 = vmatprep.subr.bf16.mxu0 %v19854_v16 }
0x1d97   :  { %18629 = vmatpush3.bf16.msra.mxu1 %v19853_v33 }
0x1d98   :  { %18630 = vmatprep.subr.bf16.mxu1 %v19855_v12 }
0x1d99   :  { %18611 = vmatpush3.bf16.msra.mxu0 %v19854_v16  ;;  %v19944_v16 = vld [vmem:[#allocation6 + $0xec] ss:$16 sps:$4 sm:$0xff]  }
0x1d9a   :  { %18612 = vmatprep.subr.bf16.mxu0 %v19856_v0 }
0x1d9b   :  { %18631 = vmatpush3.bf16.msra.mxu1 %v19855_v12 }
0x1d9c   :  { %18632 = vmatprep.subr.bf16.mxu1 %v19857_v34 }
0x1d9d   :  { %18613 = vmatpush3.bf16.msra.mxu0 %v19856_v0 }
0x1d9e   :  { %18638 = vmatprep.subr.bf16.mxu0 %v19858_v48 }
0x1d9f   :  { %18633 = vmatpush3.bf16.msra.mxu1 %v19857_v34 }
0x1da0   :  { %18615 = vmatmul.mubr.bf16.vlgmr.msra.gmra.mxu0 %v21590_v1  ;;  %18658 = vmatprep.subr.bf16.mxu1 %v19859_v27 }
0x1da1   :  { %18639 = vmatpush3.bf16.msra.mxu0 %v19858_v48  ;;  %18654 = vmatprep.mubr.bf16.mxu0 %v21584_v55  ;;  %v19891_v55 = vld [vmem:[#allocation2 + $0x1858] sm:$0xff]  }
0x1da2   :  { %18635 = vmatmul.mubr.bf16.vlgmr.msra.gmra.mxu1 %v21593_v42  ;;  %18640 = vmatprep.subr.bf16.mxu0 %v19860_v29 }
0x1da3   :  { %18659 = vmatpush3.bf16.msra.mxu1 %v19859_v27  ;;  %18674 = vmatprep.mubr.bf16.mxu1 %v21587_v7  ;;  %v19920_v7 = vld [vmem:[#allocation4 + $0x7f4] ss:$8 sps:$4 sm:$0xff]  }
0x1da4   :  { %18660 = vmatprep.subr.bf16.mxu1 %v19861_v11 }
0x1da5   :  { %18641 = vmatpush3.bf16.msra.mxu0 %v19860_v29 }
0x1da6   :  { %18642 = vmatprep.subr.bf16.mxu0 %v19862_v5 }
0x1da7   :  { %18661 = vmatpush3.bf16.msra.mxu1 %v19861_v11 }
0x1da8   :  { %18662 = vmatprep.subr.bf16.mxu1 %v19863_v25 }
0x1da9   :  { %18643 = vmatpush3.bf16.msra.mxu0 %v19862_v5 }
0x1daa   :  { %18644 = vmatprep.subr.bf16.mxu0 %v19864_v18 }
0x1dab   :  { %18663 = vmatpush3.bf16.msra.mxu1 %v19863_v25 }
0x1dac   :  { %18664 = vmatprep.subr.bf16.mxu1 %v19865_v30 }
0x1dad   :  { %18645 = vmatpush3.bf16.msra.mxu0 %v19864_v18 }
0x1dae   :  { %18646 = vmatprep.subr.bf16.mxu0 %v19866_v43 }
0x1daf   :  { %18665 = vmatpush3.bf16.msra.mxu1 %v19865_v30 }
0x1db0   :  { %18666 = vmatprep.subr.bf16.mxu1 %v19867_v24 }
0x1db1   :  { %18647 = vmatpush3.bf16.msra.mxu0 %v19866_v43 }
0x1db2   :  { %18648 = vmatprep.subr.bf16.mxu0 %v19868_v14 }
0x1db3   :  { %18667 = vmatpush3.bf16.msra.mxu1 %v19867_v24 }
0x1db4   :  { %18668 = vmatprep.subr.bf16.mxu1 %v19869_v49 }
0x1db5   :  { %18649 = vmatpush3.bf16.msra.mxu0 %v19868_v14 }
0x1db6   :  { %18650 = vmatprep.subr.bf16.mxu0 %v19870_v10 }
0x1db7   :  { %18669 = vmatpush3.bf16.msra.mxu1 %v19869_v49 }
0x1db8   :  { %18670 = vmatprep.subr.bf16.mxu1 %v19871_v44 }
0x1db9   :  { %18651 = vmatpush3.bf16.msra.mxu0 %v19870_v10 }
0x1dba   :  { %18652 = vmatprep.subr.bf16.mxu0 %v19872_v9 }
0x1dbb   :  { %18671 = vmatpush3.bf16.msra.mxu1 %v19871_v44 }
0x1dbc   :  { %18672 = vmatprep.subr.bf16.mxu1 %v19873_v39 }
0x1dbd   :  { %18653 = vmatpush3.bf16.msra.mxu0 %v19872_v9 }
0x1dbe   :  { %17306 = vmatprep.subr.bf16.mxu0 %v19874_v15 }
0x1dbf   :  { %18673 = vmatpush3.bf16.msra.mxu1 %v19873_v39 }
0x1dc0   :  { %18655 = vmatmul.mubr.bf16.vlgmr.msra.gmra.mxu0 %v21590_v1  ;;  %18678 = vmatprep.subr.bf16.mxu1 %v20723_v23  ;;  %v19921_v1 = vld [vmem:[#allocation4 + $0x7e0] ss:$8 sps:$4 sm:$0xff]  }
0x1dc1   :  { %17307 = vmatpush3.bf16.msra.mxu0 %v19875_v40  ;;  %v13383_v40 = vld [vmem:[#allocation9 + $0x21] ss:$8 sm:$0x3] }
0x1dc2   :  { %18675 = vmatmul.mubr.bf16.vlgmr.msra.gmra.mxu1 %v21593_v42  ;;  %17308 = vmatprep.subr.bf16.mxu0 %v19876_v61  ;;  %v19927_v42 = vld [vmem:[#allocation4 + $0x7c0] ss:$8 sps:$4 sm:$0xff]  }
0x1dc3   :  { %18679 = vmatpush3.bf16.msra.mxu1 %v20723_v23  ;;  %v19888_v23 = vld [vmem:[#allocation2 + $0x1810] sm:$0xff]   ;;  %18680 = vmatprep.mubr.msk.bf16.mxu1 %vm22204_vm11, %v19890_v45  ;;  %v13392_v45 = vrot.slane %v13383_v40, %v21008_v17  ;;  %vm22229_vm11 = vcmask 31744  }
0x1dc4   :  { %13793 = vmatprep.subr.bf16.mxu1 %v19920_v7 }
0x1dc5   :  { %17309 = vmatpush3.bf16.msra.mxu0 %v19877_v50 }
0x1dc6   :  { %17310 = vmatprep.subr.bf16.mxu0 %v19878_v60 }
0x1dc9   :  { %17311 = vmatpush3.bf16.msra.mxu0 %v19879_v41 }
0x1dca   :  { %17312 = vmatprep.subr.bf16.mxu0 %v19880_v22  ;;  %18681 = vmatmul.mubr.msk.bf16.vlgmr.msra.gmra.mxu1 %vm22214_vm12, %v19891_v55 }
0x1dcb   :  { %13825 = vmatprep.mubr.bf16.mxu1 %v22215_v59  ;;  %13794 = vmatpush1.bf16.msra.mxu1 %v19918_v35 }
0x1dcc   :  { %13795 = vmatprep.subr.bf16.mxu1 %v19923_v56 }
0x1dcd   :  { %17313 = vmatpush3.bf16.msra.mxu0 %v19881_v13 }
0x1dce   :  { %17314 = vmatprep.subr.bf16.mxu0 %v19882_v8 }
0x1dcf   :  { %13796 = vmatpush1.bf16.msra.mxu1 %v19921_v1 }
0x1dd0   :  { %13797 = vmatprep.subr.bf16.mxu1 %v19926_v47 }
0x1dd1   :  { %17315 = vmatpush3.bf16.msra.mxu0 %v19883_v37 }
0x1dd2   :  { %17316 = vmatprep.subr.bf16.mxu0 %v19884_v26 }
0x1dd3   :  { %13798 = vmatpush1.bf16.msra.mxu1 %v19924_v62 }
0x1dd5   :  { %17317 = vmatpush3.bf16.msra.mxu0 %v19885_v32  ;;  %v21625_v32 = vrot.slane %v13383_v40, %v21005_v36 }
0x1dd6   :  { %17318 = vmatprep.subr.bf16.mxu0 %v19886_v46 }
0x1dd9   :  { %17319 = vmatpush3.bf16.msra.mxu0 %v19887_v57 }
0x1dda   :  { %17320 = vmatprep.subr.bf16.mxu0 %v19888_v23 }
0x1ddd   :  { %17321 = vmatpush3.bf16.msra.mxu0 %v19889_v28 }
0x1dde   :  { %18702 = vmatprep.subr.msk.bf16.mxu0 %vm22213_vm10, %v20813_v21  ;;  %v19929_v21 = vld [vmem:[#allocation4 + $0x7c4] ss:$8 sps:$4 sm:$0xff]  }
0x1ddf   :  { %13799 = vmatprep.subr.bf16.mxu1 %v19929_v21 }
0x1de0   :  { %13800 = vmatpush1.bf16.msra.mxu1 %v19927_v42 }
0x1de1   :  { %13801 = vmatprep.subr.bf16.mxu1 %v19932_v3 }
0x1de4   :  { %13802 = vmatpush1.bf16.msra.mxu1 %v19930_v58 }
0x1de5   :  { %13803 = vmatprep.subr.bf16.mxu1 %v19935_v63 }
0x1de8   :  { %13804 = vmatpush1.bf16.msra.mxu1 %v19933_v54 }
0x1de9   :  { %13805 = vmatprep.subr.bf16.mxu1 %v19938_v6 }
0x1dec   :  { %13806 = vmatpush1.bf16.msra.mxu1 %v19936_v19 }
0x1ded   :  { %13807 = vmatprep.subr.bf16.mxu1 %v19941_v2 }
0x1df0   :  { %13808 = vmatpush1.bf16.msra.mxu1 %v19939_v53 }
0x1df1   :  { %14162 = vmatprep.subr.bf16.mxu1 %v19944_v16 }
0x1e40   :  { %v18576_v33 = vpop.f32.mrf.mxu0 }
0x1e41   :  { %v13300_v22 = vrot.slane %v18576_v33, 7 }
0x1e42   :  { %v18596_v12 = vpop.f32.mrf.mxu1  ;;  %v12706_v0 = vpop.f32.mrf.mxu0 }
0x1e43   :  { %v13294_v14 = vrot.slane %v12706_v0, 7  ;;  %v13302_v13 = vrot.slane %v18596_v12, 7 }
0x1e44   :  { %v21614_v34 = vpop.f32.mrf.mxu1  ;;  %v18577_v48 = vpop.f32.mrf.mxu0 }
0x1e45   :  { %v13295_v10 = vrot.slane %v21614_v34, 7  ;;  %v13304_v39 = vrot.slane %v18577_v48, 7  ;;  %v13316_v50 = vsel %vm2147_vm0, 0.0, %v13294_v14 }
0x1e46   :  { %v18597_v27 = vpop.f32.mrf.mxu1  ;;  %v12709_v29 = vpop.f32.mrf.mxu0  ;;  %v13350_v57 = vsel %vm20475_vm1, %v13316_v50, 0.0 }
0x1e47   :  { %v13296_v61 = vrot.slane %v12709_v29, 7  ;;  %v13317_v8 = vsel %vm2147_vm0, 0.0, %v13295_v10  ;;  %v13306_v37 = vrot.slane %v18597_v27, 7  ;;  %v13305_v28 = vsel %vm2147_vm0, %v13300_v22, %v13304_v39 }
0x1e48   :  { %v21616_v11 = vpop.f32.mrf.mxu1  ;;  %v13351_v35 = vsel %vm20475_vm1, %v13317_v8, 0.0  ;;  %vm22217_vm1 = vmmov %vm22193_vm2 }
0x1e49   :  { %v13298_v15 = vrot.slane %v21616_v11, 7  ;;  %v13301_v55 = vsel %vm2147_vm0, %v13296_v61, %v13300_v22  ;;  %v13297_v7 = vsel %vm2147_vm0, %v13294_v14, %v13296_v61  ;;  %v13307_v17 = vsel %vm2147_vm0, %v13302_v13, %v13306_v37  ;;  %vm22218_vm6 = vmmov %vm22217_vm1 }
0x1e4a   :  { %vm22219_vm8 = vmmov %vm22217_vm1  ;;  %v13354_v0 = vsel %vm20532_vm3, %v13301_v55, 0.0 }
0x1e4b   :  { %v13303_v23 = vsel %vm2147_vm0, %v13298_v15, %v13302_v13  ;;  %vm22220_vm2 = vmmov %vm22217_vm1 }
0x1e4c   :  { %v13355_v58 = vsel %vm20532_vm3, %v13303_v23, 0.0  ;;  %vm22221_vm14 = vmmov %vm22217_vm1 }
0x1e4d   :  { %vm22222_vm7 = vmmov %vm22217_vm1 }
0x1e4e   :  { %vm22223_vm3 = vmmov %vm22217_vm1 }
0x1e60   :  { %v18616_v5 = vpop.f32.mrf.mxu0 }
0x1e62   :  { %v18636_v25 = vpop.f32.mrf.mxu1  ;;  %v12932_v18 = vpop.f32.mrf.mxu0 }
0x1e63   :  { %v13366_v3 = vadd.f32 %v13350_v57, %v12932_v18  ;;  %v13371_v53 = vadd.f32 %v18636_v25, %v13355_v58  ;;  %v19900_v58 = vld [vmem:[#allocation6 + $0xa0] ss:$16 sps:$4 sm:$0xff]  }
0x1e64   :  { %v13045_v30 = vpop.f32.mrf.mxu1  ;;  %v21618_v43 = vpop.f32.mrf.mxu0 }
0x1e65   :  { %v13367_v25 = vadd.f32 %v13351_v35, %v13045_v30  ;;  %v13372_v22 = vadd.f32 %v21618_v43, %v13305_v28 }
0x1e66   :  { %v18637_v24 = vpop.f32.mrf.mxu1  ;;  %v12935_v49 = vpop.f32.mrf.mxu0 }
0x1e67   :  { %v13368_v63 = vadd.f32 %v13297_v7, %v12935_v49  ;;  %v13373_v33 = vadd.f32 %v18637_v24, %v13307_v17  ;;  %v13370_v49 = vadd.f32 %v18616_v5, %v13354_v0  ;;  %v13299_v24 = vsel %vm2147_vm0, %v13295_v10, %v13298_v15  ;;  %v19903_v17 = vld [vmem:[#allocation6 + $0x80] ss:$16 sps:$4 sm:$0xff]  }
0x1e68   :  { %v13048_v44 = vpop.f32.mrf.mxu1 }
0x1e69   :  { %v13369_v39 = vadd.f32 %v13299_v24, %v13048_v44  ;;  %v19951_v24 = vld [vmem:[#allocation6 + $0x88] ss:$16 sps:$4 sm:$0xff]  }
0x1e80   :  { %v18656_v9 = vpop.f32.mrf.mxu0 }
0x1e81   :  { %v13332_v56 = vrot.slane %v18656_v9, 1 }
0x1e82   :  { %v13158_v60 = vpop.f32.mrf.mxu0  ;;  %v18676_v41 = vpop.f32.mrf.mxu1 }
0x1e83   :  { %v13326_v47 = vrot.slane %v13158_v60, 1  ;;  %v13334_v62 = vrot.slane %v18676_v41, 1 }
0x1e84   :  { %v18657_v26 = vpop.f32.mrf.mxu0  ;;  %v13271_v46 = vpop.f32.mrf.mxu1 }
0x1e85   :  { %v13336_v54 = vrot.slane %v18657_v26, 1  ;;  %v13329_v29 = vrot.slane %v13271_v46, 1 }
0x1e86   :  { %v13161_v36 = vpop.f32.mrf.mxu0  ;;  %v18677_v1 = vpop.f32.mrf.mxu1 }
0x1e87   :  { %v13327_v21 = vrot.slane %v13161_v36, 1  ;;  %v13338_v42 = vrot.slane %v18677_v1, 1  ;;  %v13348_v9 = vsel %vm22220_vm2, %v13336_v54, 0.0  ;;  %v13337_v40 = vsel %vm22221_vm14, %v13332_v56, %v13336_v54  ;;  %v19895_v1 = vld [vmem:[#allocation6 + $0xe4] ss:$16 sps:$4 sm:$0xff]  }
0x1e88   :  { %v13274_v2 = vpop.f32.mrf.mxu1  ;;  %v13364_v30 = vsel %vm20561_vm5, %v13348_v9, 0.0  ;;  %v13378_v8 = vadd.f32 %v13370_v49, %v13337_v40  ;;  %v19908_v54 = vld [vmem:[#allocation6 + $0x64] ss:$16 sps:$4 sm:$0xff]   ;;  %v19948_v49 = vld [vmem:[#allocation6 + $0xa8] ss:$16 sps:$4 sm:$0xff]  }
0x1e89   :  { %v13328_v38 = vsel %vm22216_vm15, %v13326_v47, %v13327_v21  ;;  %v13333_v6 = vsel %vm22217_vm1, %v13327_v21, %v13332_v56  ;;  %v13339_v19 = vsel %vm22218_vm6, %v13334_v62, %v13338_v42  ;;  %v13349_v12 = vsel %vm22219_vm8, %v13338_v42, 0.0  ;;  %v19896_v21 = vld [vmem:[#allocation2 + $0x1868] sm:$0xff]   ;;  %v19893_v42 = vld [vmem:[#allocation6 + $0xe0] ss:$16 sps:$4 sm:$0xff]   ;;  %vm22232_vm15 = vmmov %vm22229_vm11 }
0x1e8a   :  { %v13360_v16 = vsel %vm20549_vm4, %v13333_v6, 0.0  ;;  %v13374_v34 = vadd.f32 %v13366_v3, %v13328_v38  ;;  %v13365_v27 = vsel %vm20561_vm5, %v13349_v12, 0.0  ;;  %v13379_v11 = vadd.f32 %v13371_v53, %v13339_v19  ;;  %v19899_v3 = vld [vmem:[#allocation6 + $0xc4] ss:$16 sps:$4 sm:$0xff]   ;;  %v19906_v38 = vld [vmem:[#allocation6 + $0x60] ss:$16 sps:$4 sm:$0xff]   ;;  %v18682_v12 = vpop.f32.mrf.mxu1 }
0x1e8b   :  { %v13376_v48 = vadd.f32 %v13368_v63, %v13360_v16  ;;  %v13381_v18 = vadd.f32 %v13373_v33, %v13365_v27  ;;  %v13330_v14 = vrot.slane %v13274_v2, 1  ;;  %v13380_v26 = vadd.f32 %v13372_v22, %v13364_v30  ;;  %v19905_v63 = vld [vmem:[#allocation6 + $0x84] ss:$16 sps:$4 sm:$0xff]   ;;  %v19909_v19 = vld [vmem:[#allocation6 + $0x40] ss:$16 sps:$4 sm:$0xff]  }
0x1e8c   :  { %v13395_v50 = vadd.f32 %v21625_v32, %v13374_v34  ;;  %v13400_v15 = vadd.f32 %v13392_v45, %v13379_v11  ;;  %v13399_v56 = vadd.f32 %v21625_v32, %v13378_v8  ;;  %v19911_v6 = vld [vmem:[#allocation6 + $0x44] ss:$16 sps:$4 sm:$0xff]   ;;  %v19912_v53 = vld [vmem:[#allocation6 + $0x20] ss:$16 sps:$4 sm:$0xff]   ;;  %v13680_v0 = vpop.f32.mrf.mxu1  ;;  %v19942_v27 = vld [vmem:[#allocation6 + $0xe8] ss:$16 sps:$4 sm:$0xff]  }
0x1e8d   :  { %v13331_v31 = vsel %vm22222_vm7, %v13329_v29, %v13330_v14  ;;  %v13335_v61 = vsel %vm22223_vm3, %v13330_v14, %v13334_v62  ;;  %v13397_v60 = vadd.f32 %v21625_v32, %v13376_v48  ;;  %v13402_v44 = vadd.f32 %v13392_v45, %v13381_v18  ;;  %v19914_v2 = vld [vmem:[#allocation6 + $0x24] ss:$16 sps:$4 sm:$0xff]   ;;  %v19915_v16 = vld [vmem:[#allocation6] ss:$16 sps:$4 sm:$0xff]   ;;  %v19947_v11 = vld [vmem:[#allocation6 + $0xcc] ss:$16 sps:$4 sm:$0xff]  }
0x1e8e   :  { %v13361_v41 = vsel %vm20549_vm4, %v13335_v61, 0.0  ;;  %v13375_v5 = vadd.f32 %v13367_v25, %v13331_v31  ;;  %v13403_v46 = vmax.f32 %v13395_v50, 0.0  ;;  %v13408_v35 = vmax.f32 %v13400_v15, 0.0  ;;  %v19917_v33 = vld [vmem:[#allocation6 + $0x4] ss:$16 sps:$4 sm:$0xff]   ;;  %v18683_v34 = vpop.f32.mrf.mxu1 }
0x1e8f   :  { %v13377_v10 = vadd.f32 %v13369_v39, %v13361_v41  ;;  %v13405_v57 = vmax.f32 %v13397_v60, 0.0  ;;  %v13410_v52 = vmax.f32 %v13402_v44, 0.0  ;;  %v13401_v4 = vadd.f32 %v21625_v32, %v13380_v26  ;;  %v19897_v32 = vld [vmem:[#allocation6 + $0xc0] ss:$16 sps:$4 sm:$0xff]   ;;  %v19945_v18 = vld [vmem:[#allocation6 + $0xc8] ss:$16 sps:$4 sm:$0xff]  }
0x1e90   :  { %v13396_v13 = vadd.f32 %v13392_v45, %v13375_v5  ;;  %v13407_v43 = vmax.f32 %v13399_v56, 0.0  ;;  %vm22224_vm4 = vcmask 64512   ;;  %v13683_v48 = vpop.f32.mrf.mxu1  ;;  %v13712_v14 = vpack.c.bf16 %v18683_v34, %v18682_v12  ;;  %v19950_v25 = vld [vmem:[#allocation6 + $0xac] ss:$16 sps:$4 sm:$0xff]   ;;  %v19954_v39 = vld [vmem:[#allocation6 + $0x68] ss:$16 sps:$4 sm:$0xff]  }
0x1e91   :  { %v13398_v37 = vadd.f32 %v13392_v45, %v13377_v10  ;;  %v13411_v36 = vpack.c.bf16 %v13405_v57, %v13403_v46  ;;  %v13414_v47 = vpack.c.bf16 %v13410_v52, %v13408_v35  ;;  %v13409_v28 = vmax.f32 %v13401_v4, 0.0  ;;  %v19892_v45 = vld [vmem:[#allocation2 + $0x1860] sm:$0xff]   ;;  %vm22225_vm5 = vmmov %vm22224_vm4  ;;  %v19956_v9 = vld [vmem:[#allocation6 + $0x6c] ss:$16 sps:$4 sm:$0xff]  }
0x1e92   :  { %v13404_v23 = vmax.f32 %v13396_v13, 0.0  ;;  %v13711_v29 = vpack.c.bf16 %v13683_v48, %v13680_v0  ;;  %v19959_v40 = vld [vmem:[#allocation6 + $0x4c] ss:$16 sps:$4 sm:$0xff]   ;;  %v19957_v31 = vld [vmem:[#allocation6 + $0x48] ss:$16 sps:$4 sm:$0xff]   ;;  %v14340_v5 = vld [vmem:[#allocation7 + $0x1c0] sm:$0xff]  ;;  %v22228_v12 = vlaneseq }
0x1e93   :  { %v13406_v55 = vmax.f32 %v13398_v37, 0.0  ;;  %v13413_v62 = vpack.c.bf16 %v13409_v28, %v13407_v43  ;;  %v19962_v61 = vld [vmem:[#allocation6 + $0x2c] ss:$16 sps:$4 sm:$0xff]   ;;  %v19960_v50 = vld [vmem:[#allocation6 + $0x28] ss:$16 sps:$4 sm:$0xff]   ;;  %v14344_v30 = vld [vmem:[#allocation7 + $0x1e0] sm:$0xff] }
0x1e94   :  { %13826 = vmatmul.mubr.bf16.vlgmr.msra.gmra.mxu1 %v13711_v29  ;;  %v19965_v60 = vld [vmem:[#allocation6 + $0xc] ss:$16 sps:$4 sm:$0xff]   ;;  %v19963_v41 = vld [vmem:[#allocation6 + $0x8] ss:$16 sps:$4 sm:$0xff]   ;;  %v16266_v10 = vcombine.low %v14340_v5, %v14344_v30  ;;  %v16267_v15 = vcombine.high %v14340_v5, %v14344_v30  ;;  %v13447_v22 = vld [vmem:[#allocation9 + $0x22] ss:$0 sm:$0xff] }
0x1e95   :  { %v13412_v7 = vpack.c.bf16 %v13406_v55, %v13404_v23  ;;  %14163 = vmatpush1.bf16.msra.mxu1 %v19942_v27  ;;  %13835 = vmatprep.mubr.bf16.mxu1 %v22215_v59  ;;  %v13594_v0 = vand.u32 127, %v22228_v12  ;;  %v19966_v48 = vld [vmem:[#allocation2 + $0x1870] sm:$0xff]   ;;  %vm22235_vm1 = vcmask 15360  }
0x1e96   :  { %14164 = vmatprep.subr.bf16.mxu1 %v19947_v11  ;;  %v14292_v12 = vld [vmem:[#allocation7 + $0x40] sm:$0xff]  ;;  %vm22236_vm6 = vmmov %vm22235_vm1 }
0x1e97   :  { %13576 = vmatprep.mubr.bf16.mxu0 %v13412_v7  ;;  %vm13595_vm9 = vcmp.ge.s32.totalorder %v13594_v0, 16  ;;  %vm13596_vm10 = vcmp.lt.s32.totalorder %v13594_v0, 32  ;;  %v14296_v0 = vld [vmem:[#allocation7 + $0x60] sm:$0xff] }
0x1e98   :  { %13577 = vmatmul.mubr.bf16.vlgmr.msra.gmra.mxu0 %v13411_v36  ;;  %vm21689_vm12 = vmand %vm13595_vm9, %vm13596_vm10 }
0x1e99   :  { %18685 = vmatpush3.bf16.msra.mxu0 %v20817_v51  ;;  %13584 = vmatprep.mubr.bf16.mxu0 %v13414_v47  ;;  %v19902_v51 = vld [vmem:[#allocation6 + $0xa4] ss:$16 sps:$4 sm:$0xff]  }
0x1e9a   :  { %14109 = vmatprep.subr.bf16.mxu0 %v19895_v1  ;;  %14165 = vmatpush1.bf16.msra.mxu1 %v19945_v18 }
0x1e9b   :  { %14166 = vmatprep.subr.bf16.mxu1 %v19950_v25  ;;  %v14337_v25 = vld [vmem:[#allocation7 + $0x1a8] sm:$0xff] }
0x1e9c   :  { %13836 = vmatmul.mubr.bf16.gmra.mxu1 %v13712_v14  ;;  %v14284_v14 = vld [vmem:[#allocation7] sm:$0xff] }
0x1e9d   :  { %14194 = vmatprep.mubr.bf16.mxu1 %v22215_v59 }
0x1e9e   :  { %14167 = vmatpush1.bf16.msra.mxu1 %v19948_v49  ;;  %v14333_v49 = vld [vmem:[#allocation7 + $0x188] sm:$0xff] }
0x1ea0   :  { %13585 = vmatmul.mubr.bf16.gmra.mxu0 %v13413_v62 }
0x1ea1   :  { %18686 = vmatprep.mubr.msk.bf16.mxu0 %vm22224_vm4, %v19892_v45 }
0x1ea8   :  { %18687 = vmatmul.mubr.msk.bf16.vlgmr.msra.gmra.mxu0 %vm22225_vm5, %v19896_v21 }
0x1ea9   :  { %14110 = vmatpush1.bf16.msra.mxu0 %v19893_v42  ;;  %14141 = vmatprep.mubr.bf16.mxu0 %v22215_v59 }
0x1eaa   :  { %14111 = vmatprep.subr.bf16.mxu0 %v19899_v3  ;;  %v14341_v3 = vld [vmem:[#allocation7 + $0x1c8] sm:$0xff] }
0x1ead   :  { %14112 = vmatpush1.bf16.msra.mxu0 %v19897_v32  ;;  %v14345_v32 = vld [vmem:[#allocation7 + $0x1e8] sm:$0xff] }
0x1eae   :  { %14113 = vmatprep.subr.bf16.mxu0 %v19902_v51 }
0x1eb1   :  { %14114 = vmatpush1.bf16.msra.mxu0 %v19900_v58 }
0x1eb2   :  { %14115 = vmatprep.subr.bf16.mxu0 %v19905_v63  ;;  %v14332_v63 = vld [vmem:[#allocation7 + $0x180] sm:$0xff] }
0x1eb5   :  { %14116 = vmatpush1.bf16.msra.mxu0 %v19903_v17  ;;  %v14336_v17 = vld [vmem:[#allocation7 + $0x1a0] sm:$0xff] }
0x1eb6   :  { %14117 = vmatprep.subr.bf16.mxu0 %v19908_v54 }
0x1eb9   :  { %14118 = vmatpush1.bf16.msra.mxu0 %v19906_v38 }
0x1eba   :  { %14119 = vmatprep.subr.bf16.mxu0 %v19911_v6  ;;  %v16269_v6 = vcombine.high %v14341_v3, %v14345_v32 }
0x1ebd   :  { %14120 = vmatpush1.bf16.msra.mxu0 %v19909_v19  ;;  %v16259_v19 = vcombine.high %v14332_v63, %v14336_v17 }
0x1ebe   :  { %14121 = vmatprep.subr.bf16.mxu0 %v19914_v2 }
0x1ec1   :  { %14122 = vmatpush1.bf16.msra.mxu0 %v19912_v53  ;;  %v22227_v53 = vld [vmem:[#allocation13_spill] sm:$0xff] }
0x1ec2   :  { %14123 = vmatprep.subr.bf16.mxu0 %v19917_v33 }
0x1ec5   :  { %14124 = vmatpush1.bf16.msra.mxu0 %v19915_v16  ;;  %v16258_v16 = vcombine.low %v14332_v63, %v14336_v17 }
0x1ec6   :  { %18703 = vmatprep.subr.msk.bf16.mxu0 %vm22226_vm13, %v20907_v20  ;;  %v19953_v20 = vld [vmem:[#allocation6 + $0x8c] ss:$16 sps:$4 sm:$0xff]  }
0x1ec7   :  { %14168 = vmatprep.subr.bf16.mxu1 %v19953_v20  ;;  %v19967_v20 = vld [vmem:[#allocation2 + $0x1878] sm:$0xff]  }
0x1ec8   :  { %14169 = vmatpush1.bf16.msra.mxu1 %v19951_v24 }
0x1ec9   :  { %14170 = vmatprep.subr.bf16.mxu1 %v19956_v9  ;;  %v16268_v9 = vcombine.low %v14341_v3, %v14345_v32  ;;  %v14309_v3 = vld [vmem:[#allocation7 + $0xc8] sm:$0xff] }
0x1ecc   :  { %14171 = vmatpush1.bf16.msra.mxu1 %v19954_v39 }
0x1ecd   :  { %14172 = vmatprep.subr.bf16.mxu1 %v19959_v40  ;;  %v16261_v40 = vcombine.high %v14333_v49, %v14337_v25 }
0x1ed0   :  { %14173 = vmatpush1.bf16.msra.mxu1 %v19957_v31 }
0x1ed1   :  { %14174 = vmatprep.subr.bf16.mxu1 %v19962_v61  ;;  %v16260_v61 = vcombine.low %v14333_v49, %v14337_v25  ;;  %v14288_v49 = vld [vmem:[#allocation7 + $0x20] sm:$0xff]  ;;  %v14285_v25 = vld [vmem:[#allocation7 + $0x8] sm:$0xff] }
0x1ed4   :  { %14175 = vmatpush1.bf16.msra.mxu1 %v19960_v50 }
0x1ed5   :  { %14176 = vmatprep.subr.bf16.mxu1 %v19965_v60 }
0x1ed8   :  { %14177 = vmatpush1.bf16.msra.mxu1 %v19963_v41 }
0x1ed9   :  { %14670 = vmatprep.subr.bf16.mxu1 %v16267_v15 }
0x1f58   :  { %v17322_v44 = vpop.f32.mrf.mxu0 }
0x1f5a   :  { %v17323_v13 = vpop.f32.mrf.mxu0 }
0x1f5b   :  { %v17324_v8 = vadd.f32 %v17323_v13, %v17322_v44 }
0x1f5c   :  { %v17325_v37 = vpop.f32.mrf.mxu0 }
0x1f5d   :  { %v21671_v26 = vadd.f32 %v17324_v8, %v13447_v22 }
0x1f5e   :  { %v17326_v46 = vpop.f32.mrf.mxu0 }
0x1f5f   :  { %v16146_v57 = vmul.f32 -1.442695, %v21671_v26  ;;  %v17327_v23 = vadd.f32 %v17326_v46, %v17325_v37  ;;  %v14324_v46 = vld [vmem:[#allocation7 + $0x140] sm:$0xff] }
0x1f60   :  { %v17328_v55 = vpop.f32.mrf.mxu0 }
0x1f61   :  { %19970 = vpow2.f32 %v16146_v57  ;;  %v21674_v35 = vadd.f32 %v17327_v23, %v13447_v22  ;;  %v14328_v57 = vld [vmem:[#allocation7 + $0x160] sm:$0xff]  ;;  %v14325_v23 = vld [vmem:[#allocation7 + $0x148] sm:$0xff] }
0x1f62   :  { %v17329_v52 = vpop.f32.mrf.mxu0 }
0x1f63   :  { %v16147_v7 = vmul.f32 -1.442695, %v21674_v35  ;;  %v17330_v56 = vadd.f32 %v17329_v52, %v17328_v55  ;;  %v16251_v55 = vcombine.high %v14324_v46, %v14328_v57  ;;  %v16250_v52 = vcombine.low %v14324_v46, %v14328_v57 }
0x1f64   :  { %v17331_v4 = vpop.f32.mrf.mxu0 }
0x1f65   :  { %19972 = vpow2.f32 %v16147_v7  ;;  %v21677_v36 = vadd.f32 %v17330_v56, %v13447_v22 }
0x1f66   :  { %v17332_v1 = vpop.f32.mrf.mxu0 }
0x1f67   :  { %v16148_v47 = vmul.f32 -1.442695, %v21677_v36  ;;  %v17333_v43 = vadd.f32 %v17332_v1, %v17331_v4  ;;  %v14316_v4 = vld [vmem:[#allocation7 + $0x100] sm:$0xff]  ;;  %v14317_v1 = vld [vmem:[#allocation7 + $0x108] sm:$0xff] }
0x1f68   :  { %v18688_v28 = vpop.f32.mrf.mxu0 }
0x1f69   :  { %19974 = vpow2.f32 %v16148_v47  ;;  %v21680_v45 = vadd.f32 %v17333_v43, %v13447_v22  ;;  %v14321_v43 = vld [vmem:[#allocation7 + $0x128] sm:$0xff] }
0x1f6a   :  { %v13900_v62 = vpop.f32.mrf.mxu0 }
0x1f6b   :  { %v16149_v21 = vmul.f32 -1.442695, %v21680_v45 }
0x1f6c   :  { %v18689_v42 = vpop.f32.mrf.mxu0 }
0x1f6d   :  { %19976 = vpow2.f32 %v16149_v21  ;;  %v13948_v29 = vpack.c.bf16 %v18689_v42, %v18688_v28  ;;  %v14308_v21 = vld [vmem:[#allocation7 + $0xc0] sm:$0xff] }
0x1f6e   :  { %v19971_v51 = vpop.eup %19970  ;;  %v13903_v58 = vpop.f32.mrf.mxu0  ;;  %v14312_v42 = vld [vmem:[#allocation7 + $0xe0] sm:$0xff] }
0x1f6f   :  { %v13610_v54 = vadd.f32 1.0, %v19971_v51  ;;  %v13947_v38 = vpack.c.bf16 %v13903_v58, %v13900_v62  ;;  %v16245_v62 = vcombine.high %v14317_v1, %v14321_v43  ;;  %v16235_v32 = vcombine.high %v14308_v21, %v14312_v42  ;;  %v14313_v51 = vld [vmem:[#allocation7 + $0xe8] sm:$0xff] }
0x1f70   :  { %v16234_v58 = vcombine.low %v14308_v21, %v14312_v42  ;;  %v16236_v63 = vcombine.low %v14309_v3, %v14313_v51  ;;  %v16237_v17 = vcombine.high %v14309_v3, %v14313_v51  ;;  %v14326_v51 = vld [vmem:[#allocation7 + $0x150] sm:$0xff] }
0x1f71   :  { %19978 = vrcp.f32 %v13610_v54  ;;  %14142 = vmatmul.mubr.bf16.vlgmr.msra.gmra.mxu0 %v13947_v38  ;;  %14195 = vmatmul.mubr.bf16.vlgmr.msra.gmra.mxu1 %v13947_v38  ;;  %v14300_v54 = vld [vmem:[#allocation7 + $0x80] sm:$0xff] }
0x1f72   :  { %v19973_v2 = vpop.eup %19972  ;;  %18691 = vmatpush3.bf16.msra.mxu0 %v22227_v53  ;;  %14151 = vmatprep.mubr.bf16.mxu0 %v22215_v59  ;;  %v14304_v38 = vld [vmem:[#allocation7 + $0xa0] sm:$0xff] }
0x1f73   :  { %v13611_v33 = vadd.f32 1.0, %v19973_v2  ;;  %14204 = vmatprep.mubr.bf16.mxu1 %v22215_v59  ;;  %14723 = vmatprep.subr.bf16.mxu0 %v16269_v6  ;;  %v14301_v6 = vld [vmem:[#allocation7 + $0x88] sm:$0xff]  ;;  %v16226_v53 = vcombine.low %v14300_v54, %v14304_v38 }
0x1f74   :  { %14671 = vmatpush1.bf16.msra.mxu1 %v16266_v10  ;;  %v13827_v10 = vpop.f32.mrf.mxu1  ;;  %v14305_v2 = vld [vmem:[#allocation7 + $0xa8] sm:$0xff] }
0x1f75   :  { %19980 = vrcp.f32 %v13611_v33  ;;  %14672 = vmatprep.subr.bf16.mxu1 %v16259_v19  ;;  %14963 = vst [vmem:[%s22108_s6 + $0x10] sm:$0xff] %v13827_v10  ;;  %v16227_v19 = vcombine.high %v14300_v54, %v14304_v38  ;;  %v16228_v33 = vcombine.low %v14301_v6, %v14305_v2 }
0x1f76   :  { %v19975_v34 = vpop.eup %19974  ;;  %v13829_v15 = vpop.f32.mrf.mxu1 }
0x1f77   :  { %v13612_v27 = vadd.f32 1.0, %v19975_v34  ;;  %14964 = vst [vmem:[%s22108_s6 + $0x18] sm:$0xff] %v13829_v15  ;;  %v14293_v34 = vld [vmem:[#allocation7 + $0x48] sm:$0xff] }
0x1f78   :  { %14673 = vmatpush1.bf16.msra.mxu1 %v16258_v16  ;;  %v13831_v44 = vpop.f32.mrf.mxu1  ;;  %v16229_v16 = vcombine.high %v14301_v6, %v14305_v2  ;;  %v14318_v2 = vld [vmem:[#allocation7 + $0x110] sm:$0xff] }
0x1f79   :  { %19982 = vrcp.f32 %v13612_v27  ;;  %14152 = vmatmul.mubr.bf16.gmra.mxu0 %v13948_v29  ;;  %14205 = vmatmul.mubr.bf16.gmra.mxu1 %v13948_v29  ;;  %14965 = vst [vmem:[%s22108_s6 + $0x110] sm:$0xff] %v13831_v44  ;;  %v14297_v27 = vld [vmem:[#allocation7 + $0x68] sm:$0xff]  ;;  %v16218_v29 = vcombine.low %v14292_v12, %v14296_v0 }
0x1f7a   :  { %v19977_v11 = vpop.eup %19976  ;;  %18692 = vmatprep.mubr.msk.bf16.mxu0 %vm22229_vm11, %v19966_v48  ;;  %14702 = vmatprep.mubr.bf16.mxu1 %v22215_v59  ;;  %v13833_v22 = vpop.f32.mrf.mxu1  ;;  %v16219_v48 = vcombine.high %v14292_v12, %v14296_v0 }
0x1f7b   :  { %v13613_v18 = vadd.f32 1.0, %v19977_v11  ;;  %14966 = vst [vmem:[%s22108_s6 + $0x118] sm:$0xff] %v13833_v22  ;;  %14674 = vmatprep.subr.bf16.mxu1 %v16251_v55  ;;  %v16220_v11 = vcombine.low %v14293_v34, %v14297_v27 }
0x1f7c   :  { %v13837_v13 = vpop.f32.mrf.mxu1  ;;  %14675 = vmatpush1.bf16.msra.mxu1 %v16250_v52 }
0x1f7d   :  { %19984 = vrcp.f32 %v13613_v18  ;;  %14967 = vst [vmem:[%s22108_s6 + $0x210] sm:$0xff] %v13837_v13  ;;  %v16221_v18 = vcombine.high %v14293_v34, %v14297_v27 }
0x1f7e   :  { %v19979_v24 = vpop.eup %19978  ;;  %v13839_v8 = vpop.f32.mrf.mxu1 }
0x1f7f   :  { %v13622_v39 = vsel %vm21689_vm12, %v19979_v24, %v21671_v26  ;;  %14968 = vst [vmem:[%s22108_s6 + $0x218] sm:$0xff] %v13839_v8  ;;  %v14289_v24 = vld [vmem:[#allocation7 + $0x28] sm:$0xff] }
0x1f80   :  { %14951 = vst [vmem:[%s22108_s6] sm:$0xff] %v13622_v39  ;;  %v13841_v37 = vpop.f32.mrf.mxu1  ;;  %v16212_v39 = vcombine.low %v14285_v25, %v14289_v24 }
0x1f81   :  { %18693 = vmatmul.mubr.msk.bf16.vlgmr.msra.gmra.mxu0 %vm22232_vm15, %v19967_v20  ;;  %14969 = vst [vmem:[%s22108_s6 + $0x310] sm:$0xff] %v13841_v37  ;;  %v16211_v20 = vcombine.high %v14284_v14, %v14288_v49 }
0x1f82   :  { %v19981_v31 = vpop.eup %19980  ;;  %14724 = vmatpush1.bf16.msra.mxu0 %v16268_v9  ;;  %14755 = vmatprep.mubr.bf16.mxu0 %v22215_v59  ;;  %v13843_v26 = vpop.f32.mrf.mxu1  ;;  %v16210_v9 = vcombine.low %v14284_v14, %v14288_v49  ;;  %v14315_v14 = vld [vmem:[#allocation7 + $0xf8] sm:$0xff] }
0x1f83   :  { %v13623_v50 = vsel %vm21689_vm12, %v19981_v31, %v21674_v35  ;;  %14725 = vmatprep.subr.bf16.mxu0 %v16261_v40  ;;  %14970 = vst [vmem:[%s22108_s6 + $0x318] sm:$0xff] %v13843_v26  ;;  %v14329_v35 = vld [vmem:[#allocation7 + $0x168] sm:$0xff]  ;;  %v16213_v40 = vcombine.high %v14285_v25, %v14289_v24  ;;  %v14342_v31 = vld [vmem:[#allocation7 + $0x1d0] sm:$0xff] }
0x1f84   :  { %14952 = vst [vmem:[%s22108_s6 + $0x100] sm:$0xff] %v13623_v50  ;;  %v16252_v7 = vcombine.low %v14325_v23, %v14329_v35  ;;  %v16253_v56 = vcombine.high %v14325_v23, %v14329_v35  ;;  %v14343_v50 = vld [vmem:[#allocation7 + $0x1d8] sm:$0xff] }
0x1f86   :  { %v19983_v60 = vpop.eup %19982  ;;  %14726 = vmatpush1.bf16.msra.mxu0 %v16260_v61  ;;  %v14346_v61 = vld [vmem:[#allocation7 + $0x1f0] sm:$0xff] }
0x1f87   :  { %v13624_v41 = vsel %vm21689_vm12, %v19983_v60, %v21677_v36  ;;  %14727 = vmatprep.subr.bf16.mxu0 %v16253_v56  ;;  %v14320_v36 = vld [vmem:[#allocation7 + $0x120] sm:$0xff]  ;;  %v16270_v60 = vcombine.low %v14342_v31, %v14346_v61 }
0x1f88   :  { %14953 = vst [vmem:[%s22108_s6 + $0x200] sm:$0xff] %v13624_v41  ;;  %v16243_v47 = vcombine.high %v14316_v4, %v14320_v36  ;;  %v16242_v28 = vcombine.low %v14316_v4, %v14320_v36  ;;  %v16271_v41 = vcombine.high %v14342_v31, %v14346_v61  ;;  %v14307_v31 = vld [vmem:[#allocation7 + $0xb8] sm:$0xff] }
0x1f8a   :  { %v19985_v5 = vpop.eup %19984  ;;  %14728 = vmatpush1.bf16.msra.mxu0 %v16252_v7  ;;  %14676 = vmatprep.subr.bf16.mxu1 %v16243_v47  ;;  %v14334_v47 = vld [vmem:[#allocation7 + $0x190] sm:$0xff] }
0x1f8b   :  { %v13625_v30 = vsel %vm21689_vm12, %v19985_v5, %v21680_v45  ;;  %v16244_v45 = vcombine.low %v14317_v1, %v14321_v43  ;;  %14729 = vmatprep.subr.bf16.mxu0 %v16245_v62  ;;  %14677 = vmatpush1.bf16.msra.mxu1 %v16242_v28  ;;  %v14347_v5 = vld [vmem:[#allocation7 + $0x1f8] sm:$0xff]  ;;  %v14338_v28 = vld [vmem:[#allocation7 + $0x1b0] sm:$0xff] }
0x1f8c   :  { %14954 = vst [vmem:[%s22108_s6 + $0x300] sm:$0xff] %v13625_v30  ;;  %14678 = vmatprep.subr.bf16.mxu1 %v16235_v32  ;;  %v16272_v30 = vcombine.low %v14343_v50, %v14347_v5  ;;  %v16273_v10 = vcombine.high %v14343_v50, %v14347_v5  ;;  %v14339_v62 = vld [vmem:[#allocation7 + $0x1b8] sm:$0xff]  ;;  %v16263_v3 = vcombine.high %v14334_v47, %v14338_v28  ;;  %v14294_v5 = vld [vmem:[#allocation7 + $0x50] sm:$0xff] }
0x1f8d   :  { %v16262_v54 = vcombine.low %v14334_v47, %v14338_v28  ;;  %v19969_v47 = vld [vmem:[#allocation2 + $0x1888] sm:$0xff]  }
0x1f8e   :  { %14730 = vmatpush1.bf16.msra.mxu0 %v16244_v45  ;;  %v14335_v45 = vld [vmem:[#allocation7 + $0x198] sm:$0xff] }
0x1f8f   :  { %14731 = vmatprep.subr.bf16.mxu0 %v16237_v17  ;;  %14679 = vmatpush1.bf16.msra.mxu1 %v16234_v58  ;;  %v16265_v32 = vcombine.high %v14335_v45, %v14339_v62  ;;  %v14330_v58 = vld [vmem:[#allocation7 + $0x170] sm:$0xff]  ;;  %v14331_v17 = vld [vmem:[#allocation7 + $0x178] sm:$0xff]  ;;  %v16264_v38 = vcombine.low %v14335_v45, %v14339_v62 }
0x1f90   :  { %14680 = vmatprep.subr.bf16.mxu1 %v16227_v19  ;;  %v16255_v6 = vcombine.high %v14326_v51, %v14330_v58  ;;  %v16254_v12 = vcombine.low %v14326_v51, %v14330_v58 }
0x1f92   :  { %14732 = vmatpush1.bf16.msra.mxu0 %v16236_v63  ;;  %v14327_v63 = vld [vmem:[#allocation7 + $0x158] sm:$0xff] }
0x1f93   :  { %14733 = vmatprep.subr.bf16.mxu0 %v16229_v16  ;;  %14681 = vmatpush1.bf16.msra.mxu1 %v16226_v53  ;;  %v16257_v19 = vcombine.high %v14327_v63, %v14331_v17  ;;  %v14322_v53 = vld [vmem:[#allocation7 + $0x130] sm:$0xff]  ;;  %v14323_v16 = vld [vmem:[#allocation7 + $0x138] sm:$0xff]  ;;  %v16256_v0 = vcombine.low %v14327_v63, %v14331_v17 }
0x1f94   :  { %14682 = vmatprep.subr.bf16.mxu1 %v16219_v48  ;;  %v16247_v48 = vcombine.high %v14318_v2, %v14322_v53  ;;  %v16246_v49 = vcombine.low %v14318_v2, %v14322_v53 }
0x1f96   :  { %14734 = vmatpush1.bf16.msra.mxu0 %v16228_v33  ;;  %v14319_v33 = vld [vmem:[#allocation7 + $0x118] sm:$0xff] }
0x1f97   :  { %14735 = vmatprep.subr.bf16.mxu0 %v16221_v18  ;;  %14683 = vmatpush1.bf16.msra.mxu1 %v16218_v29  ;;  %v16249_v27 = vcombine.high %v14319_v33, %v14323_v16  ;;  %v14310_v29 = vld [vmem:[#allocation7 + $0xd0] sm:$0xff]  ;;  %v14311_v18 = vld [vmem:[#allocation7 + $0xd8] sm:$0xff]  ;;  %v16248_v25 = vcombine.low %v14319_v33, %v14323_v16 }
0x1f98   :  { %14684 = vmatprep.subr.bf16.mxu1 %v16211_v20  ;;  %v16241_v24 = vcombine.high %v14311_v18, %v14315_v14  ;;  %v16240_v50 = vcombine.low %v14311_v18, %v14315_v14 }
0x1f9a   :  { %14736 = vmatpush1.bf16.msra.mxu0 %v16220_v11  ;;  %v14314_v11 = vld [vmem:[#allocation7 + $0xf0] sm:$0xff] }
0x1f9b   :  { %14737 = vmatprep.subr.bf16.mxu0 %v16213_v40  ;;  %14685 = vmatpush1.bf16.msra.mxu1 %v16210_v9  ;;  %v16239_v20 = vcombine.high %v14310_v29, %v14314_v11  ;;  %v14302_v9 = vld [vmem:[#allocation7 + $0x90] sm:$0xff]  ;;  %v14303_v40 = vld [vmem:[#allocation7 + $0x98] sm:$0xff]  ;;  %v16238_v61 = vcombine.low %v14310_v29, %v14314_v11 }
0x1f9c   :  { %14776 = vmatprep.subr.bf16.mxu1 %v16271_v41  ;;  %v16233_v41 = vcombine.high %v14303_v40, %v14307_v31 }
0x1f9e   :  { %14738 = vmatpush1.bf16.msra.mxu0 %v16212_v39  ;;  %v14306_v39 = vld [vmem:[#allocation7 + $0xb0] sm:$0xff] }
0x1f9f   :  { %14829 = vmatprep.subr.bf16.mxu0 %v16273_v10  ;;  %v14295_v10 = vld [vmem:[#allocation7 + $0x58] sm:$0xff] }
0x2031   :  { %v14143_v15 = vpop.f32.mrf.mxu0  ;;  %v14196_v44 = vpop.f32.mrf.mxu1 }
0x2032   :  { %14971 = vst [vmem:[%s22108_s6 + $0x20] sm:$0xff] %v14143_v15  ;;  %14973 = vst [vmem:[%s22108_s6 + $0x30] sm:$0xff] %v14196_v44  ;;  %v14299_v15 = vld [vmem:[#allocation7 + $0x78] sm:$0xff]  ;;  %v16230_v44 = vcombine.low %v14302_v9, %v14306_v39 }
0x2033   :  { %v14145_v22 = vpop.f32.mrf.mxu0  ;;  %v14198_v13 = vpop.f32.mrf.mxu1 }
0x2034   :  { %14972 = vst [vmem:[%s22108_s6 + $0x28] sm:$0xff] %v14145_v22  ;;  %14974 = vst [vmem:[%s22108_s6 + $0x38] sm:$0xff] %v14198_v13  ;;  %v16232_v22 = vcombine.low %v14303_v40, %v14307_v31 }
0x2035   :  { %v14147_v8 = vpop.f32.mrf.mxu0  ;;  %v14200_v37 = vpop.f32.mrf.mxu1 }
0x2036   :  { %14975 = vst [vmem:[%s22108_s6 + $0x120] sm:$0xff] %v14147_v8  ;;  %14977 = vst [vmem:[%s22108_s6 + $0x130] sm:$0xff] %v14200_v37  ;;  %v16225_v8 = vcombine.high %v14295_v10, %v14299_v15  ;;  %v14286_v37 = vld [vmem:[#allocation7 + $0x10] sm:$0xff] }
0x2037   :  { %v14149_v26 = vpop.f32.mrf.mxu0  ;;  %v14202_v46 = vpop.f32.mrf.mxu1 }
0x2038   :  { %14976 = vst [vmem:[%s22108_s6 + $0x128] sm:$0xff] %v14149_v26  ;;  %14978 = vst [vmem:[%s22108_s6 + $0x138] sm:$0xff] %v14202_v46  ;;  %v14290_v26 = vld [vmem:[#allocation7 + $0x30] sm:$0xff]  ;;  %v14287_v46 = vld [vmem:[#allocation7 + $0x18] sm:$0xff] }
0x2039   :  { %v14153_v57 = vpop.f32.mrf.mxu0  ;;  %v14206_v23 = vpop.f32.mrf.mxu1 }
0x203a   :  { %14979 = vst [vmem:[%s22108_s6 + $0x220] sm:$0xff] %v14153_v57  ;;  %14981 = vst [vmem:[%s22108_s6 + $0x230] sm:$0xff] %v14206_v23  ;;  %v14291_v57 = vld [vmem:[#allocation7 + $0x38] sm:$0xff] }
0x203b   :  { %v14155_v55 = vpop.f32.mrf.mxu0  ;;  %v14208_v35 = vpop.f32.mrf.mxu1 }
0x203c   :  { %14980 = vst [vmem:[%s22108_s6 + $0x228] sm:$0xff] %v14155_v55  ;;  %14982 = vst [vmem:[%s22108_s6 + $0x238] sm:$0xff] %v14208_v35  ;;  %v16224_v55 = vcombine.low %v14295_v10, %v14299_v15  ;;  %v16215_v35 = vcombine.high %v14286_v37, %v14290_v26 }
0x203d   :  { %v14157_v52 = vpop.f32.mrf.mxu0  ;;  %v14210_v7 = vpop.f32.mrf.mxu1 }
0x203e   :  { %14983 = vst [vmem:[%s22108_s6 + $0x320] sm:$0xff] %v14157_v52  ;;  %14985 = vst [vmem:[%s22108_s6 + $0x330] sm:$0xff] %v14210_v7  ;;  %v16217_v52 = vcombine.high %v14287_v46, %v14291_v57  ;;  %v16214_v7 = vcombine.low %v14286_v37, %v14290_v26 }
0x203f   :  { %v14159_v56 = vpop.f32.mrf.mxu0  ;;  %v14212_v4 = vpop.f32.mrf.mxu1 }
0x2040   :  { %14984 = vst [vmem:[%s22108_s6 + $0x328] sm:$0xff] %v14159_v56  ;;  %14986 = vst [vmem:[%s22108_s6 + $0x338] sm:$0xff] %v14212_v4  ;;  %v16216_v56 = vcombine.low %v14287_v46, %v14291_v57  ;;  %v22233_v4 = vld [vmem:[#allocation20_spill] sm:$0xff] }
0x2041   :  { %v18694_v36 = vpop.f32.mrf.mxu0 }
0x2043   :  { %v14269_v1 = vpop.f32.mrf.mxu0 }
0x2045   :  { %v18695_v43 = vpop.f32.mrf.mxu0 }
0x2046   :  { %v21797_v34 = vpack.c.bf16 %v18695_v43, %v18694_v36  ;;  %v22234_v36 = vld [vmem:[#allocation17_spill] sm:$0xff] }
0x2047   :  { %v14272_v21 = vpop.f32.mrf.mxu0 }
0x2048   :  { %v21791_v42 = vpack.c.bf16 %v14272_v21, %v14269_v1  ;;  %v19968_v1 = vld [vmem:[#allocation2 + $0x1880] sm:$0xff]  }
0x204a   :  { %14703 = vmatmul.mubr.bf16.vlgmr.msra.gmra.mxu1 %v21791_v42  ;;  %14756 = vmatmul.mubr.bf16.vlgmr.msra.gmra.mxu0 %v21791_v42 }
0x204b   :  { %14777 = vmatpush1.bf16.msra.mxu1 %v16270_v60  ;;  %14830 = vmatpush1.bf16.msra.mxu0 %v16272_v30  ;;  %v16231_v60 = vcombine.high %v14302_v9, %v14306_v39  ;;  %v14298_v30 = vld [vmem:[#allocation7 + $0x70] sm:$0xff] }
0x204c   :  { %14778 = vmatprep.subr.bf16.mxu1 %v16263_v3  ;;  %14831 = vmatprep.subr.bf16.mxu0 %v16265_v32  ;;  %v16223_v13 = vcombine.high %v14294_v5, %v14298_v30  ;;  %v16222_v23 = vcombine.low %v14294_v5, %v14298_v30 }
0x204d   :  { %14712 = vmatprep.mubr.bf16.mxu1 %v22215_v59  ;;  %14765 = vmatprep.mubr.bf16.mxu0 %v22215_v59 }
0x204f   :  { %14779 = vmatpush1.bf16.msra.mxu1 %v16262_v54  ;;  %14832 = vmatpush1.bf16.msra.mxu0 %v16264_v38 }
0x2050   :  { %14780 = vmatprep.subr.bf16.mxu1 %v16255_v6  ;;  %14833 = vmatprep.subr.bf16.mxu0 %v16257_v19 }
0x2052   :  { %14713 = vmatmul.mubr.bf16.gmra.mxu1 %v21797_v34  ;;  %14766 = vmatmul.mubr.bf16.gmra.mxu0 %v21797_v34 }
0x2053   :  { %14781 = vmatpush1.bf16.msra.mxu1 %v16254_v12  ;;  %14834 = vmatpush1.bf16.msra.mxu0 %v16256_v0 }
0x2054   :  { %14782 = vmatprep.subr.bf16.mxu1 %v16247_v48  ;;  %14835 = vmatprep.subr.bf16.mxu0 %v16249_v27 }
0x2055   :  { %14808 = vmatprep.mubr.bf16.mxu1 %v22215_v59  ;;  %14861 = vmatprep.mubr.bf16.mxu0 %v22215_v59 }
0x2057   :  { %14783 = vmatpush1.bf16.msra.mxu1 %v16246_v49  ;;  %14836 = vmatpush1.bf16.msra.mxu0 %v16248_v25 }
0x2058   :  { %14784 = vmatprep.subr.bf16.mxu1 %v16239_v20  ;;  %14837 = vmatprep.subr.bf16.mxu0 %v16241_v24 }
0x205b   :  { %14785 = vmatpush1.bf16.msra.mxu1 %v16238_v61  ;;  %14838 = vmatpush1.bf16.msra.mxu0 %v16240_v50 }
0x205c   :  { %14786 = vmatprep.subr.bf16.mxu1 %v16231_v60  ;;  %14839 = vmatprep.subr.bf16.mxu0 %v16233_v41 }
0x205f   :  { %14787 = vmatpush1.bf16.msra.mxu1 %v16230_v44  ;;  %14840 = vmatpush1.bf16.msra.mxu0 %v16232_v22 }
0x2060   :  { %14788 = vmatprep.subr.bf16.mxu1 %v16223_v13  ;;  %14841 = vmatprep.subr.bf16.mxu0 %v16225_v8 }
0x2063   :  { %14789 = vmatpush1.bf16.msra.mxu1 %v16222_v23  ;;  %14842 = vmatpush1.bf16.msra.mxu0 %v16224_v55 }
0x2064   :  { %14790 = vmatprep.subr.bf16.mxu1 %v16215_v35  ;;  %14843 = vmatprep.subr.bf16.mxu0 %v16217_v52 }
0x2067   :  { %14791 = vmatpush1.bf16.msra.mxu1 %v16214_v7  ;;  %14844 = vmatpush1.bf16.msra.mxu0 %v16216_v56 }
0x2068   :  { %18704 = vmatprep.subr.msk.bf16.mxu1 %vm2147_vm0, %v22233_v4 }
0x206a   :  { %14809 = vmatmul.mubr.bf16.vlgmr.msra.gmra.mxu1 %v21791_v42  ;;  %14862 = vmatmul.mubr.bf16.vlgmr.msra.gmra.mxu0 %v21791_v42 }
0x206b   :  { %18697 = vmatpush3.bf16.msra.mxu1 %v22234_v36  ;;  %14818 = vmatprep.mubr.bf16.mxu1 %v22215_v59 }
0x206c   :  { %14871 = vmatprep.mubr.bf16.mxu0 %v22215_v59 }
0x2072   :  { %14819 = vmatmul.mubr.bf16.gmra.mxu1 %v21797_v34  ;;  %14872 = vmatmul.mubr.bf16.gmra.mxu0 %v21797_v34 }
0x2073   :  { %18698 = vmatprep.mubr.msk.bf16.mxu1 %vm22235_vm1, %v19968_v1 }
0x207a   :  { %18699 = vmatmul.mubr.msk.bf16.vlgmr.msra.gmra.mxu1 %vm22236_vm6, %v19969_v47 }
0x210a   :  { %v14704_v43 = vpop.f32.mrf.mxu1  ;;  %v14757_v28 = vpop.f32.mrf.mxu0 }
0x210b   :  { %14987 = vst [vmem:[%s22108_s6 + $0x40] sm:$0xff] %v14704_v43  ;;  %14989 = vst [vmem:[%s22108_s6 + $0x50] sm:$0xff] %v14757_v28 }
0x210c   :  { %v14706_v59 = vpop.f32.mrf.mxu1  ;;  %v14759_v45 = vpop.f32.mrf.mxu0 }
0x210d   :  { %14988 = vst [vmem:[%s22108_s6 + $0x48] sm:$0xff] %v14706_v59  ;;  %14990 = vst [vmem:[%s22108_s6 + $0x58] sm:$0xff] %v14759_v45 }
0x210e   :  { %v14708_v62 = vpop.f32.mrf.mxu1  ;;  %v14761_v21 = vpop.f32.mrf.mxu0 }
0x210f   :  { %14995 = vst [vmem:[%s22108_s6 + $0x140] sm:$0xff] %v14708_v62  ;;  %14997 = vst [vmem:[%s22108_s6 + $0x150] sm:$0xff] %v14761_v21 }
0x2110   :  { %v14710_v42 = vpop.f32.mrf.mxu1  ;;  %v14763_v3 = vpop.f32.mrf.mxu0 }
0x2111   :  { %14996 = vst [vmem:[%s22108_s6 + $0x148] sm:$0xff] %v14710_v42  ;;  %14998 = vst [vmem:[%s22108_s6 + $0x158] sm:$0xff] %v14763_v3 }
0x2112   :  { %v14714_v32 = vpop.f32.mrf.mxu1  ;;  %v14767_v51 = vpop.f32.mrf.mxu0 }
0x2113   :  { %15003 = vst [vmem:[%s22108_s6 + $0x240] sm:$0xff] %v14714_v32  ;;  %15005 = vst [vmem:[%s22108_s6 + $0x250] sm:$0xff] %v14767_v51 }
0x2114   :  { %v14716_v58 = vpop.f32.mrf.mxu1  ;;  %v14769_v63 = vpop.f32.mrf.mxu0 }
0x2115   :  { %15004 = vst [vmem:[%s22108_s6 + $0x248] sm:$0xff] %v14716_v58  ;;  %15006 = vst [vmem:[%s22108_s6 + $0x258] sm:$0xff] %v14769_v63 }
0x2116   :  { %v14718_v17 = vpop.f32.mrf.mxu1  ;;  %v14771_v54 = vpop.f32.mrf.mxu0 }
0x2117   :  { %15011 = vst [vmem:[%s22108_s6 + $0x340] sm:$0xff] %v14718_v17  ;;  %15013 = vst [vmem:[%s22108_s6 + $0x350] sm:$0xff] %v14771_v54 }
0x2118   :  { %v14720_v38 = vpop.f32.mrf.mxu1  ;;  %v14773_v6 = vpop.f32.mrf.mxu0 }
0x2119   :  { %15012 = vst [vmem:[%s22108_s6 + $0x348] sm:$0xff] %v14720_v38  ;;  %15014 = vst [vmem:[%s22108_s6 + $0x358] sm:$0xff] %v14773_v6 }
0x212a   :  { %v14810_v19 = vpop.f32.mrf.mxu1  ;;  %v14863_v2 = vpop.f32.mrf.mxu0 }
0x212b   :  { %14991 = vst [vmem:[%s22108_s6 + $0x60] sm:$0xff] %v14810_v19  ;;  %14993 = vst [vmem:[%s22108_s6 + $0x70] sm:$0xff] %v14863_v2 }
0x212c   :  { %v14812_v53 = vpop.f32.mrf.mxu1  ;;  %v14865_v33 = vpop.f32.mrf.mxu0 }
0x212d   :  { %14992 = vst [vmem:[%s22108_s6 + $0x68] sm:$0xff] %v14812_v53  ;;  %14994 = vst [vmem:[%s22108_s6 + $0x78] sm:$0xff] %v14865_v33 }
0x212e   :  { %v14814_v16 = vpop.f32.mrf.mxu1  ;;  %v14867_v12 = vpop.f32.mrf.mxu0 }
0x212f   :  { %14999 = vst [vmem:[%s22108_s6 + $0x160] sm:$0xff] %v14814_v16  ;;  %15001 = vst [vmem:[%s22108_s6 + $0x170] sm:$0xff] %v14867_v12 }
0x2130   :  { %v14816_v0 = vpop.f32.mrf.mxu1  ;;  %v14869_v34 = vpop.f32.mrf.mxu0 }
0x2131   :  { %15000 = vst [vmem:[%s22108_s6 + $0x168] sm:$0xff] %v14816_v0  ;;  %15002 = vst [vmem:[%s22108_s6 + $0x178] sm:$0xff] %v14869_v34 }
0x2132   :  { %v14820_v48 = vpop.f32.mrf.mxu1  ;;  %v14873_v27 = vpop.f32.mrf.mxu0 }
0x2133   :  { %15007 = vst [vmem:[%s22108_s6 + $0x260] sm:$0xff] %v14820_v48  ;;  %15009 = vst [vmem:[%s22108_s6 + $0x270] sm:$0xff] %v14873_v27 }
0x2134   :  { %v14822_v29 = vpop.f32.mrf.mxu1  ;;  %v14875_v11 = vpop.f32.mrf.mxu0 }
0x2135   :  { %15008 = vst [vmem:[%s22108_s6 + $0x268] sm:$0xff] %v14822_v29  ;;  %15010 = vst [vmem:[%s22108_s6 + $0x278] sm:$0xff] %v14875_v11 }
0x2136   :  { %v14824_v18 = vpop.f32.mrf.mxu1  ;;  %v14877_v14 = vpop.f32.mrf.mxu0 }
0x2137   :  { %15015 = vst [vmem:[%s22108_s6 + $0x360] sm:$0xff] %v14824_v18  ;;  %15017 = vst [vmem:[%s22108_s6 + $0x370] sm:$0xff] %v14877_v14 }
0x2138   :  { %v14826_v49 = vpop.f32.mrf.mxu1  ;;  %v14879_v25 = vpop.f32.mrf.mxu0 }
0x2139   :  { %15016 = vst [vmem:[%s22108_s6 + $0x368] sm:$0xff] %v14826_v49  ;;  %15018 = vst [vmem:[%s22108_s6 + $0x378] sm:$0xff] %v14879_v25 }
0x213a   :  { %v18700_v20 = vpop.f32.mrf.mxu1 }
0x213b   :  { %15051 = vst [vmem:[%s22108_s6 + $0x280] sm:$0xff] %v18700_v20  ;;  %15052 = vst [vmem:[%s22108_s6 + $0x288] sm:$0xff] %v18700_v20 }
0x213c   :  { %15053 = vst [vmem:[%s22108_s6 + $0x290] sm:$0xff] %v18700_v20  ;;  %15054 = vst [vmem:[%s22108_s6 + $0x298] sm:$0xff] %v18700_v20  ;;  %v14936_v24 = vpop.f32.mrf.mxu1 }
0x213d   :  { %15055 = vst [vmem:[%s22108_s6 + $0x2a0] sm:$0xff] %v18700_v20  ;;  %15056 = vst [vmem:[%s22108_s6 + $0x2a8] sm:$0xff] %v18700_v20 }
0x213e   :  { %15057 = vst [vmem:[%s22108_s6 + $0x2b0] sm:$0xff] %v18700_v20  ;;  %15058 = vst [vmem:[%s22108_s6 + $0x2b8] sm:$0xff] %v18700_v20  ;;  %v18701_v9 = vpop.f32.mrf.mxu1 }
0x213f   :  { %15059 = vst [vmem:[%s22108_s6 + $0x2c0] sm:$0xff] %v18700_v20  ;;  %15060 = vst [vmem:[%s22108_s6 + $0x2c8] sm:$0xff] %v18700_v20 }
0x2140   :  { %15061 = vst [vmem:[%s22108_s6 + $0x2d0] sm:$0xff] %v18700_v20  ;;  %15062 = vst [vmem:[%s22108_s6 + $0x2d8] sm:$0xff] %v18700_v20  ;;  %v14939_v39 = vpop.f32.mrf.mxu1 }
0x2141   :  { %15063 = vst [vmem:[%s22108_s6 + $0x2e0] sm:$0xff] %v18700_v20  ;;  %15064 = vst [vmem:[%s22108_s6 + $0x2e8] sm:$0xff] %v18700_v20 }
0x2142   :  { %15065 = vst [vmem:[%s22108_s6 + $0x2f0] sm:$0xff] %v18700_v20  ;;  %15066 = vst [vmem:[%s22108_s6 + $0x2f8] sm:$0xff] %v18700_v20 }
0x2143   :  { %15019 = vst [vmem:[%s22108_s6 + $0x80] sm:$0xff] %v14936_v24  ;;  %15020 = vst [vmem:[%s22108_s6 + $0x88] sm:$0xff] %v14936_v24 }
0x2144   :  { %15021 = vst [vmem:[%s22108_s6 + $0x90] sm:$0xff] %v14936_v24  ;;  %15022 = vst [vmem:[%s22108_s6 + $0x98] sm:$0xff] %v14936_v24 }
0x2145   :  { %15023 = vst [vmem:[%s22108_s6 + $0xa0] sm:$0xff] %v14936_v24  ;;  %15024 = vst [vmem:[%s22108_s6 + $0xa8] sm:$0xff] %v14936_v24 }
0x2146   :  { %15025 = vst [vmem:[%s22108_s6 + $0xb0] sm:$0xff] %v14936_v24  ;;  %15026 = vst [vmem:[%s22108_s6 + $0xb8] sm:$0xff] %v14936_v24 }
0x2147   :  { %15027 = vst [vmem:[%s22108_s6 + $0xc0] sm:$0xff] %v14936_v24  ;;  %15028 = vst [vmem:[%s22108_s6 + $0xc8] sm:$0xff] %v14936_v24 }
0x2148   :  { %15029 = vst [vmem:[%s22108_s6 + $0xd0] sm:$0xff] %v14936_v24  ;;  %15030 = vst [vmem:[%s22108_s6 + $0xd8] sm:$0xff] %v14936_v24 }
0x2149   :  { %15031 = vst [vmem:[%s22108_s6 + $0xe0] sm:$0xff] %v14936_v24  ;;  %15032 = vst [vmem:[%s22108_s6 + $0xe8] sm:$0xff] %v14936_v24 }
0x214a   :  { %15033 = vst [vmem:[%s22108_s6 + $0xf0] sm:$0xff] %v14936_v24  ;;  %15034 = vst [vmem:[%s22108_s6 + $0xf8] sm:$0xff] %v14936_v24 }
0x214b   :  { %15067 = vst [vmem:[%s22108_s6 + $0x380] sm:$0xff] %v18701_v9  ;;  %15068 = vst [vmem:[%s22108_s6 + $0x388] sm:$0xff] %v18701_v9 }
0x214c   :  { %15069 = vst [vmem:[%s22108_s6 + $0x390] sm:$0xff] %v18701_v9  ;;  %15070 = vst [vmem:[%s22108_s6 + $0x398] sm:$0xff] %v18701_v9 }
0x214d   :  { %15071 = vst [vmem:[%s22108_s6 + $0x3a0] sm:$0xff] %v18701_v9  ;;  %15072 = vst [vmem:[%s22108_s6 + $0x3a8] sm:$0xff] %v18701_v9 }
0x214e   :  { %15073 = vst [vmem:[%s22108_s6 + $0x3b0] sm:$0xff] %v18701_v9  ;;  %15074 = vst [vmem:[%s22108_s6 + $0x3b8] sm:$0xff] %v18701_v9 }
0x214f   :  { %15075 = vst [vmem:[%s22108_s6 + $0x3c0] sm:$0xff] %v18701_v9  ;;  %15076 = vst [vmem:[%s22108_s6 + $0x3c8] sm:$0xff] %v18701_v9 }
0x2150   :  { %15077 = vst [vmem:[%s22108_s6 + $0x3d0] sm:$0xff] %v18701_v9  ;;  %15078 = vst [vmem:[%s22108_s6 + $0x3d8] sm:$0xff] %v18701_v9 }
0x2151   :  { %15079 = vst [vmem:[%s22108_s6 + $0x3e0] sm:$0xff] %v18701_v9  ;;  %15080 = vst [vmem:[%s22108_s6 + $0x3e8] sm:$0xff] %v18701_v9 }
0x2152   :  { %15081 = vst [vmem:[%s22108_s6 + $0x3f0] sm:$0xff] %v18701_v9  ;;  %15082 = vst [vmem:[%s22108_s6 + $0x3f8] sm:$0xff] %v18701_v9 }
0x2153   :  { %15035 = vst [vmem:[%s22108_s6 + $0x180] sm:$0xff] %v14939_v39  ;;  %15036 = vst [vmem:[%s22108_s6 + $0x188] sm:$0xff] %v14939_v39 }
0x2154   :  { %15037 = vst [vmem:[%s22108_s6 + $0x190] sm:$0xff] %v14939_v39  ;;  %15038 = vst [vmem:[%s22108_s6 + $0x198] sm:$0xff] %v14939_v39 }
0x2155   :  { %15039 = vst [vmem:[%s22108_s6 + $0x1a0] sm:$0xff] %v14939_v39  ;;  %15040 = vst [vmem:[%s22108_s6 + $0x1a8] sm:$0xff] %v14939_v39 }
0x2156   :  { %15041 = vst [vmem:[%s22108_s6 + $0x1b0] sm:$0xff] %v14939_v39  ;;  %15042 = vst [vmem:[%s22108_s6 + $0x1b8] sm:$0xff] %v14939_v39 }
0x2157   :  { %15043 = vst [vmem:[%s22108_s6 + $0x1c0] sm:$0xff] %v14939_v39  ;;  %15044 = vst [vmem:[%s22108_s6 + $0x1c8] sm:$0xff] %v14939_v39 }
0x2158   :  { %15045 = vst [vmem:[%s22108_s6 + $0x1d0] sm:$0xff] %v14939_v39  ;;  %15046 = vst [vmem:[%s22108_s6 + $0x1d8] sm:$0xff] %v14939_v39 }
0x2159   :  { %15047 = vst [vmem:[%s22108_s6 + $0x1e0] sm:$0xff] %v14939_v39  ;;  %15048 = vst [vmem:[%s22108_s6 + $0x1e8] sm:$0xff] %v14939_v39 }
0x215a   :  { %15049 = vst [vmem:[%s22108_s6 + $0x1f0] sm:$0xff] %v14939_v39  ;;  %15050 = vst [vmem:[%s22108_s6 + $0x1f8] sm:$0xff] %v14939_v39 }
0x215b   :  { %15087 = vsyncpa [#allocation3], 1 }
0x215c   :  { %15088 = vsyncpa [#allocation5], 1 }
0x215d   :  { %15089 = vsyncpa [#allocation8], 1 }

</bundles_post_ra>
